<compile_context>
chip_gen: v7x
topology: tpu7x:2x2x1
jax: 0.10.0
libtpu: 0.0.40
codegen_flags: <defaults>
</compile_context>

<pallas_src>
import functools

import jax
import jax.numpy as jnp
from jax.experimental import pallas as pl
from jax.experimental.pallas import tpu as pltpu

BN_EPS = 1e-5


def _round_up(x, m):
    return (x + m - 1) // m * m


# ----------------------------- Pallas kernels ------------------------------
def _conv_tap_kernel(x_ref, w_ref, b_ref, o_ref, *, taps, relu):
    """Direct conv for one batch element (tap loop unrolled in-kernel).

    x_ref: (1, S2, Cin, Lin)  bf16  phase-decomposed, padded, flattened image
    w_ref: (T, Cout, Cin)     bf16  BN-scale-folded weights, one matrix per tap
    b_ref: (Cout, 1)          f32   folded BN bias
    o_ref: (1, Cout, Lp)      bf16  flattened output (junk pad columns incl.)
    """
    cout, lp = o_ref.shape[1], o_ref.shape[2]
    acc = jnp.zeros((cout, lp), jnp.float32)
    for t, (ph, sh) in enumerate(taps):
        x_t = x_ref[0, ph, :, sh:sh + lp]                  # static offsets
        acc = acc + jnp.dot(w_ref[t], x_t, preferred_element_type=jnp.float32)
    acc = acc + b_ref[...]
    if relu:
        acc = jnp.maximum(acc, 0.0)
    o_ref[0] = acc.astype(o_ref.dtype)


def _conv_tap_kernel_res(x_ref, w_ref, b_ref, r_ref, o_ref, *, taps, relu):
    cout, lp = o_ref.shape[1], o_ref.shape[2]
    acc = jnp.zeros((cout, lp), jnp.float32)
    for t, (ph, sh) in enumerate(taps):
        x_t = x_ref[0, ph, :, sh:sh + lp]
        acc = acc + jnp.dot(w_ref[t], x_t, preferred_element_type=jnp.float32)
    acc = acc + b_ref[...] + r_ref[0].astype(jnp.float32)
    if relu:
        acc = jnp.maximum(acc, 0.0)
    o_ref[0] = acc.astype(o_ref.dtype)


# ------------------------------ conv wrapper -------------------------------
def conv2d_pallas(x, w, scale, bias, *, stride, pad, dilation=1, relu=False,
                  residual=None):
    """Fused conv + folded-BN + (ReLU) + (residual add).

    x:        (N, Cin, H, W)      activations (any float dtype; cast to bf16)
    w:        (KH, KW, Cin, Cout)
    scale:    (Cout,)             folded-BN scale (folded into w here)
    bias:     (Cout,)             folded-BN bias
    residual: (N, Cout, Ho, Wo) or None
    returns:  (N, Cout, Ho, Wo)   bf16
    """
    N, Cin, H, W = x.shape
    KH, KW, _, Cout = w.shape
    s, d, p = stride, dilation, pad
    Ho = (H + 2 * p - d * (KH - 1) - 1) // s + 1
    Wo = (W + 2 * p - d * (KW - 1) - 1) // s + 1
    Hp, Wp = H + 2 * p, W + 2 * p
    Hs, Ws = -(-Hp // s), -(-Wp // s)          # per-phase spatial extents
    S2, T = s * s, KH * KW

    # Static tap table: (phase index, flat shift within the phase slab).
    # out[ho, wo] += w[kh, kw] @ xph[phase][:, (ho+qh)*Ws + (wo+qw)]
    taps = []
    for kh in range(KH):
        for kw in range(KW):
            oh, ow = d * kh, d * kw
            taps.append(((oh % s) * s + (ow % s), (oh // s) * Ws + (ow // s)))
    max_shift = max(sh for _, sh in taps)

    Lp = _round_up(Ho * Ws, 128)               # lane-dense output flat length
    Lin = max(Hs * Ws, max_shift + Lp)         # per-phase input flat length

    # Pad + (for stride>1) phase-decompose + flatten, all in bf16.
    xb = x.astype(jnp.bfloat16)
    xp = jnp.pad(xb, ((0, 0), (0, 0), (p, Hs * s - H - p), (p, Ws * s - W - p)))
    xph = xp.reshape(N, Cin, Hs, s, Ws, s).transpose(0, 3, 5, 1, 2, 4)
    xph = xph.reshape(N, S2, Cin, Hs * Ws)
    if Lin > Hs * Ws:
        xph = jnp.pad(xph, ((0, 0), (0, 0), (0, 0), (0, Lin - Hs * Ws)))

    # Fold BN scale into the weights; one (Cout, Cin) matrix per tap.
    w_sc = (w * scale[None, None, None, :]).transpose(0, 1, 3, 2)
    w_sc = w_sc.reshape(T, Cout, Cin).astype(jnp.bfloat16)
    bias_col = bias.reshape(Cout, 1).astype(jnp.float32)

    args = [xph, w_sc, bias_col]
    in_specs = [
        pl.BlockSpec((1, S2, Cin, Lin), lambda n: (n, 0, 0, 0)),   # per-image slab
        pl.BlockSpec((T, Cout, Cin), lambda n: (0, 0, 0)),         # weights (resident)
        pl.BlockSpec((Cout, 1), lambda n: (0, 0)),                 # bias (resident)
    ]
    if residual is not None:
        r = residual.astype(jnp.bfloat16)
        r = jnp.pad(r, ((0, 0), (0, 0), (0, 0), (0, Ws - Wo)))
        r = r.reshape(N, Cout, Ho * Ws)
        r = jnp.pad(r, ((0, 0), (0, 0), (0, Lp - Ho * Ws)))
        args.append(r)
        in_specs.append(pl.BlockSpec((1, Cout, Lp), lambda n: (n, 0, 0)))
        kern = functools.partial(_conv_tap_kernel_res, taps=tuple(taps), relu=relu)
    else:
        kern = functools.partial(_conv_tap_kernel, taps=tuple(taps), relu=relu)

    out_flat = pl.pallas_call(
        kern,
        out_shape=jax.ShapeDtypeStruct((N, Cout, Lp), jnp.bfloat16),
        grid=(N,),
        in_specs=in_specs,
        out_specs=pl.BlockSpec((1, Cout, Lp), lambda n: (n, 0, 0)),
        compiler_params=pltpu.CompilerParams(
            dimension_semantics=("parallel",),
            vmem_limit_bytes=48 * 1024 * 1024,
        ),
    )(*args)
    out = out_flat[:, :, :Ho * Ws].reshape(N, Cout, Ho, Ws)
    return out[:, :, :, :Wo]


# ---------------------------- parameter creation ----------------------------
def _init_conv(key, cin, cout, k):
    fan_in = cin * k * k
    return jax.random.normal(key, (k, k, cin, cout), jnp.float32) * (2.0 / fan_in) ** 0.5


def _init_convbn(key, cin, cout, k):
    w = _init_conv(key, cin, cout, k)
    gamma = jnp.ones((cout,), jnp.float32)
    beta = jnp.zeros((cout,), jnp.float32)
    mean = jnp.zeros((cout,), jnp.float32)
    var = jnp.ones((cout,), jnp.float32)
    scale = gamma / jnp.sqrt(var + BN_EPS)        # BN folded (eval mode)
    bias = beta - mean * scale
    return {"w": w, "scale": scale, "bias": bias}


def _init_basic_block(key, cin, cout, stride):
    k1, k2, k3 = jax.random.split(key, 3)
    p = {"conv1": _init_convbn(k1, cin, cout, 3),
         "conv2": _init_convbn(k2, cout, cout, 3),
         "down": None}
    if stride != 1 or cin != cout:               # downsample: 1x1 conv + BN
        p["down"] = _init_convbn(k3, cin, cout, 1)
    return p


def init_feature_extraction(key, init_ch):
    c2, c4, c8 = init_ch * 2, init_ch * 4, init_ch * 8
    ks = jax.random.split(key, 11)
    return {
        "layer11": [_init_convbn(ks[0], 3, c2, 3),
                    _init_convbn(ks[1], c2, c2, 3),
                    _init_convbn(ks[2], c2, c2, 3)],
        "layer21": [_init_basic_block(ks[3], c2, c4, 2)],
        "layer31": [_init_basic_block(ks[4], c4, c8, 2)],
        "layer12": {"blocks": [_init_basic_block(ks[5], c2, c2, 1),
                               _init_basic_block(ks[6], c2, c2, 1)],
                    "conv": _init_conv(ks[7], c2, c2, 3)},
        "layer32": {"blocks": [_init_basic_block(ks[8], c8, c8, 1),
                               _init_basic_block(ks[9], c8, c8, 1)],
                    "conv": _init_conv(ks[10], c8, c8, 3)},
    }


# --------------------------------- forward ----------------------------------
def basic_block_fwd(x, p, stride, pad=1, dilation=1, relu_out=False):
    # ADCPNet (PSMNet-style) BasicBlock: conv1+BN+ReLU, conv2+BN, += identity,
    # no post-add ReLU inside the block (the Sequential-level ReLU is fused
    # via relu_out when present).
    out = conv2d_pallas(x, p["conv1"]["w"], p["conv1"]["scale"], p["conv1"]["bias"],
                        stride=stride, pad=pad, dilation=dilation, relu=True)
    if p["down"] is not None:
        identity = conv2d_pallas(x, p["down"]["w"], p["down"]["scale"],
                                 p["down"]["bias"], stride=stride, pad=0, relu=False)
    else:
        identity = x
    return conv2d_pallas(out, p["conv2"]["w"], p["conv2"]["scale"], p["conv2"]["bias"],
                         stride=1, pad=pad, dilation=dilation, relu=relu_out,
                         residual=identity)


def feature_extraction_fwd(params, x_nchw):
    h = x_nchw                                               # NCHW end-to-end
    for cb, s in zip(params["layer11"], (2, 1, 2)):
        h = conv2d_pallas(h, cb["w"], cb["scale"], cb["bias"],
                          stride=s, pad=1, relu=True)
    level11 = h                                              # H/4, 2c
    level21 = basic_block_fwd(level11, params["layer21"][0], stride=2)   # H/8, 4c
    level31 = basic_block_fwd(level21, params["layer31"][0], stride=2)   # H/16, 8c

    def head(level, p):
        h = basic_block_fwd(level, p["blocks"][0], stride=1)
        h = basic_block_fwd(h, p["blocks"][1], stride=1, relu_out=True)  # Seq ReLU fused
        cout = p["conv"].shape[-1]
        ones = jnp.ones((cout,), jnp.float32)
        zeros = jnp.zeros((cout,), jnp.float32)               # Conv2d(bias=False)
        return conv2d_pallas(h, p["conv"], ones, zeros, stride=1, pad=1, relu=False)

    level12 = head(level11, params["layer12"])               # H/4, 2c
    level32 = head(level31, params["layer32"])               # H/16, 8c
    return [level12.astype(jnp.float32), level32.astype(jnp.float32)]


# ----------------------------------- main ------------------------------------
if __name__ == "__main__":
    key = jax.random.PRNGKey(0)
    kp, kx = jax.random.split(key)
    init_ch = 4
    params = init_feature_extraction(kp, init_ch)
    x = jax.random.normal(kx, (2, 3, 32, 32), jnp.float32)   # NCHW like PyTorch

    outs = jax.jit(feature_extraction_fwd)(params, x)
    outs = [jax.block_until_ready(o) for o in outs]

    assert outs[0].shape == (2, init_ch * 2, 8, 8), outs[0].shape    # level12
    assert outs[1].shape == (2, init_ch * 8, 2, 2), outs[1].shape    # level32
    assert all(bool(jnp.all(jnp.isfinite(o))) for o in outs)
    print("KERNEL_OK")
</pallas_src>

<mosaic_0001>
module attributes {stable_mosaic.version = 11 : i64} {
  func.func @_conv_tap_kernel(%arg0: i32, %arg1: memref<1x4x3x402xbf16, #tpu.memory_space<vmem>>, %arg2: memref<9x8x3xbf16, #tpu.memory_space<vmem>>, %arg3: memref<8x1xf32, #tpu.memory_space<vmem>>, %arg4: memref<1x8x384xbf16, #tpu.memory_space<vmem>>) attributes {dimension_semantics = [#tpu.dimension_semantics<parallel>], iteration_bounds = array<i64: 2>, scalar_prefetch = 0 : i64, scratch_operands = 0 : i64, tpu.core_type = #tpu.core_type<tc>, window_params = [{transform_indices = @transform_0, window_bounds = array<i64: 1, 4, 3, 402>}, {pipeline_mode = #tpu.pipeline_mode<synchronous>, transform_indices = @transform_1, window_bounds = array<i64: 9, 8, 3>}, {pipeline_mode = #tpu.pipeline_mode<synchronous>, transform_indices = @transform_2, window_bounds = array<i64: 8, 1>}, {transform_indices = @transform_3, window_bounds = array<i64: 1, 8, 384>}]} {
    %cst = arith.constant 0.000000e+00 : f32
    %0 = vector.broadcast %cst : f32 to vector<8x384xf32>
    %c0 = arith.constant 0 : index
    %c0_0 = arith.constant 0 : index
    %c0_1 = arith.constant 0 : index
    %c0_2 = arith.constant 0 : index
    %1 = vector.load %arg1[%c0, %c0_0, %c0_1, %c0_2] : memref<1x4x3x402xbf16, #tpu.memory_space<vmem>>, vector<1x1x3x384xbf16>
    %2 = vector.shape_cast %1 : vector<1x1x3x384xbf16> to vector<3x384xbf16>
    %c0_3 = arith.constant 0 : index
    %c0_4 = arith.constant 0 : index
    %c0_5 = arith.constant 0 : index
    %3 = vector.load %arg2[%c0_3, %c0_4, %c0_5] : memref<9x8x3xbf16, #tpu.memory_space<vmem>>, vector<1x8x3xbf16>
    %4 = vector.shape_cast %3 : vector<1x8x3xbf16> to vector<8x3xbf16>
    %cst_6 = arith.constant dense<0.000000e+00> : vector<8x384xf32>
    %5 = tpu.matmul %4, %2, %cst_6 {dimension_numbers = #tpu.dot_dimension_numbers<[1], [0], [0], [1], [0, 0, 1, 1], [], []>} : vector<8x3xbf16>, vector<3x384xbf16>, vector<8x384xf32> -> vector<8x384xf32>
    %6 = arith.addf %0, %5 : vector<8x384xf32>
    %c0_7 = arith.constant 0 : index
    %c1 = arith.constant 1 : index
    %c0_8 = arith.constant 0 : index
    %c0_9 = arith.constant 0 : index
    %7 = vector.load %arg1[%c0_7, %c1, %c0_8, %c0_9] : memref<1x4x3x402xbf16, #tpu.memory_space<vmem>>, vector<1x1x3x384xbf16>
    %8 = vector.shape_cast %7 : vector<1x1x3x384xbf16> to vector<3x384xbf16>
    %c1_10 = arith.constant 1 : index
    %c0_11 = arith.constant 0 : index
    %c0_12 = arith.constant 0 : index
    %9 = vector.load %arg2[%c1_10, %c0_11, %c0_12] : memref<9x8x3xbf16, #tpu.memory_space<vmem>>, vector<1x8x3xbf16>
    %10 = vector.shape_cast %9 : vector<1x8x3xbf16> to vector<8x3xbf16>
    %cst_13 = arith.constant dense<0.000000e+00> : vector<8x384xf32>
    %11 = tpu.matmul %10, %8, %cst_13 {dimension_numbers = #tpu.dot_dimension_numbers<[1], [0], [0], [1], [0, 0, 1, 1], [], []>} : vector<8x3xbf16>, vector<3x384xbf16>, vector<8x384xf32> -> vector<8x384xf32>
    %12 = arith.addf %6, %11 : vector<8x384xf32>
    %c0_14 = arith.constant 0 : index
    %c0_15 = arith.constant 0 : index
    %c0_16 = arith.constant 0 : index
    %c1_17 = arith.constant 1 : index
    %13 = vector.load %arg1[%c0_14, %c0_15, %c0_16, %c1_17] : memref<1x4x3x402xbf16, #tpu.memory_space<vmem>>, vector<1x1x3x384xbf16>
    %14 = vector.shape_cast %13 : vector<1x1x3x384xbf16> to vector<3x384xbf16>
    %c2 = arith.constant 2 : index
    %c0_18 = arith.constant 0 : index
    %c0_19 = arith.constant 0 : index
    %15 = vector.load %arg2[%c2, %c0_18, %c0_19] : memref<9x8x3xbf16, #tpu.memory_space<vmem>>, vector<1x8x3xbf16>
    %16 = vector.shape_cast %15 : vector<1x8x3xbf16> to vector<8x3xbf16>
    %cst_20 = arith.constant dense<0.000000e+00> : vector<8x384xf32>
    %17 = tpu.matmul %16, %14, %cst_20 {dimension_numbers = #tpu.dot_dimension_numbers<[1], [0], [0], [1], [0, 0, 1, 1], [], []>} : vector<8x3xbf16>, vector<3x384xbf16>, vector<8x384xf32> -> vector<8x384xf32>
    %18 = arith.addf %12, %17 : vector<8x384xf32>
    %c0_21 = arith.constant 0 : index
    %c2_22 = arith.constant 2 : index
    %c0_23 = arith.constant 0 : index
    %c0_24 = arith.constant 0 : index
    %19 = vector.load %arg1[%c0_21, %c2_22, %c0_23, %c0_24] : memref<1x4x3x402xbf16, #tpu.memory_space<vmem>>, vector<1x1x3x384xbf16>
    %20 = vector.shape_cast %19 : vector<1x1x3x384xbf16> to vector<3x384xbf16>
    %c3 = arith.constant 3 : index
    %c0_25 = arith.constant 0 : index
    %c0_26 = arith.constant 0 : index
    %21 = vector.load %arg2[%c3, %c0_25, %c0_26] : memref<9x8x3xbf16, #tpu.memory_space<vmem>>, vector<1x8x3xbf16>
    %22 = vector.shape_cast %21 : vector<1x8x3xbf16> to vector<8x3xbf16>
    %cst_27 = arith.constant dense<0.000000e+00> : vector<8x384xf32>
    %23 = tpu.matmul %22, %20, %cst_27 {dimension_numbers = #tpu.dot_dimension_numbers<[1], [0], [0], [1], [0, 0, 1, 1], [], []>} : vector<8x3xbf16>, vector<3x384xbf16>, vector<8x384xf32> -> vector<8x384xf32>
    %24 = arith.addf %18, %23 : vector<8x384xf32>
    %c0_28 = arith.constant 0 : index
    %c3_29 = arith.constant 3 : index
    %c0_30 = arith.constant 0 : index
    %c0_31 = arith.constant 0 : index
    %25 = vector.load %arg1[%c0_28, %c3_29, %c0_30, %c0_31] : memref<1x4x3x402xbf16, #tpu.memory_space<vmem>>, vector<1x1x3x384xbf16>
    %26 = vector.shape_cast %25 : vector<1x1x3x384xbf16> to vector<3x384xbf16>
    %c4 = arith.constant 4 : index
    %c0_32 = arith.constant 0 : index
    %c0_33 = arith.constant 0 : index
    %27 = vector.load %arg2[%c4, %c0_32, %c0_33] : memref<9x8x3xbf16, #tpu.memory_space<vmem>>, vector<1x8x3xbf16>
    %28 = vector.shape_cast %27 : vector<1x8x3xbf16> to vector<8x3xbf16>
    %cst_34 = arith.constant dense<0.000000e+00> : vector<8x384xf32>
    %29 = tpu.matmul %28, %26, %cst_34 {dimension_numbers = #tpu.dot_dimension_numbers<[1], [0], [0], [1], [0, 0, 1, 1], [], []>} : vector<8x3xbf16>, vector<3x384xbf16>, vector<8x384xf32> -> vector<8x384xf32>
    %30 = arith.addf %24, %29 : vector<8x384xf32>
    %c0_35 = arith.constant 0 : index
    %c2_36 = arith.constant 2 : index
    %c0_37 = arith.constant 0 : index
    %c1_38 = arith.constant 1 : index
    %31 = vector.load %arg1[%c0_35, %c2_36, %c0_37, %c1_38] : memref<1x4x3x402xbf16, #tpu.memory_space<vmem>>, vector<1x1x3x384xbf16>
    %32 = vector.shape_cast %31 : vector<1x1x3x384xbf16> to vector<3x384xbf16>
    %c5 = arith.constant 5 : index
    %c0_39 = arith.constant 0 : index
    %c0_40 = arith.constant 0 : index
    %33 = vector.load %arg2[%c5, %c0_39, %c0_40] : memref<9x8x3xbf16, #tpu.memory_space<vmem>>, vector<1x8x3xbf16>
    %34 = vector.shape_cast %33 : vector<1x8x3xbf16> to vector<8x3xbf16>
    %cst_41 = arith.constant dense<0.000000e+00> : vector<8x384xf32>
    %35 = tpu.matmul %34, %32, %cst_41 {dimension_numbers = #tpu.dot_dimension_numbers<[1], [0], [0], [1], [0, 0, 1, 1], [], []>} : vector<8x3xbf16>, vector<3x384xbf16>, vector<8x384xf32> -> vector<8x384xf32>
    %36 = arith.addf %30, %35 : vector<8x384xf32>
    %c0_42 = arith.constant 0 : index
    %c0_43 = arith.constant 0 : index
    %c0_44 = arith.constant 0 : index
    %c17 = arith.constant 17 : index
    %37 = vector.load %arg1[%c0_42, %c0_43, %c0_44, %c17] : memref<1x4x3x402xbf16, #tpu.memory_space<vmem>>, vector<1x1x3x384xbf16>
    %38 = vector.shape_cast %37 : vector<1x1x3x384xbf16> to vector<3x384xbf16>
    %c6 = arith.constant 6 : index
    %c0_45 = arith.constant 0 : index
    %c0_46 = arith.constant 0 : index
    %39 = vector.load %arg2[%c6, %c0_45, %c0_46] : memref<9x8x3xbf16, #tpu.memory_space<vmem>>, vector<1x8x3xbf16>
    %40 = vector.shape_cast %39 : vector<1x8x3xbf16> to vector<8x3xbf16>
    %cst_47 = arith.constant dense<0.000000e+00> : vector<8x384xf32>
    %41 = tpu.matmul %40, %38, %cst_47 {dimension_numbers = #tpu.dot_dimension_numbers<[1], [0], [0], [1], [0, 0, 1, 1], [], []>} : vector<8x3xbf16>, vector<3x384xbf16>, vector<8x384xf32> -> vector<8x384xf32>
    %42 = arith.addf %36, %41 : vector<8x384xf32>
    %c0_48 = arith.constant 0 : index
    %c1_49 = arith.constant 1 : index
    %c0_50 = arith.constant 0 : index
    %c17_51 = arith.constant 17 : index
    %43 = vector.load %arg1[%c0_48, %c1_49, %c0_50, %c17_51] : memref<1x4x3x402xbf16, #tpu.memory_space<vmem>>, vector<1x1x3x384xbf16>
    %44 = vector.shape_cast %43 : vector<1x1x3x384xbf16> to vector<3x384xbf16>
    %c7 = arith.constant 7 : index
    %c0_52 = arith.constant 0 : index
    %c0_53 = arith.constant 0 : index
    %45 = vector.load %arg2[%c7, %c0_52, %c0_53] : memref<9x8x3xbf16, #tpu.memory_space<vmem>>, vector<1x8x3xbf16>
    %46 = vector.shape_cast %45 : vector<1x8x3xbf16> to vector<8x3xbf16>
    %cst_54 = arith.constant dense<0.000000e+00> : vector<8x384xf32>
    %47 = tpu.matmul %46, %44, %cst_54 {dimension_numbers = #tpu.dot_dimension_numbers<[1], [0], [0], [1], [0, 0, 1, 1], [], []>} : vector<8x3xbf16>, vector<3x384xbf16>, vector<8x384xf32> -> vector<8x384xf32>
    %48 = arith.addf %42, %47 : vector<8x384xf32>
    %c0_55 = arith.constant 0 : index
    %c0_56 = arith.constant 0 : index
    %c0_57 = arith.constant 0 : index
    %c18 = arith.constant 18 : index
    %49 = vector.load %arg1[%c0_55, %c0_56, %c0_57, %c18] : memref<1x4x3x402xbf16, #tpu.memory_space<vmem>>, vector<1x1x3x384xbf16>
    %50 = vector.shape_cast %49 : vector<1x1x3x384xbf16> to vector<3x384xbf16>
    %c8 = arith.constant 8 : index
    %c0_58 = arith.constant 0 : index
    %c0_59 = arith.constant 0 : index
    %51 = vector.load %arg2[%c8, %c0_58, %c0_59] : memref<9x8x3xbf16, #tpu.memory_space<vmem>>, vector<1x8x3xbf16>
    %52 = vector.shape_cast %51 : vector<1x8x3xbf16> to vector<8x3xbf16>
    %cst_60 = arith.constant dense<0.000000e+00> : vector<8x384xf32>
    %53 = tpu.matmul %52, %50, %cst_60 {dimension_numbers = #tpu.dot_dimension_numbers<[1], [0], [0], [1], [0, 0, 1, 1], [], []>} : vector<8x3xbf16>, vector<3x384xbf16>, vector<8x384xf32> -> vector<8x384xf32>
    %54 = arith.addf %48, %53 : vector<8x384xf32>
    %c0_61 = arith.constant 0 : index
    %c0_62 = arith.constant 0 : index
    %55 = vector.load %arg3[%c0_61, %c0_62] : memref<8x1xf32, #tpu.memory_space<vmem>>, vector<8x1xf32>
    %56 = vector.broadcast %55 : vector<8x1xf32> to vector<8x384xf32>
    %57 = arith.addf %54, %56 : vector<8x384xf32>
    %cst_63 = arith.constant 0.000000e+00 : f32
    %58 = vector.broadcast %cst_63 : f32 to vector<8x384xf32>
    %59 = arith.maximumf %57, %58 : vector<8x384xf32>
    %60 = arith.truncf %59 : vector<8x384xf32> to vector<8x384xbf16>
    %c0_64 = arith.constant 0 : index
    %c0_65 = arith.constant 0 : index
    %c0_66 = arith.constant 0 : index
    %61 = vector.load %arg4[%c0_64, %c0_65, %c0_66] : memref<1x8x384xbf16, #tpu.memory_space<vmem>>, vector<1x8x384xbf16>
    %62 = vector.shape_cast %61 : vector<1x8x384xbf16> to vector<8x384xbf16>
    %63 = vector.shape_cast %60 : vector<8x384xbf16> to vector<1x8x384xbf16>
    tpu.vector_store %arg4[%c0_64, %c0_65, %c0_66], %63 {strides = array<i32>} : memref<1x8x384xbf16, #tpu.memory_space<vmem>>, vector<1x8x384xbf16>,
    return
  }
  func.func @transform_0(%arg0: i32) -> (i32, i32, i32, i32) {
    %c0_i32 = arith.constant 0 : i32
    %c0_i32_0 = arith.constant 0 : i32
    %c0_i32_1 = arith.constant 0 : i32
    %c0_i32_2 = arith.constant 0 : i32
    return %arg0, %c0_i32, %c0_i32_0, %c0_i32_1 : i32, i32, i32, i32
  }
  func.func @transform_1(%arg0: i32) -> (i32, i32, i32) {
    %c0_i32 = arith.constant 0 : i32
    %c0_i32_0 = arith.constant 0 : i32
    %c0_i32_1 = arith.constant 0 : i32
    %c0_i32_2 = arith.constant 0 : i32
    return %c0_i32, %c0_i32_0, %c0_i32_1 : i32, i32, i32
  }
  func.func @transform_2(%arg0: i32) -> (i32, i32) {
    %c0_i32 = arith.constant 0 : i32
    %c0_i32_0 = arith.constant 0 : i32
    %c0_i32_1 = arith.constant 0 : i32
    return %c0_i32, %c0_i32_0 : i32, i32
  }
  func.func @transform_3(%arg0: i32) -> (i32, i32, i32) {
    %c0_i32 = arith.constant 0 : i32
    %c0_i32_0 = arith.constant 0 : i32
    %c0_i32_1 = arith.constant 0 : i32
    return %arg0, %c0_i32, %c0_i32_0 : i32, i32, i32
  }
}

module attributes {stable_mosaic.version = 11 : i64} {
  func.func @_conv_tap_kernel(%arg0: i32, %arg1: memref<1x1x8x422xbf16, #tpu.memory_space<vmem>>, %arg2: memref<9x8x8xbf16, #tpu.memory_space<vmem>>, %arg3: memref<8x1xf32, #tpu.memory_space<vmem>>, %arg4: memref<1x8x384xbf16, #tpu.memory_space<vmem>>) attributes {dimension_semantics = [#tpu.dimension_semantics<parallel>], iteration_bounds = array<i64: 2>, scalar_prefetch = 0 : i64, scratch_operands = 0 : i64, tpu.core_type = #tpu.core_type<tc>, window_params = [{transform_indices = @transform_0, window_bounds = array<i64: 1, 1, 8, 422>}, {pipeline_mode = #tpu.pipeline_mode<synchronous>, transform_indices = @transform_1, window_bounds = array<i64: 9, 8, 8>}, {pipeline_mode = #tpu.pipeline_mode<synchronous>, transform_indices = @transform_2, window_bounds = array<i64: 8, 1>}, {transform_indices = @transform_3, window_bounds = array<i64: 1, 8, 384>}]} {
    %cst = arith.constant 0.000000e+00 : f32
    %0 = vector.broadcast %cst : f32 to vector<8x384xf32>
    %c0 = arith.constant 0 : index
    %c0_0 = arith.constant 0 : index
    %c0_1 = arith.constant 0 : index
    %c0_2 = arith.constant 0 : index
    %1 = vector.load %arg1[%c0, %c0_0, %c0_1, %c0_2] : memref<1x1x8x422xbf16, #tpu.memory_space<vmem>>, vector<1x1x8x384xbf16>
    %2 = vector.shape_cast %1 : vector<1x1x8x384xbf16> to vector<8x384xbf16>
    %c0_3 = arith.constant 0 : index
    %c0_4 = arith.constant 0 : index
    %c0_5 = arith.constant 0 : index
    %3 = vector.load %arg2[%c0_3, %c0_4, %c0_5] : memref<9x8x8xbf16, #tpu.memory_space<vmem>>, vector<1x8x8xbf16>
    %4 = vector.shape_cast %3 : vector<1x8x8xbf16> to vector<8x8xbf16>
    %cst_6 = arith.constant dense<0.000000e+00> : vector<8x384xf32>
    %5 = tpu.matmul %4, %2, %cst_6 {dimension_numbers = #tpu.dot_dimension_numbers<[1], [0], [0], [1], [0, 0, 1, 1], [], []>} : vector<8x8xbf16>, vector<8x384xbf16>, vector<8x384xf32> -> vector<8x384xf32>
    %6 = arith.addf %0, %5 : vector<8x384xf32>
    %c0_7 = arith.constant 0 : index
    %c0_8 = arith.constant 0 : index
    %c0_9 = arith.constant 0 : index
    %c1 = arith.constant 1 : index
    %7 = vector.load %arg1[%c0_7, %c0_8, %c0_9, %c1] : memref<1x1x8x422xbf16, #tpu.memory_space<vmem>>, vector<1x1x8x384xbf16>
    %8 = vector.shape_cast %7 : vector<1x1x8x384xbf16> to vector<8x384xbf16>
    %c1_10 = arith.constant 1 : index
    %c0_11 = arith.constant 0 : index
    %c0_12 = arith.constant 0 : index
    %9 = vector.load %arg2[%c1_10, %c0_11, %c0_12] : memref<9x8x8xbf16, #tpu.memory_space<vmem>>, vector<1x8x8xbf16>
    %10 = vector.shape_cast %9 : vector<1x8x8xbf16> to vector<8x8xbf16>
    %cst_13 = arith.constant dense<0.000000e+00> : vector<8x384xf32>
    %11 = tpu.matmul %10, %8, %cst_13 {dimension_numbers = #tpu.dot_dimension_numbers<[1], [0], [0], [1], [0, 0, 1, 1], [], []>} : vector<8x8xbf16>, vector<8x384xbf16>, vector<8x384xf32> -> vector<8x384xf32>
    %12 = arith.addf %6, %11 : vector<8x384xf32>
    %c0_14 = arith.constant 0 : index
    %c0_15 = arith.constant 0 : index
    %c0_16 = arith.constant 0 : index
    %c2 = arith.constant 2 : index
    %13 = vector.load %arg1[%c0_14, %c0_15, %c0_16, %c2] : memref<1x1x8x422xbf16, #tpu.memory_space<vmem>>, vector<1x1x8x384xbf16>
    %14 = vector.shape_cast %13 : vector<1x1x8x384xbf16> to vector<8x384xbf16>
    %c2_17 = arith.constant 2 : index
    %c0_18 = arith.constant 0 : index
    %c0_19 = arith.constant 0 : index
    %15 = vector.load %arg2[%c2_17, %c0_18, %c0_19] : memref<9x8x8xbf16, #tpu.memory_space<vmem>>, vector<1x8x8xbf16>
    %16 = vector.shape_cast %15 : vector<1x8x8xbf16> to vector<8x8xbf16>
    %cst_20 = arith.constant dense<0.000000e+00> : vector<8x384xf32>
    %17 = tpu.matmul %16, %14, %cst_20 {dimension_numbers = #tpu.dot_dimension_numbers<[1], [0], [0], [1], [0, 0, 1, 1], [], []>} : vector<8x8xbf16>, vector<8x384xbf16>, vector<8x384xf32> -> vector<8x384xf32>
    %18 = arith.addf %12, %17 : vector<8x384xf32>
    %c0_21 = arith.constant 0 : index
    %c0_22 = arith.constant 0 : index
    %c0_23 = arith.constant 0 : index
    %c18 = arith.constant 18 : index
    %19 = vector.load %arg1[%c0_21, %c0_22, %c0_23, %c18] : memref<1x1x8x422xbf16, #tpu.memory_space<vmem>>, vector<1x1x8x384xbf16>
    %20 = vector.shape_cast %19 : vector<1x1x8x384xbf16> to vector<8x384xbf16>
    %c3 = arith.constant 3 : index
    %c0_24 = arith.constant 0 : index
    %c0_25 = arith.constant 0 : index
    %21 = vector.load %arg2[%c3, %c0_24, %c0_25] : memref<9x8x8xbf16, #tpu.memory_space<vmem>>, vector<1x8x8xbf16>
    %22 = vector.shape_cast %21 : vector<1x8x8xbf16> to vector<8x8xbf16>
    %cst_26 = arith.constant dense<0.000000e+00> : vector<8x384xf32>
    %23 = tpu.matmul %22, %20, %cst_26 {dimension_numbers = #tpu.dot_dimension_numbers<[1], [0], [0], [1], [0, 0, 1, 1], [], []>} : vector<8x8xbf16>, vector<8x384xbf16>, vector<8x384xf32> -> vector<8x384xf32>
    %24 = arith.addf %18, %23 : vector<8x384xf32>
    %c0_27 = arith.constant 0 : index
    %c0_28 = arith.constant 0 : index
    %c0_29 = arith.constant 0 : index
    %c19 = arith.constant 19 : index
    %25 = vector.load %arg1[%c0_27, %c0_28, %c0_29, %c19] : memref<1x1x8x422xbf16, #tpu.memory_space<vmem>>, vector<1x1x8x384xbf16>
    %26 = vector.shape_cast %25 : vector<1x1x8x384xbf16> to vector<8x384xbf16>
    %c4 = arith.constant 4 : index
    %c0_30 = arith.constant 0 : index
    %c0_31 = arith.constant 0 : index
    %27 = vector.load %arg2[%c4, %c0_30, %c0_31] : memref<9x8x8xbf16, #tpu.memory_space<vmem>>, vector<1x8x8xbf16>
    %28 = vector.shape_cast %27 : vector<1x8x8xbf16> to vector<8x8xbf16>
    %cst_32 = arith.constant dense<0.000000e+00> : vector<8x384xf32>
    %29 = tpu.matmul %28, %26, %cst_32 {dimension_numbers = #tpu.dot_dimension_numbers<[1], [0], [0], [1], [0, 0, 1, 1], [], []>} : vector<8x8xbf16>, vector<8x384xbf16>, vector<8x384xf32> -> vector<8x384xf32>
    %30 = arith.addf %24, %29 : vector<8x384xf32>
    %c0_33 = arith.constant 0 : index
    %c0_34 = arith.constant 0 : index
    %c0_35 = arith.constant 0 : index
    %c20 = arith.constant 20 : index
    %31 = vector.load %arg1[%c0_33, %c0_34, %c0_35, %c20] : memref<1x1x8x422xbf16, #tpu.memory_space<vmem>>, vector<1x1x8x384xbf16>
    %32 = vector.shape_cast %31 : vector<1x1x8x384xbf16> to vector<8x384xbf16>
    %c5 = arith.constant 5 : index
    %c0_36 = arith.constant 0 : index
    %c0_37 = arith.constant 0 : index
    %33 = vector.load %arg2[%c5, %c0_36, %c0_37] : memref<9x8x8xbf16, #tpu.memory_space<vmem>>, vector<1x8x8xbf16>
    %34 = vector.shape_cast %33 : vector<1x8x8xbf16> to vector<8x8xbf16>
    %cst_38 = arith.constant dense<0.000000e+00> : vector<8x384xf32>
    %35 = tpu.matmul %34, %32, %cst_38 {dimension_numbers = #tpu.dot_dimension_numbers<[1], [0], [0], [1], [0, 0, 1, 1], [], []>} : vector<8x8xbf16>, vector<8x384xbf16>, vector<8x384xf32> -> vector<8x384xf32>
    %36 = arith.addf %30, %35 : vector<8x384xf32>
    %c0_39 = arith.constant 0 : index
    %c0_40 = arith.constant 0 : index
    %c0_41 = arith.constant 0 : index
    %c36 = arith.constant 36 : index
    %37 = vector.load %arg1[%c0_39, %c0_40, %c0_41, %c36] : memref<1x1x8x422xbf16, #tpu.memory_space<vmem>>, vector<1x1x8x384xbf16>
    %38 = vector.shape_cast %37 : vector<1x1x8x384xbf16> to vector<8x384xbf16>
    %c6 = arith.constant 6 : index
    %c0_42 = arith.constant 0 : index
    %c0_43 = arith.constant 0 : index
    %39 = vector.load %arg2[%c6, %c0_42, %c0_43] : memref<9x8x8xbf16, #tpu.memory_space<vmem>>, vector<1x8x8xbf16>
    %40 = vector.shape_cast %39 : vector<1x8x8xbf16> to vector<8x8xbf16>
    %cst_44 = arith.constant dense<0.000000e+00> : vector<8x384xf32>
    %41 = tpu.matmul %40, %38, %cst_44 {dimension_numbers = #tpu.dot_dimension_numbers<[1], [0], [0], [1], [0, 0, 1, 1], [], []>} : vector<8x8xbf16>, vector<8x384xbf16>, vector<8x384xf32> -> vector<8x384xf32>
    %42 = arith.addf %36, %41 : vector<8x384xf32>
    %c0_45 = arith.constant 0 : index
    %c0_46 = arith.constant 0 : index
    %c0_47 = arith.constant 0 : index
    %c37 = arith.constant 37 : index
    %43 = vector.load %arg1[%c0_45, %c0_46, %c0_47, %c37] : memref<1x1x8x422xbf16, #tpu.memory_space<vmem>>, vector<1x1x8x384xbf16>
    %44 = vector.shape_cast %43 : vector<1x1x8x384xbf16> to vector<8x384xbf16>
    %c7 = arith.constant 7 : index
    %c0_48 = arith.constant 0 : index
    %c0_49 = arith.constant 0 : index
    %45 = vector.load %arg2[%c7, %c0_48, %c0_49] : memref<9x8x8xbf16, #tpu.memory_space<vmem>>, vector<1x8x8xbf16>
    %46 = vector.shape_cast %45 : vector<1x8x8xbf16> to vector<8x8xbf16>
    %cst_50 = arith.constant dense<0.000000e+00> : vector<8x384xf32>
    %47 = tpu.matmul %46, %44, %cst_50 {dimension_numbers = #tpu.dot_dimension_numbers<[1], [0], [0], [1], [0, 0, 1, 1], [], []>} : vector<8x8xbf16>, vector<8x384xbf16>, vector<8x384xf32> -> vector<8x384xf32>
    %48 = arith.addf %42, %47 : vector<8x384xf32>
    %c0_51 = arith.constant 0 : index
    %c0_52 = arith.constant 0 : index
    %c0_53 = arith.constant 0 : index
    %c38 = arith.constant 38 : index
    %49 = vector.load %arg1[%c0_51, %c0_52, %c0_53, %c38] : memref<1x1x8x422xbf16, #tpu.memory_space<vmem>>, vector<1x1x8x384xbf16>
    %50 = vector.shape_cast %49 : vector<1x1x8x384xbf16> to vector<8x384xbf16>
    %c8 = arith.constant 8 : index
    %c0_54 = arith.constant 0 : index
    %c0_55 = arith.constant 0 : index
    %51 = vector.load %arg2[%c8, %c0_54, %c0_55] : memref<9x8x8xbf16, #tpu.memory_space<vmem>>, vector<1x8x8xbf16>
    %52 = vector.shape_cast %51 : vector<1x8x8xbf16> to vector<8x8xbf16>
    %cst_56 = arith.constant dense<0.000000e+00> : vector<8x384xf32>
    %53 = tpu.matmul %52, %50, %cst_56 {dimension_numbers = #tpu.dot_dimension_numbers<[1], [0], [0], [1], [0, 0, 1, 1], [], []>} : vector<8x8xbf16>, vector<8x384xbf16>, vector<8x384xf32> -> vector<8x384xf32>
    %54 = arith.addf %48, %53 : vector<8x384xf32>
    %c0_57 = arith.constant 0 : index
    %c0_58 = arith.constant 0 : index
    %55 = vector.load %arg3[%c0_57, %c0_58] : memref<8x1xf32, #tpu.memory_space<vmem>>, vector<8x1xf32>
    %56 = vector.broadcast %55 : vector<8x1xf32> to vector<8x384xf32>
    %57 = arith.addf %54, %56 : vector<8x384xf32>
    %cst_59 = arith.constant 0.000000e+00 : f32
    %58 = vector.broadcast %cst_59 : f32 to vector<8x384xf32>
    %59 = arith.maximumf %57, %58 : vector<8x384xf32>
    %60 = arith.truncf %59 : vector<8x384xf32> to vector<8x384xbf16>
    %c0_60 = arith.constant 0 : index
    %c0_61 = arith.constant 0 : index
    %c0_62 = arith.constant 0 : index
    %61 = vector.load %arg4[%c0_60, %c0_61, %c0_62] : memref<1x8x384xbf16, #tpu.memory_space<vmem>>, vector<1x8x384xbf16>
    %62 = vector.shape_cast %61 : vector<1x8x384xbf16> to vector<8x384xbf16>
    %63 = vector.shape_cast %60 : vector<8x384xbf16> to vector<1x8x384xbf16>
    tpu.vector_store %arg4[%c0_60, %c0_61, %c0_62], %63 {strides = array<i32>} : memref<1x8x384xbf16, #tpu.memory_space<vmem>>, vector<1x8x384xbf16>,
    return
  }
  func.func @transform_0(%arg0: i32) -> (i32, i32, i32, i32) {
    %c0_i32 = arith.constant 0 : i32
    %c0_i32_0 = arith.constant 0 : i32
    %c0_i32_1 = arith.constant 0 : i32
    %c0_i32_2 = arith.constant 0 : i32
    return %arg0, %c0_i32, %c0_i32_0, %c0_i32_1 : i32, i32, i32, i32
  }
  func.func @transform_1(%arg0: i32) -> (i32, i32, i32) {
    %c0_i32 = arith.constant 0 : i32
    %c0_i32_0 = arith.constant 0 : i32
    %c0_i32_1 = arith.constant 0 : i32
    %c0_i32_2 = arith.constant 0 : i32
    return %c0_i32, %c0_i32_0, %c0_i32_1 : i32, i32, i32
  }
  func.func @transform_2(%arg0: i32) -> (i32, i32) {
    %c0_i32 = arith.constant 0 : i32
    %c0_i32_0 = arith.constant 0 : i32
    %c0_i32_1 = arith.constant 0 : i32
    return %c0_i32, %c0_i32_0 : i32, i32
  }
  func.func @transform_3(%arg0: i32) -> (i32, i32, i32) {
    %c0_i32 = arith.constant 0 : i32
    %c0_i32_0 = arith.constant 0 : i32
    %c0_i32_1 = arith.constant 0 : i32
    return %arg0, %c0_i32, %c0_i32_0 : i32, i32, i32
  }
}

module attributes {stable_mosaic.version = 11 : i64} {
  func.func @_conv_tap_kernel(%arg0: i32, %arg1: memref<1x4x8x138xbf16, #tpu.memory_space<vmem>>, %arg2: memref<9x8x8xbf16, #tpu.memory_space<vmem>>, %arg3: memref<8x1xf32, #tpu.memory_space<vmem>>, %arg4: memref<1x8x128xbf16, #tpu.memory_space<vmem>>) attributes {dimension_semantics = [#tpu.dimension_semantics<parallel>], iteration_bounds = array<i64: 2>, scalar_prefetch = 0 : i64, scratch_operands = 0 : i64, tpu.core_type = #tpu.core_type<tc>, window_params = [{transform_indices = @transform_0, window_bounds = array<i64: 1, 4, 8, 138>}, {pipeline_mode = #tpu.pipeline_mode<synchronous>, transform_indices = @transform_1, window_bounds = array<i64: 9, 8, 8>}, {pipeline_mode = #tpu.pipeline_mode<synchronous>, transform_indices = @transform_2, window_bounds = array<i64: 8, 1>}, {transform_indices = @transform_3, window_bounds = array<i64: 1, 8, 128>}]} {
    %cst = arith.constant 0.000000e+00 : f32
    %0 = vector.broadcast %cst : f32 to vector<8x128xf32>
    %c0 = arith.constant 0 : index
    %c0_0 = arith.constant 0 : index
    %c0_1 = arith.constant 0 : index
    %c0_2 = arith.constant 0 : index
    %1 = vector.load %arg1[%c0, %c0_0, %c0_1, %c0_2] : memref<1x4x8x138xbf16, #tpu.memory_space<vmem>>, vector<1x1x8x128xbf16>
    %2 = vector.shape_cast %1 : vector<1x1x8x128xbf16> to vector<8x128xbf16>
    %c0_3 = arith.constant 0 : index
    %c0_4 = arith.constant 0 : index
    %c0_5 = arith.constant 0 : index
    %3 = vector.load %arg2[%c0_3, %c0_4, %c0_5] : memref<9x8x8xbf16, #tpu.memory_space<vmem>>, vector<1x8x8xbf16>
    %4 = vector.shape_cast %3 : vector<1x8x8xbf16> to vector<8x8xbf16>
    %cst_6 = arith.constant dense<0.000000e+00> : vector<8x128xf32>
    %5 = tpu.matmul %4, %2, %cst_6 {dimension_numbers = #tpu.dot_dimension_numbers<[1], [0], [0], [1], [0, 0, 1, 1], [], []>} : vector<8x8xbf16>, vector<8x128xbf16>, vector<8x128xf32> -> vector<8x128xf32>
    %6 = arith.addf %0, %5 : vector<8x128xf32>
    %c0_7 = arith.constant 0 : index
    %c1 = arith.constant 1 : index
    %c0_8 = arith.constant 0 : index
    %c0_9 = arith.constant 0 : index
    %7 = vector.load %arg1[%c0_7, %c1, %c0_8, %c0_9] : memref<1x4x8x138xbf16, #tpu.memory_space<vmem>>, vector<1x1x8x128xbf16>
    %8 = vector.shape_cast %7 : vector<1x1x8x128xbf16> to vector<8x128xbf16>
    %c1_10 = arith.constant 1 : index
    %c0_11 = arith.constant 0 : index
    %c0_12 = arith.constant 0 : index
    %9 = vector.load %arg2[%c1_10, %c0_11, %c0_12] : memref<9x8x8xbf16, #tpu.memory_space<vmem>>, vector<1x8x8xbf16>
    %10 = vector.shape_cast %9 : vector<1x8x8xbf16> to vector<8x8xbf16>
    %cst_13 = arith.constant dense<0.000000e+00> : vector<8x128xf32>
    %11 = tpu.matmul %10, %8, %cst_13 {dimension_numbers = #tpu.dot_dimension_numbers<[1], [0], [0], [1], [0, 0, 1, 1], [], []>} : vector<8x8xbf16>, vector<8x128xbf16>, vector<8x128xf32> -> vector<8x128xf32>
    %12 = arith.addf %6, %11 : vector<8x128xf32>
    %c0_14 = arith.constant 0 : index
    %c0_15 = arith.constant 0 : index
    %c0_16 = arith.constant 0 : index
    %c1_17 = arith.constant 1 : index
    %13 = vector.load %arg1[%c0_14, %c0_15, %c0_16, %c1_17] : memref<1x4x8x138xbf16, #tpu.memory_space<vmem>>, vector<1x1x8x128xbf16>
    %14 = vector.shape_cast %13 : vector<1x1x8x128xbf16> to vector<8x128xbf16>
    %c2 = arith.constant 2 : index
    %c0_18 = arith.constant 0 : index
    %c0_19 = arith.constant 0 : index
    %15 = vector.load %arg2[%c2, %c0_18, %c0_19] : memref<9x8x8xbf16, #tpu.memory_space<vmem>>, vector<1x8x8xbf16>
    %16 = vector.shape_cast %15 : vector<1x8x8xbf16> to vector<8x8xbf16>
    %cst_20 = arith.constant dense<0.000000e+00> : vector<8x128xf32>
    %17 = tpu.matmul %16, %14, %cst_20 {dimension_numbers = #tpu.dot_dimension_numbers<[1], [0], [0], [1], [0, 0, 1, 1], [], []>} : vector<8x8xbf16>, vector<8x128xbf16>, vector<8x128xf32> -> vector<8x128xf32>
    %18 = arith.addf %12, %17 : vector<8x128xf32>
    %c0_21 = arith.constant 0 : index
    %c2_22 = arith.constant 2 : index
    %c0_23 = arith.constant 0 : index
    %c0_24 = arith.constant 0 : index
    %19 = vector.load %arg1[%c0_21, %c2_22, %c0_23, %c0_24] : memref<1x4x8x138xbf16, #tpu.memory_space<vmem>>, vector<1x1x8x128xbf16>
    %20 = vector.shape_cast %19 : vector<1x1x8x128xbf16> to vector<8x128xbf16>
    %c3 = arith.constant 3 : index
    %c0_25 = arith.constant 0 : index
    %c0_26 = arith.constant 0 : index
    %21 = vector.load %arg2[%c3, %c0_25, %c0_26] : memref<9x8x8xbf16, #tpu.memory_space<vmem>>, vector<1x8x8xbf16>
    %22 = vector.shape_cast %21 : vector<1x8x8xbf16> to vector<8x8xbf16>
    %cst_27 = arith.constant dense<0.000000e+00> : vector<8x128xf32>
    %23 = tpu.matmul %22, %20, %cst_27 {dimension_numbers = #tpu.dot_dimension_numbers<[1], [0], [0], [1], [0, 0, 1, 1], [], []>} : vector<8x8xbf16>, vector<8x128xbf16>, vector<8x128xf32> -> vector<8x128xf32>
    %24 = arith.addf %18, %23 : vector<8x128xf32>
    %c0_28 = arith.constant 0 : index
    %c3_29 = arith.constant 3 : index
    %c0_30 = arith.constant 0 : index
    %c0_31 = arith.constant 0 : index
    %25 = vector.load %arg1[%c0_28, %c3_29, %c0_30, %c0_31] : memref<1x4x8x138xbf16, #tpu.memory_space<vmem>>, vector<1x1x8x128xbf16>
    %26 = vector.shape_cast %25 : vector<1x1x8x128xbf16> to vector<8x128xbf16>
    %c4 = arith.constant 4 : index
    %c0_32 = arith.constant 0 : index
    %c0_33 = arith.constant 0 : index
    %27 = vector.load %arg2[%c4, %c0_32, %c0_33] : memref<9x8x8xbf16, #tpu.memory_space<vmem>>, vector<1x8x8xbf16>
    %28 = vector.shape_cast %27 : vector<1x8x8xbf16> to vector<8x8xbf16>
    %cst_34 = arith.constant dense<0.000000e+00> : vector<8x128xf32>
    %29 = tpu.matmul %28, %26, %cst_34 {dimension_numbers = #tpu.dot_dimension_numbers<[1], [0], [0], [1], [0, 0, 1, 1], [], []>} : vector<8x8xbf16>, vector<8x128xbf16>, vector<8x128xf32> -> vector<8x128xf32>
    %30 = arith.addf %24, %29 : vector<8x128xf32>
    %c0_35 = arith.constant 0 : index
    %c2_36 = arith.constant 2 : index
    %c0_37 = arith.constant 0 : index
    %c1_38 = arith.constant 1 : index
    %31 = vector.load %arg1[%c0_35, %c2_36, %c0_37, %c1_38] : memref<1x4x8x138xbf16, #tpu.memory_space<vmem>>, vector<1x1x8x128xbf16>
    %32 = vector.shape_cast %31 : vector<1x1x8x128xbf16> to vector<8x128xbf16>
    %c5 = arith.constant 5 : index
    %c0_39 = arith.constant 0 : index
    %c0_40 = arith.constant 0 : index
    %33 = vector.load %arg2[%c5, %c0_39, %c0_40] : memref<9x8x8xbf16, #tpu.memory_space<vmem>>, vector<1x8x8xbf16>
    %34 = vector.shape_cast %33 : vector<1x8x8xbf16> to vector<8x8xbf16>
    %cst_41 = arith.constant dense<0.000000e+00> : vector<8x128xf32>
    %35 = tpu.matmul %34, %32, %cst_41 {dimension_numbers = #tpu.dot_dimension_numbers<[1], [0], [0], [1], [0, 0, 1, 1], [], []>} : vector<8x8xbf16>, vector<8x128xbf16>, vector<8x128xf32> -> vector<8x128xf32>
    %36 = arith.addf %30, %35 : vector<8x128xf32>
    %c0_42 = arith.constant 0 : index
    %c0_43 = arith.constant 0 : index
    %c0_44 = arith.constant 0 : index
    %c9 = arith.constant 9 : index
    %37 = vector.load %arg1[%c0_42, %c0_43, %c0_44, %c9] : memref<1x4x8x138xbf16, #tpu.memory_space<vmem>>, vector<1x1x8x128xbf16>
    %38 = vector.shape_cast %37 : vector<1x1x8x128xbf16> to vector<8x128xbf16>
    %c6 = arith.constant 6 : index
    %c0_45 = arith.constant 0 : index
    %c0_46 = arith.constant 0 : index
    %39 = vector.load %arg2[%c6, %c0_45, %c0_46] : memref<9x8x8xbf16, #tpu.memory_space<vmem>>, vector<1x8x8xbf16>
    %40 = vector.shape_cast %39 : vector<1x8x8xbf16> to vector<8x8xbf16>
    %cst_47 = arith.constant dense<0.000000e+00> : vector<8x128xf32>
    %41 = tpu.matmul %40, %38, %cst_47 {dimension_numbers = #tpu.dot_dimension_numbers<[1], [0], [0], [1], [0, 0, 1, 1], [], []>} : vector<8x8xbf16>, vector<8x128xbf16>, vector<8x128xf32> -> vector<8x128xf32>
    %42 = arith.addf %36, %41 : vector<8x128xf32>
    %c0_48 = arith.constant 0 : index
    %c1_49 = arith.constant 1 : index
    %c0_50 = arith.constant 0 : index
    %c9_51 = arith.constant 9 : index
    %43 = vector.load %arg1[%c0_48, %c1_49, %c0_50, %c9_51] : memref<1x4x8x138xbf16, #tpu.memory_space<vmem>>, vector<1x1x8x128xbf16>
    %44 = vector.shape_cast %43 : vector<1x1x8x128xbf16> to vector<8x128xbf16>
    %c7 = arith.constant 7 : index
    %c0_52 = arith.constant 0 : index
    %c0_53 = arith.constant 0 : index
    %45 = vector.load %arg2[%c7, %c0_52, %c0_53] : memref<9x8x8xbf16, #tpu.memory_space<vmem>>, vector<1x8x8xbf16>
    %46 = vector.shape_cast %45 : vector<1x8x8xbf16> to vector<8x8xbf16>
    %cst_54 = arith.constant dense<0.000000e+00> : vector<8x128xf32>
    %47 = tpu.matmul %46, %44, %cst_54 {dimension_numbers = #tpu.dot_dimension_numbers<[1], [0], [0], [1], [0, 0, 1, 1], [], []>} : vector<8x8xbf16>, vector<8x128xbf16>, vector<8x128xf32> -> vector<8x128xf32>
    %48 = arith.addf %42, %47 : vector<8x128xf32>
    %c0_55 = arith.constant 0 : index
    %c0_56 = arith.constant 0 : index
    %c0_57 = arith.constant 0 : index
    %c10 = arith.constant 10 : index
    %49 = vector.load %arg1[%c0_55, %c0_56, %c0_57, %c10] : memref<1x4x8x138xbf16, #tpu.memory_space<vmem>>, vector<1x1x8x128xbf16>
    %50 = vector.shape_cast %49 : vector<1x1x8x128xbf16> to vector<8x128xbf16>
    %c8 = arith.constant 8 : index
    %c0_58 = arith.constant 0 : index
    %c0_59 = arith.constant 0 : index
    %51 = vector.load %arg2[%c8, %c0_58, %c0_59] : memref<9x8x8xbf16, #tpu.memory_space<vmem>>, vector<1x8x8xbf16>
    %52 = vector.shape_cast %51 : vector<1x8x8xbf16> to vector<8x8xbf16>
    %cst_60 = arith.constant dense<0.000000e+00> : vector<8x128xf32>
    %53 = tpu.matmul %52, %50, %cst_60 {dimension_numbers = #tpu.dot_dimension_numbers<[1], [0], [0], [1], [0, 0, 1, 1], [], []>} : vector<8x8xbf16>, vector<8x128xbf16>, vector<8x128xf32> -> vector<8x128xf32>
    %54 = arith.addf %48, %53 : vector<8x128xf32>
    %c0_61 = arith.constant 0 : index
    %c0_62 = arith.constant 0 : index
    %55 = vector.load %arg3[%c0_61, %c0_62] : memref<8x1xf32, #tpu.memory_space<vmem>>, vector<8x1xf32>
    %56 = vector.broadcast %55 : vector<8x1xf32> to vector<8x128xf32>
    %57 = arith.addf %54, %56 : vector<8x128xf32>
    %cst_63 = arith.constant 0.000000e+00 : f32
    %58 = vector.broadcast %cst_63 : f32 to vector<8x128xf32>
    %59 = arith.maximumf %57, %58 : vector<8x128xf32>
    %60 = arith.truncf %59 : vector<8x128xf32> to vector<8x128xbf16>
    %c0_64 = arith.constant 0 : index
    %c0_65 = arith.constant 0 : index
    %c0_66 = arith.constant 0 : index
    %61 = vector.load %arg4[%c0_64, %c0_65, %c0_66] : memref<1x8x128xbf16, #tpu.memory_space<vmem>>, vector<1x8x128xbf16>
    %62 = vector.shape_cast %61 : vector<1x8x128xbf16> to vector<8x128xbf16>
    %63 = vector.shape_cast %60 : vector<8x128xbf16> to vector<1x8x128xbf16>
    tpu.vector_store %arg4[%c0_64, %c0_65, %c0_66], %63 {strides = array<i32>} : memref<1x8x128xbf16, #tpu.memory_space<vmem>>, vector<1x8x128xbf16>,
    return
  }
  func.func @transform_0(%arg0: i32) -> (i32, i32, i32, i32) {
    %c0_i32 = arith.constant 0 : i32
    %c0_i32_0 = arith.constant 0 : i32
    %c0_i32_1 = arith.constant 0 : i32
    %c0_i32_2 = arith.constant 0 : i32
    return %arg0, %c0_i32, %c0_i32_0, %c0_i32_1 : i32, i32, i32, i32
  }
  func.func @transform_1(%arg0: i32) -> (i32, i32, i32) {
    %c0_i32 = arith.constant 0 : i32
    %c0_i32_0 = arith.constant 0 : i32
    %c0_i32_1 = arith.constant 0 : i32
    %c0_i32_2 = arith.constant 0 : i32
    return %c0_i32, %c0_i32_0, %c0_i32_1 : i32, i32, i32
  }
  func.func @transform_2(%arg0: i32) -> (i32, i32) {
    %c0_i32 = arith.constant 0 : i32
    %c0_i32_0 = arith.constant 0 : i32
    %c0_i32_1 = arith.constant 0 : i32
    return %c0_i32, %c0_i32_0 : i32, i32
  }
  func.func @transform_3(%arg0: i32) -> (i32, i32, i32) {
    %c0_i32 = arith.constant 0 : i32
    %c0_i32_0 = arith.constant 0 : i32
    %c0_i32_1 = arith.constant 0 : i32
    return %arg0, %c0_i32, %c0_i32_0 : i32, i32, i32
  }
}

module attributes {stable_mosaic.version = 11 : i64} {
  func.func @_conv_tap_kernel(%arg0: i32, %arg1: memref<1x4x8x134xbf16, #tpu.memory_space<vmem>>, %arg2: memref<9x16x8xbf16, #tpu.memory_space<vmem>>, %arg3: memref<16x1xf32, #tpu.memory_space<vmem>>, %arg4: memref<1x16x128xbf16, #tpu.memory_space<vmem>>) attributes {dimension_semantics = [#tpu.dimension_semantics<parallel>], iteration_bounds = array<i64: 2>, scalar_prefetch = 0 : i64, scratch_operands = 0 : i64, tpu.core_type = #tpu.core_type<tc>, window_params = [{transform_indices = @transform_0, window_bounds = array<i64: 1, 4, 8, 134>}, {pipeline_mode = #tpu.pipeline_mode<synchronous>, transform_indices = @transform_1, window_bounds = array<i64: 9, 16, 8>}, {pipeline_mode = #tpu.pipeline_mode<synchronous>, transform_indices = @transform_2, window_bounds = array<i64: 16, 1>}, {transform_indices = @transform_3, window_bounds = array<i64: 1, 16, 128>}]} {
    %cst = arith.constant 0.000000e+00 : f32
    %0 = vector.broadcast %cst : f32 to vector<16x128xf32>
    %c0 = arith.constant 0 : index
    %c0_0 = arith.constant 0 : index
    %c0_1 = arith.constant 0 : index
    %c0_2 = arith.constant 0 : index
    %1 = vector.load %arg1[%c0, %c0_0, %c0_1, %c0_2] : memref<1x4x8x134xbf16, #tpu.memory_space<vmem>>, vector<1x1x8x128xbf16>
    %2 = vector.shape_cast %1 : vector<1x1x8x128xbf16> to vector<8x128xbf16>
    %c0_3 = arith.constant 0 : index
    %c0_4 = arith.constant 0 : index
    %c0_5 = arith.constant 0 : index
    %3 = vector.load %arg2[%c0_3, %c0_4, %c0_5] : memref<9x16x8xbf16, #tpu.memory_space<vmem>>, vector<1x16x8xbf16>
    %4 = vector.shape_cast %3 : vector<1x16x8xbf16> to vector<16x8xbf16>
    %cst_6 = arith.constant dense<0.000000e+00> : vector<16x128xf32>
    %5 = tpu.matmul %4, %2, %cst_6 {dimension_numbers = #tpu.dot_dimension_numbers<[1], [0], [0], [1], [0, 0, 1, 1], [], []>} : vector<16x8xbf16>, vector<8x128xbf16>, vector<16x128xf32> -> vector<16x128xf32>
    %6 = arith.addf %0, %5 : vector<16x128xf32>
    %c0_7 = arith.constant 0 : index
    %c1 = arith.constant 1 : index
    %c0_8 = arith.constant 0 : index
    %c0_9 = arith.constant 0 : index
    %7 = vector.load %arg1[%c0_7, %c1, %c0_8, %c0_9] : memref<1x4x8x134xbf16, #tpu.memory_space<vmem>>, vector<1x1x8x128xbf16>
    %8 = vector.shape_cast %7 : vector<1x1x8x128xbf16> to vector<8x128xbf16>
    %c1_10 = arith.constant 1 : index
    %c0_11 = arith.constant 0 : index
    %c0_12 = arith.constant 0 : index
    %9 = vector.load %arg2[%c1_10, %c0_11, %c0_12] : memref<9x16x8xbf16, #tpu.memory_space<vmem>>, vector<1x16x8xbf16>
    %10 = vector.shape_cast %9 : vector<1x16x8xbf16> to vector<16x8xbf16>
    %cst_13 = arith.constant dense<0.000000e+00> : vector<16x128xf32>
    %11 = tpu.matmul %10, %8, %cst_13 {dimension_numbers = #tpu.dot_dimension_numbers<[1], [0], [0], [1], [0, 0, 1, 1], [], []>} : vector<16x8xbf16>, vector<8x128xbf16>, vector<16x128xf32> -> vector<16x128xf32>
    %12 = arith.addf %6, %11 : vector<16x128xf32>
    %c0_14 = arith.constant 0 : index
    %c0_15 = arith.constant 0 : index
    %c0_16 = arith.constant 0 : index
    %c1_17 = arith.constant 1 : index
    %13 = vector.load %arg1[%c0_14, %c0_15, %c0_16, %c1_17] : memref<1x4x8x134xbf16, #tpu.memory_space<vmem>>, vector<1x1x8x128xbf16>
    %14 = vector.shape_cast %13 : vector<1x1x8x128xbf16> to vector<8x128xbf16>
    %c2 = arith.constant 2 : index
    %c0_18 = arith.constant 0 : index
    %c0_19 = arith.constant 0 : index
    %15 = vector.load %arg2[%c2, %c0_18, %c0_19] : memref<9x16x8xbf16, #tpu.memory_space<vmem>>, vector<1x16x8xbf16>
    %16 = vector.shape_cast %15 : vector<1x16x8xbf16> to vector<16x8xbf16>
    %cst_20 = arith.constant dense<0.000000e+00> : vector<16x128xf32>
    %17 = tpu.matmul %16, %14, %cst_20 {dimension_numbers = #tpu.dot_dimension_numbers<[1], [0], [0], [1], [0, 0, 1, 1], [], []>} : vector<16x8xbf16>, vector<8x128xbf16>, vector<16x128xf32> -> vector<16x128xf32>
    %18 = arith.addf %12, %17 : vector<16x128xf32>
    %c0_21 = arith.constant 0 : index
    %c2_22 = arith.constant 2 : index
    %c0_23 = arith.constant 0 : index
    %c0_24 = arith.constant 0 : index
    %19 = vector.load %arg1[%c0_21, %c2_22, %c0_23, %c0_24] : memref<1x4x8x134xbf16, #tpu.memory_space<vmem>>, vector<1x1x8x128xbf16>
    %20 = vector.shape_cast %19 : vector<1x1x8x128xbf16> to vector<8x128xbf16>
    %c3 = arith.constant 3 : index
    %c0_25 = arith.constant 0 : index
    %c0_26 = arith.constant 0 : index
    %21 = vector.load %arg2[%c3, %c0_25, %c0_26] : memref<9x16x8xbf16, #tpu.memory_space<vmem>>, vector<1x16x8xbf16>
    %22 = vector.shape_cast %21 : vector<1x16x8xbf16> to vector<16x8xbf16>
    %cst_27 = arith.constant dense<0.000000e+00> : vector<16x128xf32>
    %23 = tpu.matmul %22, %20, %cst_27 {dimension_numbers = #tpu.dot_dimension_numbers<[1], [0], [0], [1], [0, 0, 1, 1], [], []>} : vector<16x8xbf16>, vector<8x128xbf16>, vector<16x128xf32> -> vector<16x128xf32>
    %24 = arith.addf %18, %23 : vector<16x128xf32>
    %c0_28 = arith.constant 0 : index
    %c3_29 = arith.constant 3 : index
    %c0_30 = arith.constant 0 : index
    %c0_31 = arith.constant 0 : index
    %25 = vector.load %arg1[%c0_28, %c3_29, %c0_30, %c0_31] : memref<1x4x8x134xbf16, #tpu.memory_space<vmem>>, vector<1x1x8x128xbf16>
    %26 = vector.shape_cast %25 : vector<1x1x8x128xbf16> to vector<8x128xbf16>
    %c4 = arith.constant 4 : index
    %c0_32 = arith.constant 0 : index
    %c0_33 = arith.constant 0 : index
    %27 = vector.load %arg2[%c4, %c0_32, %c0_33] : memref<9x16x8xbf16, #tpu.memory_space<vmem>>, vector<1x16x8xbf16>
    %28 = vector.shape_cast %27 : vector<1x16x8xbf16> to vector<16x8xbf16>
    %cst_34 = arith.constant dense<0.000000e+00> : vector<16x128xf32>
    %29 = tpu.matmul %28, %26, %cst_34 {dimension_numbers = #tpu.dot_dimension_numbers<[1], [0], [0], [1], [0, 0, 1, 1], [], []>} : vector<16x8xbf16>, vector<8x128xbf16>, vector<16x128xf32> -> vector<16x128xf32>
    %30 = arith.addf %24, %29 : vector<16x128xf32>
    %c0_35 = arith.constant 0 : index
    %c2_36 = arith.constant 2 : index
    %c0_37 = arith.constant 0 : index
    %c1_38 = arith.constant 1 : index
    %31 = vector.load %arg1[%c0_35, %c2_36, %c0_37, %c1_38] : memref<1x4x8x134xbf16, #tpu.memory_space<vmem>>, vector<1x1x8x128xbf16>
    %32 = vector.shape_cast %31 : vector<1x1x8x128xbf16> to vector<8x128xbf16>
    %c5 = arith.constant 5 : index
    %c0_39 = arith.constant 0 : index
    %c0_40 = arith.constant 0 : index
    %33 = vector.load %arg2[%c5, %c0_39, %c0_40] : memref<9x16x8xbf16, #tpu.memory_space<vmem>>, vector<1x16x8xbf16>
    %34 = vector.shape_cast %33 : vector<1x16x8xbf16> to vector<16x8xbf16>
    %cst_41 = arith.constant dense<0.000000e+00> : vector<16x128xf32>
    %35 = tpu.matmul %34, %32, %cst_41 {dimension_numbers = #tpu.dot_dimension_numbers<[1], [0], [0], [1], [0, 0, 1, 1], [], []>} : vector<16x8xbf16>, vector<8x128xbf16>, vector<16x128xf32> -> vector<16x128xf32>
    %36 = arith.addf %30, %35 : vector<16x128xf32>
    %c0_42 = arith.constant 0 : index
    %c0_43 = arith.constant 0 : index
    %c0_44 = arith.constant 0 : index
    %c5_45 = arith.constant 5 : index
    %37 = vector.load %arg1[%c0_42, %c0_43, %c0_44, %c5_45] : memref<1x4x8x134xbf16, #tpu.memory_space<vmem>>, vector<1x1x8x128xbf16>
    %38 = vector.shape_cast %37 : vector<1x1x8x128xbf16> to vector<8x128xbf16>
    %c6 = arith.constant 6 : index
    %c0_46 = arith.constant 0 : index
    %c0_47 = arith.constant 0 : index
    %39 = vector.load %arg2[%c6, %c0_46, %c0_47] : memref<9x16x8xbf16, #tpu.memory_space<vmem>>, vector<1x16x8xbf16>
    %40 = vector.shape_cast %39 : vector<1x16x8xbf16> to vector<16x8xbf16>
    %cst_48 = arith.constant dense<0.000000e+00> : vector<16x128xf32>
    %41 = tpu.matmul %40, %38, %cst_48 {dimension_numbers = #tpu.dot_dimension_numbers<[1], [0], [0], [1], [0, 0, 1, 1], [], []>} : vector<16x8xbf16>, vector<8x128xbf16>, vector<16x128xf32> -> vector<16x128xf32>
    %42 = arith.addf %36, %41 : vector<16x128xf32>
    %c0_49 = arith.constant 0 : index
    %c1_50 = arith.constant 1 : index
    %c0_51 = arith.constant 0 : index
    %c5_52 = arith.constant 5 : index
    %43 = vector.load %arg1[%c0_49, %c1_50, %c0_51, %c5_52] : memref<1x4x8x134xbf16, #tpu.memory_space<vmem>>, vector<1x1x8x128xbf16>
    %44 = vector.shape_cast %43 : vector<1x1x8x128xbf16> to vector<8x128xbf16>
    %c7 = arith.constant 7 : index
    %c0_53 = arith.constant 0 : index
    %c0_54 = arith.constant 0 : index
    %45 = vector.load %arg2[%c7, %c0_53, %c0_54] : memref<9x16x8xbf16, #tpu.memory_space<vmem>>, vector<1x16x8xbf16>
    %46 = vector.shape_cast %45 : vector<1x16x8xbf16> to vector<16x8xbf16>
    %cst_55 = arith.constant dense<0.000000e+00> : vector<16x128xf32>
    %47 = tpu.matmul %46, %44, %cst_55 {dimension_numbers = #tpu.dot_dimension_numbers<[1], [0], [0], [1], [0, 0, 1, 1], [], []>} : vector<16x8xbf16>, vector<8x128xbf16>, vector<16x128xf32> -> vector<16x128xf32>
    %48 = arith.addf %42, %47 : vector<16x128xf32>
    %c0_56 = arith.constant 0 : index
    %c0_57 = arith.constant 0 : index
    %c0_58 = arith.constant 0 : index
    %c6_59 = arith.constant 6 : index
    %49 = vector.load %arg1[%c0_56, %c0_57, %c0_58, %c6_59] : memref<1x4x8x134xbf16, #tpu.memory_space<vmem>>, vector<1x1x8x128xbf16>
    %50 = vector.shape_cast %49 : vector<1x1x8x128xbf16> to vector<8x128xbf16>
    %c8 = arith.constant 8 : index
    %c0_60 = arith.constant 0 : index
    %c0_61 = arith.constant 0 : index
    %51 = vector.load %arg2[%c8, %c0_60, %c0_61] : memref<9x16x8xbf16, #tpu.memory_space<vmem>>, vector<1x16x8xbf16>
    %52 = vector.shape_cast %51 : vector<1x16x8xbf16> to vector<16x8xbf16>
    %cst_62 = arith.constant dense<0.000000e+00> : vector<16x128xf32>
    %53 = tpu.matmul %52, %50, %cst_62 {dimension_numbers = #tpu.dot_dimension_numbers<[1], [0], [0], [1], [0, 0, 1, 1], [], []>} : vector<16x8xbf16>, vector<8x128xbf16>, vector<16x128xf32> -> vector<16x128xf32>
    %54 = arith.addf %48, %53 : vector<16x128xf32>
    %c0_63 = arith.constant 0 : index
    %c0_64 = arith.constant 0 : index
    %55 = vector.load %arg3[%c0_63, %c0_64] : memref<16x1xf32, #tpu.memory_space<vmem>>, vector<16x1xf32>
    %56 = vector.broadcast %55 : vector<16x1xf32> to vector<16x128xf32>
    %57 = arith.addf %54, %56 : vector<16x128xf32>
    %cst_65 = arith.constant 0.000000e+00 : f32
    %58 = vector.broadcast %cst_65 : f32 to vector<16x128xf32>
    %59 = arith.maximumf %57, %58 : vector<16x128xf32>
    %60 = arith.truncf %59 : vector<16x128xf32> to vector<16x128xbf16>
    %c0_66 = arith.constant 0 : index
    %c0_67 = arith.constant 0 : index
    %c0_68 = arith.constant 0 : index
    %61 = vector.load %arg4[%c0_66, %c0_67, %c0_68] : memref<1x16x128xbf16, #tpu.memory_space<vmem>>, vector<1x16x128xbf16>
    %62 = vector.shape_cast %61 : vector<1x16x128xbf16> to vector<16x128xbf16>
    %63 = vector.shape_cast %60 : vector<16x128xbf16> to vector<1x16x128xbf16>
    tpu.vector_store %arg4[%c0_66, %c0_67, %c0_68], %63 {strides = array<i32>} : memref<1x16x128xbf16, #tpu.memory_space<vmem>>, vector<1x16x128xbf16>,
    return
  }
  func.func @transform_0(%arg0: i32) -> (i32, i32, i32, i32) {
    %c0_i32 = arith.constant 0 : i32
    %c0_i32_0 = arith.constant 0 : i32
    %c0_i32_1 = arith.constant 0 : i32
    %c0_i32_2 = arith.constant 0 : i32
    return %arg0, %c0_i32, %c0_i32_0, %c0_i32_1 : i32, i32, i32, i32
  }
  func.func @transform_1(%arg0: i32) -> (i32, i32, i32) {
    %c0_i32 = arith.constant 0 : i32
    %c0_i32_0 = arith.constant 0 : i32
    %c0_i32_1 = arith.constant 0 : i32
    %c0_i32_2 = arith.constant 0 : i32
    return %c0_i32, %c0_i32_0, %c0_i32_1 : i32, i32, i32
  }
  func.func @transform_2(%arg0: i32) -> (i32, i32) {
    %c0_i32 = arith.constant 0 : i32
    %c0_i32_0 = arith.constant 0 : i32
    %c0_i32_1 = arith.constant 0 : i32
    return %c0_i32, %c0_i32_0 : i32, i32
  }
  func.func @transform_3(%arg0: i32) -> (i32, i32, i32) {
    %c0_i32 = arith.constant 0 : i32
    %c0_i32_0 = arith.constant 0 : i32
    %c0_i32_1 = arith.constant 0 : i32
    return %arg0, %c0_i32, %c0_i32_0 : i32, i32, i32
  }
}

module attributes {stable_mosaic.version = 11 : i64} {
  func.func @_conv_tap_kernel(%arg0: i32, %arg1: memref<1x4x8x128xbf16, #tpu.memory_space<vmem>>, %arg2: memref<1x16x8xbf16, #tpu.memory_space<vmem>>, %arg3: memref<16x1xf32, #tpu.memory_space<vmem>>, %arg4: memref<1x16x128xbf16, #tpu.memory_space<vmem>>) attributes {dimension_semantics = [#tpu.dimension_semantics<parallel>], iteration_bounds = array<i64: 2>, scalar_prefetch = 0 : i64, scratch_operands = 0 : i64, tpu.core_type = #tpu.core_type<tc>, window_params = [{transform_indices = @transform_0, window_bounds = array<i64: 1, 4, 8, 128>}, {pipeline_mode = #tpu.pipeline_mode<synchronous>, transform_indices = @transform_1, window_bounds = array<i64: 1, 16, 8>}, {pipeline_mode = #tpu.pipeline_mode<synchronous>, transform_indices = @transform_2, window_bounds = array<i64: 16, 1>}, {transform_indices = @transform_3, window_bounds = array<i64: 1, 16, 128>}]} {
    %cst = arith.constant 0.000000e+00 : f32
    %0 = vector.broadcast %cst : f32 to vector<16x128xf32>
    %c0 = arith.constant 0 : index
    %c0_0 = arith.constant 0 : index
    %c0_1 = arith.constant 0 : index
    %c0_2 = arith.constant 0 : index
    %1 = vector.load %arg1[%c0, %c0_0, %c0_1, %c0_2] : memref<1x4x8x128xbf16, #tpu.memory_space<vmem>>, vector<1x1x8x128xbf16>
    %2 = vector.shape_cast %1 : vector<1x1x8x128xbf16> to vector<8x128xbf16>
    %c0_3 = arith.constant 0 : index
    %c0_4 = arith.constant 0 : index
    %c0_5 = arith.constant 0 : index
    %3 = vector.load %arg2[%c0_3, %c0_4, %c0_5] : memref<1x16x8xbf16, #tpu.memory_space<vmem>>, vector<1x16x8xbf16>
    %4 = vector.shape_cast %3 : vector<1x16x8xbf16> to vector<16x8xbf16>
    %cst_6 = arith.constant dense<0.000000e+00> : vector<16x128xf32>
    %5 = tpu.matmul %4, %2, %cst_6 {dimension_numbers = #tpu.dot_dimension_numbers<[1], [0], [0], [1], [0, 0, 1, 1], [], []>} : vector<16x8xbf16>, vector<8x128xbf16>, vector<16x128xf32> -> vector<16x128xf32>
    %6 = arith.addf %0, %5 : vector<16x128xf32>
    %c0_7 = arith.constant 0 : index
    %c0_8 = arith.constant 0 : index
    %7 = vector.load %arg3[%c0_7, %c0_8] : memref<16x1xf32, #tpu.memory_space<vmem>>, vector<16x1xf32>
    %8 = vector.broadcast %7 : vector<16x1xf32> to vector<16x128xf32>
    %9 = arith.addf %6, %8 : vector<16x128xf32>
    %10 = arith.truncf %9 : vector<16x128xf32> to vector<16x128xbf16>
    %c0_9 = arith.constant 0 : index
    %c0_10 = arith.constant 0 : index
    %c0_11 = arith.constant 0 : index
    %11 = vector.load %arg4[%c0_9, %c0_10, %c0_11] : memref<1x16x128xbf16, #tpu.memory_space<vmem>>, vector<1x16x128xbf16>
    %12 = vector.shape_cast %11 : vector<1x16x128xbf16> to vector<16x128xbf16>
    %13 = vector.shape_cast %10 : vector<16x128xbf16> to vector<1x16x128xbf16>
    tpu.vector_store %arg4[%c0_9, %c0_10, %c0_11], %13 {strides = array<i32>} : memref<1x16x128xbf16, #tpu.memory_space<vmem>>, vector<1x16x128xbf16>,
    return
  }
  func.func @transform_0(%arg0: i32) -> (i32, i32, i32, i32) {
    %c0_i32 = arith.constant 0 : i32
    %c0_i32_0 = arith.constant 0 : i32
    %c0_i32_1 = arith.constant 0 : i32
    %c0_i32_2 = arith.constant 0 : i32
    return %arg0, %c0_i32, %c0_i32_0, %c0_i32_1 : i32, i32, i32, i32
  }
  func.func @transform_1(%arg0: i32) -> (i32, i32, i32) {
    %c0_i32 = arith.constant 0 : i32
    %c0_i32_0 = arith.constant 0 : i32
    %c0_i32_1 = arith.constant 0 : i32
    %c0_i32_2 = arith.constant 0 : i32
    return %c0_i32, %c0_i32_0, %c0_i32_1 : i32, i32, i32
  }
  func.func @transform_2(%arg0: i32) -> (i32, i32) {
    %c0_i32 = arith.constant 0 : i32
    %c0_i32_0 = arith.constant 0 : i32
    %c0_i32_1 = arith.constant 0 : i32
    return %c0_i32, %c0_i32_0 : i32, i32
  }
  func.func @transform_3(%arg0: i32) -> (i32, i32, i32) {
    %c0_i32 = arith.constant 0 : i32
    %c0_i32_0 = arith.constant 0 : i32
    %c0_i32_1 = arith.constant 0 : i32
    return %arg0, %c0_i32, %c0_i32_0 : i32, i32, i32
  }
}

module attributes {stable_mosaic.version = 11 : i64} {
  func.func @_conv_tap_kernel_res(%arg0: i32, %arg1: memref<1x1x16x142xbf16, #tpu.memory_space<vmem>>, %arg2: memref<9x16x16xbf16, #tpu.memory_space<vmem>>, %arg3: memref<16x1xf32, #tpu.memory_space<vmem>>, %arg4: memref<1x16x128xbf16, #tpu.memory_space<vmem>>, %arg5: memref<1x16x128xbf16, #tpu.memory_space<vmem>>) attributes {dimension_semantics = [#tpu.dimension_semantics<parallel>], iteration_bounds = array<i64: 2>, scalar_prefetch = 0 : i64, scratch_operands = 0 : i64, tpu.core_type = #tpu.core_type<tc>, window_params = [{transform_indices = @transform_0, window_bounds = array<i64: 1, 1, 16, 142>}, {pipeline_mode = #tpu.pipeline_mode<synchronous>, transform_indices = @transform_1, window_bounds = array<i64: 9, 16, 16>}, {pipeline_mode = #tpu.pipeline_mode<synchronous>, transform_indices = @transform_2, window_bounds = array<i64: 16, 1>}, {transform_indices = @transform_3, window_bounds = array<i64: 1, 16, 128>}, {transform_indices = @transform_4, window_bounds = array<i64: 1, 16, 128>}]} {
    %cst = arith.constant 0.000000e+00 : f32
    %0 = vector.broadcast %cst : f32 to vector<16x128xf32>
    %c0 = arith.constant 0 : index
    %c0_0 = arith.constant 0 : index
    %c0_1 = arith.constant 0 : index
    %c0_2 = arith.constant 0 : index
    %1 = vector.load %arg1[%c0, %c0_0, %c0_1, %c0_2] : memref<1x1x16x142xbf16, #tpu.memory_space<vmem>>, vector<1x1x16x128xbf16>
    %2 = vector.shape_cast %1 : vector<1x1x16x128xbf16> to vector<16x128xbf16>
    %c0_3 = arith.constant 0 : index
    %c0_4 = arith.constant 0 : index
    %c0_5 = arith.constant 0 : index
    %3 = vector.load %arg2[%c0_3, %c0_4, %c0_5] : memref<9x16x16xbf16, #tpu.memory_space<vmem>>, vector<1x16x16xbf16>
    %4 = vector.shape_cast %3 : vector<1x16x16xbf16> to vector<16x16xbf16>
    %cst_6 = arith.constant dense<0.000000e+00> : vector<16x128xf32>
    %5 = tpu.matmul %4, %2, %cst_6 {dimension_numbers = #tpu.dot_dimension_numbers<[1], [0], [0], [1], [0, 0, 1, 1], [], []>} : vector<16x16xbf16>, vector<16x128xbf16>, vector<16x128xf32> -> vector<16x128xf32>
    %6 = arith.addf %0, %5 : vector<16x128xf32>
    %c0_7 = arith.constant 0 : index
    %c0_8 = arith.constant 0 : index
    %c0_9 = arith.constant 0 : index
    %c1 = arith.constant 1 : index
    %7 = vector.load %arg1[%c0_7, %c0_8, %c0_9, %c1] : memref<1x1x16x142xbf16, #tpu.memory_space<vmem>>, vector<1x1x16x128xbf16>
    %8 = vector.shape_cast %7 : vector<1x1x16x128xbf16> to vector<16x128xbf16>
    %c1_10 = arith.constant 1 : index
    %c0_11 = arith.constant 0 : index
    %c0_12 = arith.constant 0 : index
    %9 = vector.load %arg2[%c1_10, %c0_11, %c0_12] : memref<9x16x16xbf16, #tpu.memory_space<vmem>>, vector<1x16x16xbf16>
    %10 = vector.shape_cast %9 : vector<1x16x16xbf16> to vector<16x16xbf16>
    %cst_13 = arith.constant dense<0.000000e+00> : vector<16x128xf32>
    %11 = tpu.matmul %10, %8, %cst_13 {dimension_numbers = #tpu.dot_dimension_numbers<[1], [0], [0], [1], [0, 0, 1, 1], [], []>} : vector<16x16xbf16>, vector<16x128xbf16>, vector<16x128xf32> -> vector<16x128xf32>
    %12 = arith.addf %6, %11 : vector<16x128xf32>
    %c0_14 = arith.constant 0 : index
    %c0_15 = arith.constant 0 : index
    %c0_16 = arith.constant 0 : index
    %c2 = arith.constant 2 : index
    %13 = vector.load %arg1[%c0_14, %c0_15, %c0_16, %c2] : memref<1x1x16x142xbf16, #tpu.memory_space<vmem>>, vector<1x1x16x128xbf16>
    %14 = vector.shape_cast %13 : vector<1x1x16x128xbf16> to vector<16x128xbf16>
    %c2_17 = arith.constant 2 : index
    %c0_18 = arith.constant 0 : index
    %c0_19 = arith.constant 0 : index
    %15 = vector.load %arg2[%c2_17, %c0_18, %c0_19] : memref<9x16x16xbf16, #tpu.memory_space<vmem>>, vector<1x16x16xbf16>
    %16 = vector.shape_cast %15 : vector<1x16x16xbf16> to vector<16x16xbf16>
    %cst_20 = arith.constant dense<0.000000e+00> : vector<16x128xf32>
    %17 = tpu.matmul %16, %14, %cst_20 {dimension_numbers = #tpu.dot_dimension_numbers<[1], [0], [0], [1], [0, 0, 1, 1], [], []>} : vector<16x16xbf16>, vector<16x128xbf16>, vector<16x128xf32> -> vector<16x128xf32>
    %18 = arith.addf %12, %17 : vector<16x128xf32>
    %c0_21 = arith.constant 0 : index
    %c0_22 = arith.constant 0 : index
    %c0_23 = arith.constant 0 : index
    %c6 = arith.constant 6 : index
    %19 = vector.load %arg1[%c0_21, %c0_22, %c0_23, %c6] : memref<1x1x16x142xbf16, #tpu.memory_space<vmem>>, vector<1x1x16x128xbf16>
    %20 = vector.shape_cast %19 : vector<1x1x16x128xbf16> to vector<16x128xbf16>
    %c3 = arith.constant 3 : index
    %c0_24 = arith.constant 0 : index
    %c0_25 = arith.constant 0 : index
    %21 = vector.load %arg2[%c3, %c0_24, %c0_25] : memref<9x16x16xbf16, #tpu.memory_space<vmem>>, vector<1x16x16xbf16>
    %22 = vector.shape_cast %21 : vector<1x16x16xbf16> to vector<16x16xbf16>
    %cst_26 = arith.constant dense<0.000000e+00> : vector<16x128xf32>
    %23 = tpu.matmul %22, %20, %cst_26 {dimension_numbers = #tpu.dot_dimension_numbers<[1], [0], [0], [1], [0, 0, 1, 1], [], []>} : vector<16x16xbf16>, vector<16x128xbf16>, vector<16x128xf32> -> vector<16x128xf32>
    %24 = arith.addf %18, %23 : vector<16x128xf32>
    %c0_27 = arith.constant 0 : index
    %c0_28 = arith.constant 0 : index
    %c0_29 = arith.constant 0 : index
    %c7 = arith.constant 7 : index
    %25 = vector.load %arg1[%c0_27, %c0_28, %c0_29, %c7] : memref<1x1x16x142xbf16, #tpu.memory_space<vmem>>, vector<1x1x16x128xbf16>
    %26 = vector.shape_cast %25 : vector<1x1x16x128xbf16> to vector<16x128xbf16>
    %c4 = arith.constant 4 : index
    %c0_30 = arith.constant 0 : index
    %c0_31 = arith.constant 0 : index
    %27 = vector.load %arg2[%c4, %c0_30, %c0_31] : memref<9x16x16xbf16, #tpu.memory_space<vmem>>, vector<1x16x16xbf16>
    %28 = vector.shape_cast %27 : vector<1x16x16xbf16> to vector<16x16xbf16>
    %cst_32 = arith.constant dense<0.000000e+00> : vector<16x128xf32>
    %29 = tpu.matmul %28, %26, %cst_32 {dimension_numbers = #tpu.dot_dimension_numbers<[1], [0], [0], [1], [0, 0, 1, 1], [], []>} : vector<16x16xbf16>, vector<16x128xbf16>, vector<16x128xf32> -> vector<16x128xf32>
    %30 = arith.addf %24, %29 : vector<16x128xf32>
    %c0_33 = arith.constant 0 : index
    %c0_34 = arith.constant 0 : index
    %c0_35 = arith.constant 0 : index
    %c8 = arith.constant 8 : index
    %31 = vector.load %arg1[%c0_33, %c0_34, %c0_35, %c8] : memref<1x1x16x142xbf16, #tpu.memory_space<vmem>>, vector<1x1x16x128xbf16>
    %32 = vector.shape_cast %31 : vector<1x1x16x128xbf16> to vector<16x128xbf16>
    %c5 = arith.constant 5 : index
    %c0_36 = arith.constant 0 : index
    %c0_37 = arith.constant 0 : index
    %33 = vector.load %arg2[%c5, %c0_36, %c0_37] : memref<9x16x16xbf16, #tpu.memory_space<vmem>>, vector<1x16x16xbf16>
    %34 = vector.shape_cast %33 : vector<1x16x16xbf16> to vector<16x16xbf16>
    %cst_38 = arith.constant dense<0.000000e+00> : vector<16x128xf32>
    %35 = tpu.matmul %34, %32, %cst_38 {dimension_numbers = #tpu.dot_dimension_numbers<[1], [0], [0], [1], [0, 0, 1, 1], [], []>} : vector<16x16xbf16>, vector<16x128xbf16>, vector<16x128xf32> -> vector<16x128xf32>
    %36 = arith.addf %30, %35 : vector<16x128xf32>
    %c0_39 = arith.constant 0 : index
    %c0_40 = arith.constant 0 : index
    %c0_41 = arith.constant 0 : index
    %c12 = arith.constant 12 : index
    %37 = vector.load %arg1[%c0_39, %c0_40, %c0_41, %c12] : memref<1x1x16x142xbf16, #tpu.memory_space<vmem>>, vector<1x1x16x128xbf16>
    %38 = vector.shape_cast %37 : vector<1x1x16x128xbf16> to vector<16x128xbf16>
    %c6_42 = arith.constant 6 : index
    %c0_43 = arith.constant 0 : index
    %c0_44 = arith.constant 0 : index
    %39 = vector.load %arg2[%c6_42, %c0_43, %c0_44] : memref<9x16x16xbf16, #tpu.memory_space<vmem>>, vector<1x16x16xbf16>
    %40 = vector.shape_cast %39 : vector<1x16x16xbf16> to vector<16x16xbf16>
    %cst_45 = arith.constant dense<0.000000e+00> : vector<16x128xf32>
    %41 = tpu.matmul %40, %38, %cst_45 {dimension_numbers = #tpu.dot_dimension_numbers<[1], [0], [0], [1], [0, 0, 1, 1], [], []>} : vector<16x16xbf16>, vector<16x128xbf16>, vector<16x128xf32> -> vector<16x128xf32>
    %42 = arith.addf %36, %41 : vector<16x128xf32>
    %c0_46 = arith.constant 0 : index
    %c0_47 = arith.constant 0 : index
    %c0_48 = arith.constant 0 : index
    %c13 = arith.constant 13 : index
    %43 = vector.load %arg1[%c0_46, %c0_47, %c0_48, %c13] : memref<1x1x16x142xbf16, #tpu.memory_space<vmem>>, vector<1x1x16x128xbf16>
    %44 = vector.shape_cast %43 : vector<1x1x16x128xbf16> to vector<16x128xbf16>
    %c7_49 = arith.constant 7 : index
    %c0_50 = arith.constant 0 : index
    %c0_51 = arith.constant 0 : index
    %45 = vector.load %arg2[%c7_49, %c0_50, %c0_51] : memref<9x16x16xbf16, #tpu.memory_space<vmem>>, vector<1x16x16xbf16>
    %46 = vector.shape_cast %45 : vector<1x16x16xbf16> to vector<16x16xbf16>
    %cst_52 = arith.constant dense<0.000000e+00> : vector<16x128xf32>
    %47 = tpu.matmul %46, %44, %cst_52 {dimension_numbers = #tpu.dot_dimension_numbers<[1], [0], [0], [1], [0, 0, 1, 1], [], []>} : vector<16x16xbf16>, vector<16x128xbf16>, vector<16x128xf32> -> vector<16x128xf32>
    %48 = arith.addf %42, %47 : vector<16x128xf32>
    %c0_53 = arith.constant 0 : index
    %c0_54 = arith.constant 0 : index
    %c0_55 = arith.constant 0 : index
    %c14 = arith.constant 14 : index
    %49 = vector.load %arg1[%c0_53, %c0_54, %c0_55, %c14] : memref<1x1x16x142xbf16, #tpu.memory_space<vmem>>, vector<1x1x16x128xbf16>
    %50 = vector.shape_cast %49 : vector<1x1x16x128xbf16> to vector<16x128xbf16>
    %c8_56 = arith.constant 8 : index
    %c0_57 = arith.constant 0 : index
    %c0_58 = arith.constant 0 : index
    %51 = vector.load %arg2[%c8_56, %c0_57, %c0_58] : memref<9x16x16xbf16, #tpu.memory_space<vmem>>, vector<1x16x16xbf16>
    %52 = vector.shape_cast %51 : vector<1x16x16xbf16> to vector<16x16xbf16>
    %cst_59 = arith.constant dense<0.000000e+00> : vector<16x128xf32>
    %53 = tpu.matmul %52, %50, %cst_59 {dimension_numbers = #tpu.dot_dimension_numbers<[1], [0], [0], [1], [0, 0, 1, 1], [], []>} : vector<16x16xbf16>, vector<16x128xbf16>, vector<16x128xf32> -> vector<16x128xf32>
    %54 = arith.addf %48, %53 : vector<16x128xf32>
    %c0_60 = arith.constant 0 : index
    %c0_61 = arith.constant 0 : index
    %55 = vector.load %arg3[%c0_60, %c0_61] : memref<16x1xf32, #tpu.memory_space<vmem>>, vector<16x1xf32>
    %56 = vector.broadcast %55 : vector<16x1xf32> to vector<16x128xf32>
    %57 = arith.addf %54, %56 : vector<16x128xf32>
    %c0_62 = arith.constant 0 : index
    %c0_63 = arith.constant 0 : index
    %c0_64 = arith.constant 0 : index
    %58 = vector.load %arg4[%c0_62, %c0_63, %c0_64] : memref<1x16x128xbf16, #tpu.memory_space<vmem>>, vector<1x16x128xbf16>
    %59 = vector.shape_cast %58 : vector<1x16x128xbf16> to vector<16x128xbf16>
    %60 = arith.extf %59 : vector<16x128xbf16> to vector<16x128xf32>
    %61 = arith.addf %57, %60 : vector<16x128xf32>
    %62 = arith.truncf %61 : vector<16x128xf32> to vector<16x128xbf16>
    %c0_65 = arith.constant 0 : index
    %c0_66 = arith.constant 0 : index
    %c0_67 = arith.constant 0 : index
    %63 = vector.load %arg5[%c0_65, %c0_66, %c0_67] : memref<1x16x128xbf16, #tpu.memory_space<vmem>>, vector<1x16x128xbf16>
    %64 = vector.shape_cast %63 : vector<1x16x128xbf16> to vector<16x128xbf16>
    %65 = vector.shape_cast %62 : vector<16x128xbf16> to vector<1x16x128xbf16>
    tpu.vector_store %arg5[%c0_65, %c0_66, %c0_67], %65 {strides = array<i32>} : memref<1x16x128xbf16, #tpu.memory_space<vmem>>, vector<1x16x128xbf16>,
    return
  }
  func.func @transform_0(%arg0: i32) -> (i32, i32, i32, i32) {
    %c0_i32 = arith.constant 0 : i32
    %c0_i32_0 = arith.constant 0 : i32
    %c0_i32_1 = arith.constant 0 : i32
    %c0_i32_2 = arith.constant 0 : i32
    return %arg0, %c0_i32, %c0_i32_0, %c0_i32_1 : i32, i32, i32, i32
  }
  func.func @transform_1(%arg0: i32) -> (i32, i32, i32) {
    %c0_i32 = arith.constant 0 : i32
    %c0_i32_0 = arith.constant 0 : i32
    %c0_i32_1 = arith.constant 0 : i32
    %c0_i32_2 = arith.constant 0 : i32
    return %c0_i32, %c0_i32_0, %c0_i32_1 : i32, i32, i32
  }
  func.func @transform_2(%arg0: i32) -> (i32, i32) {
    %c0_i32 = arith.constant 0 : i32
    %c0_i32_0 = arith.constant 0 : i32
    %c0_i32_1 = arith.constant 0 : i32
    return %c0_i32, %c0_i32_0 : i32, i32
  }
  func.func @transform_3(%arg0: i32) -> (i32, i32, i32) {
    %c0_i32 = arith.constant 0 : i32
    %c0_i32_0 = arith.constant 0 : i32
    %c0_i32_1 = arith.constant 0 : i32
    return %arg0, %c0_i32, %c0_i32_0 : i32, i32, i32
  }
  func.func @transform_4(%arg0: i32) -> (i32, i32, i32) {
    %c0_i32 = arith.constant 0 : i32
    %c0_i32_0 = arith.constant 0 : i32
    %c0_i32_1 = arith.constant 0 : i32
    return %arg0, %c0_i32, %c0_i32_0 : i32, i32, i32
  }
}

module attributes {stable_mosaic.version = 11 : i64} {
  func.func @_conv_tap_kernel(%arg0: i32, %arg1: memref<1x4x16x132xbf16, #tpu.memory_space<vmem>>, %arg2: memref<9x32x16xbf16, #tpu.memory_space<vmem>>, %arg3: memref<32x1xf32, #tpu.memory_space<vmem>>, %arg4: memref<1x32x128xbf16, #tpu.memory_space<vmem>>) attributes {dimension_semantics = [#tpu.dimension_semantics<parallel>], iteration_bounds = array<i64: 2>, scalar_prefetch = 0 : i64, scratch_operands = 0 : i64, tpu.core_type = #tpu.core_type<tc>, window_params = [{transform_indices = @transform_0, window_bounds = array<i64: 1, 4, 16, 132>}, {pipeline_mode = #tpu.pipeline_mode<synchronous>, transform_indices = @transform_1, window_bounds = array<i64: 9, 32, 16>}, {pipeline_mode = #tpu.pipeline_mode<synchronous>, transform_indices = @transform_2, window_bounds = array<i64: 32, 1>}, {transform_indices = @transform_3, window_bounds = array<i64: 1, 32, 128>}]} {
    %cst = arith.constant 0.000000e+00 : f32
    %0 = vector.broadcast %cst : f32 to vector<32x128xf32>
    %c0 = arith.constant 0 : index
    %c0_0 = arith.constant 0 : index
    %c0_1 = arith.constant 0 : index
    %c0_2 = arith.constant 0 : index
    %1 = vector.load %arg1[%c0, %c0_0, %c0_1, %c0_2] : memref<1x4x16x132xbf16, #tpu.memory_space<vmem>>, vector<1x1x16x128xbf16>
    %2 = vector.shape_cast %1 : vector<1x1x16x128xbf16> to vector<16x128xbf16>
    %c0_3 = arith.constant 0 : index
    %c0_4 = arith.constant 0 : index
    %c0_5 = arith.constant 0 : index
    %3 = vector.load %arg2[%c0_3, %c0_4, %c0_5] : memref<9x32x16xbf16, #tpu.memory_space<vmem>>, vector<1x32x16xbf16>
    %4 = vector.shape_cast %3 : vector<1x32x16xbf16> to vector<32x16xbf16>
    %cst_6 = arith.constant dense<0.000000e+00> : vector<32x128xf32>
    %5 = tpu.matmul %4, %2, %cst_6 {dimension_numbers = #tpu.dot_dimension_numbers<[1], [0], [0], [1], [0, 0, 1, 1], [], []>} : vector<32x16xbf16>, vector<16x128xbf16>, vector<32x128xf32> -> vector<32x128xf32>
    %6 = arith.addf %0, %5 : vector<32x128xf32>
    %c0_7 = arith.constant 0 : index
    %c1 = arith.constant 1 : index
    %c0_8 = arith.constant 0 : index
    %c0_9 = arith.constant 0 : index
    %7 = vector.load %arg1[%c0_7, %c1, %c0_8, %c0_9] : memref<1x4x16x132xbf16, #tpu.memory_space<vmem>>, vector<1x1x16x128xbf16>
    %8 = vector.shape_cast %7 : vector<1x1x16x128xbf16> to vector<16x128xbf16>
    %c1_10 = arith.constant 1 : index
    %c0_11 = arith.constant 0 : index
    %c0_12 = arith.constant 0 : index
    %9 = vector.load %arg2[%c1_10, %c0_11, %c0_12] : memref<9x32x16xbf16, #tpu.memory_space<vmem>>, vector<1x32x16xbf16>
    %10 = vector.shape_cast %9 : vector<1x32x16xbf16> to vector<32x16xbf16>
    %cst_13 = arith.constant dense<0.000000e+00> : vector<32x128xf32>
    %11 = tpu.matmul %10, %8, %cst_13 {dimension_numbers = #tpu.dot_dimension_numbers<[1], [0], [0], [1], [0, 0, 1, 1], [], []>} : vector<32x16xbf16>, vector<16x128xbf16>, vector<32x128xf32> -> vector<32x128xf32>
    %12 = arith.addf %6, %11 : vector<32x128xf32>
    %c0_14 = arith.constant 0 : index
    %c0_15 = arith.constant 0 : index
    %c0_16 = arith.constant 0 : index
    %c1_17 = arith.constant 1 : index
    %13 = vector.load %arg1[%c0_14, %c0_15, %c0_16, %c1_17] : memref<1x4x16x132xbf16, #tpu.memory_space<vmem>>, vector<1x1x16x128xbf16>
    %14 = vector.shape_cast %13 : vector<1x1x16x128xbf16> to vector<16x128xbf16>
    %c2 = arith.constant 2 : index
    %c0_18 = arith.constant 0 : index
    %c0_19 = arith.constant 0 : index
    %15 = vector.load %arg2[%c2, %c0_18, %c0_19] : memref<9x32x16xbf16, #tpu.memory_space<vmem>>, vector<1x32x16xbf16>
    %16 = vector.shape_cast %15 : vector<1x32x16xbf16> to vector<32x16xbf16>
    %cst_20 = arith.constant dense<0.000000e+00> : vector<32x128xf32>
    %17 = tpu.matmul %16, %14, %cst_20 {dimension_numbers = #tpu.dot_dimension_numbers<[1], [0], [0], [1], [0, 0, 1, 1], [], []>} : vector<32x16xbf16>, vector<16x128xbf16>, vector<32x128xf32> -> vector<32x128xf32>
    %18 = arith.addf %12, %17 : vector<32x128xf32>
    %c0_21 = arith.constant 0 : index
    %c2_22 = arith.constant 2 : index
    %c0_23 = arith.constant 0 : index
    %c0_24 = arith.constant 0 : index
    %19 = vector.load %arg1[%c0_21, %c2_22, %c0_23, %c0_24] : memref<1x4x16x132xbf16, #tpu.memory_space<vmem>>, vector<1x1x16x128xbf16>
    %20 = vector.shape_cast %19 : vector<1x1x16x128xbf16> to vector<16x128xbf16>
    %c3 = arith.constant 3 : index
    %c0_25 = arith.constant 0 : index
    %c0_26 = arith.constant 0 : index
    %21 = vector.load %arg2[%c3, %c0_25, %c0_26] : memref<9x32x16xbf16, #tpu.memory_space<vmem>>, vector<1x32x16xbf16>
    %22 = vector.shape_cast %21 : vector<1x32x16xbf16> to vector<32x16xbf16>
    %cst_27 = arith.constant dense<0.000000e+00> : vector<32x128xf32>
    %23 = tpu.matmul %22, %20, %cst_27 {dimension_numbers = #tpu.dot_dimension_numbers<[1], [0], [0], [1], [0, 0, 1, 1], [], []>} : vector<32x16xbf16>, vector<16x128xbf16>, vector<32x128xf32> -> vector<32x128xf32>
    %24 = arith.addf %18, %23 : vector<32x128xf32>
    %c0_28 = arith.constant 0 : index
    %c3_29 = arith.constant 3 : index
    %c0_30 = arith.constant 0 : index
    %c0_31 = arith.constant 0 : index
    %25 = vector.load %arg1[%c0_28, %c3_29, %c0_30, %c0_31] : memref<1x4x16x132xbf16, #tpu.memory_space<vmem>>, vector<1x1x16x128xbf16>
    %26 = vector.shape_cast %25 : vector<1x1x16x128xbf16> to vector<16x128xbf16>
    %c4 = arith.constant 4 : index
    %c0_32 = arith.constant 0 : index
    %c0_33 = arith.constant 0 : index
    %27 = vector.load %arg2[%c4, %c0_32, %c0_33] : memref<9x32x16xbf16, #tpu.memory_space<vmem>>, vector<1x32x16xbf16>
    %28 = vector.shape_cast %27 : vector<1x32x16xbf16> to vector<32x16xbf16>
    %cst_34 = arith.constant dense<0.000000e+00> : vector<32x128xf32>
    %29 = tpu.matmul %28, %26, %cst_34 {dimension_numbers = #tpu.dot_dimension_numbers<[1], [0], [0], [1], [0, 0, 1, 1], [], []>} : vector<32x16xbf16>, vector<16x128xbf16>, vector<32x128xf32> -> vector<32x128xf32>
    %30 = arith.addf %24, %29 : vector<32x128xf32>
    %c0_35 = arith.constant 0 : index
    %c2_36 = arith.constant 2 : index
    %c0_37 = arith.constant 0 : index
    %c1_38 = arith.constant 1 : index
    %31 = vector.load %arg1[%c0_35, %c2_36, %c0_37, %c1_38] : memref<1x4x16x132xbf16, #tpu.memory_space<vmem>>, vector<1x1x16x128xbf16>
    %32 = vector.shape_cast %31 : vector<1x1x16x128xbf16> to vector<16x128xbf16>
    %c5 = arith.constant 5 : index
    %c0_39 = arith.constant 0 : index
    %c0_40 = arith.constant 0 : index
    %33 = vector.load %arg2[%c5, %c0_39, %c0_40] : memref<9x32x16xbf16, #tpu.memory_space<vmem>>, vector<1x32x16xbf16>
    %34 = vector.shape_cast %33 : vector<1x32x16xbf16> to vector<32x16xbf16>
    %cst_41 = arith.constant dense<0.000000e+00> : vector<32x128xf32>
    %35 = tpu.matmul %34, %32, %cst_41 {dimension_numbers = #tpu.dot_dimension_numbers<[1], [0], [0], [1], [0, 0, 1, 1], [], []>} : vector<32x16xbf16>, vector<16x128xbf16>, vector<32x128xf32> -> vector<32x128xf32>
    %36 = arith.addf %30, %35 : vector<32x128xf32>
    %c0_42 = arith.constant 0 : index
    %c0_43 = arith.constant 0 : index
    %c0_44 = arith.constant 0 : index
    %c3_45 = arith.constant 3 : index
    %37 = vector.load %arg1[%c0_42, %c0_43, %c0_44, %c3_45] : memref<1x4x16x132xbf16, #tpu.memory_space<vmem>>, vector<1x1x16x128xbf16>
    %38 = vector.shape_cast %37 : vector<1x1x16x128xbf16> to vector<16x128xbf16>
    %c6 = arith.constant 6 : index
    %c0_46 = arith.constant 0 : index
    %c0_47 = arith.constant 0 : index
    %39 = vector.load %arg2[%c6, %c0_46, %c0_47] : memref<9x32x16xbf16, #tpu.memory_space<vmem>>, vector<1x32x16xbf16>
    %40 = vector.shape_cast %39 : vector<1x32x16xbf16> to vector<32x16xbf16>
    %cst_48 = arith.constant dense<0.000000e+00> : vector<32x128xf32>
    %41 = tpu.matmul %40, %38, %cst_48 {dimension_numbers = #tpu.dot_dimension_numbers<[1], [0], [0], [1], [0, 0, 1, 1], [], []>} : vector<32x16xbf16>, vector<16x128xbf16>, vector<32x128xf32> -> vector<32x128xf32>
    %42 = arith.addf %36, %41 : vector<32x128xf32>
    %c0_49 = arith.constant 0 : index
    %c1_50 = arith.constant 1 : index
    %c0_51 = arith.constant 0 : index
    %c3_52 = arith.constant 3 : index
    %43 = vector.load %arg1[%c0_49, %c1_50, %c0_51, %c3_52] : memref<1x4x16x132xbf16, #tpu.memory_space<vmem>>, vector<1x1x16x128xbf16>
    %44 = vector.shape_cast %43 : vector<1x1x16x128xbf16> to vector<16x128xbf16>
    %c7 = arith.constant 7 : index
    %c0_53 = arith.constant 0 : index
    %c0_54 = arith.constant 0 : index
    %45 = vector.load %arg2[%c7, %c0_53, %c0_54] : memref<9x32x16xbf16, #tpu.memory_space<vmem>>, vector<1x32x16xbf16>
    %46 = vector.shape_cast %45 : vector<1x32x16xbf16> to vector<32x16xbf16>
    %cst_55 = arith.constant dense<0.000000e+00> : vector<32x128xf32>
    %47 = tpu.matmul %46, %44, %cst_55 {dimension_numbers = #tpu.dot_dimension_numbers<[1], [0], [0], [1], [0, 0, 1, 1], [], []>} : vector<32x16xbf16>, vector<16x128xbf16>, vector<32x128xf32> -> vector<32x128xf32>
    %48 = arith.addf %42, %47 : vector<32x128xf32>
    %c0_56 = arith.constant 0 : index
    %c0_57 = arith.constant 0 : index
    %c0_58 = arith.constant 0 : index
    %c4_59 = arith.constant 4 : index
    %49 = vector.load %arg1[%c0_56, %c0_57, %c0_58, %c4_59] : memref<1x4x16x132xbf16, #tpu.memory_space<vmem>>, vector<1x1x16x128xbf16>
    %50 = vector.shape_cast %49 : vector<1x1x16x128xbf16> to vector<16x128xbf16>
    %c8 = arith.constant 8 : index
    %c0_60 = arith.constant 0 : index
    %c0_61 = arith.constant 0 : index
    %51 = vector.load %arg2[%c8, %c0_60, %c0_61] : memref<9x32x16xbf16, #tpu.memory_space<vmem>>, vector<1x32x16xbf16>
    %52 = vector.shape_cast %51 : vector<1x32x16xbf16> to vector<32x16xbf16>
    %cst_62 = arith.constant dense<0.000000e+00> : vector<32x128xf32>
    %53 = tpu.matmul %52, %50, %cst_62 {dimension_numbers = #tpu.dot_dimension_numbers<[1], [0], [0], [1], [0, 0, 1, 1], [], []>} : vector<32x16xbf16>, vector<16x128xbf16>, vector<32x128xf32> -> vector<32x128xf32>
    %54 = arith.addf %48, %53 : vector<32x128xf32>
    %c0_63 = arith.constant 0 : index
    %c0_64 = arith.constant 0 : index
    %55 = vector.load %arg3[%c0_63, %c0_64] : memref<32x1xf32, #tpu.memory_space<vmem>>, vector<32x1xf32>
    %56 = vector.broadcast %55 : vector<32x1xf32> to vector<32x128xf32>
    %57 = arith.addf %54, %56 : vector<32x128xf32>
    %cst_65 = arith.constant 0.000000e+00 : f32
    %58 = vector.broadcast %cst_65 : f32 to vector<32x128xf32>
    %59 = arith.maximumf %57, %58 : vector<32x128xf32>
    %60 = arith.truncf %59 : vector<32x128xf32> to vector<32x128xbf16>
    %c0_66 = arith.constant 0 : index
    %c0_67 = arith.constant 0 : index
    %c0_68 = arith.constant 0 : index
    %61 = vector.load %arg4[%c0_66, %c0_67, %c0_68] : memref<1x32x128xbf16, #tpu.memory_space<vmem>>, vector<1x32x128xbf16>
    %62 = vector.shape_cast %61 : vector<1x32x128xbf16> to vector<32x128xbf16>
    %63 = vector.shape_cast %60 : vector<32x128xbf16> to vector<1x32x128xbf16>
    tpu.vector_store %arg4[%c0_66, %c0_67, %c0_68], %63 {strides = array<i32>} : memref<1x32x128xbf16, #tpu.memory_space<vmem>>, vector<1x32x128xbf16>,
    return
  }
  func.func @transform_0(%arg0: i32) -> (i32, i32, i32, i32) {
    %c0_i32 = arith.constant 0 : i32
    %c0_i32_0 = arith.constant 0 : i32
    %c0_i32_1 = arith.constant 0 : i32
    %c0_i32_2 = arith.constant 0 : i32
    return %arg0, %c0_i32, %c0_i32_0, %c0_i32_1 : i32, i32, i32, i32
  }
  func.func @transform_1(%arg0: i32) -> (i32, i32, i32) {
    %c0_i32 = arith.constant 0 : i32
    %c0_i32_0 = arith.constant 0 : i32
    %c0_i32_1 = arith.constant 0 : i32
    %c0_i32_2 = arith.constant 0 : i32
    return %c0_i32, %c0_i32_0, %c0_i32_1 : i32, i32, i32
  }
  func.func @transform_2(%arg0: i32) -> (i32, i32) {
    %c0_i32 = arith.constant 0 : i32
    %c0_i32_0 = arith.constant 0 : i32
    %c0_i32_1 = arith.constant 0 : i32
    return %c0_i32, %c0_i32_0 : i32, i32
  }
  func.func @transform_3(%arg0: i32) -> (i32, i32, i32) {
    %c0_i32 = arith.constant 0 : i32
    %c0_i32_0 = arith.constant 0 : i32
    %c0_i32_1 = arith.constant 0 : i32
    return %arg0, %c0_i32, %c0_i32_0 : i32, i32, i32
  }
}

module attributes {stable_mosaic.version = 11 : i64} {
  func.func @_conv_tap_kernel(%arg0: i32, %arg1: memref<1x4x16x128xbf16, #tpu.memory_space<vmem>>, %arg2: memref<1x32x16xbf16, #tpu.memory_space<vmem>>, %arg3: memref<32x1xf32, #tpu.memory_space<vmem>>, %arg4: memref<1x32x128xbf16, #tpu.memory_space<vmem>>) attributes {dimension_semantics = [#tpu.dimension_semantics<parallel>], iteration_bounds = array<i64: 2>, scalar_prefetch = 0 : i64, scratch_operands = 0 : i64, tpu.core_type = #tpu.core_type<tc>, window_params = [{transform_indices = @transform_0, window_bounds = array<i64: 1, 4, 16, 128>}, {pipeline_mode = #tpu.pipeline_mode<synchronous>, transform_indices = @transform_1, window_bounds = array<i64: 1, 32, 16>}, {pipeline_mode = #tpu.pipeline_mode<synchronous>, transform_indices = @transform_2, window_bounds = array<i64: 32, 1>}, {transform_indices = @transform_3, window_bounds = array<i64: 1, 32, 128>}]} {
    %cst = arith.constant 0.000000e+00 : f32
    %0 = vector.broadcast %cst : f32 to vector<32x128xf32>
    %c0 = arith.constant 0 : index
    %c0_0 = arith.constant 0 : index
    %c0_1 = arith.constant 0 : index
    %c0_2 = arith.constant 0 : index
    %1 = vector.load %arg1[%c0, %c0_0, %c0_1, %c0_2] : memref<1x4x16x128xbf16, #tpu.memory_space<vmem>>, vector<1x1x16x128xbf16>
    %2 = vector.shape_cast %1 : vector<1x1x16x128xbf16> to vector<16x128xbf16>
    %c0_3 = arith.constant 0 : index
    %c0_4 = arith.constant 0 : index
    %c0_5 = arith.constant 0 : index
    %3 = vector.load %arg2[%c0_3, %c0_4, %c0_5] : memref<1x32x16xbf16, #tpu.memory_space<vmem>>, vector<1x32x16xbf16>
    %4 = vector.shape_cast %3 : vector<1x32x16xbf16> to vector<32x16xbf16>
    %cst_6 = arith.constant dense<0.000000e+00> : vector<32x128xf32>
    %5 = tpu.matmul %4, %2, %cst_6 {dimension_numbers = #tpu.dot_dimension_numbers<[1], [0], [0], [1], [0, 0, 1, 1], [], []>} : vector<32x16xbf16>, vector<16x128xbf16>, vector<32x128xf32> -> vector<32x128xf32>
    %6 = arith.addf %0, %5 : vector<32x128xf32>
    %c0_7 = arith.constant 0 : index
    %c0_8 = arith.constant 0 : index
    %7 = vector.load %arg3[%c0_7, %c0_8] : memref<32x1xf32, #tpu.memory_space<vmem>>, vector<32x1xf32>
    %8 = vector.broadcast %7 : vector<32x1xf32> to vector<32x128xf32>
    %9 = arith.addf %6, %8 : vector<32x128xf32>
    %10 = arith.truncf %9 : vector<32x128xf32> to vector<32x128xbf16>
    %c0_9 = arith.constant 0 : index
    %c0_10 = arith.constant 0 : index
    %c0_11 = arith.constant 0 : index
    %11 = vector.load %arg4[%c0_9, %c0_10, %c0_11] : memref<1x32x128xbf16, #tpu.memory_space<vmem>>, vector<1x32x128xbf16>
    %12 = vector.shape_cast %11 : vector<1x32x128xbf16> to vector<32x128xbf16>
    %13 = vector.shape_cast %10 : vector<32x128xbf16> to vector<1x32x128xbf16>
    tpu.vector_store %arg4[%c0_9, %c0_10, %c0_11], %13 {strides = array<i32>} : memref<1x32x128xbf16, #tpu.memory_space<vmem>>, vector<1x32x128xbf16>,
    return
  }
  func.func @transform_0(%arg0: i32) -> (i32, i32, i32, i32) {
    %c0_i32 = arith.constant 0 : i32
    %c0_i32_0 = arith.constant 0 : i32
    %c0_i32_1 = arith.constant 0 : i32
    %c0_i32_2 = arith.constant 0 : i32
    return %arg0, %c0_i32, %c0_i32_0, %c0_i32_1 : i32, i32, i32, i32
  }
  func.func @transform_1(%arg0: i32) -> (i32, i32, i32) {
    %c0_i32 = arith.constant 0 : i32
    %c0_i32_0 = arith.constant 0 : i32
    %c0_i32_1 = arith.constant 0 : i32
    %c0_i32_2 = arith.constant 0 : i32
    return %c0_i32, %c0_i32_0, %c0_i32_1 : i32, i32, i32
  }
  func.func @transform_2(%arg0: i32) -> (i32, i32) {
    %c0_i32 = arith.constant 0 : i32
    %c0_i32_0 = arith.constant 0 : i32
    %c0_i32_1 = arith.constant 0 : i32
    return %c0_i32, %c0_i32_0 : i32, i32
  }
  func.func @transform_3(%arg0: i32) -> (i32, i32, i32) {
    %c0_i32 = arith.constant 0 : i32
    %c0_i32_0 = arith.constant 0 : i32
    %c0_i32_1 = arith.constant 0 : i32
    return %arg0, %c0_i32, %c0_i32_0 : i32, i32, i32
  }
}

module attributes {stable_mosaic.version = 11 : i64} {
  func.func @_conv_tap_kernel_res(%arg0: i32, %arg1: memref<1x1x32x138xbf16, #tpu.memory_space<vmem>>, %arg2: memref<9x32x32xbf16, #tpu.memory_space<vmem>>, %arg3: memref<32x1xf32, #tpu.memory_space<vmem>>, %arg4: memref<1x32x128xbf16, #tpu.memory_space<vmem>>, %arg5: memref<1x32x128xbf16, #tpu.memory_space<vmem>>) attributes {dimension_semantics = [#tpu.dimension_semantics<parallel>], iteration_bounds = array<i64: 2>, scalar_prefetch = 0 : i64, scratch_operands = 0 : i64, tpu.core_type = #tpu.core_type<tc>, window_params = [{transform_indices = @transform_0, window_bounds = array<i64: 1, 1, 32, 138>}, {pipeline_mode = #tpu.pipeline_mode<synchronous>, transform_indices = @transform_1, window_bounds = array<i64: 9, 32, 32>}, {pipeline_mode = #tpu.pipeline_mode<synchronous>, transform_indices = @transform_2, window_bounds = array<i64: 32, 1>}, {transform_indices = @transform_3, window_bounds = array<i64: 1, 32, 128>}, {transform_indices = @transform_4, window_bounds = array<i64: 1, 32, 128>}]} {
    %cst = arith.constant 0.000000e+00 : f32
    %0 = vector.broadcast %cst : f32 to vector<32x128xf32>
    %c0 = arith.constant 0 : index
    %c0_0 = arith.constant 0 : index
    %c0_1 = arith.constant 0 : index
    %c0_2 = arith.constant 0 : index
    %1 = vector.load %arg1[%c0, %c0_0, %c0_1, %c0_2] : memref<1x1x32x138xbf16, #tpu.memory_space<vmem>>, vector<1x1x32x128xbf16>
    %2 = vector.shape_cast %1 : vector<1x1x32x128xbf16> to vector<32x128xbf16>
    %c0_3 = arith.constant 0 : index
    %c0_4 = arith.constant 0 : index
    %c0_5 = arith.constant 0 : index
    %3 = vector.load %arg2[%c0_3, %c0_4, %c0_5] : memref<9x32x32xbf16, #tpu.memory_space<vmem>>, vector<1x32x32xbf16>
    %4 = vector.shape_cast %3 : vector<1x32x32xbf16> to vector<32x32xbf16>
    %cst_6 = arith.constant dense<0.000000e+00> : vector<32x128xf32>
    %5 = tpu.matmul %4, %2, %cst_6 {dimension_numbers = #tpu.dot_dimension_numbers<[1], [0], [0], [1], [0, 0, 1, 1], [], []>} : vector<32x32xbf16>, vector<32x128xbf16>, vector<32x128xf32> -> vector<32x128xf32>
    %6 = arith.addf %0, %5 : vector<32x128xf32>
    %c0_7 = arith.constant 0 : index
    %c0_8 = arith.constant 0 : index
    %c0_9 = arith.constant 0 : index
    %c1 = arith.constant 1 : index
    %7 = vector.load %arg1[%c0_7, %c0_8, %c0_9, %c1] : memref<1x1x32x138xbf16, #tpu.memory_space<vmem>>, vector<1x1x32x128xbf16>
    %8 = vector.shape_cast %7 : vector<1x1x32x128xbf16> to vector<32x128xbf16>
    %c1_10 = arith.constant 1 : index
    %c0_11 = arith.constant 0 : index
    %c0_12 = arith.constant 0 : index
    %9 = vector.load %arg2[%c1_10, %c0_11, %c0_12] : memref<9x32x32xbf16, #tpu.memory_space<vmem>>, vector<1x32x32xbf16>
    %10 = vector.shape_cast %9 : vector<1x32x32xbf16> to vector<32x32xbf16>
    %cst_13 = arith.constant dense<0.000000e+00> : vector<32x128xf32>
    %11 = tpu.matmul %10, %8, %cst_13 {dimension_numbers = #tpu.dot_dimension_numbers<[1], [0], [0], [1], [0, 0, 1, 1], [], []>} : vector<32x32xbf16>, vector<32x128xbf16>, vector<32x128xf32> -> vector<32x128xf32>
    %12 = arith.addf %6, %11 : vector<32x128xf32>
    %c0_14 = arith.constant 0 : index
    %c0_15 = arith.constant 0 : index
    %c0_16 = arith.constant 0 : index
    %c2 = arith.constant 2 : index
    %13 = vector.load %arg1[%c0_14, %c0_15, %c0_16, %c2] : memref<1x1x32x138xbf16, #tpu.memory_space<vmem>>, vector<1x1x32x128xbf16>
    %14 = vector.shape_cast %13 : vector<1x1x32x128xbf16> to vector<32x128xbf16>
    %c2_17 = arith.constant 2 : index
    %c0_18 = arith.constant 0 : index
    %c0_19 = arith.constant 0 : index
    %15 = vector.load %arg2[%c2_17, %c0_18, %c0_19] : memref<9x32x32xbf16, #tpu.memory_space<vmem>>, vector<1x32x32xbf16>
    %16 = vector.shape_cast %15 : vector<1x32x32xbf16> to vector<32x32xbf16>
    %cst_20 = arith.constant dense<0.000000e+00> : vector<32x128xf32>
    %17 = tpu.matmul %16, %14, %cst_20 {dimension_numbers = #tpu.dot_dimension_numbers<[1], [0], [0], [1], [0, 0, 1, 1], [], []>} : vector<32x32xbf16>, vector<32x128xbf16>, vector<32x128xf32> -> vector<32x128xf32>
    %18 = arith.addf %12, %17 : vector<32x128xf32>
    %c0_21 = arith.constant 0 : index
    %c0_22 = arith.constant 0 : index
    %c0_23 = arith.constant 0 : index
    %c4 = arith.constant 4 : index
    %19 = vector.load %arg1[%c0_21, %c0_22, %c0_23, %c4] : memref<1x1x32x138xbf16, #tpu.memory_space<vmem>>, vector<1x1x32x128xbf16>
    %20 = vector.shape_cast %19 : vector<1x1x32x128xbf16> to vector<32x128xbf16>
    %c3 = arith.constant 3 : index
    %c0_24 = arith.constant 0 : index
    %c0_25 = arith.constant 0 : index
    %21 = vector.load %arg2[%c3, %c0_24, %c0_25] : memref<9x32x32xbf16, #tpu.memory_space<vmem>>, vector<1x32x32xbf16>
    %22 = vector.shape_cast %21 : vector<1x32x32xbf16> to vector<32x32xbf16>
    %cst_26 = arith.constant dense<0.000000e+00> : vector<32x128xf32>
    %23 = tpu.matmul %22, %20, %cst_26 {dimension_numbers = #tpu.dot_dimension_numbers<[1], [0], [0], [1], [0, 0, 1, 1], [], []>} : vector<32x32xbf16>, vector<32x128xbf16>, vector<32x128xf32> -> vector<32x128xf32>
    %24 = arith.addf %18, %23 : vector<32x128xf32>
    %c0_27 = arith.constant 0 : index
    %c0_28 = arith.constant 0 : index
    %c0_29 = arith.constant 0 : index
    %c5 = arith.constant 5 : index
    %25 = vector.load %arg1[%c0_27, %c0_28, %c0_29, %c5] : memref<1x1x32x138xbf16, #tpu.memory_space<vmem>>, vector<1x1x32x128xbf16>
    %26 = vector.shape_cast %25 : vector<1x1x32x128xbf16> to vector<32x128xbf16>
    %c4_30 = arith.constant 4 : index
    %c0_31 = arith.constant 0 : index
    %c0_32 = arith.constant 0 : index
    %27 = vector.load %arg2[%c4_30, %c0_31, %c0_32] : memref<9x32x32xbf16, #tpu.memory_space<vmem>>, vector<1x32x32xbf16>
    %28 = vector.shape_cast %27 : vector<1x32x32xbf16> to vector<32x32xbf16>
    %cst_33 = arith.constant dense<0.000000e+00> : vector<32x128xf32>
    %29 = tpu.matmul %28, %26, %cst_33 {dimension_numbers = #tpu.dot_dimension_numbers<[1], [0], [0], [1], [0, 0, 1, 1], [], []>} : vector<32x32xbf16>, vector<32x128xbf16>, vector<32x128xf32> -> vector<32x128xf32>
    %30 = arith.addf %24, %29 : vector<32x128xf32>
    %c0_34 = arith.constant 0 : index
    %c0_35 = arith.constant 0 : index
    %c0_36 = arith.constant 0 : index
    %c6 = arith.constant 6 : index
    %31 = vector.load %arg1[%c0_34, %c0_35, %c0_36, %c6] : memref<1x1x32x138xbf16, #tpu.memory_space<vmem>>, vector<1x1x32x128xbf16>
    %32 = vector.shape_cast %31 : vector<1x1x32x128xbf16> to vector<32x128xbf16>
    %c5_37 = arith.constant 5 : index
    %c0_38 = arith.constant 0 : index
    %c0_39 = arith.constant 0 : index
    %33 = vector.load %arg2[%c5_37, %c0_38, %c0_39] : memref<9x32x32xbf16, #tpu.memory_space<vmem>>, vector<1x32x32xbf16>
    %34 = vector.shape_cast %33 : vector<1x32x32xbf16> to vector<32x32xbf16>
    %cst_40 = arith.constant dense<0.000000e+00> : vector<32x128xf32>
    %35 = tpu.matmul %34, %32, %cst_40 {dimension_numbers = #tpu.dot_dimension_numbers<[1], [0], [0], [1], [0, 0, 1, 1], [], []>} : vector<32x32xbf16>, vector<32x128xbf16>, vector<32x128xf32> -> vector<32x128xf32>
    %36 = arith.addf %30, %35 : vector<32x128xf32>
    %c0_41 = arith.constant 0 : index
    %c0_42 = arith.constant 0 : index
    %c0_43 = arith.constant 0 : index
    %c8 = arith.constant 8 : index
    %37 = vector.load %arg1[%c0_41, %c0_42, %c0_43, %c8] : memref<1x1x32x138xbf16, #tpu.memory_space<vmem>>, vector<1x1x32x128xbf16>
    %38 = vector.shape_cast %37 : vector<1x1x32x128xbf16> to vector<32x128xbf16>
    %c6_44 = arith.constant 6 : index
    %c0_45 = arith.constant 0 : index
    %c0_46 = arith.constant 0 : index
    %39 = vector.load %arg2[%c6_44, %c0_45, %c0_46] : memref<9x32x32xbf16, #tpu.memory_space<vmem>>, vector<1x32x32xbf16>
    %40 = vector.shape_cast %39 : vector<1x32x32xbf16> to vector<32x32xbf16>
    %cst_47 = arith.constant dense<0.000000e+00> : vector<32x128xf32>
    %41 = tpu.matmul %40, %38, %cst_47 {dimension_numbers = #tpu.dot_dimension_numbers<[1], [0], [0], [1], [0, 0, 1, 1], [], []>} : vector<32x32xbf16>, vector<32x128xbf16>, vector<32x128xf32> -> vector<32x128xf32>
    %42 = arith.addf %36, %41 : vector<32x128xf32>
    %c0_48 = arith.constant 0 : index
    %c0_49 = arith.constant 0 : index
    %c0_50 = arith.constant 0 : index
    %c9 = arith.constant 9 : index
    %43 = vector.load %arg1[%c0_48, %c0_49, %c0_50, %c9] : memref<1x1x32x138xbf16, #tpu.memory_space<vmem>>, vector<1x1x32x128xbf16>
    %44 = vector.shape_cast %43 : vector<1x1x32x128xbf16> to vector<32x128xbf16>
    %c7 = arith.constant 7 : index
    %c0_51 = arith.constant 0 : index
    %c0_52 = arith.constant 0 : index
    %45 = vector.load %arg2[%c7, %c0_51, %c0_52] : memref<9x32x32xbf16, #tpu.memory_space<vmem>>, vector<1x32x32xbf16>
    %46 = vector.shape_cast %45 : vector<1x32x32xbf16> to vector<32x32xbf16>
    %cst_53 = arith.constant dense<0.000000e+00> : vector<32x128xf32>
    %47 = tpu.matmul %46, %44, %cst_53 {dimension_numbers = #tpu.dot_dimension_numbers<[1], [0], [0], [1], [0, 0, 1, 1], [], []>} : vector<32x32xbf16>, vector<32x128xbf16>, vector<32x128xf32> -> vector<32x128xf32>
    %48 = arith.addf %42, %47 : vector<32x128xf32>
    %c0_54 = arith.constant 0 : index
    %c0_55 = arith.constant 0 : index
    %c0_56 = arith.constant 0 : index
    %c10 = arith.constant 10 : index
    %49 = vector.load %arg1[%c0_54, %c0_55, %c0_56, %c10] : memref<1x1x32x138xbf16, #tpu.memory_space<vmem>>, vector<1x1x32x128xbf16>
    %50 = vector.shape_cast %49 : vector<1x1x32x128xbf16> to vector<32x128xbf16>
    %c8_57 = arith.constant 8 : index
    %c0_58 = arith.constant 0 : index
    %c0_59 = arith.constant 0 : index
    %51 = vector.load %arg2[%c8_57, %c0_58, %c0_59] : memref<9x32x32xbf16, #tpu.memory_space<vmem>>, vector<1x32x32xbf16>
    %52 = vector.shape_cast %51 : vector<1x32x32xbf16> to vector<32x32xbf16>
    %cst_60 = arith.constant dense<0.000000e+00> : vector<32x128xf32>
    %53 = tpu.matmul %52, %50, %cst_60 {dimension_numbers = #tpu.dot_dimension_numbers<[1], [0], [0], [1], [0, 0, 1, 1], [], []>} : vector<32x32xbf16>, vector<32x128xbf16>, vector<32x128xf32> -> vector<32x128xf32>
    %54 = arith.addf %48, %53 : vector<32x128xf32>
    %c0_61 = arith.constant 0 : index
    %c0_62 = arith.constant 0 : index
    %55 = vector.load %arg3[%c0_61, %c0_62] : memref<32x1xf32, #tpu.memory_space<vmem>>, vector<32x1xf32>
    %56 = vector.broadcast %55 : vector<32x1xf32> to vector<32x128xf32>
    %57 = arith.addf %54, %56 : vector<32x128xf32>
    %c0_63 = arith.constant 0 : index
    %c0_64 = arith.constant 0 : index
    %c0_65 = arith.constant 0 : index
    %58 = vector.load %arg4[%c0_63, %c0_64, %c0_65] : memref<1x32x128xbf16, #tpu.memory_space<vmem>>, vector<1x32x128xbf16>
    %59 = vector.shape_cast %58 : vector<1x32x128xbf16> to vector<32x128xbf16>
    %60 = arith.extf %59 : vector<32x128xbf16> to vector<32x128xf32>
    %61 = arith.addf %57, %60 : vector<32x128xf32>
    %62 = arith.truncf %61 : vector<32x128xf32> to vector<32x128xbf16>
    %c0_66 = arith.constant 0 : index
    %c0_67 = arith.constant 0 : index
    %c0_68 = arith.constant 0 : index
    %63 = vector.load %arg5[%c0_66, %c0_67, %c0_68] : memref<1x32x128xbf16, #tpu.memory_space<vmem>>, vector<1x32x128xbf16>
    %64 = vector.shape_cast %63 : vector<1x32x128xbf16> to vector<32x128xbf16>
    %65 = vector.shape_cast %62 : vector<32x128xbf16> to vector<1x32x128xbf16>
    tpu.vector_store %arg5[%c0_66, %c0_67, %c0_68], %65 {strides = array<i32>} : memref<1x32x128xbf16, #tpu.memory_space<vmem>>, vector<1x32x128xbf16>,
    return
  }
  func.func @transform_0(%arg0: i32) -> (i32, i32, i32, i32) {
    %c0_i32 = arith.constant 0 : i32
    %c0_i32_0 = arith.constant 0 : i32
    %c0_i32_1 = arith.constant 0 : i32
    %c0_i32_2 = arith.constant 0 : i32
    return %arg0, %c0_i32, %c0_i32_0, %c0_i32_1 : i32, i32, i32, i32
  }
  func.func @transform_1(%arg0: i32) -> (i32, i32, i32) {
    %c0_i32 = arith.constant 0 : i32
    %c0_i32_0 = arith.constant 0 : i32
    %c0_i32_1 = arith.constant 0 : i32
    %c0_i32_2 = arith.constant 0 : i32
    return %c0_i32, %c0_i32_0, %c0_i32_1 : i32, i32, i32
  }
  func.func @transform_2(%arg0: i32) -> (i32, i32) {
    %c0_i32 = arith.constant 0 : i32
    %c0_i32_0 = arith.constant 0 : i32
    %c0_i32_1 = arith.constant 0 : i32
    return %c0_i32, %c0_i32_0 : i32, i32
  }
  func.func @transform_3(%arg0: i32) -> (i32, i32, i32) {
    %c0_i32 = arith.constant 0 : i32
    %c0_i32_0 = arith.constant 0 : i32
    %c0_i32_1 = arith.constant 0 : i32
    return %arg0, %c0_i32, %c0_i32_0 : i32, i32, i32
  }
  func.func @transform_4(%arg0: i32) -> (i32, i32, i32) {
    %c0_i32 = arith.constant 0 : i32
    %c0_i32_0 = arith.constant 0 : i32
    %c0_i32_1 = arith.constant 0 : i32
    return %arg0, %c0_i32, %c0_i32_0 : i32, i32, i32
  }
}

module attributes {stable_mosaic.version = 11 : i64} {
  func.func @_conv_tap_kernel(%arg0: i32, %arg1: memref<1x1x32x138xbf16, #tpu.memory_space<vmem>>, %arg2: memref<9x32x32xbf16, #tpu.memory_space<vmem>>, %arg3: memref<32x1xf32, #tpu.memory_space<vmem>>, %arg4: memref<1x32x128xbf16, #tpu.memory_space<vmem>>) attributes {dimension_semantics = [#tpu.dimension_semantics<parallel>], iteration_bounds = array<i64: 2>, scalar_prefetch = 0 : i64, scratch_operands = 0 : i64, tpu.core_type = #tpu.core_type<tc>, window_params = [{transform_indices = @transform_0, window_bounds = array<i64: 1, 1, 32, 138>}, {pipeline_mode = #tpu.pipeline_mode<synchronous>, transform_indices = @transform_1, window_bounds = array<i64: 9, 32, 32>}, {pipeline_mode = #tpu.pipeline_mode<synchronous>, transform_indices = @transform_2, window_bounds = array<i64: 32, 1>}, {transform_indices = @transform_3, window_bounds = array<i64: 1, 32, 128>}]} {
    %cst = arith.constant 0.000000e+00 : f32
    %0 = vector.broadcast %cst : f32 to vector<32x128xf32>
    %c0 = arith.constant 0 : index
    %c0_0 = arith.constant 0 : index
    %c0_1 = arith.constant 0 : index
    %c0_2 = arith.constant 0 : index
    %1 = vector.load %arg1[%c0, %c0_0, %c0_1, %c0_2] : memref<1x1x32x138xbf16, #tpu.memory_space<vmem>>, vector<1x1x32x128xbf16>
    %2 = vector.shape_cast %1 : vector<1x1x32x128xbf16> to vector<32x128xbf16>
    %c0_3 = arith.constant 0 : index
    %c0_4 = arith.constant 0 : index
    %c0_5 = arith.constant 0 : index
    %3 = vector.load %arg2[%c0_3, %c0_4, %c0_5] : memref<9x32x32xbf16, #tpu.memory_space<vmem>>, vector<1x32x32xbf16>
    %4 = vector.shape_cast %3 : vector<1x32x32xbf16> to vector<32x32xbf16>
    %cst_6 = arith.constant dense<0.000000e+00> : vector<32x128xf32>
    %5 = tpu.matmul %4, %2, %cst_6 {dimension_numbers = #tpu.dot_dimension_numbers<[1], [0], [0], [1], [0, 0, 1, 1], [], []>} : vector<32x32xbf16>, vector<32x128xbf16>, vector<32x128xf32> -> vector<32x128xf32>
    %6 = arith.addf %0, %5 : vector<32x128xf32>
    %c0_7 = arith.constant 0 : index
    %c0_8 = arith.constant 0 : index
    %c0_9 = arith.constant 0 : index
    %c1 = arith.constant 1 : index
    %7 = vector.load %arg1[%c0_7, %c0_8, %c0_9, %c1] : memref<1x1x32x138xbf16, #tpu.memory_space<vmem>>, vector<1x1x32x128xbf16>
    %8 = vector.shape_cast %7 : vector<1x1x32x128xbf16> to vector<32x128xbf16>
    %c1_10 = arith.constant 1 : index
    %c0_11 = arith.constant 0 : index
    %c0_12 = arith.constant 0 : index
    %9 = vector.load %arg2[%c1_10, %c0_11, %c0_12] : memref<9x32x32xbf16, #tpu.memory_space<vmem>>, vector<1x32x32xbf16>
    %10 = vector.shape_cast %9 : vector<1x32x32xbf16> to vector<32x32xbf16>
    %cst_13 = arith.constant dense<0.000000e+00> : vector<32x128xf32>
    %11 = tpu.matmul %10, %8, %cst_13 {dimension_numbers = #tpu.dot_dimension_numbers<[1], [0], [0], [1], [0, 0, 1, 1], [], []>} : vector<32x32xbf16>, vector<32x128xbf16>, vector<32x128xf32> -> vector<32x128xf32>
    %12 = arith.addf %6, %11 : vector<32x128xf32>
    %c0_14 = arith.constant 0 : index
    %c0_15 = arith.constant 0 : index
    %c0_16 = arith.constant 0 : index
    %c2 = arith.constant 2 : index
    %13 = vector.load %arg1[%c0_14, %c0_15, %c0_16, %c2] : memref<1x1x32x138xbf16, #tpu.memory_space<vmem>>, vector<1x1x32x128xbf16>
    %14 = vector.shape_cast %13 : vector<1x1x32x128xbf16> to vector<32x128xbf16>
    %c2_17 = arith.constant 2 : index
    %c0_18 = arith.constant 0 : index
    %c0_19 = arith.constant 0 : index
    %15 = vector.load %arg2[%c2_17, %c0_18, %c0_19] : memref<9x32x32xbf16, #tpu.memory_space<vmem>>, vector<1x32x32xbf16>
    %16 = vector.shape_cast %15 : vector<1x32x32xbf16> to vector<32x32xbf16>
    %cst_20 = arith.constant dense<0.000000e+00> : vector<32x128xf32>
    %17 = tpu.matmul %16, %14, %cst_20 {dimension_numbers = #tpu.dot_dimension_numbers<[1], [0], [0], [1], [0, 0, 1, 1], [], []>} : vector<32x32xbf16>, vector<32x128xbf16>, vector<32x128xf32> -> vector<32x128xf32>
    %18 = arith.addf %12, %17 : vector<32x128xf32>
    %c0_21 = arith.constant 0 : index
    %c0_22 = arith.constant 0 : index
    %c0_23 = arith.constant 0 : index
    %c4 = arith.constant 4 : index
    %19 = vector.load %arg1[%c0_21, %c0_22, %c0_23, %c4] : memref<1x1x32x138xbf16, #tpu.memory_space<vmem>>, vector<1x1x32x128xbf16>
    %20 = vector.shape_cast %19 : vector<1x1x32x128xbf16> to vector<32x128xbf16>
    %c3 = arith.constant 3 : index
    %c0_24 = arith.constant 0 : index
    %c0_25 = arith.constant 0 : index
    %21 = vector.load %arg2[%c3, %c0_24, %c0_25] : memref<9x32x32xbf16, #tpu.memory_space<vmem>>, vector<1x32x32xbf16>
    %22 = vector.shape_cast %21 : vector<1x32x32xbf16> to vector<32x32xbf16>
    %cst_26 = arith.constant dense<0.000000e+00> : vector<32x128xf32>
    %23 = tpu.matmul %22, %20, %cst_26 {dimension_numbers = #tpu.dot_dimension_numbers<[1], [0], [0], [1], [0, 0, 1, 1], [], []>} : vector<32x32xbf16>, vector<32x128xbf16>, vector<32x128xf32> -> vector<32x128xf32>
    %24 = arith.addf %18, %23 : vector<32x128xf32>
    %c0_27 = arith.constant 0 : index
    %c0_28 = arith.constant 0 : index
    %c0_29 = arith.constant 0 : index
    %c5 = arith.constant 5 : index
    %25 = vector.load %arg1[%c0_27, %c0_28, %c0_29, %c5] : memref<1x1x32x138xbf16, #tpu.memory_space<vmem>>, vector<1x1x32x128xbf16>
    %26 = vector.shape_cast %25 : vector<1x1x32x128xbf16> to vector<32x128xbf16>
    %c4_30 = arith.constant 4 : index
    %c0_31 = arith.constant 0 : index
    %c0_32 = arith.constant 0 : index
    %27 = vector.load %arg2[%c4_30, %c0_31, %c0_32] : memref<9x32x32xbf16, #tpu.memory_space<vmem>>, vector<1x32x32xbf16>
    %28 = vector.shape_cast %27 : vector<1x32x32xbf16> to vector<32x32xbf16>
    %cst_33 = arith.constant dense<0.000000e+00> : vector<32x128xf32>
    %29 = tpu.matmul %28, %26, %cst_33 {dimension_numbers = #tpu.dot_dimension_numbers<[1], [0], [0], [1], [0, 0, 1, 1], [], []>} : vector<32x32xbf16>, vector<32x128xbf16>, vector<32x128xf32> -> vector<32x128xf32>
    %30 = arith.addf %24, %29 : vector<32x128xf32>
    %c0_34 = arith.constant 0 : index
    %c0_35 = arith.constant 0 : index
    %c0_36 = arith.constant 0 : index
    %c6 = arith.constant 6 : index
    %31 = vector.load %arg1[%c0_34, %c0_35, %c0_36, %c6] : memref<1x1x32x138xbf16, #tpu.memory_space<vmem>>, vector<1x1x32x128xbf16>
    %32 = vector.shape_cast %31 : vector<1x1x32x128xbf16> to vector<32x128xbf16>
    %c5_37 = arith.constant 5 : index
    %c0_38 = arith.constant 0 : index
    %c0_39 = arith.constant 0 : index
    %33 = vector.load %arg2[%c5_37, %c0_38, %c0_39] : memref<9x32x32xbf16, #tpu.memory_space<vmem>>, vector<1x32x32xbf16>
    %34 = vector.shape_cast %33 : vector<1x32x32xbf16> to vector<32x32xbf16>
    %cst_40 = arith.constant dense<0.000000e+00> : vector<32x128xf32>
    %35 = tpu.matmul %34, %32, %cst_40 {dimension_numbers = #tpu.dot_dimension_numbers<[1], [0], [0], [1], [0, 0, 1, 1], [], []>} : vector<32x32xbf16>, vector<32x128xbf16>, vector<32x128xf32> -> vector<32x128xf32>
    %36 = arith.addf %30, %35 : vector<32x128xf32>
    %c0_41 = arith.constant 0 : index
    %c0_42 = arith.constant 0 : index
    %c0_43 = arith.constant 0 : index
    %c8 = arith.constant 8 : index
    %37 = vector.load %arg1[%c0_41, %c0_42, %c0_43, %c8] : memref<1x1x32x138xbf16, #tpu.memory_space<vmem>>, vector<1x1x32x128xbf16>
    %38 = vector.shape_cast %37 : vector<1x1x32x128xbf16> to vector<32x128xbf16>
    %c6_44 = arith.constant 6 : index
    %c0_45 = arith.constant 0 : index
    %c0_46 = arith.constant 0 : index
    %39 = vector.load %arg2[%c6_44, %c0_45, %c0_46] : memref<9x32x32xbf16, #tpu.memory_space<vmem>>, vector<1x32x32xbf16>
    %40 = vector.shape_cast %39 : vector<1x32x32xbf16> to vector<32x32xbf16>
    %cst_47 = arith.constant dense<0.000000e+00> : vector<32x128xf32>
    %41 = tpu.matmul %40, %38, %cst_47 {dimension_numbers = #tpu.dot_dimension_numbers<[1], [0], [0], [1], [0, 0, 1, 1], [], []>} : vector<32x32xbf16>, vector<32x128xbf16>, vector<32x128xf32> -> vector<32x128xf32>
    %42 = arith.addf %36, %41 : vector<32x128xf32>
    %c0_48 = arith.constant 0 : index
    %c0_49 = arith.constant 0 : index
    %c0_50 = arith.constant 0 : index
    %c9 = arith.constant 9 : index
    %43 = vector.load %arg1[%c0_48, %c0_49, %c0_50, %c9] : memref<1x1x32x138xbf16, #tpu.memory_space<vmem>>, vector<1x1x32x128xbf16>
    %44 = vector.shape_cast %43 : vector<1x1x32x128xbf16> to vector<32x128xbf16>
    %c7 = arith.constant 7 : index
    %c0_51 = arith.constant 0 : index
    %c0_52 = arith.constant 0 : index
    %45 = vector.load %arg2[%c7, %c0_51, %c0_52] : memref<9x32x32xbf16, #tpu.memory_space<vmem>>, vector<1x32x32xbf16>
    %46 = vector.shape_cast %45 : vector<1x32x32xbf16> to vector<32x32xbf16>
    %cst_53 = arith.constant dense<0.000000e+00> : vector<32x128xf32>
    %47 = tpu.matmul %46, %44, %cst_53 {dimension_numbers = #tpu.dot_dimension_numbers<[1], [0], [0], [1], [0, 0, 1, 1], [], []>} : vector<32x32xbf16>, vector<32x128xbf16>, vector<32x128xf32> -> vector<32x128xf32>
    %48 = arith.addf %42, %47 : vector<32x128xf32>
    %c0_54 = arith.constant 0 : index
    %c0_55 = arith.constant 0 : index
    %c0_56 = arith.constant 0 : index
    %c10 = arith.constant 10 : index
    %49 = vector.load %arg1[%c0_54, %c0_55, %c0_56, %c10] : memref<1x1x32x138xbf16, #tpu.memory_space<vmem>>, vector<1x1x32x128xbf16>
    %50 = vector.shape_cast %49 : vector<1x1x32x128xbf16> to vector<32x128xbf16>
    %c8_57 = arith.constant 8 : index
    %c0_58 = arith.constant 0 : index
    %c0_59 = arith.constant 0 : index
    %51 = vector.load %arg2[%c8_57, %c0_58, %c0_59] : memref<9x32x32xbf16, #tpu.memory_space<vmem>>, vector<1x32x32xbf16>
    %52 = vector.shape_cast %51 : vector<1x32x32xbf16> to vector<32x32xbf16>
    %cst_60 = arith.constant dense<0.000000e+00> : vector<32x128xf32>
    %53 = tpu.matmul %52, %50, %cst_60 {dimension_numbers = #tpu.dot_dimension_numbers<[1], [0], [0], [1], [0, 0, 1, 1], [], []>} : vector<32x32xbf16>, vector<32x128xbf16>, vector<32x128xf32> -> vector<32x128xf32>
    %54 = arith.addf %48, %53 : vector<32x128xf32>
    %c0_61 = arith.constant 0 : index
    %c0_62 = arith.constant 0 : index
    %55 = vector.load %arg3[%c0_61, %c0_62] : memref<32x1xf32, #tpu.memory_space<vmem>>, vector<32x1xf32>
    %56 = vector.broadcast %55 : vector<32x1xf32> to vector<32x128xf32>
    %57 = arith.addf %54, %56 : vector<32x128xf32>
    %cst_63 = arith.constant 0.000000e+00 : f32
    %58 = vector.broadcast %cst_63 : f32 to vector<32x128xf32>
    %59 = arith.maximumf %57, %58 : vector<32x128xf32>
    %60 = arith.truncf %59 : vector<32x128xf32> to vector<32x128xbf16>
    %c0_64 = arith.constant 0 : index
    %c0_65 = arith.constant 0 : index
    %c0_66 = arith.constant 0 : index
    %61 = vector.load %arg4[%c0_64, %c0_65, %c0_66] : memref<1x32x128xbf16, #tpu.memory_space<vmem>>, vector<1x32x128xbf16>
    %62 = vector.shape_cast %61 : vector<1x32x128xbf16> to vector<32x128xbf16>
    %63 = vector.shape_cast %60 : vector<32x128xbf16> to vector<1x32x128xbf16>
    tpu.vector_store %arg4[%c0_64, %c0_65, %c0_66], %63 {strides = array<i32>} : memref<1x32x128xbf16, #tpu.memory_space<vmem>>, vector<1x32x128xbf16>,
    return
  }
  func.func @transform_0(%arg0: i32) -> (i32, i32, i32, i32) {
    %c0_i32 = arith.constant 0 : i32
    %c0_i32_0 = arith.constant 0 : i32
    %c0_i32_1 = arith.constant 0 : i32
    %c0_i32_2 = arith.constant 0 : i32
    return %arg0, %c0_i32, %c0_i32_0, %c0_i32_1 : i32, i32, i32, i32
  }
  func.func @transform_1(%arg0: i32) -> (i32, i32, i32) {
    %c0_i32 = arith.constant 0 : i32
    %c0_i32_0 = arith.constant 0 : i32
    %c0_i32_1 = arith.constant 0 : i32
    %c0_i32_2 = arith.constant 0 : i32
    return %c0_i32, %c0_i32_0, %c0_i32_1 : i32, i32, i32
  }
  func.func @transform_2(%arg0: i32) -> (i32, i32) {
    %c0_i32 = arith.constant 0 : i32
    %c0_i32_0 = arith.constant 0 : i32
    %c0_i32_1 = arith.constant 0 : i32
    return %c0_i32, %c0_i32_0 : i32, i32
  }
  func.func @transform_3(%arg0: i32) -> (i32, i32, i32) {
    %c0_i32 = arith.constant 0 : i32
    %c0_i32_0 = arith.constant 0 : i32
    %c0_i32_1 = arith.constant 0 : i32
    return %arg0, %c0_i32, %c0_i32_0 : i32, i32, i32
  }
}

module attributes {stable_mosaic.version = 11 : i64} {
  func.func @_conv_tap_kernel_res(%arg0: i32, %arg1: memref<1x1x32x138xbf16, #tpu.memory_space<vmem>>, %arg2: memref<9x32x32xbf16, #tpu.memory_space<vmem>>, %arg3: memref<32x1xf32, #tpu.memory_space<vmem>>, %arg4: memref<1x32x128xbf16, #tpu.memory_space<vmem>>, %arg5: memref<1x32x128xbf16, #tpu.memory_space<vmem>>) attributes {dimension_semantics = [#tpu.dimension_semantics<parallel>], iteration_bounds = array<i64: 2>, scalar_prefetch = 0 : i64, scratch_operands = 0 : i64, tpu.core_type = #tpu.core_type<tc>, window_params = [{transform_indices = @transform_0, window_bounds = array<i64: 1, 1, 32, 138>}, {pipeline_mode = #tpu.pipeline_mode<synchronous>, transform_indices = @transform_1, window_bounds = array<i64: 9, 32, 32>}, {pipeline_mode = #tpu.pipeline_mode<synchronous>, transform_indices = @transform_2, window_bounds = array<i64: 32, 1>}, {transform_indices = @transform_3, window_bounds = array<i64: 1, 32, 128>}, {transform_indices = @transform_4, window_bounds = array<i64: 1, 32, 128>}]} {
    %cst = arith.constant 0.000000e+00 : f32
    %0 = vector.broadcast %cst : f32 to vector<32x128xf32>
    %c0 = arith.constant 0 : index
    %c0_0 = arith.constant 0 : index
    %c0_1 = arith.constant 0 : index
    %c0_2 = arith.constant 0 : index
    %1 = vector.load %arg1[%c0, %c0_0, %c0_1, %c0_2] : memref<1x1x32x138xbf16, #tpu.memory_space<vmem>>, vector<1x1x32x128xbf16>
    %2 = vector.shape_cast %1 : vector<1x1x32x128xbf16> to vector<32x128xbf16>
    %c0_3 = arith.constant 0 : index
    %c0_4 = arith.constant 0 : index
    %c0_5 = arith.constant 0 : index
    %3 = vector.load %arg2[%c0_3, %c0_4, %c0_5] : memref<9x32x32xbf16, #tpu.memory_space<vmem>>, vector<1x32x32xbf16>
    %4 = vector.shape_cast %3 : vector<1x32x32xbf16> to vector<32x32xbf16>
    %cst_6 = arith.constant dense<0.000000e+00> : vector<32x128xf32>
    %5 = tpu.matmul %4, %2, %cst_6 {dimension_numbers = #tpu.dot_dimension_numbers<[1], [0], [0], [1], [0, 0, 1, 1], [], []>} : vector<32x32xbf16>, vector<32x128xbf16>, vector<32x128xf32> -> vector<32x128xf32>
    %6 = arith.addf %0, %5 : vector<32x128xf32>
    %c0_7 = arith.constant 0 : index
    %c0_8 = arith.constant 0 : index
    %c0_9 = arith.constant 0 : index
    %c1 = arith.constant 1 : index
    %7 = vector.load %arg1[%c0_7, %c0_8, %c0_9, %c1] : memref<1x1x32x138xbf16, #tpu.memory_space<vmem>>, vector<1x1x32x128xbf16>
    %8 = vector.shape_cast %7 : vector<1x1x32x128xbf16> to vector<32x128xbf16>
    %c1_10 = arith.constant 1 : index
    %c0_11 = arith.constant 0 : index
    %c0_12 = arith.constant 0 : index
    %9 = vector.load %arg2[%c1_10, %c0_11, %c0_12] : memref<9x32x32xbf16, #tpu.memory_space<vmem>>, vector<1x32x32xbf16>
    %10 = vector.shape_cast %9 : vector<1x32x32xbf16> to vector<32x32xbf16>
    %cst_13 = arith.constant dense<0.000000e+00> : vector<32x128xf32>
    %11 = tpu.matmul %10, %8, %cst_13 {dimension_numbers = #tpu.dot_dimension_numbers<[1], [0], [0], [1], [0, 0, 1, 1], [], []>} : vector<32x32xbf16>, vector<32x128xbf16>, vector<32x128xf32> -> vector<32x128xf32>
    %12 = arith.addf %6, %11 : vector<32x128xf32>
    %c0_14 = arith.constant 0 : index
    %c0_15 = arith.constant 0 : index
    %c0_16 = arith.constant 0 : index
    %c2 = arith.constant 2 : index
    %13 = vector.load %arg1[%c0_14, %c0_15, %c0_16, %c2] : memref<1x1x32x138xbf16, #tpu.memory_space<vmem>>, vector<1x1x32x128xbf16>
    %14 = vector.shape_cast %13 : vector<1x1x32x128xbf16> to vector<32x128xbf16>
    %c2_17 = arith.constant 2 : index
    %c0_18 = arith.constant 0 : index
    %c0_19 = arith.constant 0 : index
    %15 = vector.load %arg2[%c2_17, %c0_18, %c0_19] : memref<9x32x32xbf16, #tpu.memory_space<vmem>>, vector<1x32x32xbf16>
    %16 = vector.shape_cast %15 : vector<1x32x32xbf16> to vector<32x32xbf16>
    %cst_20 = arith.constant dense<0.000000e+00> : vector<32x128xf32>
    %17 = tpu.matmul %16, %14, %cst_20 {dimension_numbers = #tpu.dot_dimension_numbers<[1], [0], [0], [1], [0, 0, 1, 1], [], []>} : vector<32x32xbf16>, vector<32x128xbf16>, vector<32x128xf32> -> vector<32x128xf32>
    %18 = arith.addf %12, %17 : vector<32x128xf32>
    %c0_21 = arith.constant 0 : index
    %c0_22 = arith.constant 0 : index
    %c0_23 = arith.constant 0 : index
    %c4 = arith.constant 4 : index
    %19 = vector.load %arg1[%c0_21, %c0_22, %c0_23, %c4] : memref<1x1x32x138xbf16, #tpu.memory_space<vmem>>, vector<1x1x32x128xbf16>
    %20 = vector.shape_cast %19 : vector<1x1x32x128xbf16> to vector<32x128xbf16>
    %c3 = arith.constant 3 : index
    %c0_24 = arith.constant 0 : index
    %c0_25 = arith.constant 0 : index
    %21 = vector.load %arg2[%c3, %c0_24, %c0_25] : memref<9x32x32xbf16, #tpu.memory_space<vmem>>, vector<1x32x32xbf16>
    %22 = vector.shape_cast %21 : vector<1x32x32xbf16> to vector<32x32xbf16>
    %cst_26 = arith.constant dense<0.000000e+00> : vector<32x128xf32>
    %23 = tpu.matmul %22, %20, %cst_26 {dimension_numbers = #tpu.dot_dimension_numbers<[1], [0], [0], [1], [0, 0, 1, 1], [], []>} : vector<32x32xbf16>, vector<32x128xbf16>, vector<32x128xf32> -> vector<32x128xf32>
    %24 = arith.addf %18, %23 : vector<32x128xf32>
    %c0_27 = arith.constant 0 : index
    %c0_28 = arith.constant 0 : index
    %c0_29 = arith.constant 0 : index
    %c5 = arith.constant 5 : index
    %25 = vector.load %arg1[%c0_27, %c0_28, %c0_29, %c5] : memref<1x1x32x138xbf16, #tpu.memory_space<vmem>>, vector<1x1x32x128xbf16>
    %26 = vector.shape_cast %25 : vector<1x1x32x128xbf16> to vector<32x128xbf16>
    %c4_30 = arith.constant 4 : index
    %c0_31 = arith.constant 0 : index
    %c0_32 = arith.constant 0 : index
    %27 = vector.load %arg2[%c4_30, %c0_31, %c0_32] : memref<9x32x32xbf16, #tpu.memory_space<vmem>>, vector<1x32x32xbf16>
    %28 = vector.shape_cast %27 : vector<1x32x32xbf16> to vector<32x32xbf16>
    %cst_33 = arith.constant dense<0.000000e+00> : vector<32x128xf32>
    %29 = tpu.matmul %28, %26, %cst_33 {dimension_numbers = #tpu.dot_dimension_numbers<[1], [0], [0], [1], [0, 0, 1, 1], [], []>} : vector<32x32xbf16>, vector<32x128xbf16>, vector<32x128xf32> -> vector<32x128xf32>
    %30 = arith.addf %24, %29 : vector<32x128xf32>
    %c0_34 = arith.constant 0 : index
    %c0_35 = arith.constant 0 : index
    %c0_36 = arith.constant 0 : index
    %c6 = arith.constant 6 : index
    %31 = vector.load %arg1[%c0_34, %c0_35, %c0_36, %c6] : memref<1x1x32x138xbf16, #tpu.memory_space<vmem>>, vector<1x1x32x128xbf16>
    %32 = vector.shape_cast %31 : vector<1x1x32x128xbf16> to vector<32x128xbf16>
    %c5_37 = arith.constant 5 : index
    %c0_38 = arith.constant 0 : index
    %c0_39 = arith.constant 0 : index
    %33 = vector.load %arg2[%c5_37, %c0_38, %c0_39] : memref<9x32x32xbf16, #tpu.memory_space<vmem>>, vector<1x32x32xbf16>
    %34 = vector.shape_cast %33 : vector<1x32x32xbf16> to vector<32x32xbf16>
    %cst_40 = arith.constant dense<0.000000e+00> : vector<32x128xf32>
    %35 = tpu.matmul %34, %32, %cst_40 {dimension_numbers = #tpu.dot_dimension_numbers<[1], [0], [0], [1], [0, 0, 1, 1], [], []>} : vector<32x32xbf16>, vector<32x128xbf16>, vector<32x128xf32> -> vector<32x128xf32>
    %36 = arith.addf %30, %35 : vector<32x128xf32>
    %c0_41 = arith.constant 0 : index
    %c0_42 = arith.constant 0 : index
    %c0_43 = arith.constant 0 : index
    %c8 = arith.constant 8 : index
    %37 = vector.load %arg1[%c0_41, %c0_42, %c0_43, %c8] : memref<1x1x32x138xbf16, #tpu.memory_space<vmem>>, vector<1x1x32x128xbf16>
    %38 = vector.shape_cast %37 : vector<1x1x32x128xbf16> to vector<32x128xbf16>
    %c6_44 = arith.constant 6 : index
    %c0_45 = arith.constant 0 : index
    %c0_46 = arith.constant 0 : index
    %39 = vector.load %arg2[%c6_44, %c0_45, %c0_46] : memref<9x32x32xbf16, #tpu.memory_space<vmem>>, vector<1x32x32xbf16>
    %40 = vector.shape_cast %39 : vector<1x32x32xbf16> to vector<32x32xbf16>
    %cst_47 = arith.constant dense<0.000000e+00> : vector<32x128xf32>
    %41 = tpu.matmul %40, %38, %cst_47 {dimension_numbers = #tpu.dot_dimension_numbers<[1], [0], [0], [1], [0, 0, 1, 1], [], []>} : vector<32x32xbf16>, vector<32x128xbf16>, vector<32x128xf32> -> vector<32x128xf32>
    %42 = arith.addf %36, %41 : vector<32x128xf32>
    %c0_48 = arith.constant 0 : index
    %c0_49 = arith.constant 0 : index
    %c0_50 = arith.constant 0 : index
    %c9 = arith.constant 9 : index
    %43 = vector.load %arg1[%c0_48, %c0_49, %c0_50, %c9] : memref<1x1x32x138xbf16, #tpu.memory_space<vmem>>, vector<1x1x32x128xbf16>
    %44 = vector.shape_cast %43 : vector<1x1x32x128xbf16> to vector<32x128xbf16>
    %c7 = arith.constant 7 : index
    %c0_51 = arith.constant 0 : index
    %c0_52 = arith.constant 0 : index
    %45 = vector.load %arg2[%c7, %c0_51, %c0_52] : memref<9x32x32xbf16, #tpu.memory_space<vmem>>, vector<1x32x32xbf16>
    %46 = vector.shape_cast %45 : vector<1x32x32xbf16> to vector<32x32xbf16>
    %cst_53 = arith.constant dense<0.000000e+00> : vector<32x128xf32>
    %47 = tpu.matmul %46, %44, %cst_53 {dimension_numbers = #tpu.dot_dimension_numbers<[1], [0], [0], [1], [0, 0, 1, 1], [], []>} : vector<32x32xbf16>, vector<32x128xbf16>, vector<32x128xf32> -> vector<32x128xf32>
    %48 = arith.addf %42, %47 : vector<32x128xf32>
    %c0_54 = arith.constant 0 : index
    %c0_55 = arith.constant 0 : index
    %c0_56 = arith.constant 0 : index
    %c10 = arith.constant 10 : index
    %49 = vector.load %arg1[%c0_54, %c0_55, %c0_56, %c10] : memref<1x1x32x138xbf16, #tpu.memory_space<vmem>>, vector<1x1x32x128xbf16>
    %50 = vector.shape_cast %49 : vector<1x1x32x128xbf16> to vector<32x128xbf16>
    %c8_57 = arith.constant 8 : index
    %c0_58 = arith.constant 0 : index
    %c0_59 = arith.constant 0 : index
    %51 = vector.load %arg2[%c8_57, %c0_58, %c0_59] : memref<9x32x32xbf16, #tpu.memory_space<vmem>>, vector<1x32x32xbf16>
    %52 = vector.shape_cast %51 : vector<1x32x32xbf16> to vector<32x32xbf16>
    %cst_60 = arith.constant dense<0.000000e+00> : vector<32x128xf32>
    %53 = tpu.matmul %52, %50, %cst_60 {dimension_numbers = #tpu.dot_dimension_numbers<[1], [0], [0], [1], [0, 0, 1, 1], [], []>} : vector<32x32xbf16>, vector<32x128xbf16>, vector<32x128xf32> -> vector<32x128xf32>
    %54 = arith.addf %48, %53 : vector<32x128xf32>
    %c0_61 = arith.constant 0 : index
    %c0_62 = arith.constant 0 : index
    %55 = vector.load %arg3[%c0_61, %c0_62] : memref<32x1xf32, #tpu.memory_space<vmem>>, vector<32x1xf32>
    %56 = vector.broadcast %55 : vector<32x1xf32> to vector<32x128xf32>
    %57 = arith.addf %54, %56 : vector<32x128xf32>
    %c0_63 = arith.constant 0 : index
    %c0_64 = arith.constant 0 : index
    %c0_65 = arith.constant 0 : index
    %58 = vector.load %arg4[%c0_63, %c0_64, %c0_65] : memref<1x32x128xbf16, #tpu.memory_space<vmem>>, vector<1x32x128xbf16>
    %59 = vector.shape_cast %58 : vector<1x32x128xbf16> to vector<32x128xbf16>
    %60 = arith.extf %59 : vector<32x128xbf16> to vector<32x128xf32>
    %61 = arith.addf %57, %60 : vector<32x128xf32>
    %cst_66 = arith.constant 0.000000e+00 : f32
    %62 = vector.broadcast %cst_66 : f32 to vector<32x128xf32>
    %63 = arith.maximumf %61, %62 : vector<32x128xf32>
    %64 = arith.truncf %63 : vector<32x128xf32> to vector<32x128xbf16>
    %c0_67 = arith.constant 0 : index
    %c0_68 = arith.constant 0 : index
    %c0_69 = arith.constant 0 : index
    %65 = vector.load %arg5[%c0_67, %c0_68, %c0_69] : memref<1x32x128xbf16, #tpu.memory_space<vmem>>, vector<1x32x128xbf16>
    %66 = vector.shape_cast %65 : vector<1x32x128xbf16> to vector<32x128xbf16>
    %67 = vector.shape_cast %64 : vector<32x128xbf16> to vector<1x32x128xbf16>
    tpu.vector_store %arg5[%c0_67, %c0_68, %c0_69], %67 {strides = array<i32>} : memref<1x32x128xbf16, #tpu.memory_space<vmem>>, vector<1x32x128xbf16>,
    return
  }
  func.func @transform_0(%arg0: i32) -> (i32, i32, i32, i32) {
    %c0_i32 = arith.constant 0 : i32
    %c0_i32_0 = arith.constant 0 : i32
    %c0_i32_1 = arith.constant 0 : i32
    %c0_i32_2 = arith.constant 0 : i32
    return %arg0, %c0_i32, %c0_i32_0, %c0_i32_1 : i32, i32, i32, i32
  }
  func.func @transform_1(%arg0: i32) -> (i32, i32, i32) {
    %c0_i32 = arith.constant 0 : i32
    %c0_i32_0 = arith.constant 0 : i32
    %c0_i32_1 = arith.constant 0 : i32
    %c0_i32_2 = arith.constant 0 : i32
    return %c0_i32, %c0_i32_0, %c0_i32_1 : i32, i32, i32
  }
  func.func @transform_2(%arg0: i32) -> (i32, i32) {
    %c0_i32 = arith.constant 0 : i32
    %c0_i32_0 = arith.constant 0 : i32
    %c0_i32_1 = arith.constant 0 : i32
    return %c0_i32, %c0_i32_0 : i32, i32
  }
  func.func @transform_3(%arg0: i32) -> (i32, i32, i32) {
    %c0_i32 = arith.constant 0 : i32
    %c0_i32_0 = arith.constant 0 : i32
    %c0_i32_1 = arith.constant 0 : i32
    return %arg0, %c0_i32, %c0_i32_0 : i32, i32, i32
  }
  func.func @transform_4(%arg0: i32) -> (i32, i32, i32) {
    %c0_i32 = arith.constant 0 : i32
    %c0_i32_0 = arith.constant 0 : i32
    %c0_i32_1 = arith.constant 0 : i32
    return %arg0, %c0_i32, %c0_i32_0 : i32, i32, i32
  }
}

module attributes {stable_mosaic.version = 11 : i64} {
  func.func @_conv_tap_kernel(%arg0: i32, %arg1: memref<1x1x32x138xbf16, #tpu.memory_space<vmem>>, %arg2: memref<9x32x32xbf16, #tpu.memory_space<vmem>>, %arg3: memref<32x1xf32, #tpu.memory_space<vmem>>, %arg4: memref<1x32x128xbf16, #tpu.memory_space<vmem>>) attributes {dimension_semantics = [#tpu.dimension_semantics<parallel>], iteration_bounds = array<i64: 2>, scalar_prefetch = 0 : i64, scratch_operands = 0 : i64, tpu.core_type = #tpu.core_type<tc>, window_params = [{transform_indices = @transform_0, window_bounds = array<i64: 1, 1, 32, 138>}, {pipeline_mode = #tpu.pipeline_mode<synchronous>, transform_indices = @transform_1, window_bounds = array<i64: 9, 32, 32>}, {pipeline_mode = #tpu.pipeline_mode<synchronous>, transform_indices = @transform_2, window_bounds = array<i64: 32, 1>}, {transform_indices = @transform_3, window_bounds = array<i64: 1, 32, 128>}]} {
    %cst = arith.constant 0.000000e+00 : f32
    %0 = vector.broadcast %cst : f32 to vector<32x128xf32>
    %c0 = arith.constant 0 : index
    %c0_0 = arith.constant 0 : index
    %c0_1 = arith.constant 0 : index
    %c0_2 = arith.constant 0 : index
    %1 = vector.load %arg1[%c0, %c0_0, %c0_1, %c0_2] : memref<1x1x32x138xbf16, #tpu.memory_space<vmem>>, vector<1x1x32x128xbf16>
    %2 = vector.shape_cast %1 : vector<1x1x32x128xbf16> to vector<32x128xbf16>
    %c0_3 = arith.constant 0 : index
    %c0_4 = arith.constant 0 : index
    %c0_5 = arith.constant 0 : index
    %3 = vector.load %arg2[%c0_3, %c0_4, %c0_5] : memref<9x32x32xbf16, #tpu.memory_space<vmem>>, vector<1x32x32xbf16>
    %4 = vector.shape_cast %3 : vector<1x32x32xbf16> to vector<32x32xbf16>
    %cst_6 = arith.constant dense<0.000000e+00> : vector<32x128xf32>
    %5 = tpu.matmul %4, %2, %cst_6 {dimension_numbers = #tpu.dot_dimension_numbers<[1], [0], [0], [1], [0, 0, 1, 1], [], []>} : vector<32x32xbf16>, vector<32x128xbf16>, vector<32x128xf32> -> vector<32x128xf32>
    %6 = arith.addf %0, %5 : vector<32x128xf32>
    %c0_7 = arith.constant 0 : index
    %c0_8 = arith.constant 0 : index
    %c0_9 = arith.constant 0 : index
    %c1 = arith.constant 1 : index
    %7 = vector.load %arg1[%c0_7, %c0_8, %c0_9, %c1] : memref<1x1x32x138xbf16, #tpu.memory_space<vmem>>, vector<1x1x32x128xbf16>
    %8 = vector.shape_cast %7 : vector<1x1x32x128xbf16> to vector<32x128xbf16>
    %c1_10 = arith.constant 1 : index
    %c0_11 = arith.constant 0 : index
    %c0_12 = arith.constant 0 : index
    %9 = vector.load %arg2[%c1_10, %c0_11, %c0_12] : memref<9x32x32xbf16, #tpu.memory_space<vmem>>, vector<1x32x32xbf16>
    %10 = vector.shape_cast %9 : vector<1x32x32xbf16> to vector<32x32xbf16>
    %cst_13 = arith.constant dense<0.000000e+00> : vector<32x128xf32>
    %11 = tpu.matmul %10, %8, %cst_13 {dimension_numbers = #tpu.dot_dimension_numbers<[1], [0], [0], [1], [0, 0, 1, 1], [], []>} : vector<32x32xbf16>, vector<32x128xbf16>, vector<32x128xf32> -> vector<32x128xf32>
    %12 = arith.addf %6, %11 : vector<32x128xf32>
    %c0_14 = arith.constant 0 : index
    %c0_15 = arith.constant 0 : index
    %c0_16 = arith.constant 0 : index
    %c2 = arith.constant 2 : index
    %13 = vector.load %arg1[%c0_14, %c0_15, %c0_16, %c2] : memref<1x1x32x138xbf16, #tpu.memory_space<vmem>>, vector<1x1x32x128xbf16>
    %14 = vector.shape_cast %13 : vector<1x1x32x128xbf16> to vector<32x128xbf16>
    %c2_17 = arith.constant 2 : index
    %c0_18 = arith.constant 0 : index
    %c0_19 = arith.constant 0 : index
    %15 = vector.load %arg2[%c2_17, %c0_18, %c0_19] : memref<9x32x32xbf16, #tpu.memory_space<vmem>>, vector<1x32x32xbf16>
    %16 = vector.shape_cast %15 : vector<1x32x32xbf16> to vector<32x32xbf16>
    %cst_20 = arith.constant dense<0.000000e+00> : vector<32x128xf32>
    %17 = tpu.matmul %16, %14, %cst_20 {dimension_numbers = #tpu.dot_dimension_numbers<[1], [0], [0], [1], [0, 0, 1, 1], [], []>} : vector<32x32xbf16>, vector<32x128xbf16>, vector<32x128xf32> -> vector<32x128xf32>
    %18 = arith.addf %12, %17 : vector<32x128xf32>
    %c0_21 = arith.constant 0 : index
    %c0_22 = arith.constant 0 : index
    %c0_23 = arith.constant 0 : index
    %c4 = arith.constant 4 : index
    %19 = vector.load %arg1[%c0_21, %c0_22, %c0_23, %c4] : memref<1x1x32x138xbf16, #tpu.memory_space<vmem>>, vector<1x1x32x128xbf16>
    %20 = vector.shape_cast %19 : vector<1x1x32x128xbf16> to vector<32x128xbf16>
    %c3 = arith.constant 3 : index
    %c0_24 = arith.constant 0 : index
    %c0_25 = arith.constant 0 : index
    %21 = vector.load %arg2[%c3, %c0_24, %c0_25] : memref<9x32x32xbf16, #tpu.memory_space<vmem>>, vector<1x32x32xbf16>
    %22 = vector.shape_cast %21 : vector<1x32x32xbf16> to vector<32x32xbf16>
    %cst_26 = arith.constant dense<0.000000e+00> : vector<32x128xf32>
    %23 = tpu.matmul %22, %20, %cst_26 {dimension_numbers = #tpu.dot_dimension_numbers<[1], [0], [0], [1], [0, 0, 1, 1], [], []>} : vector<32x32xbf16>, vector<32x128xbf16>, vector<32x128xf32> -> vector<32x128xf32>
    %24 = arith.addf %18, %23 : vector<32x128xf32>
    %c0_27 = arith.constant 0 : index
    %c0_28 = arith.constant 0 : index
    %c0_29 = arith.constant 0 : index
    %c5 = arith.constant 5 : index
    %25 = vector.load %arg1[%c0_27, %c0_28, %c0_29, %c5] : memref<1x1x32x138xbf16, #tpu.memory_space<vmem>>, vector<1x1x32x128xbf16>
    %26 = vector.shape_cast %25 : vector<1x1x32x128xbf16> to vector<32x128xbf16>
    %c4_30 = arith.constant 4 : index
    %c0_31 = arith.constant 0 : index
    %c0_32 = arith.constant 0 : index
    %27 = vector.load %arg2[%c4_30, %c0_31, %c0_32] : memref<9x32x32xbf16, #tpu.memory_space<vmem>>, vector<1x32x32xbf16>
    %28 = vector.shape_cast %27 : vector<1x32x32xbf16> to vector<32x32xbf16>
    %cst_33 = arith.constant dense<0.000000e+00> : vector<32x128xf32>
    %29 = tpu.matmul %28, %26, %cst_33 {dimension_numbers = #tpu.dot_dimension_numbers<[1], [0], [0], [1], [0, 0, 1, 1], [], []>} : vector<32x32xbf16>, vector<32x128xbf16>, vector<32x128xf32> -> vector<32x128xf32>
    %30 = arith.addf %24, %29 : vector<32x128xf32>
    %c0_34 = arith.constant 0 : index
    %c0_35 = arith.constant 0 : index
    %c0_36 = arith.constant 0 : index
    %c6 = arith.constant 6 : index
    %31 = vector.load %arg1[%c0_34, %c0_35, %c0_36, %c6] : memref<1x1x32x138xbf16, #tpu.memory_space<vmem>>, vector<1x1x32x128xbf16>
    %32 = vector.shape_cast %31 : vector<1x1x32x128xbf16> to vector<32x128xbf16>
    %c5_37 = arith.constant 5 : index
    %c0_38 = arith.constant 0 : index
    %c0_39 = arith.constant 0 : index
    %33 = vector.load %arg2[%c5_37, %c0_38, %c0_39] : memref<9x32x32xbf16, #tpu.memory_space<vmem>>, vector<1x32x32xbf16>
    %34 = vector.shape_cast %33 : vector<1x32x32xbf16> to vector<32x32xbf16>
    %cst_40 = arith.constant dense<0.000000e+00> : vector<32x128xf32>
    %35 = tpu.matmul %34, %32, %cst_40 {dimension_numbers = #tpu.dot_dimension_numbers<[1], [0], [0], [1], [0, 0, 1, 1], [], []>} : vector<32x32xbf16>, vector<32x128xbf16>, vector<32x128xf32> -> vector<32x128xf32>
    %36 = arith.addf %30, %35 : vector<32x128xf32>
    %c0_41 = arith.constant 0 : index
    %c0_42 = arith.constant 0 : index
    %c0_43 = arith.constant 0 : index
    %c8 = arith.constant 8 : index
    %37 = vector.load %arg1[%c0_41, %c0_42, %c0_43, %c8] : memref<1x1x32x138xbf16, #tpu.memory_space<vmem>>, vector<1x1x32x128xbf16>
    %38 = vector.shape_cast %37 : vector<1x1x32x128xbf16> to vector<32x128xbf16>
    %c6_44 = arith.constant 6 : index
    %c0_45 = arith.constant 0 : index
    %c0_46 = arith.constant 0 : index
    %39 = vector.load %arg2[%c6_44, %c0_45, %c0_46] : memref<9x32x32xbf16, #tpu.memory_space<vmem>>, vector<1x32x32xbf16>
    %40 = vector.shape_cast %39 : vector<1x32x32xbf16> to vector<32x32xbf16>
    %cst_47 = arith.constant dense<0.000000e+00> : vector<32x128xf32>
    %41 = tpu.matmul %40, %38, %cst_47 {dimension_numbers = #tpu.dot_dimension_numbers<[1], [0], [0], [1], [0, 0, 1, 1], [], []>} : vector<32x32xbf16>, vector<32x128xbf16>, vector<32x128xf32> -> vector<32x128xf32>
    %42 = arith.addf %36, %41 : vector<32x128xf32>
    %c0_48 = arith.constant 0 : index
    %c0_49 = arith.constant 0 : index
    %c0_50 = arith.constant 0 : index
    %c9 = arith.constant 9 : index
    %43 = vector.load %arg1[%c0_48, %c0_49, %c0_50, %c9] : memref<1x1x32x138xbf16, #tpu.memory_space<vmem>>, vector<1x1x32x128xbf16>
    %44 = vector.shape_cast %43 : vector<1x1x32x128xbf16> to vector<32x128xbf16>
    %c7 = arith.constant 7 : index
    %c0_51 = arith.constant 0 : index
    %c0_52 = arith.constant 0 : index
    %45 = vector.load %arg2[%c7, %c0_51, %c0_52] : memref<9x32x32xbf16, #tpu.memory_space<vmem>>, vector<1x32x32xbf16>
    %46 = vector.shape_cast %45 : vector<1x32x32xbf16> to vector<32x32xbf16>
    %cst_53 = arith.constant dense<0.000000e+00> : vector<32x128xf32>
    %47 = tpu.matmul %46, %44, %cst_53 {dimension_numbers = #tpu.dot_dimension_numbers<[1], [0], [0], [1], [0, 0, 1, 1], [], []>} : vector<32x32xbf16>, vector<32x128xbf16>, vector<32x128xf32> -> vector<32x128xf32>
    %48 = arith.addf %42, %47 : vector<32x128xf32>
    %c0_54 = arith.constant 0 : index
    %c0_55 = arith.constant 0 : index
    %c0_56 = arith.constant 0 : index
    %c10 = arith.constant 10 : index
    %49 = vector.load %arg1[%c0_54, %c0_55, %c0_56, %c10] : memref<1x1x32x138xbf16, #tpu.memory_space<vmem>>, vector<1x1x32x128xbf16>
    %50 = vector.shape_cast %49 : vector<1x1x32x128xbf16> to vector<32x128xbf16>
    %c8_57 = arith.constant 8 : index
    %c0_58 = arith.constant 0 : index
    %c0_59 = arith.constant 0 : index
    %51 = vector.load %arg2[%c8_57, %c0_58, %c0_59] : memref<9x32x32xbf16, #tpu.memory_space<vmem>>, vector<1x32x32xbf16>
    %52 = vector.shape_cast %51 : vector<1x32x32xbf16> to vector<32x32xbf16>
    %cst_60 = arith.constant dense<0.000000e+00> : vector<32x128xf32>
    %53 = tpu.matmul %52, %50, %cst_60 {dimension_numbers = #tpu.dot_dimension_numbers<[1], [0], [0], [1], [0, 0, 1, 1], [], []>} : vector<32x32xbf16>, vector<32x128xbf16>, vector<32x128xf32> -> vector<32x128xf32>
    %54 = arith.addf %48, %53 : vector<32x128xf32>
    %c0_61 = arith.constant 0 : index
    %c0_62 = arith.constant 0 : index
    %55 = vector.load %arg3[%c0_61, %c0_62] : memref<32x1xf32, #tpu.memory_space<vmem>>, vector<32x1xf32>
    %56 = vector.broadcast %55 : vector<32x1xf32> to vector<32x128xf32>
    %57 = arith.addf %54, %56 : vector<32x128xf32>
    %58 = arith.truncf %57 : vector<32x128xf32> to vector<32x128xbf16>
    %c0_63 = arith.constant 0 : index
    %c0_64 = arith.constant 0 : index
    %c0_65 = arith.constant 0 : index
    %59 = vector.load %arg4[%c0_63, %c0_64, %c0_65] : memref<1x32x128xbf16, #tpu.memory_space<vmem>>, vector<1x32x128xbf16>
    %60 = vector.shape_cast %59 : vector<1x32x128xbf16> to vector<32x128xbf16>
    %61 = vector.shape_cast %58 : vector<32x128xbf16> to vector<1x32x128xbf16>
    tpu.vector_store %arg4[%c0_63, %c0_64, %c0_65], %61 {strides = array<i32>} : memref<1x32x128xbf16, #tpu.memory_space<vmem>>, vector<1x32x128xbf16>,
    return
  }
  func.func @transform_0(%arg0: i32) -> (i32, i32, i32, i32) {
    %c0_i32 = arith.constant 0 : i32
    %c0_i32_0 = arith.constant 0 : i32
    %c0_i32_1 = arith.constant 0 : i32
    %c0_i32_2 = arith.constant 0 : i32
    return %arg0, %c0_i32, %c0_i32_0, %c0_i32_1 : i32, i32, i32, i32
  }
  func.func @transform_1(%arg0: i32) -> (i32, i32, i32) {
    %c0_i32 = arith.constant 0 : i32
    %c0_i32_0 = arith.constant 0 : i32
    %c0_i32_1 = arith.constant 0 : i32
    %c0_i32_2 = arith.constant 0 : i32
    return %c0_i32, %c0_i32_0, %c0_i32_1 : i32, i32, i32
  }
  func.func @transform_2(%arg0: i32) -> (i32, i32) {
    %c0_i32 = arith.constant 0 : i32
    %c0_i32_0 = arith.constant 0 : i32
    %c0_i32_1 = arith.constant 0 : i32
    return %c0_i32, %c0_i32_0 : i32, i32
  }
  func.func @transform_3(%arg0: i32) -> (i32, i32, i32) {
    %c0_i32 = arith.constant 0 : i32
    %c0_i32_0 = arith.constant 0 : i32
    %c0_i32_1 = arith.constant 0 : i32
    return %arg0, %c0_i32, %c0_i32_0 : i32, i32, i32
  }
}

module attributes {stable_mosaic.version = 11 : i64} {
  func.func @_conv_tap_kernel(%arg0: i32, %arg1: memref<1x1x8x150xbf16, #tpu.memory_space<vmem>>, %arg2: memref<9x8x8xbf16, #tpu.memory_space<vmem>>, %arg3: memref<8x1xf32, #tpu.memory_space<vmem>>, %arg4: memref<1x8x128xbf16, #tpu.memory_space<vmem>>) attributes {dimension_semantics = [#tpu.dimension_semantics<parallel>], iteration_bounds = array<i64: 2>, scalar_prefetch = 0 : i64, scratch_operands = 0 : i64, tpu.core_type = #tpu.core_type<tc>, window_params = [{transform_indices = @transform_0, window_bounds = array<i64: 1, 1, 8, 150>}, {pipeline_mode = #tpu.pipeline_mode<synchronous>, transform_indices = @transform_1, window_bounds = array<i64: 9, 8, 8>}, {pipeline_mode = #tpu.pipeline_mode<synchronous>, transform_indices = @transform_2, window_bounds = array<i64: 8, 1>}, {transform_indices = @transform_3, window_bounds = array<i64: 1, 8, 128>}]} {
    %cst = arith.constant 0.000000e+00 : f32
    %0 = vector.broadcast %cst : f32 to vector<8x128xf32>
    %c0 = arith.constant 0 : index
    %c0_0 = arith.constant 0 : index
    %c0_1 = arith.constant 0 : index
    %c0_2 = arith.constant 0 : index
    %1 = vector.load %arg1[%c0, %c0_0, %c0_1, %c0_2] : memref<1x1x8x150xbf16, #tpu.memory_space<vmem>>, vector<1x1x8x128xbf16>
    %2 = vector.shape_cast %1 : vector<1x1x8x128xbf16> to vector<8x128xbf16>
    %c0_3 = arith.constant 0 : index
    %c0_4 = arith.constant 0 : index
    %c0_5 = arith.constant 0 : index
    %3 = vector.load %arg2[%c0_3, %c0_4, %c0_5] : memref<9x8x8xbf16, #tpu.memory_space<vmem>>, vector<1x8x8xbf16>
    %4 = vector.shape_cast %3 : vector<1x8x8xbf16> to vector<8x8xbf16>
    %cst_6 = arith.constant dense<0.000000e+00> : vector<8x128xf32>
    %5 = tpu.matmul %4, %2, %cst_6 {dimension_numbers = #tpu.dot_dimension_numbers<[1], [0], [0], [1], [0, 0, 1, 1], [], []>} : vector<8x8xbf16>, vector<8x128xbf16>, vector<8x128xf32> -> vector<8x128xf32>
    %6 = arith.addf %0, %5 : vector<8x128xf32>
    %c0_7 = arith.constant 0 : index
    %c0_8 = arith.constant 0 : index
    %c0_9 = arith.constant 0 : index
    %c1 = arith.constant 1 : index
    %7 = vector.load %arg1[%c0_7, %c0_8, %c0_9, %c1] : memref<1x1x8x150xbf16, #tpu.memory_space<vmem>>, vector<1x1x8x128xbf16>
    %8 = vector.shape_cast %7 : vector<1x1x8x128xbf16> to vector<8x128xbf16>
    %c1_10 = arith.constant 1 : index
    %c0_11 = arith.constant 0 : index
    %c0_12 = arith.constant 0 : index
    %9 = vector.load %arg2[%c1_10, %c0_11, %c0_12] : memref<9x8x8xbf16, #tpu.memory_space<vmem>>, vector<1x8x8xbf16>
    %10 = vector.shape_cast %9 : vector<1x8x8xbf16> to vector<8x8xbf16>
    %cst_13 = arith.constant dense<0.000000e+00> : vector<8x128xf32>
    %11 = tpu.matmul %10, %8, %cst_13 {dimension_numbers = #tpu.dot_dimension_numbers<[1], [0], [0], [1], [0, 0, 1, 1], [], []>} : vector<8x8xbf16>, vector<8x128xbf16>, vector<8x128xf32> -> vector<8x128xf32>
    %12 = arith.addf %6, %11 : vector<8x128xf32>
    %c0_14 = arith.constant 0 : index
    %c0_15 = arith.constant 0 : index
    %c0_16 = arith.constant 0 : index
    %c2 = arith.constant 2 : index
    %13 = vector.load %arg1[%c0_14, %c0_15, %c0_16, %c2] : memref<1x1x8x150xbf16, #tpu.memory_space<vmem>>, vector<1x1x8x128xbf16>
    %14 = vector.shape_cast %13 : vector<1x1x8x128xbf16> to vector<8x128xbf16>
    %c2_17 = arith.constant 2 : index
    %c0_18 = arith.constant 0 : index
    %c0_19 = arith.constant 0 : index
    %15 = vector.load %arg2[%c2_17, %c0_18, %c0_19] : memref<9x8x8xbf16, #tpu.memory_space<vmem>>, vector<1x8x8xbf16>
    %16 = vector.shape_cast %15 : vector<1x8x8xbf16> to vector<8x8xbf16>
    %cst_20 = arith.constant dense<0.000000e+00> : vector<8x128xf32>
    %17 = tpu.matmul %16, %14, %cst_20 {dimension_numbers = #tpu.dot_dimension_numbers<[1], [0], [0], [1], [0, 0, 1, 1], [], []>} : vector<8x8xbf16>, vector<8x128xbf16>, vector<8x128xf32> -> vector<8x128xf32>
    %18 = arith.addf %12, %17 : vector<8x128xf32>
    %c0_21 = arith.constant 0 : index
    %c0_22 = arith.constant 0 : index
    %c0_23 = arith.constant 0 : index
    %c10 = arith.constant 10 : index
    %19 = vector.load %arg1[%c0_21, %c0_22, %c0_23, %c10] : memref<1x1x8x150xbf16, #tpu.memory_space<vmem>>, vector<1x1x8x128xbf16>
    %20 = vector.shape_cast %19 : vector<1x1x8x128xbf16> to vector<8x128xbf16>
    %c3 = arith.constant 3 : index
    %c0_24 = arith.constant 0 : index
    %c0_25 = arith.constant 0 : index
    %21 = vector.load %arg2[%c3, %c0_24, %c0_25] : memref<9x8x8xbf16, #tpu.memory_space<vmem>>, vector<1x8x8xbf16>
    %22 = vector.shape_cast %21 : vector<1x8x8xbf16> to vector<8x8xbf16>
    %cst_26 = arith.constant dense<0.000000e+00> : vector<8x128xf32>
    %23 = tpu.matmul %22, %20, %cst_26 {dimension_numbers = #tpu.dot_dimension_numbers<[1], [0], [0], [1], [0, 0, 1, 1], [], []>} : vector<8x8xbf16>, vector<8x128xbf16>, vector<8x128xf32> -> vector<8x128xf32>
    %24 = arith.addf %18, %23 : vector<8x128xf32>
    %c0_27 = arith.constant 0 : index
    %c0_28 = arith.constant 0 : index
    %c0_29 = arith.constant 0 : index
    %c11 = arith.constant 11 : index
    %25 = vector.load %arg1[%c0_27, %c0_28, %c0_29, %c11] : memref<1x1x8x150xbf16, #tpu.memory_space<vmem>>, vector<1x1x8x128xbf16>
    %26 = vector.shape_cast %25 : vector<1x1x8x128xbf16> to vector<8x128xbf16>
    %c4 = arith.constant 4 : index
    %c0_30 = arith.constant 0 : index
    %c0_31 = arith.constant 0 : index
    %27 = vector.load %arg2[%c4, %c0_30, %c0_31] : memref<9x8x8xbf16, #tpu.memory_space<vmem>>, vector<1x8x8xbf16>
    %28 = vector.shape_cast %27 : vector<1x8x8xbf16> to vector<8x8xbf16>
    %cst_32 = arith.constant dense<0.000000e+00> : vector<8x128xf32>
    %29 = tpu.matmul %28, %26, %cst_32 {dimension_numbers = #tpu.dot_dimension_numbers<[1], [0], [0], [1], [0, 0, 1, 1], [], []>} : vector<8x8xbf16>, vector<8x128xbf16>, vector<8x128xf32> -> vector<8x128xf32>
    %30 = arith.addf %24, %29 : vector<8x128xf32>
    %c0_33 = arith.constant 0 : index
    %c0_34 = arith.constant 0 : index
    %c0_35 = arith.constant 0 : index
    %c12 = arith.constant 12 : index
    %31 = vector.load %arg1[%c0_33, %c0_34, %c0_35, %c12] : memref<1x1x8x150xbf16, #tpu.memory_space<vmem>>, vector<1x1x8x128xbf16>
    %32 = vector.shape_cast %31 : vector<1x1x8x128xbf16> to vector<8x128xbf16>
    %c5 = arith.constant 5 : index
    %c0_36 = arith.constant 0 : index
    %c0_37 = arith.constant 0 : index
    %33 = vector.load %arg2[%c5, %c0_36, %c0_37] : memref<9x8x8xbf16, #tpu.memory_space<vmem>>, vector<1x8x8xbf16>
    %34 = vector.shape_cast %33 : vector<1x8x8xbf16> to vector<8x8xbf16>
    %cst_38 = arith.constant dense<0.000000e+00> : vector<8x128xf32>
    %35 = tpu.matmul %34, %32, %cst_38 {dimension_numbers = #tpu.dot_dimension_numbers<[1], [0], [0], [1], [0, 0, 1, 1], [], []>} : vector<8x8xbf16>, vector<8x128xbf16>, vector<8x128xf32> -> vector<8x128xf32>
    %36 = arith.addf %30, %35 : vector<8x128xf32>
    %c0_39 = arith.constant 0 : index
    %c0_40 = arith.constant 0 : index
    %c0_41 = arith.constant 0 : index
    %c20 = arith.constant 20 : index
    %37 = vector.load %arg1[%c0_39, %c0_40, %c0_41, %c20] : memref<1x1x8x150xbf16, #tpu.memory_space<vmem>>, vector<1x1x8x128xbf16>
    %38 = vector.shape_cast %37 : vector<1x1x8x128xbf16> to vector<8x128xbf16>
    %c6 = arith.constant 6 : index
    %c0_42 = arith.constant 0 : index
    %c0_43 = arith.constant 0 : index
    %39 = vector.load %arg2[%c6, %c0_42, %c0_43] : memref<9x8x8xbf16, #tpu.memory_space<vmem>>, vector<1x8x8xbf16>
    %40 = vector.shape_cast %39 : vector<1x8x8xbf16> to vector<8x8xbf16>
    %cst_44 = arith.constant dense<0.000000e+00> : vector<8x128xf32>
    %41 = tpu.matmul %40, %38, %cst_44 {dimension_numbers = #tpu.dot_dimension_numbers<[1], [0], [0], [1], [0, 0, 1, 1], [], []>} : vector<8x8xbf16>, vector<8x128xbf16>, vector<8x128xf32> -> vector<8x128xf32>
    %42 = arith.addf %36, %41 : vector<8x128xf32>
    %c0_45 = arith.constant 0 : index
    %c0_46 = arith.constant 0 : index
    %c0_47 = arith.constant 0 : index
    %c21 = arith.constant 21 : index
    %43 = vector.load %arg1[%c0_45, %c0_46, %c0_47, %c21] : memref<1x1x8x150xbf16, #tpu.memory_space<vmem>>, vector<1x1x8x128xbf16>
    %44 = vector.shape_cast %43 : vector<1x1x8x128xbf16> to vector<8x128xbf16>
    %c7 = arith.constant 7 : index
    %c0_48 = arith.constant 0 : index
    %c0_49 = arith.constant 0 : index
    %45 = vector.load %arg2[%c7, %c0_48, %c0_49] : memref<9x8x8xbf16, #tpu.memory_space<vmem>>, vector<1x8x8xbf16>
    %46 = vector.shape_cast %45 : vector<1x8x8xbf16> to vector<8x8xbf16>
    %cst_50 = arith.constant dense<0.000000e+00> : vector<8x128xf32>
    %47 = tpu.matmul %46, %44, %cst_50 {dimension_numbers = #tpu.dot_dimension_numbers<[1], [0], [0], [1], [0, 0, 1, 1], [], []>} : vector<8x8xbf16>, vector<8x128xbf16>, vector<8x128xf32> -> vector<8x128xf32>
    %48 = arith.addf %42, %47 : vector<8x128xf32>
    %c0_51 = arith.constant 0 : index
    %c0_52 = arith.constant 0 : index
    %c0_53 = arith.constant 0 : index
    %c22 = arith.constant 22 : index
    %49 = vector.load %arg1[%c0_51, %c0_52, %c0_53, %c22] : memref<1x1x8x150xbf16, #tpu.memory_space<vmem>>, vector<1x1x8x128xbf16>
    %50 = vector.shape_cast %49 : vector<1x1x8x128xbf16> to vector<8x128xbf16>
    %c8 = arith.constant 8 : index
    %c0_54 = arith.constant 0 : index
    %c0_55 = arith.constant 0 : index
    %51 = vector.load %arg2[%c8, %c0_54, %c0_55] : memref<9x8x8xbf16, #tpu.memory_space<vmem>>, vector<1x8x8xbf16>
    %52 = vector.shape_cast %51 : vector<1x8x8xbf16> to vector<8x8xbf16>
    %cst_56 = arith.constant dense<0.000000e+00> : vector<8x128xf32>
    %53 = tpu.matmul %52, %50, %cst_56 {dimension_numbers = #tpu.dot_dimension_numbers<[1], [0], [0], [1], [0, 0, 1, 1], [], []>} : vector<8x8xbf16>, vector<8x128xbf16>, vector<8x128xf32> -> vector<8x128xf32>
    %54 = arith.addf %48, %53 : vector<8x128xf32>
    %c0_57 = arith.constant 0 : index
    %c0_58 = arith.constant 0 : index
    %55 = vector.load %arg3[%c0_57, %c0_58] : memref<8x1xf32, #tpu.memory_space<vmem>>, vector<8x1xf32>
    %56 = vector.broadcast %55 : vector<8x1xf32> to vector<8x128xf32>
    %57 = arith.addf %54, %56 : vector<8x128xf32>
    %cst_59 = arith.constant 0.000000e+00 : f32
    %58 = vector.broadcast %cst_59 : f32 to vector<8x128xf32>
    %59 = arith.maximumf %57, %58 : vector<8x128xf32>
    %60 = arith.truncf %59 : vector<8x128xf32> to vector<8x128xbf16>
    %c0_60 = arith.constant 0 : index
    %c0_61 = arith.constant 0 : index
    %c0_62 = arith.constant 0 : index
    %61 = vector.load %arg4[%c0_60, %c0_61, %c0_62] : memref<1x8x128xbf16, #tpu.memory_space<vmem>>, vector<1x8x128xbf16>
    %62 = vector.shape_cast %61 : vector<1x8x128xbf16> to vector<8x128xbf16>
    %63 = vector.shape_cast %60 : vector<8x128xbf16> to vector<1x8x128xbf16>
    tpu.vector_store %arg4[%c0_60, %c0_61, %c0_62], %63 {strides = array<i32>} : memref<1x8x128xbf16, #tpu.memory_space<vmem>>, vector<1x8x128xbf16>,
    return
  }
  func.func @transform_0(%arg0: i32) -> (i32, i32, i32, i32) {
    %c0_i32 = arith.constant 0 : i32
    %c0_i32_0 = arith.constant 0 : i32
    %c0_i32_1 = arith.constant 0 : i32
    %c0_i32_2 = arith.constant 0 : i32
    return %arg0, %c0_i32, %c0_i32_0, %c0_i32_1 : i32, i32, i32, i32
  }
  func.func @transform_1(%arg0: i32) -> (i32, i32, i32) {
    %c0_i32 = arith.constant 0 : i32
    %c0_i32_0 = arith.constant 0 : i32
    %c0_i32_1 = arith.constant 0 : i32
    %c0_i32_2 = arith.constant 0 : i32
    return %c0_i32, %c0_i32_0, %c0_i32_1 : i32, i32, i32
  }
  func.func @transform_2(%arg0: i32) -> (i32, i32) {
    %c0_i32 = arith.constant 0 : i32
    %c0_i32_0 = arith.constant 0 : i32
    %c0_i32_1 = arith.constant 0 : i32
    return %c0_i32, %c0_i32_0 : i32, i32
  }
  func.func @transform_3(%arg0: i32) -> (i32, i32, i32) {
    %c0_i32 = arith.constant 0 : i32
    %c0_i32_0 = arith.constant 0 : i32
    %c0_i32_1 = arith.constant 0 : i32
    return %arg0, %c0_i32, %c0_i32_0 : i32, i32, i32
  }
}

module attributes {stable_mosaic.version = 11 : i64} {
  func.func @_conv_tap_kernel_res(%arg0: i32, %arg1: memref<1x1x8x150xbf16, #tpu.memory_space<vmem>>, %arg2: memref<9x8x8xbf16, #tpu.memory_space<vmem>>, %arg3: memref<8x1xf32, #tpu.memory_space<vmem>>, %arg4: memref<1x8x128xbf16, #tpu.memory_space<vmem>>, %arg5: memref<1x8x128xbf16, #tpu.memory_space<vmem>>) attributes {dimension_semantics = [#tpu.dimension_semantics<parallel>], iteration_bounds = array<i64: 2>, scalar_prefetch = 0 : i64, scratch_operands = 0 : i64, tpu.core_type = #tpu.core_type<tc>, window_params = [{transform_indices = @transform_0, window_bounds = array<i64: 1, 1, 8, 150>}, {pipeline_mode = #tpu.pipeline_mode<synchronous>, transform_indices = @transform_1, window_bounds = array<i64: 9, 8, 8>}, {pipeline_mode = #tpu.pipeline_mode<synchronous>, transform_indices = @transform_2, window_bounds = array<i64: 8, 1>}, {transform_indices = @transform_3, window_bounds = array<i64: 1, 8, 128>}, {transform_indices = @transform_4, window_bounds = array<i64: 1, 8, 128>}]} {
    %cst = arith.constant 0.000000e+00 : f32
    %0 = vector.broadcast %cst : f32 to vector<8x128xf32>
    %c0 = arith.constant 0 : index
    %c0_0 = arith.constant 0 : index
    %c0_1 = arith.constant 0 : index
    %c0_2 = arith.constant 0 : index
    %1 = vector.load %arg1[%c0, %c0_0, %c0_1, %c0_2] : memref<1x1x8x150xbf16, #tpu.memory_space<vmem>>, vector<1x1x8x128xbf16>
    %2 = vector.shape_cast %1 : vector<1x1x8x128xbf16> to vector<8x128xbf16>
    %c0_3 = arith.constant 0 : index
    %c0_4 = arith.constant 0 : index
    %c0_5 = arith.constant 0 : index
    %3 = vector.load %arg2[%c0_3, %c0_4, %c0_5] : memref<9x8x8xbf16, #tpu.memory_space<vmem>>, vector<1x8x8xbf16>
    %4 = vector.shape_cast %3 : vector<1x8x8xbf16> to vector<8x8xbf16>
    %cst_6 = arith.constant dense<0.000000e+00> : vector<8x128xf32>
    %5 = tpu.matmul %4, %2, %cst_6 {dimension_numbers = #tpu.dot_dimension_numbers<[1], [0], [0], [1], [0, 0, 1, 1], [], []>} : vector<8x8xbf16>, vector<8x128xbf16>, vector<8x128xf32> -> vector<8x128xf32>
    %6 = arith.addf %0, %5 : vector<8x128xf32>
    %c0_7 = arith.constant 0 : index
    %c0_8 = arith.constant 0 : index
    %c0_9 = arith.constant 0 : index
    %c1 = arith.constant 1 : index
    %7 = vector.load %arg1[%c0_7, %c0_8, %c0_9, %c1] : memref<1x1x8x150xbf16, #tpu.memory_space<vmem>>, vector<1x1x8x128xbf16>
    %8 = vector.shape_cast %7 : vector<1x1x8x128xbf16> to vector<8x128xbf16>
    %c1_10 = arith.constant 1 : index
    %c0_11 = arith.constant 0 : index
    %c0_12 = arith.constant 0 : index
    %9 = vector.load %arg2[%c1_10, %c0_11, %c0_12] : memref<9x8x8xbf16, #tpu.memory_space<vmem>>, vector<1x8x8xbf16>
    %10 = vector.shape_cast %9 : vector<1x8x8xbf16> to vector<8x8xbf16>
    %cst_13 = arith.constant dense<0.000000e+00> : vector<8x128xf32>
    %11 = tpu.matmul %10, %8, %cst_13 {dimension_numbers = #tpu.dot_dimension_numbers<[1], [0], [0], [1], [0, 0, 1, 1], [], []>} : vector<8x8xbf16>, vector<8x128xbf16>, vector<8x128xf32> -> vector<8x128xf32>
    %12 = arith.addf %6, %11 : vector<8x128xf32>
    %c0_14 = arith.constant 0 : index
    %c0_15 = arith.constant 0 : index
    %c0_16 = arith.constant 0 : index
    %c2 = arith.constant 2 : index
    %13 = vector.load %arg1[%c0_14, %c0_15, %c0_16, %c2] : memref<1x1x8x150xbf16, #tpu.memory_space<vmem>>, vector<1x1x8x128xbf16>
    %14 = vector.shape_cast %13 : vector<1x1x8x128xbf16> to vector<8x128xbf16>
    %c2_17 = arith.constant 2 : index
    %c0_18 = arith.constant 0 : index
    %c0_19 = arith.constant 0 : index
    %15 = vector.load %arg2[%c2_17, %c0_18, %c0_19] : memref<9x8x8xbf16, #tpu.memory_space<vmem>>, vector<1x8x8xbf16>
    %16 = vector.shape_cast %15 : vector<1x8x8xbf16> to vector<8x8xbf16>
    %cst_20 = arith.constant dense<0.000000e+00> : vector<8x128xf32>
    %17 = tpu.matmul %16, %14, %cst_20 {dimension_numbers = #tpu.dot_dimension_numbers<[1], [0], [0], [1], [0, 0, 1, 1], [], []>} : vector<8x8xbf16>, vector<8x128xbf16>, vector<8x128xf32> -> vector<8x128xf32>
    %18 = arith.addf %12, %17 : vector<8x128xf32>
    %c0_21 = arith.constant 0 : index
    %c0_22 = arith.constant 0 : index
    %c0_23 = arith.constant 0 : index
    %c10 = arith.constant 10 : index
    %19 = vector.load %arg1[%c0_21, %c0_22, %c0_23, %c10] : memref<1x1x8x150xbf16, #tpu.memory_space<vmem>>, vector<1x1x8x128xbf16>
    %20 = vector.shape_cast %19 : vector<1x1x8x128xbf16> to vector<8x128xbf16>
    %c3 = arith.constant 3 : index
    %c0_24 = arith.constant 0 : index
    %c0_25 = arith.constant 0 : index
    %21 = vector.load %arg2[%c3, %c0_24, %c0_25] : memref<9x8x8xbf16, #tpu.memory_space<vmem>>, vector<1x8x8xbf16>
    %22 = vector.shape_cast %21 : vector<1x8x8xbf16> to vector<8x8xbf16>
    %cst_26 = arith.constant dense<0.000000e+00> : vector<8x128xf32>
    %23 = tpu.matmul %22, %20, %cst_26 {dimension_numbers = #tpu.dot_dimension_numbers<[1], [0], [0], [1], [0, 0, 1, 1], [], []>} : vector<8x8xbf16>, vector<8x128xbf16>, vector<8x128xf32> -> vector<8x128xf32>
    %24 = arith.addf %18, %23 : vector<8x128xf32>
    %c0_27 = arith.constant 0 : index
    %c0_28 = arith.constant 0 : index
    %c0_29 = arith.constant 0 : index
    %c11 = arith.constant 11 : index
    %25 = vector.load %arg1[%c0_27, %c0_28, %c0_29, %c11] : memref<1x1x8x150xbf16, #tpu.memory_space<vmem>>, vector<1x1x8x128xbf16>
    %26 = vector.shape_cast %25 : vector<1x1x8x128xbf16> to vector<8x128xbf16>
    %c4 = arith.constant 4 : index
    %c0_30 = arith.constant 0 : index
    %c0_31 = arith.constant 0 : index
    %27 = vector.load %arg2[%c4, %c0_30, %c0_31] : memref<9x8x8xbf16, #tpu.memory_space<vmem>>, vector<1x8x8xbf16>
    %28 = vector.shape_cast %27 : vector<1x8x8xbf16> to vector<8x8xbf16>
    %cst_32 = arith.constant dense<0.000000e+00> : vector<8x128xf32>
    %29 = tpu.matmul %28, %26, %cst_32 {dimension_numbers = #tpu.dot_dimension_numbers<[1], [0], [0], [1], [0, 0, 1, 1], [], []>} : vector<8x8xbf16>, vector<8x128xbf16>, vector<8x128xf32> -> vector<8x128xf32>
    %30 = arith.addf %24, %29 : vector<8x128xf32>
    %c0_33 = arith.constant 0 : index
    %c0_34 = arith.constant 0 : index
    %c0_35 = arith.constant 0 : index
    %c12 = arith.constant 12 : index
    %31 = vector.load %arg1[%c0_33, %c0_34, %c0_35, %c12] : memref<1x1x8x150xbf16, #tpu.memory_space<vmem>>, vector<1x1x8x128xbf16>
    %32 = vector.shape_cast %31 : vector<1x1x8x128xbf16> to vector<8x128xbf16>
    %c5 = arith.constant 5 : index
    %c0_36 = arith.constant 0 : index
    %c0_37 = arith.constant 0 : index
    %33 = vector.load %arg2[%c5, %c0_36, %c0_37] : memref<9x8x8xbf16, #tpu.memory_space<vmem>>, vector<1x8x8xbf16>
    %34 = vector.shape_cast %33 : vector<1x8x8xbf16> to vector<8x8xbf16>
    %cst_38 = arith.constant dense<0.000000e+00> : vector<8x128xf32>
    %35 = tpu.matmul %34, %32, %cst_38 {dimension_numbers = #tpu.dot_dimension_numbers<[1], [0], [0], [1], [0, 0, 1, 1], [], []>} : vector<8x8xbf16>, vector<8x128xbf16>, vector<8x128xf32> -> vector<8x128xf32>
    %36 = arith.addf %30, %35 : vector<8x128xf32>
    %c0_39 = arith.constant 0 : index
    %c0_40 = arith.constant 0 : index
    %c0_41 = arith.constant 0 : index
    %c20 = arith.constant 20 : index
    %37 = vector.load %arg1[%c0_39, %c0_40, %c0_41, %c20] : memref<1x1x8x150xbf16, #tpu.memory_space<vmem>>, vector<1x1x8x128xbf16>
    %38 = vector.shape_cast %37 : vector<1x1x8x128xbf16> to vector<8x128xbf16>
    %c6 = arith.constant 6 : index
    %c0_42 = arith.constant 0 : index
    %c0_43 = arith.constant 0 : index
    %39 = vector.load %arg2[%c6, %c0_42, %c0_43] : memref<9x8x8xbf16, #tpu.memory_space<vmem>>, vector<1x8x8xbf16>
    %40 = vector.shape_cast %39 : vector<1x8x8xbf16> to vector<8x8xbf16>
    %cst_44 = arith.constant dense<0.000000e+00> : vector<8x128xf32>
    %41 = tpu.matmul %40, %38, %cst_44 {dimension_numbers = #tpu.dot_dimension_numbers<[1], [0], [0], [1], [0, 0, 1, 1], [], []>} : vector<8x8xbf16>, vector<8x128xbf16>, vector<8x128xf32> -> vector<8x128xf32>
    %42 = arith.addf %36, %41 : vector<8x128xf32>
    %c0_45 = arith.constant 0 : index
    %c0_46 = arith.constant 0 : index
    %c0_47 = arith.constant 0 : index
    %c21 = arith.constant 21 : index
    %43 = vector.load %arg1[%c0_45, %c0_46, %c0_47, %c21] : memref<1x1x8x150xbf16, #tpu.memory_space<vmem>>, vector<1x1x8x128xbf16>
    %44 = vector.shape_cast %43 : vector<1x1x8x128xbf16> to vector<8x128xbf16>
    %c7 = arith.constant 7 : index
    %c0_48 = arith.constant 0 : index
    %c0_49 = arith.constant 0 : index
    %45 = vector.load %arg2[%c7, %c0_48, %c0_49] : memref<9x8x8xbf16, #tpu.memory_space<vmem>>, vector<1x8x8xbf16>
    %46 = vector.shape_cast %45 : vector<1x8x8xbf16> to vector<8x8xbf16>
    %cst_50 = arith.constant dense<0.000000e+00> : vector<8x128xf32>
    %47 = tpu.matmul %46, %44, %cst_50 {dimension_numbers = #tpu.dot_dimension_numbers<[1], [0], [0], [1], [0, 0, 1, 1], [], []>} : vector<8x8xbf16>, vector<8x128xbf16>, vector<8x128xf32> -> vector<8x128xf32>
    %48 = arith.addf %42, %47 : vector<8x128xf32>
    %c0_51 = arith.constant 0 : index
    %c0_52 = arith.constant 0 : index
    %c0_53 = arith.constant 0 : index
    %c22 = arith.constant 22 : index
    %49 = vector.load %arg1[%c0_51, %c0_52, %c0_53, %c22] : memref<1x1x8x150xbf16, #tpu.memory_space<vmem>>, vector<1x1x8x128xbf16>
    %50 = vector.shape_cast %49 : vector<1x1x8x128xbf16> to vector<8x128xbf16>
    %c8 = arith.constant 8 : index
    %c0_54 = arith.constant 0 : index
    %c0_55 = arith.constant 0 : index
    %51 = vector.load %arg2[%c8, %c0_54, %c0_55] : memref<9x8x8xbf16, #tpu.memory_space<vmem>>, vector<1x8x8xbf16>
    %52 = vector.shape_cast %51 : vector<1x8x8xbf16> to vector<8x8xbf16>
    %cst_56 = arith.constant dense<0.000000e+00> : vector<8x128xf32>
    %53 = tpu.matmul %52, %50, %cst_56 {dimension_numbers = #tpu.dot_dimension_numbers<[1], [0], [0], [1], [0, 0, 1, 1], [], []>} : vector<8x8xbf16>, vector<8x128xbf16>, vector<8x128xf32> -> vector<8x128xf32>
    %54 = arith.addf %48, %53 : vector<8x128xf32>
    %c0_57 = arith.constant 0 : index
    %c0_58 = arith.constant 0 : index
    %55 = vector.load %arg3[%c0_57, %c0_58] : memref<8x1xf32, #tpu.memory_space<vmem>>, vector<8x1xf32>
    %56 = vector.broadcast %55 : vector<8x1xf32> to vector<8x128xf32>
    %57 = arith.addf %54, %56 : vector<8x128xf32>
    %c0_59 = arith.constant 0 : index
    %c0_60 = arith.constant 0 : index
    %c0_61 = arith.constant 0 : index
    %58 = vector.load %arg4[%c0_59, %c0_60, %c0_61] : memref<1x8x128xbf16, #tpu.memory_space<vmem>>, vector<1x8x128xbf16>
    %59 = vector.shape_cast %58 : vector<1x8x128xbf16> to vector<8x128xbf16>
    %60 = arith.extf %59 : vector<8x128xbf16> to vector<8x128xf32>
    %61 = arith.addf %57, %60 : vector<8x128xf32>
    %62 = arith.truncf %61 : vector<8x128xf32> to vector<8x128xbf16>
    %c0_62 = arith.constant 0 : index
    %c0_63 = arith.constant 0 : index
    %c0_64 = arith.constant 0 : index
    %63 = vector.load %arg5[%c0_62, %c0_63, %c0_64] : memref<1x8x128xbf16, #tpu.memory_space<vmem>>, vector<1x8x128xbf16>
    %64 = vector.shape_cast %63 : vector<1x8x128xbf16> to vector<8x128xbf16>
    %65 = vector.shape_cast %62 : vector<8x128xbf16> to vector<1x8x128xbf16>
    tpu.vector_store %arg5[%c0_62, %c0_63, %c0_64], %65 {strides = array<i32>} : memref<1x8x128xbf16, #tpu.memory_space<vmem>>, vector<1x8x128xbf16>,
    return
  }
  func.func @transform_0(%arg0: i32) -> (i32, i32, i32, i32) {
    %c0_i32 = arith.constant 0 : i32
    %c0_i32_0 = arith.constant 0 : i32
    %c0_i32_1 = arith.constant 0 : i32
    %c0_i32_2 = arith.constant 0 : i32
    return %arg0, %c0_i32, %c0_i32_0, %c0_i32_1 : i32, i32, i32, i32
  }
  func.func @transform_1(%arg0: i32) -> (i32, i32, i32) {
    %c0_i32 = arith.constant 0 : i32
    %c0_i32_0 = arith.constant 0 : i32
    %c0_i32_1 = arith.constant 0 : i32
    %c0_i32_2 = arith.constant 0 : i32
    return %c0_i32, %c0_i32_0, %c0_i32_1 : i32, i32, i32
  }
  func.func @transform_2(%arg0: i32) -> (i32, i32) {
    %c0_i32 = arith.constant 0 : i32
    %c0_i32_0 = arith.constant 0 : i32
    %c0_i32_1 = arith.constant 0 : i32
    return %c0_i32, %c0_i32_0 : i32, i32
  }
  func.func @transform_3(%arg0: i32) -> (i32, i32, i32) {
    %c0_i32 = arith.constant 0 : i32
    %c0_i32_0 = arith.constant 0 : i32
    %c0_i32_1 = arith.constant 0 : i32
    return %arg0, %c0_i32, %c0_i32_0 : i32, i32, i32
  }
  func.func @transform_4(%arg0: i32) -> (i32, i32, i32) {
    %c0_i32 = arith.constant 0 : i32
    %c0_i32_0 = arith.constant 0 : i32
    %c0_i32_1 = arith.constant 0 : i32
    return %arg0, %c0_i32, %c0_i32_0 : i32, i32, i32
  }
}

module attributes {stable_mosaic.version = 11 : i64} {
  func.func @_conv_tap_kernel_res(%arg0: i32, %arg1: memref<1x1x8x150xbf16, #tpu.memory_space<vmem>>, %arg2: memref<9x8x8xbf16, #tpu.memory_space<vmem>>, %arg3: memref<8x1xf32, #tpu.memory_space<vmem>>, %arg4: memref<1x8x128xbf16, #tpu.memory_space<vmem>>, %arg5: memref<1x8x128xbf16, #tpu.memory_space<vmem>>) attributes {dimension_semantics = [#tpu.dimension_semantics<parallel>], iteration_bounds = array<i64: 2>, scalar_prefetch = 0 : i64, scratch_operands = 0 : i64, tpu.core_type = #tpu.core_type<tc>, window_params = [{transform_indices = @transform_0, window_bounds = array<i64: 1, 1, 8, 150>}, {pipeline_mode = #tpu.pipeline_mode<synchronous>, transform_indices = @transform_1, window_bounds = array<i64: 9, 8, 8>}, {pipeline_mode = #tpu.pipeline_mode<synchronous>, transform_indices = @transform_2, window_bounds = array<i64: 8, 1>}, {transform_indices = @transform_3, window_bounds = array<i64: 1, 8, 128>}, {transform_indices = @transform_4, window_bounds = array<i64: 1, 8, 128>}]} {
    %cst = arith.constant 0.000000e+00 : f32
    %0 = vector.broadcast %cst : f32 to vector<8x128xf32>
    %c0 = arith.constant 0 : index
    %c0_0 = arith.constant 0 : index
    %c0_1 = arith.constant 0 : index
    %c0_2 = arith.constant 0 : index
    %1 = vector.load %arg1[%c0, %c0_0, %c0_1, %c0_2] : memref<1x1x8x150xbf16, #tpu.memory_space<vmem>>, vector<1x1x8x128xbf16>
    %2 = vector.shape_cast %1 : vector<1x1x8x128xbf16> to vector<8x128xbf16>
    %c0_3 = arith.constant 0 : index
    %c0_4 = arith.constant 0 : index
    %c0_5 = arith.constant 0 : index
    %3 = vector.load %arg2[%c0_3, %c0_4, %c0_5] : memref<9x8x8xbf16, #tpu.memory_space<vmem>>, vector<1x8x8xbf16>
    %4 = vector.shape_cast %3 : vector<1x8x8xbf16> to vector<8x8xbf16>
    %cst_6 = arith.constant dense<0.000000e+00> : vector<8x128xf32>
    %5 = tpu.matmul %4, %2, %cst_6 {dimension_numbers = #tpu.dot_dimension_numbers<[1], [0], [0], [1], [0, 0, 1, 1], [], []>} : vector<8x8xbf16>, vector<8x128xbf16>, vector<8x128xf32> -> vector<8x128xf32>
    %6 = arith.addf %0, %5 : vector<8x128xf32>
    %c0_7 = arith.constant 0 : index
    %c0_8 = arith.constant 0 : index
    %c0_9 = arith.constant 0 : index
    %c1 = arith.constant 1 : index
    %7 = vector.load %arg1[%c0_7, %c0_8, %c0_9, %c1] : memref<1x1x8x150xbf16, #tpu.memory_space<vmem>>, vector<1x1x8x128xbf16>
    %8 = vector.shape_cast %7 : vector<1x1x8x128xbf16> to vector<8x128xbf16>
    %c1_10 = arith.constant 1 : index
    %c0_11 = arith.constant 0 : index
    %c0_12 = arith.constant 0 : index
    %9 = vector.load %arg2[%c1_10, %c0_11, %c0_12] : memref<9x8x8xbf16, #tpu.memory_space<vmem>>, vector<1x8x8xbf16>
    %10 = vector.shape_cast %9 : vector<1x8x8xbf16> to vector<8x8xbf16>
    %cst_13 = arith.constant dense<0.000000e+00> : vector<8x128xf32>
    %11 = tpu.matmul %10, %8, %cst_13 {dimension_numbers = #tpu.dot_dimension_numbers<[1], [0], [0], [1], [0, 0, 1, 1], [], []>} : vector<8x8xbf16>, vector<8x128xbf16>, vector<8x128xf32> -> vector<8x128xf32>
    %12 = arith.addf %6, %11 : vector<8x128xf32>
    %c0_14 = arith.constant 0 : index
    %c0_15 = arith.constant 0 : index
    %c0_16 = arith.constant 0 : index
    %c2 = arith.constant 2 : index
    %13 = vector.load %arg1[%c0_14, %c0_15, %c0_16, %c2] : memref<1x1x8x150xbf16, #tpu.memory_space<vmem>>, vector<1x1x8x128xbf16>
    %14 = vector.shape_cast %13 : vector<1x1x8x128xbf16> to vector<8x128xbf16>
    %c2_17 = arith.constant 2 : index
    %c0_18 = arith.constant 0 : index
    %c0_19 = arith.constant 0 : index
    %15 = vector.load %arg2[%c2_17, %c0_18, %c0_19] : memref<9x8x8xbf16, #tpu.memory_space<vmem>>, vector<1x8x8xbf16>
    %16 = vector.shape_cast %15 : vector<1x8x8xbf16> to vector<8x8xbf16>
    %cst_20 = arith.constant dense<0.000000e+00> : vector<8x128xf32>
    %17 = tpu.matmul %16, %14, %cst_20 {dimension_numbers = #tpu.dot_dimension_numbers<[1], [0], [0], [1], [0, 0, 1, 1], [], []>} : vector<8x8xbf16>, vector<8x128xbf16>, vector<8x128xf32> -> vector<8x128xf32>
    %18 = arith.addf %12, %17 : vector<8x128xf32>
    %c0_21 = arith.constant 0 : index
    %c0_22 = arith.constant 0 : index
    %c0_23 = arith.constant 0 : index
    %c10 = arith.constant 10 : index
    %19 = vector.load %arg1[%c0_21, %c0_22, %c0_23, %c10] : memref<1x1x8x150xbf16, #tpu.memory_space<vmem>>, vector<1x1x8x128xbf16>
    %20 = vector.shape_cast %19 : vector<1x1x8x128xbf16> to vector<8x128xbf16>
    %c3 = arith.constant 3 : index
    %c0_24 = arith.constant 0 : index
    %c0_25 = arith.constant 0 : index
    %21 = vector.load %arg2[%c3, %c0_24, %c0_25] : memref<9x8x8xbf16, #tpu.memory_space<vmem>>, vector<1x8x8xbf16>
    %22 = vector.shape_cast %21 : vector<1x8x8xbf16> to vector<8x8xbf16>
    %cst_26 = arith.constant dense<0.000000e+00> : vector<8x128xf32>
    %23 = tpu.matmul %22, %20, %cst_26 {dimension_numbers = #tpu.dot_dimension_numbers<[1], [0], [0], [1], [0, 0, 1, 1], [], []>} : vector<8x8xbf16>, vector<8x128xbf16>, vector<8x128xf32> -> vector<8x128xf32>
    %24 = arith.addf %18, %23 : vector<8x128xf32>
    %c0_27 = arith.constant 0 : index
    %c0_28 = arith.constant 0 : index
    %c0_29 = arith.constant 0 : index
    %c11 = arith.constant 11 : index
    %25 = vector.load %arg1[%c0_27, %c0_28, %c0_29, %c11] : memref<1x1x8x150xbf16, #tpu.memory_space<vmem>>, vector<1x1x8x128xbf16>
    %26 = vector.shape_cast %25 : vector<1x1x8x128xbf16> to vector<8x128xbf16>
    %c4 = arith.constant 4 : index
    %c0_30 = arith.constant 0 : index
    %c0_31 = arith.constant 0 : index
    %27 = vector.load %arg2[%c4, %c0_30, %c0_31] : memref<9x8x8xbf16, #tpu.memory_space<vmem>>, vector<1x8x8xbf16>
    %28 = vector.shape_cast %27 : vector<1x8x8xbf16> to vector<8x8xbf16>
    %cst_32 = arith.constant dense<0.000000e+00> : vector<8x128xf32>
    %29 = tpu.matmul %28, %26, %cst_32 {dimension_numbers = #tpu.dot_dimension_numbers<[1], [0], [0], [1], [0, 0, 1, 1], [], []>} : vector<8x8xbf16>, vector<8x128xbf16>, vector<8x128xf32> -> vector<8x128xf32>
    %30 = arith.addf %24, %29 : vector<8x128xf32>
    %c0_33 = arith.constant 0 : index
    %c0_34 = arith.constant 0 : index
    %c0_35 = arith.constant 0 : index
    %c12 = arith.constant 12 : index
    %31 = vector.load %arg1[%c0_33, %c0_34, %c0_35, %c12] : memref<1x1x8x150xbf16, #tpu.memory_space<vmem>>, vector<1x1x8x128xbf16>
    %32 = vector.shape_cast %31 : vector<1x1x8x128xbf16> to vector<8x128xbf16>
    %c5 = arith.constant 5 : index
    %c0_36 = arith.constant 0 : index
    %c0_37 = arith.constant 0 : index
    %33 = vector.load %arg2[%c5, %c0_36, %c0_37] : memref<9x8x8xbf16, #tpu.memory_space<vmem>>, vector<1x8x8xbf16>
    %34 = vector.shape_cast %33 : vector<1x8x8xbf16> to vector<8x8xbf16>
    %cst_38 = arith.constant dense<0.000000e+00> : vector<8x128xf32>
    %35 = tpu.matmul %34, %32, %cst_38 {dimension_numbers = #tpu.dot_dimension_numbers<[1], [0], [0], [1], [0, 0, 1, 1], [], []>} : vector<8x8xbf16>, vector<8x128xbf16>, vector<8x128xf32> -> vector<8x128xf32>
    %36 = arith.addf %30, %35 : vector<8x128xf32>
    %c0_39 = arith.constant 0 : index
    %c0_40 = arith.constant 0 : index
    %c0_41 = arith.constant 0 : index
    %c20 = arith.constant 20 : index
    %37 = vector.load %arg1[%c0_39, %c0_40, %c0_41, %c20] : memref<1x1x8x150xbf16, #tpu.memory_space<vmem>>, vector<1x1x8x128xbf16>
    %38 = vector.shape_cast %37 : vector<1x1x8x128xbf16> to vector<8x128xbf16>
    %c6 = arith.constant 6 : index
    %c0_42 = arith.constant 0 : index
    %c0_43 = arith.constant 0 : index
    %39 = vector.load %arg2[%c6, %c0_42, %c0_43] : memref<9x8x8xbf16, #tpu.memory_space<vmem>>, vector<1x8x8xbf16>
    %40 = vector.shape_cast %39 : vector<1x8x8xbf16> to vector<8x8xbf16>
    %cst_44 = arith.constant dense<0.000000e+00> : vector<8x128xf32>
    %41 = tpu.matmul %40, %38, %cst_44 {dimension_numbers = #tpu.dot_dimension_numbers<[1], [0], [0], [1], [0, 0, 1, 1], [], []>} : vector<8x8xbf16>, vector<8x128xbf16>, vector<8x128xf32> -> vector<8x128xf32>
    %42 = arith.addf %36, %41 : vector<8x128xf32>
    %c0_45 = arith.constant 0 : index
    %c0_46 = arith.constant 0 : index
    %c0_47 = arith.constant 0 : index
    %c21 = arith.constant 21 : index
    %43 = vector.load %arg1[%c0_45, %c0_46, %c0_47, %c21] : memref<1x1x8x150xbf16, #tpu.memory_space<vmem>>, vector<1x1x8x128xbf16>
    %44 = vector.shape_cast %43 : vector<1x1x8x128xbf16> to vector<8x128xbf16>
    %c7 = arith.constant 7 : index
    %c0_48 = arith.constant 0 : index
    %c0_49 = arith.constant 0 : index
    %45 = vector.load %arg2[%c7, %c0_48, %c0_49] : memref<9x8x8xbf16, #tpu.memory_space<vmem>>, vector<1x8x8xbf16>
    %46 = vector.shape_cast %45 : vector<1x8x8xbf16> to vector<8x8xbf16>
    %cst_50 = arith.constant dense<0.000000e+00> : vector<8x128xf32>
    %47 = tpu.matmul %46, %44, %cst_50 {dimension_numbers = #tpu.dot_dimension_numbers<[1], [0], [0], [1], [0, 0, 1, 1], [], []>} : vector<8x8xbf16>, vector<8x128xbf16>, vector<8x128xf32> -> vector<8x128xf32>
    %48 = arith.addf %42, %47 : vector<8x128xf32>
    %c0_51 = arith.constant 0 : index
    %c0_52 = arith.constant 0 : index
    %c0_53 = arith.constant 0 : index
    %c22 = arith.constant 22 : index
    %49 = vector.load %arg1[%c0_51, %c0_52, %c0_53, %c22] : memref<1x1x8x150xbf16, #tpu.memory_space<vmem>>, vector<1x1x8x128xbf16>
    %50 = vector.shape_cast %49 : vector<1x1x8x128xbf16> to vector<8x128xbf16>
    %c8 = arith.constant 8 : index
    %c0_54 = arith.constant 0 : index
    %c0_55 = arith.constant 0 : index
    %51 = vector.load %arg2[%c8, %c0_54, %c0_55] : memref<9x8x8xbf16, #tpu.memory_space<vmem>>, vector<1x8x8xbf16>
    %52 = vector.shape_cast %51 : vector<1x8x8xbf16> to vector<8x8xbf16>
    %cst_56 = arith.constant dense<0.000000e+00> : vector<8x128xf32>
    %53 = tpu.matmul %52, %50, %cst_56 {dimension_numbers = #tpu.dot_dimension_numbers<[1], [0], [0], [1], [0, 0, 1, 1], [], []>} : vector<8x8xbf16>, vector<8x128xbf16>, vector<8x128xf32> -> vector<8x128xf32>
    %54 = arith.addf %48, %53 : vector<8x128xf32>
    %c0_57 = arith.constant 0 : index
    %c0_58 = arith.constant 0 : index
    %55 = vector.load %arg3[%c0_57, %c0_58] : memref<8x1xf32, #tpu.memory_space<vmem>>, vector<8x1xf32>
    %56 = vector.broadcast %55 : vector<8x1xf32> to vector<8x128xf32>
    %57 = arith.addf %54, %56 : vector<8x128xf32>
    %c0_59 = arith.constant 0 : index
    %c0_60 = arith.constant 0 : index
    %c0_61 = arith.constant 0 : index
    %58 = vector.load %arg4[%c0_59, %c0_60, %c0_61] : memref<1x8x128xbf16, #tpu.memory_space<vmem>>, vector<1x8x128xbf16>
    %59 = vector.shape_cast %58 : vector<1x8x128xbf16> to vector<8x128xbf16>
    %60 = arith.extf %59 : vector<8x128xbf16> to vector<8x128xf32>
    %61 = arith.addf %57, %60 : vector<8x128xf32>
    %cst_62 = arith.constant 0.000000e+00 : f32
    %62 = vector.broadcast %cst_62 : f32 to vector<8x128xf32>
    %63 = arith.maximumf %61, %62 : vector<8x128xf32>
    %64 = arith.truncf %63 : vector<8x128xf32> to vector<8x128xbf16>
    %c0_63 = arith.constant 0 : index
    %c0_64 = arith.constant 0 : index
    %c0_65 = arith.constant 0 : index
    %65 = vector.load %arg5[%c0_63, %c0_64, %c0_65] : memref<1x8x128xbf16, #tpu.memory_space<vmem>>, vector<1x8x128xbf16>
    %66 = vector.shape_cast %65 : vector<1x8x128xbf16> to vector<8x128xbf16>
    %67 = vector.shape_cast %64 : vector<8x128xbf16> to vector<1x8x128xbf16>
    tpu.vector_store %arg5[%c0_63, %c0_64, %c0_65], %67 {strides = array<i32>} : memref<1x8x128xbf16, #tpu.memory_space<vmem>>, vector<1x8x128xbf16>,
    return
  }
  func.func @transform_0(%arg0: i32) -> (i32, i32, i32, i32) {
    %c0_i32 = arith.constant 0 : i32
    %c0_i32_0 = arith.constant 0 : i32
    %c0_i32_1 = arith.constant 0 : i32
    %c0_i32_2 = arith.constant 0 : i32
    return %arg0, %c0_i32, %c0_i32_0, %c0_i32_1 : i32, i32, i32, i32
  }
  func.func @transform_1(%arg0: i32) -> (i32, i32, i32) {
    %c0_i32 = arith.constant 0 : i32
    %c0_i32_0 = arith.constant 0 : i32
    %c0_i32_1 = arith.constant 0 : i32
    %c0_i32_2 = arith.constant 0 : i32
    return %c0_i32, %c0_i32_0, %c0_i32_1 : i32, i32, i32
  }
  func.func @transform_2(%arg0: i32) -> (i32, i32) {
    %c0_i32 = arith.constant 0 : i32
    %c0_i32_0 = arith.constant 0 : i32
    %c0_i32_1 = arith.constant 0 : i32
    return %c0_i32, %c0_i32_0 : i32, i32
  }
  func.func @transform_3(%arg0: i32) -> (i32, i32, i32) {
    %c0_i32 = arith.constant 0 : i32
    %c0_i32_0 = arith.constant 0 : i32
    %c0_i32_1 = arith.constant 0 : i32
    return %arg0, %c0_i32, %c0_i32_0 : i32, i32, i32
  }
  func.func @transform_4(%arg0: i32) -> (i32, i32, i32) {
    %c0_i32 = arith.constant 0 : i32
    %c0_i32_0 = arith.constant 0 : i32
    %c0_i32_1 = arith.constant 0 : i32
    return %arg0, %c0_i32, %c0_i32_0 : i32, i32, i32
  }
}

module attributes {stable_mosaic.version = 11 : i64} {
  func.func @_conv_tap_kernel(%arg0: i32, %arg1: memref<1x1x8x150xbf16, #tpu.memory_space<vmem>>, %arg2: memref<9x8x8xbf16, #tpu.memory_space<vmem>>, %arg3: memref<8x1xf32, #tpu.memory_space<vmem>>, %arg4: memref<1x8x128xbf16, #tpu.memory_space<vmem>>) attributes {dimension_semantics = [#tpu.dimension_semantics<parallel>], iteration_bounds = array<i64: 2>, scalar_prefetch = 0 : i64, scratch_operands = 0 : i64, tpu.core_type = #tpu.core_type<tc>, window_params = [{transform_indices = @transform_0, window_bounds = array<i64: 1, 1, 8, 150>}, {pipeline_mode = #tpu.pipeline_mode<synchronous>, transform_indices = @transform_1, window_bounds = array<i64: 9, 8, 8>}, {pipeline_mode = #tpu.pipeline_mode<synchronous>, transform_indices = @transform_2, window_bounds = array<i64: 8, 1>}, {transform_indices = @transform_3, window_bounds = array<i64: 1, 8, 128>}]} {
    %cst = arith.constant 0.000000e+00 : f32
    %0 = vector.broadcast %cst : f32 to vector<8x128xf32>
    %c0 = arith.constant 0 : index
    %c0_0 = arith.constant 0 : index
    %c0_1 = arith.constant 0 : index
    %c0_2 = arith.constant 0 : index
    %1 = vector.load %arg1[%c0, %c0_0, %c0_1, %c0_2] : memref<1x1x8x150xbf16, #tpu.memory_space<vmem>>, vector<1x1x8x128xbf16>
    %2 = vector.shape_cast %1 : vector<1x1x8x128xbf16> to vector<8x128xbf16>
    %c0_3 = arith.constant 0 : index
    %c0_4 = arith.constant 0 : index
    %c0_5 = arith.constant 0 : index
    %3 = vector.load %arg2[%c0_3, %c0_4, %c0_5] : memref<9x8x8xbf16, #tpu.memory_space<vmem>>, vector<1x8x8xbf16>
    %4 = vector.shape_cast %3 : vector<1x8x8xbf16> to vector<8x8xbf16>
    %cst_6 = arith.constant dense<0.000000e+00> : vector<8x128xf32>
    %5 = tpu.matmul %4, %2, %cst_6 {dimension_numbers = #tpu.dot_dimension_numbers<[1], [0], [0], [1], [0, 0, 1, 1], [], []>} : vector<8x8xbf16>, vector<8x128xbf16>, vector<8x128xf32> -> vector<8x128xf32>
    %6 = arith.addf %0, %5 : vector<8x128xf32>
    %c0_7 = arith.constant 0 : index
    %c0_8 = arith.constant 0 : index
    %c0_9 = arith.constant 0 : index
    %c1 = arith.constant 1 : index
    %7 = vector.load %arg1[%c0_7, %c0_8, %c0_9, %c1] : memref<1x1x8x150xbf16, #tpu.memory_space<vmem>>, vector<1x1x8x128xbf16>
    %8 = vector.shape_cast %7 : vector<1x1x8x128xbf16> to vector<8x128xbf16>
    %c1_10 = arith.constant 1 : index
    %c0_11 = arith.constant 0 : index
    %c0_12 = arith.constant 0 : index
    %9 = vector.load %arg2[%c1_10, %c0_11, %c0_12] : memref<9x8x8xbf16, #tpu.memory_space<vmem>>, vector<1x8x8xbf16>
    %10 = vector.shape_cast %9 : vector<1x8x8xbf16> to vector<8x8xbf16>
    %cst_13 = arith.constant dense<0.000000e+00> : vector<8x128xf32>
    %11 = tpu.matmul %10, %8, %cst_13 {dimension_numbers = #tpu.dot_dimension_numbers<[1], [0], [0], [1], [0, 0, 1, 1], [], []>} : vector<8x8xbf16>, vector<8x128xbf16>, vector<8x128xf32> -> vector<8x128xf32>
    %12 = arith.addf %6, %11 : vector<8x128xf32>
    %c0_14 = arith.constant 0 : index
    %c0_15 = arith.constant 0 : index
    %c0_16 = arith.constant 0 : index
    %c2 = arith.constant 2 : index
    %13 = vector.load %arg1[%c0_14, %c0_15, %c0_16, %c2] : memref<1x1x8x150xbf16, #tpu.memory_space<vmem>>, vector<1x1x8x128xbf16>
    %14 = vector.shape_cast %13 : vector<1x1x8x128xbf16> to vector<8x128xbf16>
    %c2_17 = arith.constant 2 : index
    %c0_18 = arith.constant 0 : index
    %c0_19 = arith.constant 0 : index
    %15 = vector.load %arg2[%c2_17, %c0_18, %c0_19] : memref<9x8x8xbf16, #tpu.memory_space<vmem>>, vector<1x8x8xbf16>
    %16 = vector.shape_cast %15 : vector<1x8x8xbf16> to vector<8x8xbf16>
    %cst_20 = arith.constant dense<0.000000e+00> : vector<8x128xf32>
    %17 = tpu.matmul %16, %14, %cst_20 {dimension_numbers = #tpu.dot_dimension_numbers<[1], [0], [0], [1], [0, 0, 1, 1], [], []>} : vector<8x8xbf16>, vector<8x128xbf16>, vector<8x128xf32> -> vector<8x128xf32>
    %18 = arith.addf %12, %17 : vector<8x128xf32>
    %c0_21 = arith.constant 0 : index
    %c0_22 = arith.constant 0 : index
    %c0_23 = arith.constant 0 : index
    %c10 = arith.constant 10 : index
    %19 = vector.load %arg1[%c0_21, %c0_22, %c0_23, %c10] : memref<1x1x8x150xbf16, #tpu.memory_space<vmem>>, vector<1x1x8x128xbf16>
    %20 = vector.shape_cast %19 : vector<1x1x8x128xbf16> to vector<8x128xbf16>
    %c3 = arith.constant 3 : index
    %c0_24 = arith.constant 0 : index
    %c0_25 = arith.constant 0 : index
    %21 = vector.load %arg2[%c3, %c0_24, %c0_25] : memref<9x8x8xbf16, #tpu.memory_space<vmem>>, vector<1x8x8xbf16>
    %22 = vector.shape_cast %21 : vector<1x8x8xbf16> to vector<8x8xbf16>
    %cst_26 = arith.constant dense<0.000000e+00> : vector<8x128xf32>
    %23 = tpu.matmul %22, %20, %cst_26 {dimension_numbers = #tpu.dot_dimension_numbers<[1], [0], [0], [1], [0, 0, 1, 1], [], []>} : vector<8x8xbf16>, vector<8x128xbf16>, vector<8x128xf32> -> vector<8x128xf32>
    %24 = arith.addf %18, %23 : vector<8x128xf32>
    %c0_27 = arith.constant 0 : index
    %c0_28 = arith.constant 0 : index
    %c0_29 = arith.constant 0 : index
    %c11 = arith.constant 11 : index
    %25 = vector.load %arg1[%c0_27, %c0_28, %c0_29, %c11] : memref<1x1x8x150xbf16, #tpu.memory_space<vmem>>, vector<1x1x8x128xbf16>
    %26 = vector.shape_cast %25 : vector<1x1x8x128xbf16> to vector<8x128xbf16>
    %c4 = arith.constant 4 : index
    %c0_30 = arith.constant 0 : index
    %c0_31 = arith.constant 0 : index
    %27 = vector.load %arg2[%c4, %c0_30, %c0_31] : memref<9x8x8xbf16, #tpu.memory_space<vmem>>, vector<1x8x8xbf16>
    %28 = vector.shape_cast %27 : vector<1x8x8xbf16> to vector<8x8xbf16>
    %cst_32 = arith.constant dense<0.000000e+00> : vector<8x128xf32>
    %29 = tpu.matmul %28, %26, %cst_32 {dimension_numbers = #tpu.dot_dimension_numbers<[1], [0], [0], [1], [0, 0, 1, 1], [], []>} : vector<8x8xbf16>, vector<8x128xbf16>, vector<8x128xf32> -> vector<8x128xf32>
    %30 = arith.addf %24, %29 : vector<8x128xf32>
    %c0_33 = arith.constant 0 : index
    %c0_34 = arith.constant 0 : index
    %c0_35 = arith.constant 0 : index
    %c12 = arith.constant 12 : index
    %31 = vector.load %arg1[%c0_33, %c0_34, %c0_35, %c12] : memref<1x1x8x150xbf16, #tpu.memory_space<vmem>>, vector<1x1x8x128xbf16>
    %32 = vector.shape_cast %31 : vector<1x1x8x128xbf16> to vector<8x128xbf16>
    %c5 = arith.constant 5 : index
    %c0_36 = arith.constant 0 : index
    %c0_37 = arith.constant 0 : index
    %33 = vector.load %arg2[%c5, %c0_36, %c0_37] : memref<9x8x8xbf16, #tpu.memory_space<vmem>>, vector<1x8x8xbf16>
    %34 = vector.shape_cast %33 : vector<1x8x8xbf16> to vector<8x8xbf16>
    %cst_38 = arith.constant dense<0.000000e+00> : vector<8x128xf32>
    %35 = tpu.matmul %34, %32, %cst_38 {dimension_numbers = #tpu.dot_dimension_numbers<[1], [0], [0], [1], [0, 0, 1, 1], [], []>} : vector<8x8xbf16>, vector<8x128xbf16>, vector<8x128xf32> -> vector<8x128xf32>
    %36 = arith.addf %30, %35 : vector<8x128xf32>
    %c0_39 = arith.constant 0 : index
    %c0_40 = arith.constant 0 : index
    %c0_41 = arith.constant 0 : index
    %c20 = arith.constant 20 : index
    %37 = vector.load %arg1[%c0_39, %c0_40, %c0_41, %c20] : memref<1x1x8x150xbf16, #tpu.memory_space<vmem>>, vector<1x1x8x128xbf16>
    %38 = vector.shape_cast %37 : vector<1x1x8x128xbf16> to vector<8x128xbf16>
    %c6 = arith.constant 6 : index
    %c0_42 = arith.constant 0 : index
    %c0_43 = arith.constant 0 : index
    %39 = vector.load %arg2[%c6, %c0_42, %c0_43] : memref<9x8x8xbf16, #tpu.memory_space<vmem>>, vector<1x8x8xbf16>
    %40 = vector.shape_cast %39 : vector<1x8x8xbf16> to vector<8x8xbf16>
    %cst_44 = arith.constant dense<0.000000e+00> : vector<8x128xf32>
    %41 = tpu.matmul %40, %38, %cst_44 {dimension_numbers = #tpu.dot_dimension_numbers<[1], [0], [0], [1], [0, 0, 1, 1], [], []>} : vector<8x8xbf16>, vector<8x128xbf16>, vector<8x128xf32> -> vector<8x128xf32>
    %42 = arith.addf %36, %41 : vector<8x128xf32>
    %c0_45 = arith.constant 0 : index
    %c0_46 = arith.constant 0 : index
    %c0_47 = arith.constant 0 : index
    %c21 = arith.constant 21 : index
    %43 = vector.load %arg1[%c0_45, %c0_46, %c0_47, %c21] : memref<1x1x8x150xbf16, #tpu.memory_space<vmem>>, vector<1x1x8x128xbf16>
    %44 = vector.shape_cast %43 : vector<1x1x8x128xbf16> to vector<8x128xbf16>
    %c7 = arith.constant 7 : index
    %c0_48 = arith.constant 0 : index
    %c0_49 = arith.constant 0 : index
    %45 = vector.load %arg2[%c7, %c0_48, %c0_49] : memref<9x8x8xbf16, #tpu.memory_space<vmem>>, vector<1x8x8xbf16>
    %46 = vector.shape_cast %45 : vector<1x8x8xbf16> to vector<8x8xbf16>
    %cst_50 = arith.constant dense<0.000000e+00> : vector<8x128xf32>
    %47 = tpu.matmul %46, %44, %cst_50 {dimension_numbers = #tpu.dot_dimension_numbers<[1], [0], [0], [1], [0, 0, 1, 1], [], []>} : vector<8x8xbf16>, vector<8x128xbf16>, vector<8x128xf32> -> vector<8x128xf32>
    %48 = arith.addf %42, %47 : vector<8x128xf32>
    %c0_51 = arith.constant 0 : index
    %c0_52 = arith.constant 0 : index
    %c0_53 = arith.constant 0 : index
    %c22 = arith.constant 22 : index
    %49 = vector.load %arg1[%c0_51, %c0_52, %c0_53, %c22] : memref<1x1x8x150xbf16, #tpu.memory_space<vmem>>, vector<1x1x8x128xbf16>
    %50 = vector.shape_cast %49 : vector<1x1x8x128xbf16> to vector<8x128xbf16>
    %c8 = arith.constant 8 : index
    %c0_54 = arith.constant 0 : index
    %c0_55 = arith.constant 0 : index
    %51 = vector.load %arg2[%c8, %c0_54, %c0_55] : memref<9x8x8xbf16, #tpu.memory_space<vmem>>, vector<1x8x8xbf16>
    %52 = vector.shape_cast %51 : vector<1x8x8xbf16> to vector<8x8xbf16>
    %cst_56 = arith.constant dense<0.000000e+00> : vector<8x128xf32>
    %53 = tpu.matmul %52, %50, %cst_56 {dimension_numbers = #tpu.dot_dimension_numbers<[1], [0], [0], [1], [0, 0, 1, 1], [], []>} : vector<8x8xbf16>, vector<8x128xbf16>, vector<8x128xf32> -> vector<8x128xf32>
    %54 = arith.addf %48, %53 : vector<8x128xf32>
    %c0_57 = arith.constant 0 : index
    %c0_58 = arith.constant 0 : index
    %55 = vector.load %arg3[%c0_57, %c0_58] : memref<8x1xf32, #tpu.memory_space<vmem>>, vector<8x1xf32>
    %56 = vector.broadcast %55 : vector<8x1xf32> to vector<8x128xf32>
    %57 = arith.addf %54, %56 : vector<8x128xf32>
    %58 = arith.truncf %57 : vector<8x128xf32> to vector<8x128xbf16>
    %c0_59 = arith.constant 0 : index
    %c0_60 = arith.constant 0 : index
    %c0_61 = arith.constant 0 : index
    %59 = vector.load %arg4[%c0_59, %c0_60, %c0_61] : memref<1x8x128xbf16, #tpu.memory_space<vmem>>, vector<1x8x128xbf16>
    %60 = vector.shape_cast %59 : vector<1x8x128xbf16> to vector<8x128xbf16>
    %61 = vector.shape_cast %58 : vector<8x128xbf16> to vector<1x8x128xbf16>
    tpu.vector_store %arg4[%c0_59, %c0_60, %c0_61], %61 {strides = array<i32>} : memref<1x8x128xbf16, #tpu.memory_space<vmem>>, vector<1x8x128xbf16>,
    return
  }
  func.func @transform_0(%arg0: i32) -> (i32, i32, i32, i32) {
    %c0_i32 = arith.constant 0 : i32
    %c0_i32_0 = arith.constant 0 : i32
    %c0_i32_1 = arith.constant 0 : i32
    %c0_i32_2 = arith.constant 0 : i32
    return %arg0, %c0_i32, %c0_i32_0, %c0_i32_1 : i32, i32, i32, i32
  }
  func.func @transform_1(%arg0: i32) -> (i32, i32, i32) {
    %c0_i32 = arith.constant 0 : i32
    %c0_i32_0 = arith.constant 0 : i32
    %c0_i32_1 = arith.constant 0 : i32
    %c0_i32_2 = arith.constant 0 : i32
    return %c0_i32, %c0_i32_0, %c0_i32_1 : i32, i32, i32
  }
  func.func @transform_2(%arg0: i32) -> (i32, i32) {
    %c0_i32 = arith.constant 0 : i32
    %c0_i32_0 = arith.constant 0 : i32
    %c0_i32_1 = arith.constant 0 : i32
    return %c0_i32, %c0_i32_0 : i32, i32
  }
  func.func @transform_3(%arg0: i32) -> (i32, i32, i32) {
    %c0_i32 = arith.constant 0 : i32
    %c0_i32_0 = arith.constant 0 : i32
    %c0_i32_1 = arith.constant 0 : i32
    return %arg0, %c0_i32, %c0_i32_0 : i32, i32, i32
  }
}

</mosaic_0001>

<bundles_post_ra>
// kernel: feature_extraction_fwd.19
= control target key start
LH: loop header
LB: loop body
LE: loop exit
PB: predicated region body
PF: predicated region fallthrough
CT: control target
= control target key end

     0   :  { %s1541_s12 = smov 0   ;;  %s1764_s0 = inlined_call_operand.vmem [shape: bf16[2,4,3,402], index: 0, kind: input, shape index: {}]   ;;  %s1765_s1 = inlined_call_operand.vmem [shape: bf16[9,8,3], index: 1, kind: input, shape index: {}]   ;;  %s1766_s2 = inlined_call_operand.vmem [shape: f32[8,1], index: 2, kind: input, shape index: {}]   ;;  %s1767_s3 = inlined_call_operand.vmem [shape: bf16[2,8,384], index: 3, kind: output, shape index: {}]  }
   0x1 LB: > { %s1362_s13 = sadd.s32 4294967295, %s1511_s12   ;;  %p1366_p0 = scmp.ge.s32.totalorder %s1511_s12, 1  ;;  %s1511_s12 = sphi %s1541_s12, %s13_s12  }
   0x2   : > { %p137_p1 = scmp.lt.s32.totalorder %s1511_s12, 3 }
   0x4   : > { %p138_p2 = pnand %p1366_p0, %p137_p1 }
   0x5   : > { %p161_p3 = scmp.lt.s32.totalorder (!%p138_p2), %s1362_s13, 1  ;;  %v183_v0 = vlaneseq (!%p138_p2)  ;;  %v1513_v1 = vmov (!%p138_p2), 1983009808   ;;  %vm199_vm0 = vcmask (!%p138_p2), 1040384   ;;  %v1514_v4 = vmov (!%p138_p2), 0.0   ;;  %s1518_s18 = smov (!%p138_p2), 127  }
   0x6   : > { %141 = sbr.rel (%p138_p2) target bundleno = 417 (0x1a1), region = 32  ;;  %v181_v2 = vunpack.c.l.s4 (!%p138_p2), %v1513_v1  ;;  %1426 = vmatprep.subr.bf16.mxu1 (!%p138_p2), %v1514_v4  ;;  %v1515_v5 = vmov (!%p138_p2), 0   ;;  %vm1516_vm1 = vmmov (!%p138_p2), 0   ;;  %vm200_vm2 = vcmask (!%p138_p2), 1041408   ;;  %v1371_v40 = vld [vmem:[%s1765_s1 + $0x4] sm:$0xf] (!%p138_p2) }
   0x7   : > { %v184_v3 = vshrl.u32 (!%p138_p2), %v183_v0, 7  ;;  %244 = vmatprep.mubr.bf16.mxu0 (!%p138_p2), %v1515_v5  ;;  %1497 = vset.pattern.permute.xlu0 (!%p138_p2), %v1515_v5  ;;  %v1517_v8 = vmov (!%p138_p2), 65535   ;;  %vm195_vm3 = vcmask (!%p138_p2), 23552   ;;  %v173_v49 = vld [vmem:[%s1765_s1] sm:$0xf] (!%p138_p2)  ;;  %s1519_s23 = smov (!%p138_p2), 111  }
   0x8   : > { %v182_v6 = vunpack.c.0.s8 (!%p138_p2), %v181_v2  ;;  %1428 = vmatprep.mubr.msk.bf16.mxu1 (!%p138_p2), %vm1516_vm1, %v1514_v4  ;;  %v201_v9 = vsel (!%p138_p2), %vm199_vm0, 4294967295, %v1517_v8  ;;  %s1520_s24 = smov (!%p138_p2), 110   ;;  %v1280_v55 = vld [vmem:[%s1766_s2] sm:$0xff] (!%p138_p2)  ;;  %vm432_vm4 = vcmask (!%p138_p2), 1039360   ;;  %v1376_v8 = vld [vmem:[%s1765_s1 + $0x8] sm:$0xf] (!%p138_p2) }
   0x9   : > { %v1571_v16 = vsel (!%p138_p2), %vm200_vm2, %v201_v9, 0  ;;  %vm923_vm5 = vcmask (!%p138_p2), 908288   ;;  %vm1180_vm6 = vcmask (!%p138_p2), 900096  }
   0xa   : > { %v1562_v7 = vsub.s32 (!%p138_p2), %v182_v6, %v184_v3 }
   0xd   : > { %s1769_s13 = smov (!%p161_p3, %s1362_s13), 1 }
   0xe   : > { %s1405_s14 = sshll.u32 %s1769_s13, 5  ;;  %s1480_s16 = smul.u32 12, %s1769_s13 }
   0xf   : > { %s1560_s17 = scalar_lea.vmem %s1764_s0, %s1405_s14 }
  0x10   : > { %v403_v10 = vld [vmem:[%s1560_s17] sm:$0xff]  ;;  %v1387_v11 = vld [vmem:[%s1560_s17 + $0x10] sm:$0xff]  ;;  %v1370_v14 = vld [vmem:[%s1560_s17 + $0x8] sm:$0x3f]  ;;  %s170_s19 = scalar_lea.vmem %s1767_s3, %s1480_s16 }
  0x11   : > { %v1567_v12 = vrot.slane %v403_v10, %v1562_v7  ;;  %v407_v13 = vcombine.high %v403_v10, %v403_v10  ;;  %v186_v15 = vrot.slane %v1370_v14, %v1562_v7  ;;  %v179_v17 = vcombine.high %v1370_v14, %v1370_v14  ;;  %v172_v21 = vld [vmem:[%s1560_s17] sm:$0x3f]  ;;  %v1379_v22 = vld [vmem:[%s1560_s17 + $0x10] sm:$0x3f]  ;;  %v1383_v38 = vld [vmem:[%s1560_s17 + $0x18] sm:$0x3f] }
  0x12   : > { %v770_v20 = vcombine.high %v1387_v11, %v1387_v11  ;;  %v777_v23 = vrot.slane %v1387_v11, %v1562_v7  ;;  %v294_v28 = vcombine.high %v172_v21, %v172_v21  ;;  %v301_v30 = vrot.slane %v172_v21, %v1562_v7  ;;  %v1394_v48 = vld [vmem:[%s1560_s17 + $0x8] sm:$0xff] }
  0x13   : > { %424 = vrot.lane.b32.xlu1 %v1567_v12, %s1518_s18  ;;  %v1577_v18 = vcombine.high %v1567_v12, %v1567_v12  ;;  %v1580_v19 = vrot.slane %v407_v13, %v1562_v7  ;;  %v194_v24 = vcombine.high %v186_v15, %v186_v15  ;;  %v204_v26 = vand.u32 %v1571_v16, %v186_v15 }
  0x14   : > { %v193_v27 = vrot.slane %v179_v17, %v1562_v7  ;;  %v537_v31 = vcombine.high %v1379_v22, %v1379_v22  ;;  %v784_v32 = vrot.slane %v770_v20, %v1562_v7  ;;  %v308_v34 = vrot.slane %v294_v28, %v1562_v7 }
  0x15   : > { %426 = vrot.lane.b32.xlu0 %v1577_v18, %s1518_s18  ;;  %v1589_v25 = vcombine.high %v1580_v19, %v1580_v19  ;;  %v207_v29 = vand.u32 %v1571_v16, %v194_v24  ;;  %v1601_v35 = vrot.slane %v1379_v22, %v1562_v7  ;;  %v309_v36 = vcombine.high %v301_v30, %v301_v30 }
  0x16   : > { %v210_v33 = vand.u32 %v1571_v16, %v193_v27  ;;  %v1604_v37 = vrot.slane %v537_v31, %v1562_v7  ;;  %v785_v39 = vcombine.high %v777_v23, %v777_v23  ;;  %v314_v42 = vand.u32 %v301_v30, %v1571_v16 }
  0x17   : > { %430 = vrot.lane.b32.xlu1 %v1589_v25, %s1518_s18  ;;  %212 = vmatprep.subr.bf16.mxu0 %v207_v29  ;;  %v317_v41 = vand.u32 %v309_v36, %v1571_v16  ;;  %v654_v43 = vcombine.high %v1383_v38, %v1383_v38  ;;  %v1615_v44 = vrot.slane %v1383_v38, %v1562_v7  ;;  %v1384_v29 = vld [vmem:[%s1765_s1 + $0x10] sm:$0xf] }
  0x18   : > { %213 = vmatpush1.bf16.msra.mxu0 %v204_v26  ;;  %1427 = vmatpush3.bf16.msra.mxu1 %v210_v33  ;;  %v786_v45 = vcombine.high %v784_v32, %v784_v32  ;;  %v320_v46 = vand.u32 %v308_v34, %v1571_v16  ;;  %v1027_v50 = vcombine.high %v1394_v48, %v1394_v48 }
  0x19   : > { %428 = vrot.lane.b32.xlu0 %v1580_v19, %s1518_s18  ;;  %1432 = vmatprep.subr.bf16.mxu1 %v1514_v4  ;;  %v1622_v47 = vrot.slane %v654_v43, %v1562_v7  ;;  %v1034_v51 = vrot.slane %v1394_v48, %v1562_v7  ;;  %v552_v59 = vcombine.high %v1601_v35, %v1601_v35 }
  0x1a   : > { %322 = vmatprep.subr.bf16.mxu0 %v317_v41  ;;  %v1041_v52 = vrot.slane %v1027_v50, %v1562_v7  ;;  %v669_v7 = vcombine.high %v1615_v44, %v1615_v44  ;;  %v563_v9 = vand.u32 %v1604_v37, %v1571_v16  ;;  %v557_v11 = vand.u32 %v1601_v35, %v1571_v16 }
  0x1b   : > { %791 = vrot.lane.b32.xlu1 %v784_v32, %s1518_s18  ;;  %1372 = vmatmul.mubr.msk.bf16.vlgmr.msra.gmra.mrb[0].mxu0 %vm195_vm3, %v1371_v40  ;;  %v1042_v53 = vcombine.high %v1034_v51, %v1034_v51  ;;  %v560_v2 = vand.u32 %v552_v59, %v1571_v16  ;;  %v674_v21 = vand.u32 %v1615_v44, %v1571_v16  ;;  %v1398_v59 = vld [vmem:[%s1765_s1 + $0x20] sm:$0xf] }
  0x1c   : > { %1429 = vmatmul.mubr.msk.bf16.vlgmr.msra.gmra.mrb[0].mxu1 %vm195_vm3, %v1371_v40  ;;  %323 = vmatpush1.bf16.msra.mxu0 %v314_v42  ;;  %v1043_v54 = vcombine.high %v1041_v52, %v1041_v52  ;;  %v677_v13 = vand.u32 %v669_v7, %v1571_v16  ;;  %v1388_v40 = vld [vmem:[%s1765_s1 + $0x14] sm:$0xf] }
  0x1d   : > { %789 = vrot.lane.b32.xlu0 %v785_v39, %s1518_s18  ;;  %354 = vmatprep.mubr.bf16.mxu0 %v1515_v5 }
  0x1e   : > { %1433 = vmatpush3.bf16.msra.mxu1 %v320_v46  ;;  %1434 = vmatprep.mubr.msk.bf16.mxu1 %vm1516_vm1, %v1514_v4 }
  0x1f   : > { %793 = vrot.lane.b32.xlu1 %v786_v45, %s1518_s18  ;;  %1438 = vmatprep.subr.bf16.mxu1 %v1514_v4 }
  0x21   : > { %787 = vrot.lane.b32.xlu0 %v777_v23, %s1518_s18 }
  0x23   : > { %919 = vrot.lane.b32.xlu1 %v1580_v19, %s1519_s23  ;;  %1374 = vmatmul.mubr.msk.bf16.vlgmr.msra.gmra.mrb[4].mxu0 %vm195_vm3, %v173_v49 }
  0x24   : > { %1435 = vmatmul.mubr.msk.bf16.vlgmr.msra.gmra.mrb[4].mxu1 %vm195_vm3, %v173_v49  ;;  %480 = vmatprep.mubr.bf16.mxu0 %v1515_v5  ;;  %v1391_v49 = vld [vmem:[%s1765_s1 + $0x18] sm:$0xf] }
  0x25   : > { %917 = vrot.lane.b32.xlu0 %v1577_v18, %s1519_s23  ;;  %1440 = vmatprep.mubr.msk.bf16.mxu1 %vm1516_vm1, %v1514_v4 }
  0x27   : > { %921 = vrot.lane.b32.xlu1 %v1589_v25, %s1519_s23 }
  0x29   : > { %915 = vrot.lane.b32.xlu0 %v1567_v12, %s1519_s23 }
  0x2b   : > { %1048 = vrot.lane.b32.xlu1 %v1041_v52, %s1519_s23 }
  0x2d   : > { %1046 = vrot.lane.b32.xlu0 %v1042_v53, %s1519_s23 }
  0x2f   : > { %1050 = vrot.lane.b32.xlu1 %v1043_v54, %s1519_s23 }
  0x31   : > { %1044 = vrot.lane.b32.xlu0 %v1034_v51, %s1519_s23 }
  0x33   : > { %1176 = vrot.lane.b32.xlu1 %v1580_v19, %s1520_s24  ;;  %v680_v19 = vand.u32 %v1622_v47, %v1571_v16 }
  0x35   : > { %1174 = vrot.lane.b32.xlu0 %v1577_v18, %s1520_s24  ;;  %v1380_v18 = vld [vmem:[%s1765_s1 + $0xc] sm:$0xf] }
  0x37   : > { %1178 = vrot.lane.b32.xlu1 %v1589_v25, %s1520_s24 }
  0x39   : > { %1172 = vrot.lane.b32.xlu0 %v1567_v12, %s1520_s24 }
  0x3d   : > { %1283 = vperm.xlu0 %1497, %v1280_v55  }
  0x85   : > { %v425_v56 = vpop.permute.xlu1 %424 }
  0x87   : > { %v427_v57 = vpop.permute.xlu0 %426 }
  0x88   : > { %v433_v60 = vsel %vm432_vm4, %v425_v56, %v427_v57 }
  0x89   : > { %v431_v58 = vpop.permute.xlu1 %430  ;;  %v440_v6 = vand.u32 %v433_v60, %v1571_v16 }
  0x8b   : > { %v429_v61 = vpop.permute.xlu0 %428 }
  0x8c   : > { %v434_v62 = vsel %vm432_vm4, %v427_v57, %v429_v61  ;;  %v435_v63 = vsel %vm432_vm4, %v429_v61, %v431_v58  ;;  %v1395_v57 = vld [vmem:[%s1765_s1 + $0x1c] sm:$0xf] }
  0x8d   : > { %v443_v0 = vand.u32 %v434_v62, %v1571_v16  ;;  %v446_v1 = vand.u32 %v435_v63, %v1571_v16  ;;  %v792_v3 = vpop.permute.xlu1 %791 }
  0x8f   : > { %448 = vmatprep.subr.bf16.mxu0 %v443_v0  ;;  %1439 = vmatpush3.bf16.msra.mxu1 %v446_v1  ;;  %v790_v10 = vpop.permute.xlu0 %789 }
  0x90   : > { %449 = vmatpush1.bf16.msra.mxu0 %v440_v6  ;;  %1444 = vmatprep.subr.bf16.mxu1 %v1514_v4  ;;  %v796_v17 = vsel %vm432_vm4, %v790_v10, %v792_v3 }
  0x91   : > { %565 = vmatprep.subr.bf16.mxu0 %v560_v2  ;;  %v794_v12 = vpop.permute.xlu1 %793  ;;  %v805_v22 = vand.u32 %v796_v17, %v1571_v16 }
  0x92   : > { %1441 = vmatmul.mubr.msk.bf16.vlgmr.msra.gmra.mrb[8].mxu1 %vm195_vm3, %v1376_v8  ;;  %v797_v25 = vsel %vm432_vm4, %v792_v3, %v794_v12 }
  0x93   : > { %1377 = vmatmul.mubr.msk.bf16.vlgmr.msra.gmra.mrb[8].mxu0 %vm195_vm3, %v1376_v8  ;;  %1445 = vmatpush3.bf16.msra.mxu1 %v563_v9  ;;  %v788_v14 = vpop.permute.xlu0 %787  ;;  %v808_v28 = vand.u32 %v797_v25, %v1571_v16 }
  0x94   : > { %566 = vmatpush1.bf16.msra.mxu0 %v557_v11  ;;  %1446 = vmatprep.mubr.msk.bf16.mxu1 %vm1516_vm1, %v1514_v4  ;;  %v795_v26 = vsel %vm432_vm4, %v788_v14, %v790_v10 }
  0x95   : > { %597 = vmatprep.mubr.bf16.mxu0 %v1515_v5  ;;  %1450 = vmatprep.subr.bf16.mxu1 %v1514_v4  ;;  %v920_v15 = vpop.permute.xlu1 %919  ;;  %v802_v31 = vand.u32 %v795_v26, %v1571_v16 }
  0x96   : > { %682 = vmatprep.subr.bf16.mxu0 %v677_v13 }
  0x97   : > { %v918_v20 = vpop.permute.xlu0 %917 }
  0x98   : > { %v925_v27 = vsel %vm923_vm5, %v918_v20, %v920_v15 }
  0x99   : > { %v922_v23 = vpop.permute.xlu1 %921  ;;  %v934_v33 = vand.u32 %v925_v27, %v1571_v16 }
  0x9a   : > { %1447 = vmatmul.mubr.msk.bf16.vlgmr.msra.gmra.mrb[12].mxu1 %vm195_vm3, %v1380_v18  ;;  %v926_v34 = vsel %vm923_vm5, %v920_v15, %v922_v23 }
  0x9b   : > { %1381 = vmatmul.mubr.msk.bf16.vlgmr.msra.gmra.mrb[12].mxu0 %vm195_vm3, %v1380_v18  ;;  %1451 = vmatpush3.bf16.msra.mxu1 %v680_v19  ;;  %v916_v24 = vpop.permute.xlu0 %915  ;;  %v937_v39 = vand.u32 %v926_v34, %v1571_v16 }
  0x9c   : > { %683 = vmatpush1.bf16.msra.mxu0 %v674_v21  ;;  %1452 = vmatprep.mubr.msk.bf16.mxu1 %vm1516_vm1, %v1514_v4  ;;  %v924_v35 = vsel %vm923_vm5, %v916_v24, %v918_v20 }
  0x9d   : > { %714 = vmatprep.mubr.bf16.mxu0 %v1515_v5  ;;  %810 = vmatprep.subr.bf16.mxu0 %v805_v22  ;;  %v1049_v30 = vpop.permute.xlu1 %1048  ;;  %v931_v41 = vand.u32 %v924_v35, %v1571_v16 }
  0x9e   : > { %1456 = vmatprep.subr.bf16.mxu1 %v1514_v4 }
  0x9f   : > { %v1047_v32 = vpop.permute.xlu0 %1046 }
  0xa0   : > { %v1053_v37 = vsel %vm923_vm5, %v1047_v32, %v1049_v30 }
  0xa1   : > { %v1051_v36 = vpop.permute.xlu1 %1050  ;;  %v1062_v42 = vand.u32 %v1053_v37, %v1571_v16 }
  0xa2   : > { %1453 = vmatmul.mubr.msk.bf16.vlgmr.msra.gmra.mrb[16].mxu1 %vm195_vm3, %v1384_v29  ;;  %v1054_v44 = vsel %vm923_vm5, %v1049_v30, %v1051_v36 }
  0xa3   : > { %1385 = vmatmul.mubr.msk.bf16.vlgmr.msra.gmra.mrb[16].mxu0 %vm195_vm3, %v1384_v29  ;;  %1457 = vmatpush3.bf16.msra.mxu1 %v808_v28  ;;  %v1045_v38 = vpop.permute.xlu0 %1044  ;;  %v1065_v48 = vand.u32 %v1054_v44, %v1571_v16 }
  0xa4   : > { %811 = vmatpush1.bf16.msra.mxu0 %v802_v31  ;;  %1458 = vmatprep.mubr.msk.bf16.mxu1 %vm1516_vm1, %v1514_v4  ;;  %v1052_v46 = vsel %vm923_vm5, %v1045_v38, %v1047_v32 }
  0xa5   : > { %842 = vmatprep.mubr.bf16.mxu0 %v1515_v5  ;;  %939 = vmatprep.subr.bf16.mxu0 %v934_v33  ;;  %v1177_v43 = vpop.permute.xlu1 %1176  ;;  %v1059_v50 = vand.u32 %v1052_v46, %v1571_v16 }
  0xa6   : > { %1462 = vmatprep.subr.bf16.mxu1 %v1514_v4 }
  0xa7   : > { %v1175_v45 = vpop.permute.xlu0 %1174 }
  0xa8   : > { %v1182_v47 = vsel %vm1180_vm6, %v1175_v45, %v1177_v43 }
  0xa9   : > { %v1191_v51 = vand.u32 %v1182_v47, %v1571_v16  ;;  %v1179_v52 = vpop.permute.xlu1 %1178 }
  0xaa   : > { %1459 = vmatmul.mubr.msk.bf16.vlgmr.msra.gmra.mrb[20].mxu1 %vm195_vm3, %v1388_v40  ;;  %v1183_v54 = vsel %vm1180_vm6, %v1177_v43, %v1179_v52 }
  0xab   : > { %1389 = vmatmul.mubr.msk.bf16.vlgmr.msra.gmra.mrb[20].mxu0 %vm195_vm3, %v1388_v40  ;;  %1463 = vmatpush3.bf16.msra.mxu1 %v937_v39  ;;  %v1173_v53 = vpop.permute.xlu0 %1172  ;;  %v1194_v56 = vand.u32 %v1183_v54, %v1571_v16 }
  0xac   : > { %940 = vmatpush1.bf16.msra.mxu0 %v931_v41  ;;  %1464 = vmatprep.mubr.msk.bf16.mxu1 %vm1516_vm1, %v1514_v4  ;;  %v1181_v55 = vsel %vm1180_vm6, %v1173_v53, %v1175_v45 }
  0xad   : > { %971 = vmatprep.mubr.bf16.mxu0 %v1515_v5  ;;  %1067 = vmatprep.subr.bf16.mxu0 %v1062_v42  ;;  %v1188_v58 = vand.u32 %v1181_v55, %v1571_v16 }
  0xae   : > { %1468 = vmatprep.subr.bf16.mxu1 %v1514_v4 }
  0xb2   : > { %1465 = vmatmul.mubr.msk.bf16.vlgmr.msra.gmra.mrb[24].mxu1 %vm195_vm3, %v1391_v49 }
  0xb3   : > { %1392 = vmatmul.mubr.msk.bf16.vlgmr.msra.gmra.mrb[24].mxu0 %vm195_vm3, %v1391_v49  ;;  %1469 = vmatpush3.bf16.msra.mxu1 %v1065_v48 }
  0xb4   : > { %1068 = vmatpush1.bf16.msra.mxu0 %v1059_v50  ;;  %1470 = vmatprep.mubr.msk.bf16.mxu1 %vm1516_vm1, %v1514_v4 }
  0xb5   : > { %1099 = vmatprep.mubr.bf16.mxu0 %v1515_v5  ;;  %1196 = vmatprep.subr.bf16.mxu0 %v1191_v51 }
  0xb6   : > { %1474 = vmatprep.subr.bf16.mxu1 %v1514_v4 }
  0xba   : > { %1471 = vmatmul.mubr.msk.bf16.vlgmr.msra.gmra.mrb[28].mxu1 %vm195_vm3, %v1395_v57 }
  0xbb   : > { %1396 = vmatmul.mubr.msk.bf16.vlgmr.msra.gmra.mrb[28].mxu0 %vm195_vm3, %v1395_v57  ;;  %1475 = vmatpush3.bf16.msra.mxu1 %v1194_v56 }
  0xbc   : > { %1197 = vmatpush1.bf16.msra.mxu0 %v1188_v58  ;;  %1476 = vmatprep.mubr.msk.bf16.mxu1 %vm1516_vm1, %v1514_v4 }
  0xbd   : > { %1228 = vmatprep.mubr.bf16.mxu0 %v1515_v5 }
  0xc2   : > { %1477 = vmatmul.mubr.msk.bf16.vlgmr.msra.gmra.mrb[32].mxu1 %vm195_vm3, %v1398_v59 }
  0xc3   : > { %1399 = vmatmul.mubr.msk.bf16.vlgmr.msra.gmra.mrb[32].mxu0 %vm195_vm3, %v1398_v59 }
  0xee   : > { %v246_v16 = vpop.f32.mrb[0].mxu0 }
  0xef   : > { %v248_v60 = vpop.f32.mrb[1].mxu0  ;;  %v287_v61 = vpop.f32.mrb[0].mxu1 }
  0xf0   : > { %v250_v62 = vpop.f32.mrb[2].mxu0  ;;  %v1430_v63 = vpop.f32.mrb[1].mxu1 }
  0xf1   : > { %v251_v0 = vpop.f32.mrb[3].mxu0  ;;  %v290_v1 = vpop.f32.mrb[2].mxu1 }
  0xf2   : > { %v1431_v2 = vpop.f32.mrb[3].mxu1 }
  0xf6   : > { %v356_v3 = vpop.f32.mrb[4].mxu0 }
  0xf7   : > { %v357_v4 = vadd.f32 %v356_v3, %v246_v16  ;;  %v358_v6 = vpop.f32.mrb[5].mxu0  ;;  %v397_v5 = vpop.f32.mrb[4].mxu1 }
  0xf8   : > { %v359_v7 = vadd.f32 %v358_v6, %v248_v60  ;;  %v398_v8 = vadd.f32 %v397_v5, %v287_v61  ;;  %v360_v9 = vpop.f32.mrb[6].mxu0  ;;  %v1436_v10 = vpop.f32.mrb[5].mxu1 }
  0xf9   : > { %v361_v11 = vpop.f32.mrb[7].mxu0  ;;  %v400_v12 = vpop.f32.mrb[6].mxu1 }
  0xfa   : > { %v1437_v13 = vpop.f32.mrb[7].mxu1 }
 0x165   : > { %v523_v14 = vpop.f32.mrb[8].mxu1 }
 0x166   : > { %v531_v15 = vadd.f32 %v523_v14, %v398_v8  ;;  %v482_v17 = vpop.f32.mrb[8].mxu0  ;;  %v1442_v18 = vpop.f32.mrb[9].mxu1 }
 0x167   : > { %v529_v19 = vadd.f32 %v482_v17, %v357_v4  ;;  %v484_v20 = vpop.f32.mrb[9].mxu0  ;;  %v526_v21 = vpop.f32.mrb[10].mxu1 }
 0x168   : > { %v530_v22 = vadd.f32 %v484_v20, %v359_v7  ;;  %v486_v23 = vpop.f32.mrb[10].mxu0  ;;  %v1443_v24 = vpop.f32.mrb[11].mxu1 }
 0x169   : > { %v487_v25 = vpop.f32.mrb[11].mxu0  ;;  %v1284_v18 = vpop.permute.xlu0 %1283 }
 0x16d   : > { %v640_v26 = vpop.f32.mrb[12].mxu1 }
 0x16e   : > { %v648_v27 = vadd.f32 %v640_v26, %v531_v15  ;;  %v599_v28 = vpop.f32.mrb[12].mxu0  ;;  %v1448_v29 = vpop.f32.mrb[13].mxu1 }
 0x16f   : > { %v646_v30 = vadd.f32 %v599_v28, %v529_v19  ;;  %v601_v31 = vpop.f32.mrb[13].mxu0  ;;  %v643_v32 = vpop.f32.mrb[14].mxu1 }
 0x170   : > { %v647_v33 = vadd.f32 %v601_v31, %v530_v22  ;;  %v603_v34 = vpop.f32.mrb[14].mxu0  ;;  %v1449_v35 = vpop.f32.mrb[15].mxu1 }
 0x171   : > { %v604_v36 = vpop.f32.mrb[15].mxu0 }
 0x175   : > { %v757_v37 = vpop.f32.mrb[16].mxu1 }
 0x176   : > { %v765_v38 = vadd.f32 %v757_v37, %v648_v27  ;;  %v716_v39 = vpop.f32.mrb[16].mxu0  ;;  %v1454_v40 = vpop.f32.mrb[17].mxu1 }
 0x177   : > { %v763_v41 = vadd.f32 %v716_v39, %v646_v30  ;;  %v718_v42 = vpop.f32.mrb[17].mxu0  ;;  %v760_v43 = vpop.f32.mrb[18].mxu1 }
 0x178   : > { %v764_v44 = vadd.f32 %v718_v42, %v647_v33  ;;  %v720_v45 = vpop.f32.mrb[18].mxu0  ;;  %v1455_v46 = vpop.f32.mrb[19].mxu1 }
 0x179   : > { %v721_v47 = vpop.f32.mrb[19].mxu0 }
 0x17d   : > { %v885_v48 = vpop.f32.mrb[20].mxu1 }
 0x17e   : > { %v893_v49 = vadd.f32 %v885_v48, %v765_v38  ;;  %v844_v50 = vpop.f32.mrb[20].mxu0  ;;  %v1460_v51 = vpop.f32.mrb[21].mxu1 }
 0x17f   : > { %v891_v52 = vadd.f32 %v844_v50, %v763_v41  ;;  %v846_v53 = vpop.f32.mrb[21].mxu0  ;;  %v888_v54 = vpop.f32.mrb[22].mxu1 }
 0x180   : > { %v892_v55 = vadd.f32 %v846_v53, %v764_v44  ;;  %v848_v56 = vpop.f32.mrb[22].mxu0  ;;  %v1461_v57 = vpop.f32.mrb[23].mxu1 }
 0x181   : > { %v849_v58 = vpop.f32.mrb[23].mxu0 }
 0x185   : > { %v1014_v59 = vpop.f32.mrb[24].mxu1 }
 0x186   : > { %v1022_v16 = vadd.f32 %v1014_v59, %v893_v49  ;;  %v973_v60 = vpop.f32.mrb[24].mxu0  ;;  %v1466_v61 = vpop.f32.mrb[25].mxu1 }
 0x187   : > { %v1020_v62 = vadd.f32 %v973_v60, %v891_v52  ;;  %v975_v63 = vpop.f32.mrb[25].mxu0  ;;  %v1017_v0 = vpop.f32.mrb[26].mxu1 }
 0x188   : > { %v1021_v1 = vadd.f32 %v975_v63, %v892_v55  ;;  %v977_v2 = vpop.f32.mrb[26].mxu0  ;;  %v1467_v3 = vpop.f32.mrb[27].mxu1 }
 0x189   : > { %v978_v4 = vpop.f32.mrb[27].mxu0 }
 0x18d   : > { %v1142_v6 = vpop.f32.mrb[28].mxu1 }
 0x18e   : > { %v1150_v5 = vadd.f32 %v1142_v6, %v1022_v16  ;;  %v1101_v7 = vpop.f32.mrb[28].mxu0  ;;  %v1472_v8 = vpop.f32.mrb[29].mxu1 }
 0x18f   : > { %v1148_v9 = vadd.f32 %v1101_v7, %v1020_v62  ;;  %v1103_v10 = vpop.f32.mrb[29].mxu0  ;;  %v1145_v11 = vpop.f32.mrb[30].mxu1 }
 0x190   : > { %v1149_v12 = vadd.f32 %v1103_v10, %v1021_v1  ;;  %v1105_v13 = vpop.f32.mrb[30].mxu0  ;;  %v1473_v14 = vpop.f32.mrb[31].mxu1 }
 0x191   : > { %v1106_v15 = vpop.f32.mrb[31].mxu0 }
 0x195   : > { %v1271_v17 = vpop.f32.mrb[32].mxu1 }
 0x196   : > { %v1279_v19 = vadd.f32 %v1271_v17, %v1150_v5  ;;  %v1230_v20 = vpop.f32.mrb[32].mxu0  ;;  %v1478_v21 = vpop.f32.mrb[33].mxu1 }
 0x197   : > { %v1277_v22 = vadd.f32 %v1230_v20, %v1148_v9  ;;  %v1232_v23 = vpop.f32.mrb[33].mxu0  ;;  %v1274_v24 = vpop.f32.mrb[34].mxu1 }
 0x198   : > { %v1288_v25 = vadd.f32 %v1284_v18, %v1279_v19  ;;  %v1278_v26 = vadd.f32 %v1232_v23, %v1149_v12  ;;  %v1234_v27 = vpop.f32.mrb[34].mxu0  ;;  %v1479_v28 = vpop.f32.mrb[35].mxu1 }
 0x199   : > { %v1286_v29 = vadd.f32 %v1284_v18, %v1277_v22  ;;  %v1235_v30 = vpop.f32.mrb[35].mxu0 }
 0x19a   : > { %v1291_v31 = vmax.f32 %v1288_v25, 0.0  ;;  %v1287_v32 = vadd.f32 %v1284_v18, %v1278_v26 }
 0x19b   : > { %v1289_v33 = vmax.f32 %v1286_v29, 0.0 }
 0x19c   : > { %v1407_v34 = vpack.c.bf16 %v1291_v31, %v1291_v31  ;;  %v1290_v35 = vmax.f32 %v1287_v32, 0.0 }
 0x19e   : > { %1306 = vst [vmem:[%s170_s19 + $0x8] sm:$0xf] %v1407_v34  ;;  %v1406_v36 = vpack.c.bf16 %v1290_v35, %v1289_v33 }
 0x1a0   : > { %1305 = vst [vmem:[%s170_s19] sm:$0xff] %v1406_v36 }
 0x1a1 PF: > { %s13_s12 = sadd.s32 1, %s1511_s12  }
 0x1a2   : > { %p10_p4 = scmp.ge.s32.totalorder %s13_s12, 4  }
 0x1a4   :  { %12 = sbr.rel (!%p10_p4) target bundleno = 1 (0x1), region = 73 }

// kernel: feature_extraction_fwd.20
= control target key start
LH: loop header
LB: loop body
LE: loop exit
PB: predicated region body
PF: predicated region fallthrough
CT: control target
= control target key end

     0   :  { %s1435_s12 = smov 0   ;;  %s1584_s0 = inlined_call_operand.vmem [shape: bf16[2,1,8,422], index: 0, kind: input, shape index: {}]   ;;  %s1585_s1 = inlined_call_operand.vmem [shape: bf16[9,8,8], index: 1, kind: input, shape index: {}]   ;;  %s1586_s2 = inlined_call_operand.vmem [shape: f32[8,1], index: 2, kind: input, shape index: {}]   ;;  %s1587_s3 = inlined_call_operand.vmem [shape: bf16[2,8,384], index: 3, kind: output, shape index: {}]  }
   0x1 LB: > { %s1243_s13 = sadd.s32 4294967295, %s1402_s12   ;;  %p1247_p0 = scmp.ge.s32.totalorder %s1402_s12, 1  ;;  %s1402_s12 = sphi %s1435_s12, %s13_s12  }
   0x2   : > { %p137_p1 = scmp.lt.s32.totalorder %s1402_s12, 3 }
   0x4   : > { %p138_p2 = pnand %p1247_p0, %p137_p1 }
   0x5   : > { %p161_p3 = scmp.lt.s32.totalorder (!%p138_p2), %s1243_s13, 1  ;;  %v1404_v0 = vmov (!%p138_p2), 0.0   ;;  %v1405_v1 = vmov (!%p138_p2), 0   ;;  %vm1406_vm0 = vmmov (!%p138_p2), 0   ;;  %s1407_s18 = smov (!%p138_p2), 127   ;;  %v1161_v8 = vld [vmem:[%s1586_s2] sm:$0xff] (!%p138_p2) }
   0x6   : > { %141 = sbr.rel (%p138_p2) target bundleno = 429 (0x1ad), region = 32  ;;  %1316 = vmatprep.subr.bf16.mxu1 (!%p138_p2), %v1404_v0  ;;  %246 = vmatprep.mubr.bf16.mxu0 (!%p138_p2), %v1405_v1  ;;  %s1408_s19 = smov (!%p138_p2), 126   ;;  %vm196_vm1 = vcmask (!%p138_p2), 1039360   ;;  %vm204_vm2 = vcmask (!%p138_p2), 1043456   ;;  %v1251_v19 = vld [vmem:[%s1585_s1 + $0x4] sm:$0xf] (!%p138_p2) }
   0x7   : > { %1318 = vmatprep.mubr.msk.bf16.mxu1 (!%p138_p2), %vm1406_vm0, %v1404_v0  ;;  %1390 = vset.pattern.permute.xlu0 (!%p138_p2), %v1405_v1  ;;  %s1409_s20 = smov (!%p138_p2), 110   ;;  %s1410_s21 = smov (!%p138_p2), 109   ;;  %vm200_vm3 = vcmask (!%p138_p2), 64512   ;;  %vm401_vm4 = vcmask (!%p138_p2), 1031168   ;;  %v174_v29 = vld [vmem:[%s1585_s1] sm:$0xf] (!%p138_p2) }
   0x8   : > { %s1411_s22 = smov (!%p138_p2), 108   ;;  %s1412_s23 = smov (!%p138_p2), 92   ;;  %vm511_vm5 = vcmask (!%p138_p2), 900096   ;;  %v1263_v39 = vld [vmem:[%s1585_s1 + $0x8] sm:$0xf] (!%p138_p2)  ;;  %vm621_vm6 = vcmask (!%p138_p2), 891904  }
   0x9   : > { %s1413_s24 = smov (!%p138_p2), 91   ;;  %s1414_s25 = smov (!%p138_p2), 90   ;;  %v1267_v49 = vld [vmem:[%s1585_s1 + $0xc] sm:$0xf] (!%p138_p2)  ;;  %vm731_vm7 = vcmask (!%p138_p2), 883712   ;;  %vm841_vm8 = vcmask (!%p138_p2), 752640  }
   0xa   : > { %v1271_v59 = vld [vmem:[%s1585_s1 + $0x10] sm:$0xf] (!%p138_p2)  ;;  %vm951_vm9 = vcmask (!%p138_p2), 744448   ;;  %vm1061_vm10 = vcmask (!%p138_p2), 736256  }
   0xd   : > { %s1589_s13 = smov (!%p161_p3, %s1243_s13), 1 }
   0xe   : > { %s1295_s14 = sshll.u32 %s1589_s13, 4 }
   0xf   : > { %s1454_s17 = scalar_lea.vmem %s1584_s0, %s1295_s14 }
  0x10   : > { %v175_v2 = vld [vmem:[%s1454_s17 + $0x8] sm:$0xff]  ;;  %v172_v3 = vld [vmem:[%s1454_s17] sm:$0xff] }
  0x11   : > { %v1254_v4 = vcombine.low %v175_v2, %v175_v2  ;;  %v1458_v5 = vcombine.low %v172_v3, %v172_v3  ;;  %v1253_v6 = vcombine.high %v172_v3, %v172_v3  ;;  %v1255_v7 = vcombine.high %v175_v2, %v175_v2  ;;  %v1395_v13 = vld [vmem:[%s1454_s17 + $0x8] ss:$0 sps:$4 sm:$0xff]  }
  0x12   : > { %v308_v22 = vsel %vm204_vm2, %v1395_v13, 0 }
  0x13   : > { %192 = vrot.lane.b32.xlu1 %v1254_v4, %s1407_s18  ;;  %188 = vrot.lane.b32.xlu0 %v1458_v5, %s1407_s18  ;;  %v302_v21 = vsel %vm204_vm2, %v1458_v5, 0 }
  0x17   : > { %194 = vrot.lane.b32.xlu1 %v1255_v7, %s1407_s18  ;;  %190 = vrot.lane.b32.xlu0 %v1253_v6, %s1407_s18 }
  0x1b   : > { %393 = vrot.lane.b32.xlu0 %v1458_v5, %s1408_s19  ;;  %395 = vrot.lane.b32.xlu1 %v1253_v6, %s1408_s19 }
  0x1f   : > { %397 = vrot.lane.b32.xlu0 %v1254_v4, %s1408_s19  ;;  %399 = vrot.lane.b32.xlu1 %v1255_v7, %s1408_s19 }
  0x23   : > { %503 = vrot.lane.b32.xlu0 %v1458_v5, %s1409_s20  ;;  %505 = vrot.lane.b32.xlu1 %v1253_v6, %s1409_s20 }
  0x27   : > { %507 = vrot.lane.b32.xlu0 %v1254_v4, %s1409_s20  ;;  %509 = vrot.lane.b32.xlu1 %v1255_v7, %s1409_s20 }
  0x2b   : > { %613 = vrot.lane.b32.xlu0 %v1458_v5, %s1410_s21  ;;  %615 = vrot.lane.b32.xlu1 %v1253_v6, %s1410_s21 }
  0x2f   : > { %617 = vrot.lane.b32.xlu0 %v1254_v4, %s1410_s21  ;;  %619 = vrot.lane.b32.xlu1 %v1255_v7, %s1410_s21  ;;  %s1370_s21 = smul.u32 12, %s1589_s13 }
  0x33   : > { %723 = vrot.lane.b32.xlu0 %v1458_v5, %s1411_s22  ;;  %725 = vrot.lane.b32.xlu1 %v1253_v6, %s1411_s22 }
  0x37   : > { %727 = vrot.lane.b32.xlu0 %v1254_v4, %s1411_s22  ;;  %729 = vrot.lane.b32.xlu1 %v1255_v7, %s1411_s22 }
  0x3b   : > { %833 = vrot.lane.b32.xlu0 %v1458_v5, %s1412_s23  ;;  %835 = vrot.lane.b32.xlu1 %v1253_v6, %s1412_s23 }
  0x3f   : > { %837 = vrot.lane.b32.xlu0 %v1254_v4, %s1412_s23  ;;  %839 = vrot.lane.b32.xlu1 %v1255_v7, %s1412_s23 }
  0x43   : > { %943 = vrot.lane.b32.xlu0 %v1458_v5, %s1413_s24  ;;  %945 = vrot.lane.b32.xlu1 %v1253_v6, %s1413_s24 }
  0x47   : > { %947 = vrot.lane.b32.xlu0 %v1254_v4, %s1413_s24  ;;  %949 = vrot.lane.b32.xlu1 %v1255_v7, %s1413_s24  ;;  %s170_s24 = scalar_lea.vmem %s1587_s3, %s1370_s21 }
  0x4b   : > { %1053 = vrot.lane.b32.xlu0 %v1458_v5, %s1414_s25  ;;  %1055 = vrot.lane.b32.xlu1 %v1253_v6, %s1414_s25 }
  0x4f   : > { %1057 = vrot.lane.b32.xlu0 %v1254_v4, %s1414_s25  ;;  %1059 = vrot.lane.b32.xlu1 %v1255_v7, %s1414_s25  ;;  %v1275_v7 = vld [vmem:[%s1585_s1 + $0x14] sm:$0xf] }
  0x53   : > { %1164 = vperm.xlu0 %1390, %v1161_v8  }
  0x85   : > { %v193_v9 = vpop.permute.xlu1 %192  ;;  %v189_v10 = vpop.permute.xlu0 %188 }
  0x89   : > { %v195_v11 = vpop.permute.xlu1 %194  ;;  %v191_v12 = vpop.permute.xlu0 %190 }
  0x8a   : > { %v198_v14 = vsel %vm196_vm1, %v191_v12, %v193_v9  ;;  %v197_v15 = vsel %vm196_vm1, %v189_v10, %v191_v12  ;;  %v199_v16 = vsel %vm196_vm1, %v193_v9, %v195_v11 }
  0x8b   : > { %1256 = vmatprep.subr.msk.bf16.mxu0 %vm204_vm2, %v198_v14  ;;  %v206_v17 = vsel %vm204_vm2, %v197_v15, 0  ;;  %v212_v18 = vsel %vm204_vm2, %v199_v16, 0 }
  0x8c   : > { %215 = vmatpush1.bf16.msra.mxu0 %v206_v17  ;;  %1317 = vmatpush3.bf16.msra.mxu1 %v212_v18  ;;  %v1279_v17 = vld [vmem:[%s1585_s1 + $0x18] sm:$0xf] }
  0x8d   : > { %v394_v20 = vpop.permute.xlu0 %393  ;;  %1260 = vmatprep.subr.msk.bf16.mxu0 %vm204_vm2, %v1253_v6  ;;  %1322 = vmatprep.subr.bf16.mxu1 %v1404_v0  ;;  %v396_v23 = vpop.permute.xlu1 %395 }
  0x8e   : > { %v402_v26 = vsel %vm401_vm4, %v394_v20, %v396_v23 }
  0x8f   : > { %1257 = vmatmul.mubr.msk.bf16.vlgmr.msra.gmra.mrb[0].mxu0 %vm200_vm3, %v1251_v19  ;;  %1319 = vmatmul.mubr.msk.bf16.vlgmr.msra.gmra.mrb[0].mxu1 %vm200_vm3, %v1251_v19  ;;  %v409_v30 = vsel %vm204_vm2, %v402_v26, 0 }
  0x90   : > { %311 = vmatpush1.bf16.msra.mxu0 %v302_v21  ;;  %1323 = vmatpush3.bf16.msra.mxu1 %v308_v22 }
  0x91   : > { %v398_v24 = vpop.permute.xlu0 %397  ;;  %v400_v25 = vpop.permute.xlu1 %399  ;;  %342 = vmatprep.mubr.bf16.mxu0 %v1405_v1  ;;  %1324 = vmatprep.mubr.msk.bf16.mxu1 %vm1406_vm0, %v1404_v0 }
  0x92   : > { %v403_v27 = vsel %vm401_vm4, %v396_v23, %v398_v24  ;;  %v404_v28 = vsel %vm401_vm4, %v398_v24, %v400_v25  ;;  %1328 = vmatprep.subr.bf16.mxu1 %v1404_v0 }
  0x93   : > { %1264 = vmatprep.subr.msk.bf16.mxu0 %vm204_vm2, %v403_v27  ;;  %v415_v31 = vsel %vm204_vm2, %v404_v28, 0  ;;  %v1283_v27 = vld [vmem:[%s1585_s1 + $0x1c] sm:$0xf] }
  0x95   : > { %v504_v32 = vpop.permute.xlu0 %503  ;;  %v506_v33 = vpop.permute.xlu1 %505 }
  0x96   : > { %v512_v36 = vsel %vm511_vm5, %v504_v32, %v506_v33 }
  0x97   : > { %1261 = vmatmul.mubr.msk.bf16.vlgmr.msra.gmra.mrb[4].mxu0 %vm200_vm3, %v174_v29  ;;  %1325 = vmatmul.mubr.msk.bf16.vlgmr.msra.gmra.mrb[4].mxu1 %vm200_vm3, %v174_v29  ;;  %v519_v40 = vsel %vm204_vm2, %v512_v36, 0 }
  0x98   : > { %418 = vmatpush1.bf16.msra.mxu0 %v409_v30  ;;  %1329 = vmatpush3.bf16.msra.mxu1 %v415_v31  ;;  %v1287_v30 = vld [vmem:[%s1585_s1 + $0x20] sm:$0xf] }
  0x99   : > { %v508_v34 = vpop.permute.xlu0 %507  ;;  %v510_v35 = vpop.permute.xlu1 %509  ;;  %1330 = vmatprep.mubr.msk.bf16.mxu1 %vm1406_vm0, %v1404_v0  ;;  %449 = vmatprep.mubr.bf16.mxu0 %v1405_v1 }
  0x9a   : > { %v513_v37 = vsel %vm511_vm5, %v506_v33, %v508_v34  ;;  %v514_v38 = vsel %vm511_vm5, %v508_v34, %v510_v35  ;;  %1334 = vmatprep.subr.bf16.mxu1 %v1404_v0 }
  0x9b   : > { %1268 = vmatprep.subr.msk.bf16.mxu0 %vm204_vm2, %v513_v37  ;;  %v525_v41 = vsel %vm204_vm2, %v514_v38, 0 }
  0x9d   : > { %v614_v42 = vpop.permute.xlu0 %613  ;;  %v616_v43 = vpop.permute.xlu1 %615 }
  0x9e   : > { %v622_v46 = vsel %vm621_vm6, %v614_v42, %v616_v43 }
  0x9f   : > { %1265 = vmatmul.mubr.msk.bf16.vlgmr.msra.gmra.mrb[8].mxu0 %vm200_vm3, %v1263_v39  ;;  %1331 = vmatmul.mubr.msk.bf16.vlgmr.msra.gmra.mrb[8].mxu1 %vm200_vm3, %v1263_v39  ;;  %v629_v50 = vsel %vm204_vm2, %v622_v46, 0 }
  0xa0   : > { %528 = vmatpush1.bf16.msra.mxu0 %v519_v40  ;;  %1335 = vmatpush3.bf16.msra.mxu1 %v525_v41 }
  0xa1   : > { %v618_v44 = vpop.permute.xlu0 %617  ;;  %v620_v45 = vpop.permute.xlu1 %619  ;;  %1336 = vmatprep.mubr.msk.bf16.mxu1 %vm1406_vm0, %v1404_v0  ;;  %559 = vmatprep.mubr.bf16.mxu0 %v1405_v1 }
  0xa2   : > { %v623_v47 = vsel %vm621_vm6, %v616_v43, %v618_v44  ;;  %v624_v48 = vsel %vm621_vm6, %v618_v44, %v620_v45  ;;  %1340 = vmatprep.subr.bf16.mxu1 %v1404_v0 }
  0xa3   : > { %1272 = vmatprep.subr.msk.bf16.mxu0 %vm204_vm2, %v623_v47  ;;  %v635_v51 = vsel %vm204_vm2, %v624_v48, 0 }
  0xa5   : > { %v724_v52 = vpop.permute.xlu0 %723  ;;  %v726_v53 = vpop.permute.xlu1 %725 }
  0xa6   : > { %v732_v56 = vsel %vm731_vm7, %v724_v52, %v726_v53 }
  0xa7   : > { %1269 = vmatmul.mubr.msk.bf16.vlgmr.msra.gmra.mrb[12].mxu0 %vm200_vm3, %v1267_v49  ;;  %1337 = vmatmul.mubr.msk.bf16.vlgmr.msra.gmra.mrb[12].mxu1 %vm200_vm3, %v1267_v49  ;;  %v739_v60 = vsel %vm204_vm2, %v732_v56, 0 }
  0xa8   : > { %638 = vmatpush1.bf16.msra.mxu0 %v629_v50  ;;  %1341 = vmatpush3.bf16.msra.mxu1 %v635_v51 }
  0xa9   : > { %v728_v54 = vpop.permute.xlu0 %727  ;;  %v730_v55 = vpop.permute.xlu1 %729  ;;  %1342 = vmatprep.mubr.msk.bf16.mxu1 %vm1406_vm0, %v1404_v0  ;;  %669 = vmatprep.mubr.bf16.mxu0 %v1405_v1 }
  0xaa   : > { %v733_v57 = vsel %vm731_vm7, %v726_v53, %v728_v54  ;;  %v734_v58 = vsel %vm731_vm7, %v728_v54, %v730_v55  ;;  %1346 = vmatprep.subr.bf16.mxu1 %v1404_v0 }
  0xab   : > { %1276 = vmatprep.subr.msk.bf16.mxu0 %vm204_vm2, %v733_v57  ;;  %v745_v61 = vsel %vm204_vm2, %v734_v58, 0 }
  0xad   : > { %v834_v62 = vpop.permute.xlu0 %833  ;;  %v836_v63 = vpop.permute.xlu1 %835 }
  0xae   : > { %v842_v4 = vsel %vm841_vm8, %v834_v62, %v836_v63 }
  0xaf   : > { %1273 = vmatmul.mubr.msk.bf16.vlgmr.msra.gmra.mrb[16].mxu0 %vm200_vm3, %v1271_v59  ;;  %1343 = vmatmul.mubr.msk.bf16.vlgmr.msra.gmra.mrb[16].mxu1 %vm200_vm3, %v1271_v59  ;;  %v849_v8 = vsel %vm204_vm2, %v842_v4, 0 }
  0xb0   : > { %748 = vmatpush1.bf16.msra.mxu0 %v739_v60  ;;  %1347 = vmatpush3.bf16.msra.mxu1 %v745_v61 }
  0xb1   : > { %v838_v2 = vpop.permute.xlu0 %837  ;;  %v840_v3 = vpop.permute.xlu1 %839  ;;  %1348 = vmatprep.mubr.msk.bf16.mxu1 %vm1406_vm0, %v1404_v0  ;;  %779 = vmatprep.mubr.bf16.mxu0 %v1405_v1 }
  0xb2   : > { %v843_v5 = vsel %vm841_vm8, %v836_v63, %v838_v2  ;;  %v844_v6 = vsel %vm841_vm8, %v838_v2, %v840_v3  ;;  %1352 = vmatprep.subr.bf16.mxu1 %v1404_v0 }
  0xb3   : > { %1280 = vmatprep.subr.msk.bf16.mxu0 %vm204_vm2, %v843_v5  ;;  %v855_v9 = vsel %vm204_vm2, %v844_v6, 0 }
  0xb5   : > { %v944_v10 = vpop.permute.xlu0 %943  ;;  %v946_v11 = vpop.permute.xlu1 %945 }
  0xb6   : > { %v952_v14 = vsel %vm951_vm9, %v944_v10, %v946_v11 }
  0xb7   : > { %1277 = vmatmul.mubr.msk.bf16.vlgmr.msra.gmra.mrb[20].mxu0 %vm200_vm3, %v1275_v7  ;;  %1349 = vmatmul.mubr.msk.bf16.vlgmr.msra.gmra.mrb[20].mxu1 %vm200_vm3, %v1275_v7  ;;  %v959_v18 = vsel %vm204_vm2, %v952_v14, 0 }
  0xb8   : > { %858 = vmatpush1.bf16.msra.mxu0 %v849_v8  ;;  %1353 = vmatpush3.bf16.msra.mxu1 %v855_v9 }
  0xb9   : > { %v948_v12 = vpop.permute.xlu0 %947  ;;  %v950_v13 = vpop.permute.xlu1 %949  ;;  %1354 = vmatprep.mubr.msk.bf16.mxu1 %vm1406_vm0, %v1404_v0  ;;  %889 = vmatprep.mubr.bf16.mxu0 %v1405_v1 }
  0xba   : > { %v953_v15 = vsel %vm951_vm9, %v946_v11, %v948_v12  ;;  %v954_v16 = vsel %vm951_vm9, %v948_v12, %v950_v13  ;;  %1358 = vmatprep.subr.bf16.mxu1 %v1404_v0 }
  0xbb   : > { %1284 = vmatprep.subr.msk.bf16.mxu0 %vm204_vm2, %v953_v15  ;;  %v965_v19 = vsel %vm204_vm2, %v954_v16, 0 }
  0xbd   : > { %v1054_v20 = vpop.permute.xlu0 %1053  ;;  %v1056_v21 = vpop.permute.xlu1 %1055 }
  0xbe   : > { %v1062_v24 = vsel %vm1061_vm10, %v1054_v20, %v1056_v21 }
  0xbf   : > { %1281 = vmatmul.mubr.msk.bf16.vlgmr.msra.gmra.mrb[24].mxu0 %vm200_vm3, %v1279_v17  ;;  %1355 = vmatmul.mubr.msk.bf16.vlgmr.msra.gmra.mrb[24].mxu1 %vm200_vm3, %v1279_v17  ;;  %v1069_v28 = vsel %vm204_vm2, %v1062_v24, 0 }
  0xc0   : > { %968 = vmatpush1.bf16.msra.mxu0 %v959_v18  ;;  %1359 = vmatpush3.bf16.msra.mxu1 %v965_v19 }
  0xc1   : > { %v1058_v22 = vpop.permute.xlu0 %1057  ;;  %v1060_v23 = vpop.permute.xlu1 %1059  ;;  %999 = vmatprep.mubr.bf16.mxu0 %v1405_v1  ;;  %1360 = vmatprep.mubr.msk.bf16.mxu1 %vm1406_vm0, %v1404_v0 }
  0xc2   : > { %v1063_v25 = vsel %vm1061_vm10, %v1056_v21, %v1058_v22  ;;  %v1064_v26 = vsel %vm1061_vm10, %v1058_v22, %v1060_v23  ;;  %1364 = vmatprep.subr.bf16.mxu1 %v1404_v0 }
  0xc3   : > { %1288 = vmatprep.subr.msk.bf16.mxu0 %vm204_vm2, %v1063_v25  ;;  %v1075_v29 = vsel %vm204_vm2, %v1064_v26, 0 }
  0xc7   : > { %1285 = vmatmul.mubr.msk.bf16.vlgmr.msra.gmra.mrb[28].mxu0 %vm200_vm3, %v1283_v27  ;;  %1361 = vmatmul.mubr.msk.bf16.vlgmr.msra.gmra.mrb[28].mxu1 %vm200_vm3, %v1283_v27 }
  0xc8   : > { %1078 = vmatpush1.bf16.msra.mxu0 %v1069_v28  ;;  %1365 = vmatpush3.bf16.msra.mxu1 %v1075_v29 }
  0xc9   : > { %1109 = vmatprep.mubr.bf16.mxu0 %v1405_v1  ;;  %1366 = vmatprep.mubr.msk.bf16.mxu1 %vm1406_vm0, %v1404_v0 }
  0xcf   : > { %1289 = vmatmul.mubr.msk.bf16.vlgmr.msra.gmra.mrb[32].mxu0 %vm200_vm3, %v1287_v30  ;;  %1367 = vmatmul.mubr.msk.bf16.vlgmr.msra.gmra.mrb[32].mxu1 %vm200_vm3, %v1287_v30 }
 0x162   : > { %v248_v31 = vpop.f32.mrb[0].mxu0  ;;  %v289_v32 = vpop.f32.mrb[0].mxu1 }
 0x163   : > { %v250_v33 = vpop.f32.mrb[1].mxu0  ;;  %v1320_v34 = vpop.f32.mrb[1].mxu1 }
 0x164   : > { %v252_v35 = vpop.f32.mrb[2].mxu0  ;;  %v292_v36 = vpop.f32.mrb[2].mxu1 }
 0x165   : > { %v253_v37 = vpop.f32.mrb[3].mxu0  ;;  %v1321_v38 = vpop.f32.mrb[3].mxu1 }
 0x16a   : > { %v344_v1 = vpop.f32.mrb[4].mxu0  ;;  %v385_v39 = vpop.f32.mrb[4].mxu1 }
 0x16b   : > { %v345_v40 = vadd.f32 %v344_v1, %v248_v31  ;;  %v386_v0 = vadd.f32 %v385_v39, %v289_v32  ;;  %v346_v41 = vpop.f32.mrb[5].mxu0  ;;  %v1326_v42 = vpop.f32.mrb[5].mxu1 }
 0x16c   : > { %v347_v43 = vadd.f32 %v346_v41, %v250_v33  ;;  %v348_v44 = vpop.f32.mrb[6].mxu0  ;;  %v388_v45 = vpop.f32.mrb[6].mxu1 }
 0x16d   : > { %v349_v46 = vpop.f32.mrb[7].mxu0  ;;  %v1327_v47 = vpop.f32.mrb[7].mxu1 }
 0x172   : > { %v451_v48 = vpop.f32.mrb[8].mxu0  ;;  %v492_v49 = vpop.f32.mrb[8].mxu1 }
 0x173   : > { %v498_v50 = vadd.f32 %v451_v48, %v345_v40  ;;  %v500_v51 = vadd.f32 %v492_v49, %v386_v0  ;;  %v453_v52 = vpop.f32.mrb[9].mxu0  ;;  %v1332_v53 = vpop.f32.mrb[9].mxu1 }
 0x174   : > { %v499_v54 = vadd.f32 %v453_v52, %v347_v43  ;;  %v455_v55 = vpop.f32.mrb[10].mxu0  ;;  %v495_v56 = vpop.f32.mrb[10].mxu1 }
 0x175   : > { %v456_v57 = vpop.f32.mrb[11].mxu0  ;;  %v1333_v58 = vpop.f32.mrb[11].mxu1 }
 0x17a   : > { %v561_v59 = vpop.f32.mrb[12].mxu0  ;;  %v602_v60 = vpop.f32.mrb[12].mxu1 }
 0x17b   : > { %v608_v61 = vadd.f32 %v561_v59, %v498_v50  ;;  %v610_v62 = vadd.f32 %v602_v60, %v500_v51  ;;  %v563_v63 = vpop.f32.mrb[13].mxu0  ;;  %v1338_v2 = vpop.f32.mrb[13].mxu1 }
 0x17c   : > { %v609_v3 = vadd.f32 %v563_v63, %v499_v54  ;;  %v565_v4 = vpop.f32.mrb[14].mxu0  ;;  %v605_v5 = vpop.f32.mrb[14].mxu1 }
 0x17d   : > { %v566_v6 = vpop.f32.mrb[15].mxu0  ;;  %v1339_v7 = vpop.f32.mrb[15].mxu1 }
 0x17e   : > { %v1165_v50 = vpop.permute.xlu0 %1164 }
 0x182   : > { %v671_v8 = vpop.f32.mrb[16].mxu0  ;;  %v712_v9 = vpop.f32.mrb[16].mxu1 }
 0x183   : > { %v718_v10 = vadd.f32 %v671_v8, %v608_v61  ;;  %v720_v11 = vadd.f32 %v712_v9, %v610_v62  ;;  %v673_v12 = vpop.f32.mrb[17].mxu0  ;;  %v1344_v13 = vpop.f32.mrb[17].mxu1 }
 0x184   : > { %v719_v14 = vadd.f32 %v673_v12, %v609_v3  ;;  %v675_v15 = vpop.f32.mrb[18].mxu0  ;;  %v715_v16 = vpop.f32.mrb[18].mxu1 }
 0x185   : > { %v676_v17 = vpop.f32.mrb[19].mxu0  ;;  %v1345_v18 = vpop.f32.mrb[19].mxu1 }
 0x18a   : > { %v781_v19 = vpop.f32.mrb[20].mxu0  ;;  %v822_v20 = vpop.f32.mrb[20].mxu1 }
 0x18b   : > { %v828_v21 = vadd.f32 %v781_v19, %v718_v10  ;;  %v830_v22 = vadd.f32 %v822_v20, %v720_v11  ;;  %v783_v23 = vpop.f32.mrb[21].mxu0  ;;  %v1350_v24 = vpop.f32.mrb[21].mxu1 }
 0x18c   : > { %v829_v25 = vadd.f32 %v783_v23, %v719_v14  ;;  %v785_v26 = vpop.f32.mrb[22].mxu0  ;;  %v825_v27 = vpop.f32.mrb[22].mxu1 }
 0x18d   : > { %v786_v28 = vpop.f32.mrb[23].mxu0  ;;  %v1351_v29 = vpop.f32.mrb[23].mxu1 }
 0x192   : > { %v891_v30 = vpop.f32.mrb[24].mxu0  ;;  %v932_v31 = vpop.f32.mrb[24].mxu1 }
 0x193   : > { %v938_v32 = vadd.f32 %v891_v30, %v828_v21  ;;  %v940_v33 = vadd.f32 %v932_v31, %v830_v22  ;;  %v893_v34 = vpop.f32.mrb[25].mxu0  ;;  %v1356_v35 = vpop.f32.mrb[25].mxu1 }
 0x194   : > { %v939_v36 = vadd.f32 %v893_v34, %v829_v25  ;;  %v895_v37 = vpop.f32.mrb[26].mxu0  ;;  %v935_v38 = vpop.f32.mrb[26].mxu1 }
 0x195   : > { %v896_v1 = vpop.f32.mrb[27].mxu0  ;;  %v1357_v39 = vpop.f32.mrb[27].mxu1 }
 0x19a   : > { %v1001_v40 = vpop.f32.mrb[28].mxu0  ;;  %v1042_v0 = vpop.f32.mrb[28].mxu1 }
 0x19b   : > { %v1048_v41 = vadd.f32 %v1001_v40, %v938_v32  ;;  %v1050_v42 = vadd.f32 %v1042_v0, %v940_v33  ;;  %v1003_v43 = vpop.f32.mrb[29].mxu0  ;;  %v1362_v44 = vpop.f32.mrb[29].mxu1 }
 0x19c   : > { %v1049_v45 = vadd.f32 %v1003_v43, %v939_v36  ;;  %v1005_v46 = vpop.f32.mrb[30].mxu0  ;;  %v1045_v47 = vpop.f32.mrb[30].mxu1 }
 0x19d   : > { %v1006_v48 = vpop.f32.mrb[31].mxu0  ;;  %v1363_v49 = vpop.f32.mrb[31].mxu1 }
 0x1a2   : > { %v1111_v51 = vpop.f32.mrb[32].mxu0  ;;  %v1152_v52 = vpop.f32.mrb[32].mxu1 }
 0x1a3   : > { %v1158_v53 = vadd.f32 %v1111_v51, %v1048_v41  ;;  %v1160_v54 = vadd.f32 %v1152_v52, %v1050_v42  ;;  %v1113_v55 = vpop.f32.mrb[33].mxu0  ;;  %v1368_v56 = vpop.f32.mrb[33].mxu1 }
 0x1a4   : > { %v1159_v57 = vadd.f32 %v1113_v55, %v1049_v45  ;;  %v1155_v58 = vpop.f32.mrb[34].mxu1  ;;  %v1115_v59 = vpop.f32.mrb[34].mxu0 }
 0x1a5   : > { %v1167_v60 = vadd.f32 %v1165_v50, %v1158_v53  ;;  %v1169_v61 = vadd.f32 %v1165_v50, %v1160_v54  ;;  %v1116_v62 = vpop.f32.mrb[35].mxu0  ;;  %v1369_v63 = vpop.f32.mrb[35].mxu1 }
 0x1a6   : > { %v1168_v2 = vadd.f32 %v1165_v50, %v1159_v57 }
 0x1a7   : > { %v1170_v3 = vmax.f32 %v1167_v60, 0.0  ;;  %v1172_v4 = vmax.f32 %v1169_v61, 0.0 }
 0x1a8   : > { %v1171_v5 = vmax.f32 %v1168_v2, 0.0 }
 0x1a9   : > { %v1297_v6 = vpack.c.bf16 %v1172_v4, %v1172_v4 }
 0x1aa   : > { %v1296_v7 = vpack.c.bf16 %v1171_v5, %v1170_v3 }
 0x1ab   : > { %1187 = vst [vmem:[%s170_s24 + $0x8] sm:$0xf] %v1297_v6 }
 0x1ac   : > { %1186 = vst [vmem:[%s170_s24] sm:$0xff] %v1296_v7 }
 0x1ad PF: > { %s13_s12 = sadd.s32 1, %s1402_s12  }
 0x1ae   : > { %p10_p4 = scmp.ge.s32.totalorder %s13_s12, 4  }
 0x1b0   :  { %12 = sbr.rel (!%p10_p4) target bundleno = 1 (0x1), region = 70 }

// kernel: feature_extraction_fwd.21
= control target key start
LH: loop header
LB: loop body
LE: loop exit
PB: predicated region body
PF: predicated region fallthrough
CT: control target
= control target key end

     0   :  { %s892_s12 = smov 0   ;;  %s997_s0 = inlined_call_operand.vmem [shape: bf16[2,4,8,138], index: 0, kind: input, shape index: {}]   ;;  %s998_s1 = inlined_call_operand.vmem [shape: bf16[9,8,8], index: 1, kind: input, shape index: {}]   ;;  %s999_s2 = inlined_call_operand.vmem [shape: f32[8,1], index: 2, kind: input, shape index: {}]   ;;  %s1000_s3 = inlined_call_operand.vmem [shape: bf16[2,8,128], index: 3, kind: output, shape index: {}]  }
   0x1 LB: > { %s726_s13 = sadd.s32 4294967295, %s864_s12   ;;  %p730_p0 = scmp.ge.s32.totalorder %s864_s12, 1  ;;  %s864_s12 = sphi %s892_s12, %s13_s12  }
   0x2   : > { %p137_p1 = scmp.lt.s32.totalorder %s864_s12, 3 }
   0x4   : > { %p138_p2 = pnand %p730_p0, %p137_p1 }
   0x5   : > { %p160_p3 = scmp.lt.s32.totalorder (!%p138_p2), %s726_s13, 1  ;;  %v866_v0 = vmov (!%p138_p2), 0.0   ;;  %vm867_vm0 = vmmov (!%p138_p2), 0   ;;  %vm180_vm1 = vcmask (!%p138_p2), 1043456   ;;  %s868_s18 = smov (!%p138_p2), 127   ;;  %vm176_vm2 = vcmask (!%p138_p2), 64512  }
   0x6   : > { %141 = sbr.rel (%p138_p2) target bundleno = 388 (0x184), region = 32  ;;  %783 = vmatprep.subr.bf16.mxu0 (!%p138_p2), %v866_v0  ;;  %789 = vmatprep.subr.bf16.mxu1 (!%p138_p2), %v866_v0  ;;  %v735_v12 = vld [vmem:[%s998_s1 + $0x4] sm:$0xf] (!%p138_p2)  ;;  %v171_v13 = vld [vmem:[%s998_s1] sm:$0xf] (!%p138_p2)  ;;  %s869_s23 = smov (!%p138_p2), 119  }
   0x7   : > { %785 = vmatprep.mubr.msk.bf16.mxu0 (!%p138_p2), %vm867_vm0, %v866_v0  ;;  %791 = vmatprep.mubr.msk.bf16.mxu1 (!%p138_p2), %vm867_vm0, %v866_v0  ;;  %v743_v18 = vld [vmem:[%s998_s1 + $0xc] sm:$0xf] (!%p138_p2)  ;;  %s870_s26 = smov (!%p138_p2), 118   ;;  %v663_v19 = vld [vmem:[%s999_s2] sm:$0xff] (!%p138_p2)  ;;  %v871_v20 = vmov (!%p138_p2), 0   ;;  %vm282_vm3 = vcmask (!%p138_p2), 1039360  }
   0x8   : > { %851 = vset.pattern.permute.xlu0 (!%p138_p2), %v871_v20  ;;  %v738_v30 = vld [vmem:[%s998_s1 + $0x8] sm:$0xf] (!%p138_p2)  ;;  %v749_v31 = vld [vmem:[%s998_s1 + $0x14] sm:$0xf] (!%p138_p2)  ;;  %vm499_vm4 = vcmask (!%p138_p2), 973824   ;;  %vm614_vm5 = vcmask (!%p138_p2), 965632  }
   0x9   : > { %v746_v40 = vld [vmem:[%s998_s1 + $0x10] sm:$0xf] (!%p138_p2)  ;;  %v756_v41 = vld [vmem:[%s998_s1 + $0x1c] sm:$0xf] (!%p138_p2)  ;;  %v753_v46 = vld [vmem:[%s998_s1 + $0x18] sm:$0xf] (!%p138_p2) }
   0xa   : > { %v760_v48 = vld [vmem:[%s998_s1 + $0x20] sm:$0xf] (!%p138_p2) }
   0xd   : > { %s1002_s13 = smov (!%p160_p3, %s726_s13), 1 }
   0xe   : > { %s764_s14 = sshll.u32 %s1002_s13, 5  ;;  %s733_s16 = sshll.u32 %s1002_s13, 2 }
   0xf   : > { %s912_s17 = scalar_lea.vmem %s997_s0, %s764_s14  ;;  %s168_s19 = scalar_lea.vmem %s1000_s3, %s733_s16 }
  0x10   : > { %v270_v1 = vld [vmem:[%s912_s17] sm:$0xff]  ;;  %v748_v2 = vld [vmem:[%s912_s17 + $0x10] sm:$0xff]  ;;  %v734_v5 = vld [vmem:[%s912_s17 + $0x8] sm:$0xf] }
  0x11   : > { %v739_v3 = vcombine.low %v270_v1, %v270_v1  ;;  %v750_v4 = vcombine.low %v748_v2, %v748_v2  ;;  %v170_v6 = vld [vmem:[%s912_s17] sm:$0xf]  ;;  %v182_v7 = vsel %vm180_vm1, %v734_v5, 0  ;;  %v740_v9 = vcombine.high %v270_v1, %v270_v1  ;;  %v742_v11 = vld [vmem:[%s912_s17 + $0x10] sm:$0xf]  ;;  %v755_v15 = vld [vmem:[%s912_s17 + $0x8] sm:$0xff] }
  0x12   : > { %v228_v8 = vsel %vm180_vm1, %v170_v6, 0  ;;  %v751_v10 = vcombine.high %v748_v2, %v748_v2  ;;  %784 = vmatpush3.bf16.msra.mxu0 %v182_v7  ;;  %v339_v14 = vsel %vm180_vm1, %v742_v11, 0  ;;  %v758_v16 = vcombine.high %v755_v15, %v755_v15  ;;  %v745_v27 = vld [vmem:[%s912_s17 + $0x18] sm:$0xf] }
  0x13   : > { %278 = vrot.lane.b32.xlu0 %v739_v3, %s868_s18  ;;  %441 = vrot.lane.b32.xlu1 %v750_v4, %s868_s18  ;;  %v757_v17 = vcombine.low %v755_v15, %v755_v15  ;;  %v390_v32 = vsel %vm180_vm1, %v745_v27, 0 }
  0x14   : > { %790 = vmatpush3.bf16.msra.mxu1 %v228_v8  ;;  %795 = vmatprep.subr.bf16.mxu0 %v866_v0 }
  0x15   : > { %801 = vmatprep.subr.bf16.mxu1 %v866_v0  ;;  %786 = vmatmul.mubr.msk.bf16.vlgmr.msra.gmra.mrb[0].mxu0 %vm176_vm2, %v735_v12 }
  0x16   : > { %797 = vmatprep.mubr.msk.bf16.mxu0 %vm867_vm0, %v866_v0 }
  0x17   : > { %280 = vrot.lane.b32.xlu0 %v740_v9, %s868_s18  ;;  %443 = vrot.lane.b32.xlu1 %v751_v10, %s868_s18 }
  0x18   : > { %792 = vmatmul.mubr.msk.bf16.vlgmr.msra.gmra.mrb[0].mxu1 %vm176_vm2, %v171_v13 }
  0x19   : > { %802 = vmatpush3.bf16.msra.mxu1 %v339_v14  ;;  %803 = vmatprep.mubr.msk.bf16.mxu1 %vm867_vm0, %v866_v0 }
  0x1a   : > { %813 = vmatprep.subr.bf16.mxu1 %v866_v0 }
  0x1b   : > { %497 = vrot.lane.b32.xlu1 %v740_v9, %s869_s23  ;;  %495 = vrot.lane.b32.xlu0 %v739_v3, %s869_s23 }
  0x1f   : > { %558 = vrot.lane.b32.xlu1 %v758_v16, %s869_s23  ;;  %556 = vrot.lane.b32.xlu0 %v757_v17, %s869_s23 }
  0x20   : > { %804 = vmatmul.mubr.msk.bf16.vlgmr.msra.gmra.mrb[4].mxu1 %vm176_vm2, %v743_v18 }
  0x21   : > { %815 = vmatprep.mubr.msk.bf16.mxu1 %vm867_vm0, %v866_v0 }
  0x23   : > { %612 = vrot.lane.b32.xlu1 %v740_v9, %s870_s26  ;;  %610 = vrot.lane.b32.xlu0 %v739_v3, %s870_s26 }
  0x27   : > { %666 = vperm.xlu0 %851, %v663_v19  }
  0x85   : > { %v279_v21 = vpop.permute.xlu0 %278  ;;  %v442_v22 = vpop.permute.xlu1 %441 }
  0x89   : > { %v281_v23 = vpop.permute.xlu0 %280  ;;  %v444_v24 = vpop.permute.xlu1 %443 }
  0x8a   : > { %v283_v25 = vsel %vm282_vm3, %v279_v21, %v281_v23  ;;  %v445_v26 = vsel %vm282_vm3, %v442_v22, %v444_v24 }
  0x8b   : > { %v288_v28 = vsel %vm180_vm1, %v283_v25, 0  ;;  %v450_v29 = vsel %vm180_vm1, %v445_v26, 0 }
  0x8c   : > { %796 = vmatpush3.bf16.msra.mxu0 %v288_v28  ;;  %814 = vmatpush3.bf16.msra.mxu1 %v450_v29 }
  0x8d   : > { %807 = vmatprep.subr.bf16.mxu0 %v866_v0  ;;  %v498_v33 = vpop.permute.xlu1 %497  ;;  %v496_v34 = vpop.permute.xlu0 %495  ;;  %825 = vmatprep.subr.bf16.mxu1 %v866_v0 }
  0x8e   : > { %v500_v37 = vsel %vm499_vm4, %v496_v34, %v498_v33 }
  0x8f   : > { %798 = vmatmul.mubr.msk.bf16.vlgmr.msra.gmra.mrb[4].mxu0 %vm176_vm2, %v738_v30  ;;  %816 = vmatmul.mubr.msk.bf16.vlgmr.msra.gmra.mrb[8].mxu1 %vm176_vm2, %v749_v31  ;;  %v505_v42 = vsel %vm180_vm1, %v500_v37, 0 }
  0x90   : > { %808 = vmatpush3.bf16.msra.mxu0 %v390_v32  ;;  %809 = vmatprep.mubr.msk.bf16.mxu0 %vm867_vm0, %v866_v0 }
  0x91   : > { %v559_v35 = vpop.permute.xlu1 %558  ;;  %v557_v36 = vpop.permute.xlu0 %556  ;;  %819 = vmatprep.subr.bf16.mxu0 %v866_v0  ;;  %827 = vmatprep.mubr.msk.bf16.mxu1 %vm867_vm0, %v866_v0 }
  0x92   : > { %v560_v38 = vsel %vm499_vm4, %v557_v36, %v559_v35 }
  0x93   : > { %v565_v39 = vsel %vm180_vm1, %v560_v38, 0 }
  0x94   : > { %826 = vmatpush3.bf16.msra.mxu1 %v565_v39 }
  0x95   : > { %v613_v43 = vpop.permute.xlu1 %612  ;;  %v611_v44 = vpop.permute.xlu0 %610 }
  0x96   : > { %v615_v45 = vsel %vm614_vm5, %v611_v44, %v613_v43 }
  0x97   : > { %810 = vmatmul.mubr.msk.bf16.vlgmr.msra.gmra.mrb[8].mxu0 %vm176_vm2, %v746_v40  ;;  %828 = vmatmul.mubr.msk.bf16.vlgmr.msra.gmra.mrb[12].mxu1 %vm176_vm2, %v756_v41  ;;  %v620_v47 = vsel %vm180_vm1, %v615_v45, 0 }
  0x98   : > { %820 = vmatpush3.bf16.msra.mxu0 %v505_v42  ;;  %821 = vmatprep.mubr.msk.bf16.mxu0 %vm867_vm0, %v866_v0 }
  0x99   : > { %831 = vmatprep.subr.bf16.mxu0 %v866_v0 }
  0x9f   : > { %822 = vmatmul.mubr.msk.bf16.vlgmr.msra.gmra.mrb[12].mxu0 %vm176_vm2, %v753_v46 }
  0xa0   : > { %832 = vmatpush3.bf16.msra.mxu0 %v620_v47  ;;  %833 = vmatprep.mubr.msk.bf16.mxu0 %vm867_vm0, %v866_v0 }
  0xa6   : > { %v667_v25 = vpop.permute.xlu0 %666 }
  0xa7   : > { %834 = vmatmul.mubr.msk.bf16.vlgmr.msra.gmra.mrb[16].mxu0 %vm176_vm2, %v760_v48 }
  0xe8   : > { %v218_v49 = vpop.f32.mrb[0].mxu0 }
  0xe9   : > { %v787_v51 = vpop.f32.mrb[1].mxu0 }
  0xea   : > { %v221_v54 = vpop.f32.mrb[2].mxu0 }
  0xeb   : > { %v264_v50 = vpop.f32.mrb[0].mxu1  ;;  %v788_v56 = vpop.f32.mrb[3].mxu0 }
  0xec   : > { %v265_v52 = vadd.f32 %v264_v50, %v218_v49  ;;  %v793_v53 = vpop.f32.mrb[1].mxu1 }
  0xed   : > { %v267_v55 = vpop.f32.mrb[2].mxu1 }
  0xee   : > { %v794_v57 = vpop.f32.mrb[3].mxu1 }
  0xf3   : > { %v375_v58 = vpop.f32.mrb[4].mxu1 }
  0xf4   : > { %v805_v59 = vpop.f32.mrb[5].mxu1 }
  0xf5   : > { %v378_v60 = vpop.f32.mrb[6].mxu1 }
  0xf6   : > { %v806_v61 = vpop.f32.mrb[7].mxu1 }
 0x162   : > { %v324_v62 = vpop.f32.mrb[4].mxu0  ;;  %v486_v63 = vpop.f32.mrb[8].mxu1 }
 0x163   : > { %v330_v0 = vadd.f32 %v324_v62, %v265_v52  ;;  %v799_v1 = vpop.f32.mrb[5].mxu0  ;;  %v817_v2 = vpop.f32.mrb[9].mxu1 }
 0x164   : > { %v327_v3 = vpop.f32.mrb[6].mxu0  ;;  %v489_v4 = vpop.f32.mrb[10].mxu1 }
 0x165   : > { %v381_v5 = vadd.f32 %v375_v58, %v330_v0  ;;  %v800_v6 = vpop.f32.mrb[7].mxu0  ;;  %v818_v7 = vpop.f32.mrb[11].mxu1 }
 0x16a   : > { %v426_v8 = vpop.f32.mrb[8].mxu0  ;;  %v601_v9 = vpop.f32.mrb[12].mxu1 }
 0x16b   : > { %v432_v10 = vadd.f32 %v426_v8, %v381_v5  ;;  %v811_v11 = vpop.f32.mrb[9].mxu0  ;;  %v829_v12 = vpop.f32.mrb[13].mxu1 }
 0x16c   : > { %v429_v13 = vpop.f32.mrb[10].mxu0  ;;  %v604_v14 = vpop.f32.mrb[14].mxu1 }
 0x16d   : > { %v492_v15 = vadd.f32 %v486_v63, %v432_v10  ;;  %v812_v16 = vpop.f32.mrb[11].mxu0  ;;  %v830_v17 = vpop.f32.mrb[15].mxu1 }
 0x172   : > { %v541_v18 = vpop.f32.mrb[12].mxu0 }
 0x173   : > { %v547_v19 = vadd.f32 %v541_v18, %v492_v15  ;;  %v823_v20 = vpop.f32.mrb[13].mxu0 }
 0x174   : > { %v544_v21 = vpop.f32.mrb[14].mxu0 }
 0x175   : > { %v607_v22 = vadd.f32 %v601_v9, %v547_v19  ;;  %v824_v23 = vpop.f32.mrb[15].mxu0 }
 0x17a   : > { %v656_v24 = vpop.f32.mrb[16].mxu0 }
 0x17b   : > { %v662_v26 = vadd.f32 %v656_v24, %v607_v22  ;;  %v835_v27 = vpop.f32.mrb[17].mxu0 }
 0x17c   : > { %v659_v28 = vpop.f32.mrb[18].mxu0 }
 0x17d   : > { %v669_v29 = vadd.f32 %v667_v25, %v662_v26  ;;  %v836_v30 = vpop.f32.mrb[19].mxu0 }
 0x17f   : > { %v670_v31 = vmax.f32 %v669_v29, 0.0 }
 0x181   : > { %v671_v32 = vpack.c.bf16 %v670_v31, %v670_v31 }
 0x183   : > { %672 = vst [vmem:[%s168_s19] sm:$0xf] %v671_v32 }
 0x184 PF: > { %s13_s12 = sadd.s32 1, %s864_s12  }
 0x185   : > { %p10_p4 = scmp.ge.s32.totalorder %s13_s12, 4  }
 0x187   :  { %12 = sbr.rel (!%p10_p4) target bundleno = 1 (0x1), region = 73 }

// kernel: feature_extraction_fwd.22
= control target key start
LH: loop header
LB: loop body
LE: loop exit
PB: predicated region body
PF: predicated region fallthrough
CT: control target
= control target key end

     0   :  { %s1020_s12 = smov 0   ;;  %s1128_s0 = inlined_call_operand.vmem [shape: bf16[2,4,8,134], index: 0, kind: input, shape index: {}]   ;;  %s1129_s1 = inlined_call_operand.vmem [shape: bf16[9,16,8], index: 1, kind: input, shape index: {}]   ;;  %s1130_s2 = inlined_call_operand.vmem [shape: f32[16,1], index: 2, kind: input, shape index: {}]   ;;  %s1131_s3 = inlined_call_operand.vmem [shape: bf16[2,16,128], index: 3, kind: output, shape index: {}]  }
   0x1 LB: > { %s816_s13 = sadd.s32 4294967295, %s992_s12   ;;  %p820_p0 = scmp.ge.s32.totalorder %s992_s12, 1  ;;  %s992_s12 = sphi %s1020_s12, %s13_s12  }
   0x2   : > { %p137_p1 = scmp.lt.s32.totalorder %s992_s12, 3 }
   0x4   : > { %p138_p2 = pnand %p820_p0, %p137_p1 }
   0x5   : > { %p161_p3 = scmp.lt.s32.totalorder (!%p138_p2), %s816_s13, 1  ;;  %v994_v0 = vmov (!%p138_p2), 0.0   ;;  %vm995_vm0 = vmmov (!%p138_p2), 0   ;;  %vm189_vm1 = vcmask (!%p138_p2), 1043456   ;;  %v977_v9 = vld [vmem:[%s1129_s1 + $0x8] sm:$0xff] (!%p138_p2)   ;;  %v978_v10 = vld [vmem:[%s1129_s1] sm:$0xff] (!%p138_p2)  }
   0x6   : > { %141 = sbr.rel (%p138_p2) target bundleno = 390 (0x186), region = 32  ;;  %901 = vmatprep.subr.bf16.mxu0 (!%p138_p2), %v994_v0  ;;  %907 = vmatprep.subr.bf16.mxu1 (!%p138_p2), %v994_v0  ;;  %s996_s22 = smov (!%p138_p2), 127   ;;  %vm185_vm2 = vcmask (!%p138_p2), 64512   ;;  %v980_v18 = vld [vmem:[%s1129_s1 + $0x18] sm:$0xff] (!%p138_p2)   ;;  %v735_v19 = vld [vmem:[%s1130_s2] sm:$0xff] (!%p138_p2)  ;;  %v736_v20 = vld [vmem:[%s1130_s2 + $0x8] sm:$0xff] (!%p138_p2) }
   0x7   : > { %903 = vmatprep.mubr.msk.bf16.mxu0 (!%p138_p2), %vm995_vm0, %v994_v0  ;;  %909 = vmatprep.mubr.msk.bf16.mxu1 (!%p138_p2), %vm995_vm0, %v994_v0  ;;  %s997_s23 = smov (!%p138_p2), 123   ;;  %s998_s26 = smov (!%p138_p2), 122   ;;  %v999_v21 = vmov (!%p138_p2), 0   ;;  %vm304_vm3 = vcmask (!%p138_p2), 1039360   ;;  %v979_v30 = vld [vmem:[%s1129_s1 + $0x10] sm:$0xff] (!%p138_p2)   ;;  %v982_v32 = vld [vmem:[%s1129_s1 + $0x28] sm:$0xff] (!%p138_p2)  }
   0x8   : > { %969 = vset.pattern.permute.xlu0 (!%p138_p2), %v999_v21  ;;  %970 = vset.pattern.permute.xlu1 (!%p138_p2), %v999_v21  ;;  %vm553_vm4 = vcmask (!%p138_p2), 1006592   ;;  %v981_v40 = vld [vmem:[%s1129_s1 + $0x20] sm:$0xff] (!%p138_p2)   ;;  %v984_v42 = vld [vmem:[%s1129_s1 + $0x38] sm:$0xff] (!%p138_p2)   ;;  %vm684_vm5 = vcmask (!%p138_p2), 998400   ;;  %v983_v47 = vld [vmem:[%s1129_s1 + $0x30] sm:$0xff] (!%p138_p2)  }
   0x9   : > { %v985_v49 = vld [vmem:[%s1129_s1 + $0x40] sm:$0xff] (!%p138_p2)  }
   0xd   : > { %s1133_s13 = smov (!%p161_p3, %s816_s13), 1 }
   0xe   : > { %s874_s14 = sshll.u32 %s1133_s13, 5  ;;  %s875_s18 = sshll.u32 %s1133_s13, 3 }
   0xf   : > { %s1040_s17 = scalar_lea.vmem %s1128_s0, %s874_s14  ;;  %s170_s21 = scalar_lea.vmem %s1131_s3, %s875_s18 }
  0x10   : > { %v286_v1 = vld [vmem:[%s1040_s17] sm:$0xff]  ;;  %v848_v2 = vld [vmem:[%s1040_s17 + $0x10] sm:$0xff]  ;;  %v825_v5 = vld [vmem:[%s1040_s17 + $0x8] sm:$0xf] }
  0x11   : > { %v835_v3 = vcombine.low %v286_v1, %v286_v1  ;;  %v852_v4 = vcombine.low %v848_v2, %v848_v2  ;;  %v172_v6 = vld [vmem:[%s1040_s17] sm:$0xf]  ;;  %v191_v7 = vsel %vm189_vm1, %v825_v5, 0  ;;  %v838_v11 = vld [vmem:[%s1040_s17 + $0x10] sm:$0xf]  ;;  %v836_v12 = vcombine.high %v286_v1, %v286_v1  ;;  %v859_v15 = vld [vmem:[%s1040_s17 + $0x8] sm:$0xff] }
  0x12   : > { %v243_v8 = vsel %vm189_vm1, %v172_v6, 0  ;;  %v853_v13 = vcombine.high %v848_v2, %v848_v2  ;;  %902 = vmatpush3.bf16.msra.mxu0 %v191_v7  ;;  %v369_v14 = vsel %vm189_vm1, %v838_v11, 0  ;;  %v864_v16 = vcombine.high %v859_v15, %v859_v15  ;;  %v843_v28 = vld [vmem:[%s1040_s17 + $0x18] sm:$0xf] }
  0x13   : > { %300 = vrot.lane.b32.xlu0 %v835_v3, %s996_s22  ;;  %487 = vrot.lane.b32.xlu1 %v852_v4, %s996_s22  ;;  %v863_v17 = vcombine.low %v859_v15, %v859_v15  ;;  %v428_v33 = vsel %vm189_vm1, %v843_v28, 0 }
  0x14   : > { %908 = vmatpush3.bf16.msra.mxu1 %v243_v8  ;;  %913 = vmatprep.subr.bf16.mxu0 %v994_v0 }
  0x15   : > { %919 = vmatprep.subr.bf16.mxu1 %v994_v0  ;;  %904 = vmatmul.mubr.msk.bf16.vlgmr.msra.gmra.mrb[0].mxu0 %vm185_vm2, %v977_v9 }
  0x16   : > { %915 = vmatprep.mubr.msk.bf16.mxu0 %vm995_vm0, %v994_v0 }
  0x17   : > { %302 = vrot.lane.b32.xlu0 %v836_v12, %s996_s22  ;;  %489 = vrot.lane.b32.xlu1 %v853_v13, %s996_s22 }
  0x18   : > { %910 = vmatmul.mubr.msk.bf16.vlgmr.msra.gmra.mrb[0].mxu1 %vm185_vm2, %v978_v10 }
  0x19   : > { %920 = vmatpush3.bf16.msra.mxu1 %v369_v14  ;;  %921 = vmatprep.mubr.msk.bf16.mxu1 %vm995_vm0, %v994_v0 }
  0x1a   : > { %931 = vmatprep.subr.bf16.mxu1 %v994_v0 }
  0x1b   : > { %551 = vrot.lane.b32.xlu1 %v836_v12, %s997_s23  ;;  %549 = vrot.lane.b32.xlu0 %v835_v3, %s997_s23 }
  0x1f   : > { %620 = vrot.lane.b32.xlu1 %v864_v16, %s997_s23  ;;  %618 = vrot.lane.b32.xlu0 %v863_v17, %s997_s23 }
  0x20   : > { %922 = vmatmul.mubr.msk.bf16.vlgmr.msra.gmra.mrb[4].mxu1 %vm185_vm2, %v980_v18 }
  0x21   : > { %933 = vmatprep.mubr.msk.bf16.mxu1 %vm995_vm0, %v994_v0 }
  0x23   : > { %682 = vrot.lane.b32.xlu1 %v836_v12, %s998_s26  ;;  %680 = vrot.lane.b32.xlu0 %v835_v3, %s998_s26 }
  0x27   : > { %739 = vperm.xlu0 %969, %v735_v19   ;;  %744 = vperm.xlu1 %970, %v736_v20  }
  0x85   : > { %v301_v22 = vpop.permute.xlu0 %300  ;;  %v488_v23 = vpop.permute.xlu1 %487 }
  0x89   : > { %v303_v24 = vpop.permute.xlu0 %302  ;;  %v490_v25 = vpop.permute.xlu1 %489 }
  0x8a   : > { %v305_v26 = vsel %vm304_vm3, %v301_v22, %v303_v24  ;;  %v491_v27 = vsel %vm304_vm3, %v488_v23, %v490_v25 }
  0x8b   : > { %v310_v29 = vsel %vm189_vm1, %v305_v26, 0  ;;  %v496_v31 = vsel %vm189_vm1, %v491_v27, 0 }
  0x8c   : > { %914 = vmatpush3.bf16.msra.mxu0 %v310_v29  ;;  %932 = vmatpush3.bf16.msra.mxu1 %v496_v31 }
  0x8d   : > { %925 = vmatprep.subr.bf16.mxu0 %v994_v0  ;;  %v552_v34 = vpop.permute.xlu1 %551  ;;  %v550_v35 = vpop.permute.xlu0 %549  ;;  %943 = vmatprep.subr.bf16.mxu1 %v994_v0 }
  0x8e   : > { %v554_v38 = vsel %vm553_vm4, %v550_v35, %v552_v34 }
  0x8f   : > { %916 = vmatmul.mubr.msk.bf16.vlgmr.msra.gmra.mrb[4].mxu0 %vm185_vm2, %v979_v30  ;;  %934 = vmatmul.mubr.msk.bf16.vlgmr.msra.gmra.mrb[8].mxu1 %vm185_vm2, %v982_v32  ;;  %v559_v43 = vsel %vm189_vm1, %v554_v38, 0 }
  0x90   : > { %926 = vmatpush3.bf16.msra.mxu0 %v428_v33  ;;  %927 = vmatprep.mubr.msk.bf16.mxu0 %vm995_vm0, %v994_v0 }
  0x91   : > { %v621_v36 = vpop.permute.xlu1 %620  ;;  %v619_v37 = vpop.permute.xlu0 %618  ;;  %937 = vmatprep.subr.bf16.mxu0 %v994_v0  ;;  %945 = vmatprep.mubr.msk.bf16.mxu1 %vm995_vm0, %v994_v0 }
  0x92   : > { %v622_v39 = vsel %vm553_vm4, %v619_v37, %v621_v36 }
  0x93   : > { %v627_v41 = vsel %vm189_vm1, %v622_v39, 0 }
  0x94   : > { %944 = vmatpush3.bf16.msra.mxu1 %v627_v41 }
  0x95   : > { %v683_v44 = vpop.permute.xlu1 %682  ;;  %v681_v45 = vpop.permute.xlu0 %680 }
  0x96   : > { %v685_v46 = vsel %vm684_vm5, %v681_v45, %v683_v44 }
  0x97   : > { %928 = vmatmul.mubr.msk.bf16.vlgmr.msra.gmra.mrb[8].mxu0 %vm185_vm2, %v981_v40  ;;  %946 = vmatmul.mubr.msk.bf16.vlgmr.msra.gmra.mrb[12].mxu1 %vm185_vm2, %v984_v42  ;;  %v690_v48 = vsel %vm189_vm1, %v685_v46, 0 }
  0x98   : > { %938 = vmatpush3.bf16.msra.mxu0 %v559_v43  ;;  %939 = vmatprep.mubr.msk.bf16.mxu0 %vm995_vm0, %v994_v0 }
  0x99   : > { %949 = vmatprep.subr.bf16.mxu0 %v994_v0 }
  0x9f   : > { %940 = vmatmul.mubr.msk.bf16.vlgmr.msra.gmra.mrb[12].mxu0 %vm185_vm2, %v983_v47 }
  0xa0   : > { %950 = vmatpush3.bf16.msra.mxu0 %v690_v48  ;;  %951 = vmatprep.mubr.msk.bf16.mxu0 %vm995_vm0, %v994_v0 }
  0xa6   : > { %v740_v33 = vpop.permute.xlu0 %739  ;;  %v745_v37 = vpop.permute.xlu1 %744 }
  0xa7   : > { %952 = vmatmul.mubr.msk.bf16.vlgmr.msra.gmra.mrb[16].mxu0 %vm185_vm2, %v985_v49 }
  0xe8   : > { %v227_v50 = vpop.f32.mrb[0].mxu0 }
  0xe9   : > { %v905_v52 = vpop.f32.mrb[1].mxu0 }
  0xea   : > { %v230_v55 = vpop.f32.mrb[2].mxu0 }
  0xeb   : > { %v279_v51 = vpop.f32.mrb[0].mxu1  ;;  %v906_v57 = vpop.f32.mrb[3].mxu0 }
  0xec   : > { %v280_v53 = vadd.f32 %v279_v51, %v227_v50  ;;  %v911_v54 = vpop.f32.mrb[1].mxu1 }
  0xed   : > { %v282_v56 = vpop.f32.mrb[2].mxu1 }
  0xee   : > { %v283_v58 = vadd.f32 %v282_v56, %v230_v55  ;;  %v912_v59 = vpop.f32.mrb[3].mxu1 }
  0xf3   : > { %v405_v60 = vpop.f32.mrb[4].mxu1 }
  0xf4   : > { %v923_v61 = vpop.f32.mrb[5].mxu1 }
  0xf5   : > { %v408_v62 = vpop.f32.mrb[6].mxu1 }
  0xf6   : > { %v924_v63 = vpop.f32.mrb[7].mxu1 }
 0x162   : > { %v346_v0 = vpop.f32.mrb[4].mxu0  ;;  %v532_v1 = vpop.f32.mrb[8].mxu1 }
 0x163   : > { %v353_v2 = vadd.f32 %v346_v0, %v280_v53  ;;  %v917_v3 = vpop.f32.mrb[5].mxu0  ;;  %v935_v4 = vpop.f32.mrb[9].mxu1 }
 0x164   : > { %v349_v5 = vpop.f32.mrb[6].mxu0  ;;  %v535_v6 = vpop.f32.mrb[10].mxu1 }
 0x165   : > { %v354_v7 = vadd.f32 %v349_v5, %v283_v58  ;;  %v412_v8 = vadd.f32 %v405_v60, %v353_v2  ;;  %v918_v9 = vpop.f32.mrb[7].mxu0  ;;  %v936_v10 = vpop.f32.mrb[11].mxu1 }
 0x167   : > { %v413_v11 = vadd.f32 %v408_v62, %v354_v7 }
 0x16a   : > { %v464_v12 = vpop.f32.mrb[8].mxu0  ;;  %v663_v13 = vpop.f32.mrb[12].mxu1 }
 0x16b   : > { %v471_v14 = vadd.f32 %v464_v12, %v412_v8  ;;  %v929_v15 = vpop.f32.mrb[9].mxu0  ;;  %v947_v16 = vpop.f32.mrb[13].mxu1 }
 0x16c   : > { %v467_v17 = vpop.f32.mrb[10].mxu0  ;;  %v666_v18 = vpop.f32.mrb[14].mxu1 }
 0x16d   : > { %v472_v19 = vadd.f32 %v467_v17, %v413_v11  ;;  %v539_v20 = vadd.f32 %v532_v1, %v471_v14  ;;  %v930_v21 = vpop.f32.mrb[11].mxu0  ;;  %v948_v22 = vpop.f32.mrb[15].mxu1 }
 0x16f   : > { %v540_v23 = vadd.f32 %v535_v6, %v472_v19 }
 0x172   : > { %v595_v24 = vpop.f32.mrb[12].mxu0 }
 0x173   : > { %v602_v25 = vadd.f32 %v595_v24, %v539_v20  ;;  %v941_v26 = vpop.f32.mrb[13].mxu0 }
 0x174   : > { %v598_v27 = vpop.f32.mrb[14].mxu0 }
 0x175   : > { %v603_v28 = vadd.f32 %v598_v27, %v540_v23  ;;  %v670_v29 = vadd.f32 %v663_v13, %v602_v25  ;;  %v942_v30 = vpop.f32.mrb[15].mxu0 }
 0x177   : > { %v671_v31 = vadd.f32 %v666_v18, %v603_v28 }
 0x17a   : > { %v726_v32 = vpop.f32.mrb[16].mxu0 }
 0x17b   : > { %v733_v34 = vadd.f32 %v726_v32, %v670_v29  ;;  %v953_v35 = vpop.f32.mrb[17].mxu0 }
 0x17c   : > { %v729_v36 = vpop.f32.mrb[18].mxu0 }
 0x17d   : > { %v747_v38 = vadd.f32 %v740_v33, %v733_v34  ;;  %v734_v39 = vadd.f32 %v729_v36, %v671_v31  ;;  %v954_v40 = vpop.f32.mrb[19].mxu0 }
 0x17f   : > { %v748_v41 = vadd.f32 %v745_v37, %v734_v39  ;;  %v749_v42 = vmax.f32 %v747_v38, 0.0 }
 0x181   : > { %v750_v43 = vmax.f32 %v748_v41, 0.0 }
 0x183   : > { %v881_v44 = vpack.c.bf16 %v750_v43, %v749_v42 }
 0x185   : > { %882 = vst [vmem:[%s170_s21] sm:$0xff] %v881_v44  }
 0x186 PF: > { %s13_s12 = sadd.s32 1, %s992_s12  }
 0x187   : > { %p10_p4 = scmp.ge.s32.totalorder %s13_s12, 4  }
 0x189   :  { %12 = sbr.rel (!%p10_p4) target bundleno = 1 (0x1), region = 73 }

// kernel: feature_extraction_fwd.23
= control target key start
LH: loop header
LB: loop body
LE: loop exit
PB: predicated region body
PF: predicated region fallthrough
CT: control target
= control target key end

     0   :  { %s382_s12 = smov 0   ;;  %s408_s0 = inlined_call_operand.vmem [shape: bf16[2,4,8,128], index: 0, kind: input, shape index: {}]   ;;  %s409_s1 = inlined_call_operand.vmem [shape: bf16[1,16,8], index: 1, kind: input, shape index: {}]   ;;  %s410_s2 = inlined_call_operand.vmem [shape: f32[16,1], index: 2, kind: input, shape index: {}]   ;;  %s411_s3 = inlined_call_operand.vmem [shape: bf16[2,16,128], index: 3, kind: output, shape index: {}]  }
   0x1 LB: > { %s306_s13 = sadd.s32 4294967295, %s357_s12   ;;  %p310_p0 = scmp.ge.s32.totalorder %s357_s12, 1  ;;  %s357_s12 = sphi %s382_s12, %s13_s12  }
   0x2   : > { %p137_p1 = scmp.lt.s32.totalorder %s357_s12, 3 }
   0x4   : > { %p138_p2 = pnand %p310_p0, %p137_p1 }
   0x5   : > { %p161_p3 = scmp.lt.s32.totalorder (!%p138_p2), %s306_s13, 1  ;;  %v359_v0 = vmov (!%p138_p2), 0.0   ;;  %vm360_vm0 = vmmov (!%p138_p2), 0   ;;  %v175_v1 = vld [vmem:[%s410_s2] sm:$0xff] (!%p138_p2)  ;;  %v361_v2 = vmov (!%p138_p2), 0   ;;  %vm196_vm1 = vcmask (!%p138_p2), 1043456  }
   0x6   : > { %141 = sbr.rel (%p138_p2) target bundleno = 240 (0xf0), region = 32  ;;  %332 = vmatprep.subr.bf16.mxu0 (!%p138_p2), %v359_v0  ;;  %334 = vmatprep.mubr.msk.bf16.mxu0 (!%p138_p2), %vm360_vm0, %v359_v0  ;;  %v176_v3 = vld [vmem:[%s410_s2 + $0x8] sm:$0xff] (!%p138_p2)  ;;  %v350_v6 = vld [vmem:[%s409_s1] sm:$0xff] (!%p138_p2)   ;;  %vm192_vm2 = vcmask (!%p138_p2), 64512  }
   0x7   : > { %349 = vset.pattern.permute.xlu0 (!%p138_p2), %v361_v2 }
   0x8   : > { %179 = vperm.xlu0 (!%p138_p2), %349, %v175_v1  }
   0xc   : > { %184 = vperm.xlu0 (!%p138_p2), %349, %v176_v3  }
   0xd   : > { %s413_s13 = smov (!%p161_p3, %s306_s13), 1 }
   0xe   : > { %s321_s16 = sshll.u32 %s413_s13, 4  ;;  %s322_s24 = sshll.u32 %s413_s13, 3 }
   0xf   : > { %s165_s21 = scalar_lea.vmem %s408_s0, %s321_s16  ;;  %s170_s27 = scalar_lea.vmem %s411_s3, %s322_s24 }
  0x10   : > { %v172_v4 = vld [vmem:[%s165_s21] sm:$0xf] }
  0x11   : > { %v198_v5 = vsel %vm196_vm1, %v172_v4, 0 }
  0x12   : > { %333 = vmatpush3.bf16.msra.mxu0 %v198_v5 }
  0x15   : > { %335 = vmatmul.mubr.msk.bf16.vlgmr.msra.gmra.mrb[0].mxu0 %vm192_vm2, %v350_v6 }
  0x87   : > { %v180_v7 = vpop.permute.xlu0 %179 }
  0x8b   : > { %v185_v10 = vpop.permute.xlu0 %184 }
  0xe8   : > { %v234_v8 = vpop.f32.mrb[0].mxu0 }
  0xe9   : > { %v336_v9 = vpop.f32.mrb[1].mxu0  ;;  %v235_v12 = vadd.f32 %v234_v8, %v180_v7 }
  0xea   : > { %v237_v11 = vpop.f32.mrb[2].mxu0 }
  0xeb   : > { %v238_v13 = vadd.f32 %v237_v11, %v185_v10  ;;  %v337_v14 = vpop.f32.mrb[3].mxu0 }
  0xed   : > { %v328_v15 = vpack.c.bf16 %v238_v13, %v235_v12 }
  0xef   : > { %329 = vst [vmem:[%s170_s27] sm:$0xff] %v328_v15  }
  0xf0 PF: > { %s13_s12 = sadd.s32 1, %s357_s12  }
  0xf1   : > { %p10_p4 = scmp.ge.s32.totalorder %s13_s12, 4  }
  0xf3   :  { %12 = sbr.rel (!%p10_p4) target bundleno = 1 (0x1), region = 62 }

// kernel: feature_extraction_fwd.24
= control target key start
LH: loop header
LB: loop body
LE: loop exit
PB: predicated region body
PF: predicated region fallthrough
CT: control target
= control target key end

     0   :  { %s1088_s15 = smov 0   ;;  %s1181_s0 = inlined_call_operand.vmem [shape: bf16[2,1,16,142], index: 0, kind: input, shape index: {}]   ;;  %s1182_s1 = inlined_call_operand.vmem [shape: bf16[9,16,16], index: 1, kind: input, shape index: {}]   ;;  %s1183_s2 = inlined_call_operand.vmem [shape: f32[16,1], index: 2, kind: input, shape index: {}]   ;;  %s1184_s3 = inlined_call_operand.vmem [shape: bf16[2,16,128], index: 3, kind: input, shape index: {}]   ;;  %s1185_s4 = inlined_call_operand.vmem [shape: bf16[2,16,128], index: 4, kind: output, shape index: {}]  }
   0x1 LB: > { %s872_s16 = sadd.s32 4294967295, %s1050_s15   ;;  %p876_p0 = scmp.ge.s32.totalorder %s1050_s15, 1  ;;  %s1050_s15 = sphi %s1088_s15, %s14_s15  }
   0x2   : > { %p172_p1 = scmp.lt.s32.totalorder %s1050_s15, 3 }
   0x4   : > { %p173_p2 = pnand %p876_p0, %p172_p1 }
   0x5   : > { %p203_p3 = scmp.lt.s32.totalorder (!%p173_p2), %s872_s16, 1  ;;  %v1052_v0 = vmov (!%p173_p2), 0.0   ;;  %vm1053_vm0 = vmmov (!%p173_p2), 0   ;;  %v1036_v2 = vld [vmem:[%s1182_s1] sm:$0xff] (!%p173_p2)   ;;  %s1054_s23 = smov (!%p173_p2), 126   ;;  %vm248_vm1 = vcmask (!%p173_p2), 130048  }
   0x6   : > { %176 = sbr.rel (%p173_p2) target bundleno = 395 (0x18b), region = 36  ;;  %956 = vmatprep.subr.bf16.mxu0 (!%p173_p2), %v1052_v0  ;;  %962 = vmatprep.subr.bf16.mxu1 (!%p173_p2), %v1052_v0  ;;  %s1055_s24 = smov (!%p173_p2), 127   ;;  %v1062_v5 = vmov (!%p173_p2), 0   ;;  %v775_v6 = vld [vmem:[%s1183_s2] sm:$0xff] (!%p173_p2)  ;;  %v776_v7 = vld [vmem:[%s1183_s2 + $0x8] sm:$0xff] (!%p173_p2)  ;;  %vm245_vm2 = vcmask (!%p173_p2), 1039360  }
   0x7   : > { %958 = vmatprep.mubr.msk.bf16.mxu0 (!%p173_p2), %vm1053_vm0, %v1052_v0  ;;  %964 = vmatprep.mubr.msk.bf16.mxu1 (!%p173_p2), %vm1053_vm0, %v1052_v0  ;;  %s1056_s25 = smov (!%p173_p2), 122   ;;  %s1057_s26 = smov (!%p173_p2), 121   ;;  %vm360_vm3 = vcmask (!%p173_p2), 1031168   ;;  %v1035_v13 = vld [vmem:[%s1182_s1 + $0x8] sm:$0xff] (!%p173_p2)   ;;  %vm421_vm4 = vcmask (!%p173_p2), 998400   ;;  %v1038_v18 = vld [vmem:[%s1182_s1 + $0x18] sm:$0xff] (!%p173_p2)  }
   0x8   : > { %s1058_s27 = smov (!%p173_p2), 120   ;;  %s1059_s28 = smov (!%p173_p2), 116   ;;  %1029 = vset.pattern.permute.xlu0 (!%p173_p2), %v1062_v5  ;;  %1030 = vset.pattern.permute.xlu1 (!%p173_p2), %v1062_v5  ;;  %vm482_vm5 = vcmask (!%p173_p2), 990208   ;;  %v1037_v21 = vld [vmem:[%s1182_s1 + $0x10] sm:$0xff] (!%p173_p2)   ;;  %vm543_vm6 = vcmask (!%p173_p2), 982016   ;;  %v1040_v26 = vld [vmem:[%s1182_s1 + $0x28] sm:$0xff] (!%p173_p2)  }
   0x9   : > { %s1060_s29 = smov (!%p173_p2), 115   ;;  %s1061_s30 = smov (!%p173_p2), 114   ;;  %vm604_vm7 = vcmask (!%p173_p2), 949248   ;;  %v1039_v29 = vld [vmem:[%s1182_s1 + $0x20] sm:$0xff] (!%p173_p2)   ;;  %vm665_vm8 = vcmask (!%p173_p2), 941056   ;;  %v1042_v34 = vld [vmem:[%s1182_s1 + $0x38] sm:$0xff] (!%p173_p2)  }
   0xa   : > { %vm726_vm9 = vcmask (!%p173_p2), 932864   ;;  %v1041_v37 = vld [vmem:[%s1182_s1 + $0x30] sm:$0xff] (!%p173_p2)   ;;  %v1043_v39 = vld [vmem:[%s1182_s1 + $0x40] sm:$0xff] (!%p173_p2)  }
   0xd   : > { %s1187_s16 = smov (!%p203_p3, %s872_s16), 1 }
   0xe   : > { %s924_s17 = sshll.u32 %s1187_s16, 4 }
   0xf   : > { %s207_s20 = scalar_lea.vmem %s1181_s0, %s924_s17 }
  0x10   : > { %v1031_v1 = vld [vmem:[%s207_s20] ss:$8 sps:$4 sm:$0xff]   ;;  %v1033_v3 = vld [vmem:[%s207_s20 + $0x4] ss:$8 sps:$4 sm:$0xff]  }
  0x11   : > { %356 = vrot.lane.b32.xlu1 %v1031_v1, %s1054_s23  ;;  %241 = vrot.lane.b32.xlu0 %v1031_v1, %s1055_s24  ;;  %v1034_v4 = vld [vmem:[%s207_s20] ss:$8 sps:$4 sm:$0xff]  }
  0x12   : > { %963 = vmatpush3.bf16.msra.mxu1 %v1034_v4 }
  0x13   : > { %974 = vmatprep.subr.bf16.mxu1 %v1052_v0 }
  0x15   : > { %358 = vrot.lane.b32.xlu1 %v1033_v3, %s1054_s23  ;;  %243 = vrot.lane.b32.xlu0 %v1033_v3, %s1055_s24 }
  0x16   : > { %965 = vmatmul.mubr.msk.bf16.vlgmr.msra.gmra.mrb[0].mxu1 %vm248_vm1, %v1036_v2 }
  0x17   : > { %976 = vmatprep.mubr.msk.bf16.mxu1 %vm1053_vm0, %v1052_v0 }
  0x19   : > { %419 = vrot.lane.b32.xlu1 %v1033_v3, %s1056_s25  ;;  %417 = vrot.lane.b32.xlu0 %v1031_v1, %s1056_s25 }
  0x1d   : > { %480 = vrot.lane.b32.xlu1 %v1033_v3, %s1057_s26  ;;  %478 = vrot.lane.b32.xlu0 %v1031_v1, %s1057_s26 }
  0x21   : > { %541 = vrot.lane.b32.xlu1 %v1033_v3, %s1058_s27  ;;  %539 = vrot.lane.b32.xlu0 %v1031_v1, %s1058_s27  ;;  %s925_s27 = sshll.u32 %s1187_s16, 3 }
  0x22   : > { %s217_s6 = scalar_lea.vmem %s1185_s4, %s925_s27 }
  0x25   : > { %602 = vrot.lane.b32.xlu1 %v1033_v3, %s1059_s28  ;;  %600 = vrot.lane.b32.xlu0 %v1031_v1, %s1059_s28 }
  0x29   : > { %663 = vrot.lane.b32.xlu1 %v1033_v3, %s1060_s29  ;;  %661 = vrot.lane.b32.xlu0 %v1031_v1, %s1060_s29 }
  0x2d   : > { %724 = vrot.lane.b32.xlu1 %v1033_v3, %s1061_s30  ;;  %722 = vrot.lane.b32.xlu0 %v1031_v1, %s1061_s30  ;;  %s212_s30 = scalar_lea.vmem %s1184_s3, %s925_s27 }
  0x31   : > { %779 = vperm.xlu0 %1029, %v775_v6   ;;  %784 = vperm.xlu1 %1030, %v776_v7  }
  0x83   : > { %v357_v8 = vpop.permute.xlu1 %356  ;;  %v242_v9 = vpop.permute.xlu0 %241 }
  0x87   : > { %v359_v10 = vpop.permute.xlu1 %358  ;;  %v244_v11 = vpop.permute.xlu0 %243 }
  0x88   : > { %v246_v12 = vsel %vm245_vm2, %v242_v9, %v244_v11  ;;  %v361_v14 = vsel %vm360_vm3, %v357_v8, %v359_v10 }
  0x89   : > { %957 = vmatpush3.bf16.msra.mxu0 %v246_v12 }
  0x8a   : > { %968 = vmatprep.subr.bf16.mxu0 %v1052_v0 }
  0x8b   : > { %v420_v15 = vpop.permute.xlu1 %419  ;;  %v418_v16 = vpop.permute.xlu0 %417 }
  0x8c   : > { %959 = vmatmul.mubr.msk.bf16.vlgmr.msra.gmra.mrb[0].mxu0 %vm248_vm1, %v1035_v13  ;;  %v422_v17 = vsel %vm421_vm4, %v418_v16, %v420_v15 }
  0x8d   : > { %969 = vmatpush3.bf16.msra.mxu0 %v361_v14  ;;  %975 = vmatpush3.bf16.msra.mxu1 %v422_v17 }
  0x8e   : > { %970 = vmatprep.mubr.msk.bf16.mxu0 %vm1053_vm0, %v1052_v0  ;;  %980 = vmatprep.subr.bf16.mxu0 %v1052_v0 }
  0x8f   : > { %v481_v19 = vpop.permute.xlu1 %480  ;;  %v479_v20 = vpop.permute.xlu0 %478  ;;  %986 = vmatprep.subr.bf16.mxu1 %v1052_v0 }
  0x90   : > { %977 = vmatmul.mubr.msk.bf16.vlgmr.msra.gmra.mrb[4].mxu1 %vm248_vm1, %v1038_v18  ;;  %v483_v22 = vsel %vm482_vm5, %v479_v20, %v481_v19 }
  0x91   : > { %988 = vmatprep.mubr.msk.bf16.mxu1 %vm1053_vm0, %v1052_v0 }
  0x93   : > { %v542_v23 = vpop.permute.xlu1 %541  ;;  %v540_v24 = vpop.permute.xlu0 %539 }
  0x94   : > { %971 = vmatmul.mubr.msk.bf16.vlgmr.msra.gmra.mrb[4].mxu0 %vm248_vm1, %v1037_v21  ;;  %v544_v25 = vsel %vm543_vm6, %v540_v24, %v542_v23  ;;  %v930_v23 = vld [vmem:[%s212_s30] sm:$0xff]  }
  0x95   : > { %981 = vmatpush3.bf16.msra.mxu0 %v483_v22  ;;  %987 = vmatpush3.bf16.msra.mxu1 %v544_v25 }
  0x96   : > { %982 = vmatprep.mubr.msk.bf16.mxu0 %vm1053_vm0, %v1052_v0  ;;  %992 = vmatprep.subr.bf16.mxu0 %v1052_v0 }
  0x97   : > { %v603_v27 = vpop.permute.xlu1 %602  ;;  %v601_v28 = vpop.permute.xlu0 %600  ;;  %998 = vmatprep.subr.bf16.mxu1 %v1052_v0 }
  0x98   : > { %989 = vmatmul.mubr.msk.bf16.vlgmr.msra.gmra.mrb[8].mxu1 %vm248_vm1, %v1040_v26  ;;  %v605_v30 = vsel %vm604_vm7, %v601_v28, %v603_v27 }
  0x99   : > { %1000 = vmatprep.mubr.msk.bf16.mxu1 %vm1053_vm0, %v1052_v0 }
  0x9b   : > { %v664_v31 = vpop.permute.xlu1 %663  ;;  %v662_v32 = vpop.permute.xlu0 %661 }
  0x9c   : > { %983 = vmatmul.mubr.msk.bf16.vlgmr.msra.gmra.mrb[8].mxu0 %vm248_vm1, %v1039_v29  ;;  %v666_v33 = vsel %vm665_vm8, %v662_v32, %v664_v31 }
  0x9d   : > { %993 = vmatpush3.bf16.msra.mxu0 %v605_v30  ;;  %999 = vmatpush3.bf16.msra.mxu1 %v666_v33  ;;  %v931_v30 = vunpack.c.l.bf16 %v930_v23  ;;  %v932_v33 = vunpack.c.h.bf16 %v930_v23 }
  0x9e   : > { %994 = vmatprep.mubr.msk.bf16.mxu0 %vm1053_vm0, %v1052_v0  ;;  %1004 = vmatprep.subr.bf16.mxu0 %v1052_v0 }
  0x9f   : > { %v725_v35 = vpop.permute.xlu1 %724  ;;  %v723_v36 = vpop.permute.xlu0 %722 }
  0xa0   : > { %1001 = vmatmul.mubr.msk.bf16.vlgmr.msra.gmra.mrb[12].mxu1 %vm248_vm1, %v1042_v34  ;;  %v727_v38 = vsel %vm726_vm9, %v723_v36, %v725_v35 }
  0xa4   : > { %995 = vmatmul.mubr.msk.bf16.vlgmr.msra.gmra.mrb[12].mxu0 %vm248_vm1, %v1041_v37 }
  0xa5   : > { %1005 = vmatpush3.bf16.msra.mxu0 %v727_v38  ;;  %1006 = vmatprep.mubr.msk.bf16.mxu0 %vm1053_vm0, %v1052_v0 }
  0xac   : > { %1007 = vmatmul.mubr.msk.bf16.vlgmr.msra.gmra.mrb[16].mxu0 %vm248_vm1, %v1043_v39 }
  0xb0   : > { %v780_v24 = vpop.permute.xlu0 %779  ;;  %v785_v28 = vpop.permute.xlu1 %784 }
  0xe9   : > { %v341_v40 = vpop.f32.mrb[0].mxu1 }
  0xea   : > { %v966_v41 = vpop.f32.mrb[1].mxu1 }
  0xeb   : > { %v344_v42 = vpop.f32.mrb[2].mxu1 }
  0xec   : > { %v967_v43 = vpop.f32.mrb[3].mxu1 }
 0x15f   : > { %v286_v44 = vpop.f32.mrb[0].mxu0 }
 0x160   : > { %v342_v45 = vadd.f32 %v341_v40, %v286_v44  ;;  %v960_v46 = vpop.f32.mrb[1].mxu0 }
 0x161   : > { %v289_v47 = vpop.f32.mrb[2].mxu0 }
 0x162   : > { %v345_v48 = vadd.f32 %v344_v42, %v289_v47  ;;  %v961_v49 = vpop.f32.mrb[3].mxu0 }
 0x163   : > { %v461_v50 = vpop.f32.mrb[4].mxu1 }
 0x164   : > { %v978_v51 = vpop.f32.mrb[5].mxu1 }
 0x165   : > { %v464_v52 = vpop.f32.mrb[6].mxu1 }
 0x166   : > { %v979_v53 = vpop.f32.mrb[7].mxu1 }
 0x167   : > { %v400_v54 = vpop.f32.mrb[4].mxu0 }
 0x168   : > { %v407_v55 = vadd.f32 %v400_v54, %v342_v45  ;;  %v972_v56 = vpop.f32.mrb[5].mxu0 }
 0x169   : > { %v403_v57 = vpop.f32.mrb[6].mxu0 }
 0x16a   : > { %v408_v58 = vadd.f32 %v403_v57, %v345_v48  ;;  %v468_v59 = vadd.f32 %v461_v50, %v407_v55  ;;  %v973_v60 = vpop.f32.mrb[7].mxu0 }
 0x16b   : > { %v583_v61 = vpop.f32.mrb[8].mxu1 }
 0x16c   : > { %v469_v62 = vadd.f32 %v464_v52, %v408_v58  ;;  %v990_v63 = vpop.f32.mrb[9].mxu1 }
 0x16d   : > { %v586_v0 = vpop.f32.mrb[10].mxu1 }
 0x16e   : > { %v991_v1 = vpop.f32.mrb[11].mxu1 }
 0x16f   : > { %v522_v2 = vpop.f32.mrb[8].mxu0 }
 0x170   : > { %v529_v3 = vadd.f32 %v522_v2, %v468_v59  ;;  %v984_v4 = vpop.f32.mrb[9].mxu0 }
 0x171   : > { %v525_v5 = vpop.f32.mrb[10].mxu0 }
 0x172   : > { %v530_v6 = vadd.f32 %v525_v5, %v469_v62  ;;  %v590_v7 = vadd.f32 %v583_v61, %v529_v3  ;;  %v985_v8 = vpop.f32.mrb[11].mxu0 }
 0x173   : > { %v705_v9 = vpop.f32.mrb[12].mxu1 }
 0x174   : > { %v591_v10 = vadd.f32 %v586_v0, %v530_v6  ;;  %v1002_v11 = vpop.f32.mrb[13].mxu1 }
 0x175   : > { %v708_v12 = vpop.f32.mrb[14].mxu1 }
 0x176   : > { %v1003_v13 = vpop.f32.mrb[15].mxu1 }
 0x177   : > { %v644_v14 = vpop.f32.mrb[12].mxu0 }
 0x178   : > { %v651_v15 = vadd.f32 %v644_v14, %v590_v7  ;;  %v996_v16 = vpop.f32.mrb[13].mxu0 }
 0x179   : > { %v647_v17 = vpop.f32.mrb[14].mxu0 }
 0x17a   : > { %v652_v18 = vadd.f32 %v647_v17, %v591_v10  ;;  %v712_v19 = vadd.f32 %v705_v9, %v651_v15  ;;  %v997_v20 = vpop.f32.mrb[15].mxu0 }
 0x17c   : > { %v713_v21 = vadd.f32 %v708_v12, %v652_v18 }
 0x17f   : > { %v766_v22 = vpop.f32.mrb[16].mxu0 }
 0x180   : > { %v773_v25 = vadd.f32 %v766_v22, %v712_v19  ;;  %v1008_v26 = vpop.f32.mrb[17].mxu0 }
 0x181   : > { %v769_v27 = vpop.f32.mrb[18].mxu0 }
 0x182   : > { %v774_v29 = vadd.f32 %v769_v27, %v713_v21  ;;  %v787_v31 = vadd.f32 %v780_v24, %v773_v25  ;;  %v1009_v32 = vpop.f32.mrb[19].mxu0 }
 0x184   : > { %v788_v34 = vadd.f32 %v785_v28, %v774_v29  ;;  %v793_v35 = vadd.f32 %v931_v30, %v787_v31 }
 0x186   : > { %v794_v36 = vadd.f32 %v932_v33, %v788_v34 }
 0x188   : > { %v936_v37 = vpack.c.bf16 %v794_v36, %v793_v35 }
 0x18a   : > { %937 = vst [vmem:[%s217_s6] sm:$0xff] %v936_v37  }
 0x18b PF: > { %s14_s15 = sadd.s32 1, %s1050_s15  }
 0x18c   : > { %p11_p4 = scmp.ge.s32.totalorder %s14_s15, 4  }
 0x18e   :  { %13 = sbr.rel (!%p11_p4) target bundleno = 1 (0x1), region = 77 }

// kernel: feature_extraction_fwd.26
= control target key start
LH: loop header
LB: loop body
LE: loop exit
PB: predicated region body
PF: predicated region fallthrough
CT: control target
= control target key end

     0   :  { %s438_s12 = smov 0   ;;  %s479_s0 = inlined_call_operand.vmem [shape: bf16[2,4,16,128], index: 0, kind: input, shape index: {}]   ;;  %s480_s1 = inlined_call_operand.vmem [shape: bf16[1,32,16], index: 1, kind: input, shape index: {}]   ;;  %s481_s2 = inlined_call_operand.vmem [shape: f32[32,1], index: 2, kind: input, shape index: {}]   ;;  %s482_s3 = inlined_call_operand.vmem [shape: bf16[2,32,128], index: 3, kind: output, shape index: {}]  }
   0x1 LB: > { %s349_s13 = sadd.s32 4294967295, %s415_s12   ;;  %p353_p0 = scmp.ge.s32.totalorder %s415_s12, 1  ;;  %s415_s12 = sphi %s438_s12, %s13_s12  }
   0x2   : > { %p137_p1 = scmp.lt.s32.totalorder %s415_s12, 3 }
   0x4   : > { %p138_p2 = pnand %p353_p0, %p137_p1 }
   0x5   : > { %p161_p3 = scmp.lt.s32.totalorder (!%p138_p2), %s349_s13, 1  ;;  %v407_v0 = vld [vmem:[%s480_s1] sm:$0xff] (!%p138_p2)   ;;  %vm218_vm0 = vcmask (!%p138_p2), 130048   ;;  %v180_v1 = vld [vmem:[%s481_s2 + $0x10] sm:$0xff] (!%p138_p2)  ;;  %v417_v3 = vmov (!%p138_p2), 0   ;;  %v181_v4 = vld [vmem:[%s481_s2 + $0x18] sm:$0xff] (!%p138_p2) }
   0x6   : > { %141 = sbr.rel (%p138_p2) target bundleno = 241 (0xf1), region = 32  ;;  %391 = vmatprep.mubr.msk.bf16.mxu0 (!%p138_p2), %vm218_vm0, %v407_v0  ;;  %v178_v2 = vld [vmem:[%s481_s2] sm:$0xff] (!%p138_p2)  ;;  %405 = vset.pattern.permute.xlu1 (!%p138_p2), %v417_v3  ;;  %v179_v5 = vld [vmem:[%s481_s2 + $0x8] sm:$0xff] (!%p138_p2) }
   0x7   : > { %404 = vset.pattern.permute.xlu0 (!%p138_p2), %v417_v3  ;;  %194 = vperm.xlu1 (!%p138_p2), %405, %v180_v1   ;;  %v408_v7 = vld [vmem:[%s480_s1 + $0x8] sm:$0xff] (!%p138_p2)  }
   0x8   : > { %184 = vperm.xlu0 (!%p138_p2), %404, %v178_v2  }
   0xb   : > { %199 = vperm.xlu1 (!%p138_p2), %405, %v181_v4  }
   0xc   : > { %189 = vperm.xlu0 (!%p138_p2), %404, %v179_v5  }
   0xd   : > { %s484_s13 = smov (!%p161_p3, %s349_s13), 1 }
   0xe   : > { %s369_s20 = sshll.u32 %s484_s13, 5  ;;  %s370_s30 = sshll.u32 %s484_s13, 4 }
   0xf   : > { %s165_s23 = scalar_lea.vmem %s479_s0, %s369_s20  ;;  %s170_s6 = scalar_lea.vmem %s482_s3, %s370_s30 }
  0x10   : > { %v406_v6 = vld [vmem:[%s165_s23] sm:$0xff]  }
  0x11   : > { %389 = vmatprep.subr.bf16.mxu0 %v406_v6 }
  0x12   : > { %390 = vmatpush3.bf16.msra.mxu0 %v406_v6 }
  0x15   : > { %392 = vmatmul.mubr.msk.bf16.vlgmr.msra.gmra.mrb[0].mxu0 %vm218_vm0, %v408_v7 }
  0x86   : > { %v195_v8 = vpop.permute.xlu1 %194 }
  0x87   : > { %v185_v9 = vpop.permute.xlu0 %184 }
  0x8a   : > { %v200_v12 = vpop.permute.xlu1 %199 }
  0x8b   : > { %v190_v14 = vpop.permute.xlu0 %189 }
  0xe8   : > { %v393_v10 = vpop.f32.mrb[0].mxu0 }
  0xe9   : > { %v259_v11 = vpop.f32.mrb[1].mxu0  ;;  %v268_v15 = vadd.f32 %v393_v10, %v195_v8 }
  0xea   : > { %v394_v13 = vpop.f32.mrb[2].mxu0  ;;  %v260_v18 = vadd.f32 %v259_v11, %v185_v9 }
  0xeb   : > { %v271_v16 = vadd.f32 %v394_v13, %v200_v12  ;;  %v262_v17 = vpop.f32.mrb[3].mxu0 }
  0xec   : > { %v263_v19 = vadd.f32 %v262_v17, %v190_v14 }
  0xed   : > { %v383_v20 = vpack.c.bf16 %v271_v16, %v268_v15 }
  0xee   : > { %v378_v21 = vpack.c.bf16 %v263_v19, %v260_v18 }
  0xef   : > { %385 = vst [vmem:[%s170_s6 + $0x8] sm:$0xff] %v383_v20  }
  0xf0   : > { %379 = vst [vmem:[%s170_s6] sm:$0xff] %v378_v21  }
  0xf1 PF: > { %s13_s12 = sadd.s32 1, %s415_s12  }
  0xf2   : > { %p10_p4 = scmp.ge.s32.totalorder %s13_s12, 4  }
  0xf4   :  { %12 = sbr.rel (!%p10_p4) target bundleno = 1 (0x1), region = 62 }

// kernel: feature_extraction_fwd.25
= control target key start
LH: loop header
LB: loop body
LE: loop exit
PB: predicated region body
PF: predicated region fallthrough
CT: control target
= control target key end

     0   :  { %s1345_s12 = smov 0   ;;  %s1464_s0 = inlined_call_operand.vmem [shape: bf16[2,4,16,132], index: 0, kind: input, shape index: {}]   ;;  %s1465_s1 = inlined_call_operand.vmem [shape: bf16[9,32,16], index: 1, kind: input, shape index: {}]   ;;  %s1466_s2 = inlined_call_operand.vmem [shape: f32[32,1], index: 2, kind: input, shape index: {}]   ;;  %s1467_s3 = inlined_call_operand.vmem [shape: bf16[2,32,128], index: 3, kind: output, shape index: {}]  }
   0x1 LB: > { %s1035_s13 = sadd.s32 4294967295, %s1319_s12   ;;  %p1039_p0 = scmp.ge.s32.totalorder %s1319_s12, 1  ;;  %s1319_s12 = sphi %s1345_s12, %s13_s12  }
   0x2   : > { %p137_p1 = scmp.lt.s32.totalorder %s1319_s12, 3 }
   0x4   : > { %p138_p2 = pnand %p1039_p0, %p137_p1 }
   0x5   : > { %p161_p3 = scmp.lt.s32.totalorder (!%p138_p2), %s1035_s13, 1  ;;  %v1292_v0 = vld [vmem:[%s1465_s1 + $0x10] sm:$0xff] (!%p138_p2)   ;;  %vm202_vm0 = vcmask (!%p138_p2), 130048   ;;  %v1295_v1 = vld [vmem:[%s1465_s1 + $0x40] sm:$0xff] (!%p138_p2)   ;;  %s1321_s22 = smov (!%p138_p2), 127   ;;  %v1293_v7 = vld [vmem:[%s1465_s1 + $0x18] sm:$0xff] (!%p138_p2)  }
   0x6   : > { %141 = sbr.rel (%p138_p2) target bundleno = 401 (0x191), region = 32  ;;  %1184 = vmatprep.mubr.msk.bf16.mxu1 (!%p138_p2), %vm202_vm0, %v1292_v0  ;;  %1208 = vmatprep.mubr.msk.bf16.mxu0 (!%p138_p2), %vm202_vm0, %v1295_v1  ;;  %s1322_s23 = smov (!%p138_p2), 125   ;;  %v1297_v10 = vld [vmem:[%s1465_s1 + $0x48] sm:$0xff] (!%p138_p2)   ;;  %v1298_v11 = vld [vmem:[%s1465_s1] sm:$0xff] (!%p138_p2)   ;;  %v1300_v12 = vld [vmem:[%s1465_s1 + $0x50] sm:$0xff] (!%p138_p2)   ;;  %v1324_v19 = vmov (!%p138_p2), 0  }
   0x7   : > { %v1299_v15 = vld [vmem:[%s1465_s1 + $0x8] sm:$0xff] (!%p138_p2)   ;;  %s1323_s7 = smov (!%p138_p2), 124   ;;  %v1302_v16 = vld [vmem:[%s1465_s1 + $0x20] sm:$0xff] (!%p138_p2)   ;;  %1281 = vset.pattern.permute.xlu1 (!%p138_p2), %v1324_v19  ;;  %1280 = vset.pattern.permute.xlu0 (!%p138_p2), %v1324_v19  ;;  %v930_v20 = vld [vmem:[%s1466_s2 + $0x10] sm:$0xff] (!%p138_p2)  ;;  %vm358_vm1 = vcmask (!%p138_p2), 1039360   ;;  %vm695_vm2 = vcmask (!%p138_p2), 1022976  }
   0x8   : > { %v929_v17 = vld [vmem:[%s1466_s2 + $0x8] sm:$0xff] (!%p138_p2)  ;;  %v928_v18 = vld [vmem:[%s1466_s2] sm:$0xff] (!%p138_p2)  ;;  %v931_v21 = vld [vmem:[%s1466_s2 + $0x18] sm:$0xff] (!%p138_p2)  ;;  %vm866_vm3 = vcmask (!%p138_p2), 1014784  }
   0x9   : > { %v1301_v27 = vld [vmem:[%s1465_s1 + $0x58] sm:$0xff] (!%p138_p2)   ;;  %v1304_v29 = vld [vmem:[%s1465_s1 + $0x60] sm:$0xff] (!%p138_p2)   ;;  %v1303_v34 = vld [vmem:[%s1465_s1 + $0x28] sm:$0xff] (!%p138_p2)  }
   0xa   : > { %v1307_v36 = vld [vmem:[%s1465_s1 + $0x30] sm:$0xff] (!%p138_p2)   ;;  %v1306_v39 = vld [vmem:[%s1465_s1 + $0x68] sm:$0xff] (!%p138_p2)   ;;  %v1308_v44 = vld [vmem:[%s1465_s1 + $0x38] sm:$0xff] (!%p138_p2)  }
   0xb   : > { %v1309_v42 = vld [vmem:[%s1465_s1 + $0x70] sm:$0xff] (!%p138_p2)   ;;  %v1310_v45 = vld [vmem:[%s1465_s1 + $0x78] sm:$0xff] (!%p138_p2)   ;;  %v1311_v46 = vld [vmem:[%s1465_s1 + $0x80] sm:$0xff] (!%p138_p2)  }
   0xc   : > { %v1312_v47 = vld [vmem:[%s1465_s1 + $0x88] sm:$0xff] (!%p138_p2)  }
   0xd   : > { %s1469_s13 = smov (!%p161_p3, %s1035_s13), 1 }
   0xe   : > { %s1138_s18 = sshll.u32 %s1469_s13, 6  ;;  %s1139_s15 = sshll.u32 %s1469_s13, 4 }
   0xf   : > { %s1366_s21 = scalar_lea.vmem %s1464_s0, %s1138_s18  ;;  %s170_s18 = scalar_lea.vmem %s1467_s3, %s1139_s15 }
  0x10   : > { %v1282_v2 = vld [vmem:[%s1366_s21 + $0x20] ss:$8 sps:$4 sm:$0xff]   ;;  %v1284_v3 = vld [vmem:[%s1366_s21 + $0x24] ss:$8 sps:$4 sm:$0xff]   ;;  %v1291_v6 = vld [vmem:[%s1366_s21 + $0x10] ss:$8 sps:$4 sm:$0xff]  }
  0x11   : > { %611 = vrot.lane.b32.xlu0 %v1282_v2, %s1321_s22  ;;  %v1285_v4 = vld [vmem:[%s1366_s21] ss:$8 sps:$4 sm:$0xff]   ;;  %v1287_v5 = vld [vmem:[%s1366_s21 + $0x4] ss:$8 sps:$4 sm:$0xff]   ;;  %v1294_v8 = vld [vmem:[%s1366_s21 + $0x30] ss:$8 sps:$4 sm:$0xff]   ;;  %1182 = vmatprep.subr.bf16.mxu1 %v1291_v6 }
  0x12   : > { %691 = vrot.lane.b32.xlu1 %v1285_v4, %s1322_s23  ;;  %v1296_v9 = vld [vmem:[%s1366_s21] ss:$8 sps:$4 sm:$0xff]   ;;  %1183 = vmatpush3.bf16.msra.mxu1 %v1291_v6  ;;  %v1288_v13 = vld [vmem:[%s1366_s21 + $0x10] ss:$8 sps:$4 sm:$0xff]   ;;  %v1290_v14 = vld [vmem:[%s1366_s21 + $0x14] ss:$8 sps:$4 sm:$0xff]  }
  0x13   : > { %1206 = vmatprep.subr.bf16.mxu0 %v1294_v8  ;;  %1188 = vmatprep.subr.bf16.mxu1 %v1296_v9  ;;  %v1305_v32 = vld [vmem:[%s1366_s21 + $0x20] ss:$8 sps:$4 sm:$0xff]  }
  0x14   : > { %1207 = vmatpush3.bf16.msra.mxu0 %v1294_v8 }
  0x15   : > { %613 = vrot.lane.b32.xlu0 %v1284_v3, %s1321_s22  ;;  %1185 = vmatmul.mubr.msk.bf16.vlgmr.msra.gmra.mrb[0].mxu1 %vm202_vm0, %v1293_v7 }
  0x16   : > { %693 = vrot.lane.b32.xlu1 %v1287_v5, %s1322_s23  ;;  %1189 = vmatpush3.bf16.msra.mxu1 %v1296_v9 }
  0x17   : > { %1209 = vmatmul.mubr.msk.bf16.vlgmr.msra.gmra.mrb[0].mxu0 %vm202_vm0, %v1297_v10  ;;  %1190 = vmatprep.mubr.msk.bf16.mxu1 %vm202_vm0, %v1298_v11 }
  0x18   : > { %1214 = vmatprep.mubr.msk.bf16.mxu0 %vm202_vm0, %v1300_v12 }
  0x19   : > { %354 = vrot.lane.b32.xlu0 %v1285_v4, %s1321_s22 }
  0x1a   : > { %356 = vrot.lane.b32.xlu1 %v1287_v5, %s1321_s22 }
  0x1d   : > { %782 = vrot.lane.b32.xlu0 %v1288_v13, %s1322_s23 }
  0x1e   : > { %784 = vrot.lane.b32.xlu1 %v1290_v14, %s1322_s23 }
  0x21   : > { %862 = vrot.lane.b32.xlu0 %v1285_v4, %s1323_s7  ;;  %1191 = vmatmul.mubr.msk.bf16.vlgmr.msra.gmra.mrb[0].mxu1 %vm202_vm0, %v1299_v15 }
  0x22   : > { %864 = vrot.lane.b32.xlu1 %v1287_v5, %s1323_s7  ;;  %1196 = vmatprep.mubr.msk.bf16.mxu1 %vm202_vm0, %v1302_v16 }
  0x25   : > { %934 = vperm.xlu0 %1280, %v928_v18  }
  0x26   : > { %939 = vperm.xlu1 %1281, %v929_v17  }
  0x29   : > { %949 = vperm.xlu0 %1280, %v931_v21  }
  0x2a   : > { %944 = vperm.xlu1 %1281, %v930_v20  }
  0x83   : > { %v612_v22 = vpop.permute.xlu0 %611 }
  0x84   : > { %v692_v23 = vpop.permute.xlu1 %691 }
  0x87   : > { %v614_v24 = vpop.permute.xlu0 %613 }
  0x88   : > { %v615_v25 = vsel %vm358_vm1, %v612_v22, %v614_v24  ;;  %v694_v26 = vpop.permute.xlu1 %693 }
  0x89   : > { %1212 = vmatprep.subr.bf16.mxu0 %v615_v25  ;;  %v696_v28 = vsel %vm695_vm2, %v692_v23, %v694_v26 }
  0x8a   : > { %1213 = vmatpush3.bf16.msra.mxu0 %v615_v25 }
  0x8b   : > { %v355_v30 = vpop.permute.xlu0 %354  ;;  %1218 = vmatprep.subr.bf16.mxu0 %v696_v28 }
  0x8c   : > { %v357_v31 = vpop.permute.xlu1 %356 }
  0x8d   : > { %1215 = vmatmul.mubr.msk.bf16.vlgmr.msra.gmra.mrb[0].mxu0 %vm202_vm0, %v1301_v27  ;;  %v359_v33 = vsel %vm358_vm1, %v355_v30, %v357_v31 }
  0x8e   : > { %1219 = vmatpush3.bf16.msra.mxu0 %v696_v28  ;;  %1220 = vmatprep.mubr.msk.bf16.mxu0 %vm202_vm0, %v1304_v29 }
  0x8f   : > { %1194 = vmatprep.subr.bf16.mxu1 %v359_v33  ;;  %v783_v35 = vpop.permute.xlu0 %782 }
  0x90   : > { %1195 = vmatpush3.bf16.msra.mxu1 %v359_v33  ;;  %v785_v37 = vpop.permute.xlu1 %784 }
  0x91   : > { %1200 = vmatprep.subr.bf16.mxu1 %v1305_v32  ;;  %v786_v38 = vsel %vm695_vm2, %v783_v35, %v785_v37 }
  0x92   : > { %1224 = vmatprep.subr.bf16.mxu0 %v786_v38 }
  0x93   : > { %1197 = vmatmul.mubr.msk.bf16.vlgmr.msra.gmra.mrb[0].mxu1 %vm202_vm0, %v1303_v34  ;;  %v863_v40 = vpop.permute.xlu0 %862 }
  0x94   : > { %1201 = vmatpush3.bf16.msra.mxu1 %v1305_v32  ;;  %1202 = vmatprep.mubr.msk.bf16.mxu1 %vm202_vm0, %v1307_v36  ;;  %v865_v41 = vpop.permute.xlu1 %864 }
  0x95   : > { %v867_v43 = vsel %vm866_vm3, %v863_v40, %v865_v41 }
  0x99   : > { %1221 = vmatmul.mubr.msk.bf16.vlgmr.msra.gmra.mrb[0].mxu0 %vm202_vm0, %v1306_v39 }
  0x9a   : > { %1225 = vmatpush3.bf16.msra.mxu0 %v786_v38  ;;  %1226 = vmatprep.mubr.msk.bf16.mxu0 %vm202_vm0, %v1309_v42 }
  0x9b   : > { %1230 = vmatprep.subr.bf16.mxu0 %v867_v43 }
  0x9f   : > { %1203 = vmatmul.mubr.msk.bf16.vlgmr.msra.gmra.mrb[0].mxu1 %vm202_vm0, %v1308_v44 }
  0xa4   : > { %v935_v53 = vpop.permute.xlu0 %934 }
  0xa5   : > { %1227 = vmatmul.mubr.msk.bf16.vlgmr.msra.gmra.mrb[0].mxu0 %vm202_vm0, %v1310_v45  ;;  %v940_v52 = vpop.permute.xlu1 %939 }
  0xa6   : > { %1231 = vmatpush3.bf16.msra.mxu0 %v867_v43  ;;  %1232 = vmatprep.mubr.msk.bf16.mxu0 %vm202_vm0, %v1311_v46 }
  0xa8   : > { %v950_v1 = vpop.permute.xlu0 %949 }
  0xa9   : > { %v945_v55 = vpop.permute.xlu1 %944 }
  0xb1   : > { %1233 = vmatmul.mubr.msk.bf16.vlgmr.msra.gmra.mrb[0].mxu0 %vm202_vm0, %v1312_v47 }
 0x172   : > { %v1204_v48 = vpop.f32.mrb[0].mxu1 }
 0x173   : > { %v484_v49 = vpop.f32.mrb[1].mxu1 }
 0x174   : > { %v1205_v50 = vpop.f32.mrb[2].mxu1 }
 0x175   : > { %v487_v51 = vpop.f32.mrb[3].mxu1 }
 0x184   : > { %v1234_v54 = vpop.f32.mrb[0].mxu0 }
 0x185   : > { %v1236_v56 = vadd.f32 %v1234_v54, %v1204_v48  ;;  %v909_v57 = vpop.f32.mrb[1].mxu0 }
 0x186   : > { %v1237_v58 = vadd.f32 %v909_v57, %v484_v49  ;;  %v1235_v59 = vpop.f32.mrb[2].mxu0 }
 0x187   : > { %v1238_v60 = vadd.f32 %v1235_v59, %v1205_v50  ;;  %v954_v61 = vadd.f32 %v1236_v56, %v945_v55  ;;  %v912_v62 = vpop.f32.mrb[3].mxu0 }
 0x188   : > { %v952_v63 = vadd.f32 %v1237_v58, %v935_v53  ;;  %v1239_v0 = vadd.f32 %v912_v62, %v487_v51 }
 0x189   : > { %v955_v2 = vadd.f32 %v1238_v60, %v950_v1  ;;  %v958_v4 = vmax.f32 %v954_v61, 0.0 }
 0x18a   : > { %v953_v3 = vadd.f32 %v1239_v0, %v940_v52  ;;  %v956_v6 = vmax.f32 %v952_v63, 0.0 }
 0x18b   : > { %v959_v5 = vmax.f32 %v955_v2, 0.0 }
 0x18c   : > { %v957_v7 = vmax.f32 %v953_v3, 0.0 }
 0x18d   : > { %v1152_v8 = vpack.c.bf16 %v959_v5, %v958_v4 }
 0x18e   : > { %v1147_v9 = vpack.c.bf16 %v957_v7, %v956_v6 }
 0x18f   : > { %1154 = vst [vmem:[%s170_s18 + $0x8] sm:$0xff] %v1152_v8  }
 0x190   : > { %1148 = vst [vmem:[%s170_s18] sm:$0xff] %v1147_v9  }
 0x191 PF: > { %s13_s12 = sadd.s32 1, %s1319_s12  }
 0x192   : > { %p10_p4 = scmp.ge.s32.totalorder %s13_s12, 4  }
 0x194   :  { %12 = sbr.rel (!%p10_p4) target bundleno = 1 (0x1), region = 73 }

// kernel: feature_extraction_fwd.33
= control target key start
LH: loop header
LB: loop body
LE: loop exit
PB: predicated region body
PF: predicated region fallthrough
CT: control target
= control target key end

     0   :  { %s1405_s12 = smov 0   ;;  %s1532_s0 = inlined_call_operand.vmem [shape: bf16[2,1,32,138], index: 0, kind: input, shape index: {}]   ;;  %s1533_s1 = inlined_call_operand.vmem [shape: bf16[9,32,32], index: 1, kind: input, shape index: {}]   ;;  %s1534_s2 = inlined_call_operand.vmem [shape: f32[32,1], index: 2, kind: input, shape index: {}]   ;;  %s1535_s3 = inlined_call_operand.vmem [shape: bf16[2,32,128], index: 3, kind: output, shape index: {}]  }
   0x1 LB: > { %s1077_s13 = sadd.s32 4294967295, %s1374_s12   ;;  %p1081_p0 = scmp.ge.s32.totalorder %s1374_s12, 1  ;;  %s1374_s12 = sphi %s1405_s12, %s13_s12  }
   0x2   : > { %p137_p1 = scmp.lt.s32.totalorder %s1374_s12, 3 }
   0x4   : > { %p138_p2 = pnand %p1081_p0, %p137_p1 }
   0x5   : > { %p161_p3 = scmp.lt.s32.totalorder (!%p138_p2), %s1077_s13, 1  ;;  %vm228_vm0 = vcmask (!%p138_p2), 261120   ;;  %s1376_s18 = smov (!%p138_p2), 123   ;;  %v1348_v3 = vld [vmem:[%s1533_s1 + $0x40] sm:$0xff] (!%p138_p2)   ;;  %v1350_v5 = vld [vmem:[%s1533_s1 + $0x10] sm:$0xff] (!%p138_p2)   ;;  %v1384_v6 = vmov (!%p138_p2), 0  }
   0x6   : > { %141 = sbr.rel (%p138_p2) target bundleno = 421 (0x1a5), region = 32  ;;  %1255 = vmatprep.mubr.msk.bf16.mxu0 (!%p138_p2), %vm228_vm0, %v1348_v3  ;;  %s1377_s23 = smov (!%p138_p2), 127   ;;  %1223 = vmatprep.mubr.msk.bf16.mxu1 (!%p138_p2), %vm228_vm0, %v1350_v5  ;;  %v971_v7 = vld [vmem:[%s1534_s2 + $0x8] sm:$0xff] (!%p138_p2)  ;;  %v970_v8 = vld [vmem:[%s1534_s2] sm:$0xff] (!%p138_p2)  ;;  %v972_v9 = vld [vmem:[%s1534_s2 + $0x10] sm:$0xff] (!%p138_p2)  ;;  %vm558_vm1 = vcmask (!%p138_p2), 1006592  }
   0x7   : > { %s1378_s24 = smov (!%p138_p2), 122   ;;  %s1379_s25 = smov (!%p138_p2), 120   ;;  %1341 = vset.pattern.permute.xlu1 (!%p138_p2), %v1384_v6  ;;  %1340 = vset.pattern.permute.xlu0 (!%p138_p2), %v1384_v6  ;;  %v973_v10 = vld [vmem:[%s1534_s2 + $0x18] sm:$0xff] (!%p138_p2)  ;;  %vm223_vm2 = vcmask (!%p138_p2), 1039360   ;;  %vm645_vm3 = vcmask (!%p138_p2), 998400   ;;  %v1349_v20 = vld [vmem:[%s1533_s1 + $0x48] sm:$0xff] (!%p138_p2)  }
   0x8   : > { %s1380_s26 = smov (!%p138_p2), 126   ;;  %s1381_s27 = smov (!%p138_p2), 119   ;;  %v1353_v22 = vld [vmem:[%s1533_s1 + $0x50] sm:$0xff] (!%p138_p2)   ;;  %v1351_v29 = vld [vmem:[%s1533_s1 + $0x18] sm:$0xff] (!%p138_p2)   ;;  %v1356_v33 = vld [vmem:[%s1533_s1] sm:$0xff] (!%p138_p2)   ;;  %vm732_vm4 = vcmask (!%p138_p2), 982016  }
   0x9   : > { %s1382_s28 = smov (!%p138_p2), 124   ;;  %s1383_s29 = smov (!%p138_p2), 118   ;;  %v1354_v35 = vld [vmem:[%s1533_s1 + $0x58] sm:$0xff] (!%p138_p2)   ;;  %v1358_v38 = vld [vmem:[%s1533_s1 + $0x60] sm:$0xff] (!%p138_p2)   ;;  %vm384_vm5 = vcmask (!%p138_p2), 1031168   ;;  %v1357_v43 = vld [vmem:[%s1533_s1 + $0x8] sm:$0xff] (!%p138_p2)  }
   0xa   : > { %v1360_v45 = vld [vmem:[%s1533_s1 + $0x20] sm:$0xff] (!%p138_p2)   ;;  %vm819_vm6 = vcmask (!%p138_p2), 973824   ;;  %v1359_v48 = vld [vmem:[%s1533_s1 + $0x68] sm:$0xff] (!%p138_p2)   ;;  %v1362_v50 = vld [vmem:[%s1533_s1 + $0x70] sm:$0xff] (!%p138_p2)   ;;  %vm471_vm7 = vcmask (!%p138_p2), 1014784   ;;  %vm906_vm8 = vcmask (!%p138_p2), 965632  }
   0xb   : > { %v1361_v56 = vld [vmem:[%s1533_s1 + $0x28] sm:$0xff] (!%p138_p2)   ;;  %v1364_v58 = vld [vmem:[%s1533_s1 + $0x30] sm:$0xff] (!%p138_p2)   ;;  %v1363_v61 = vld [vmem:[%s1533_s1 + $0x78] sm:$0xff] (!%p138_p2)  }
   0xc   : > { %v1366_v63 = vld [vmem:[%s1533_s1 + $0x80] sm:$0xff] (!%p138_p2)  }
   0xd   : > { %s1537_s13 = smov (!%p161_p3, %s1077_s13), 1 }
   0xe   : > { %s1166_s14 = sshll.u32 %s1537_s13, 5  ;;  %s1167_s21 = sshll.u32 %s1537_s13, 4 }
   0xf   : > { %s1419_s17 = scalar_lea.vmem %s1532_s0, %s1166_s14 }
  0x10   : > { %v1342_v0 = vld [vmem:[%s1419_s17 + $0x10] ss:$8 sps:$4 sm:$0xff]   ;;  %v1344_v1 = vld [vmem:[%s1419_s17] ss:$8 sps:$4 sm:$0xff]   ;;  %v1346_v2 = vld [vmem:[%s1419_s17 + $0x14] ss:$8 sps:$4 sm:$0xff]  }
  0x11   : > { %554 = vrot.lane.b32.xlu1 %v1342_v0, %s1376_s18  ;;  %550 = vrot.lane.b32.xlu0 %v1344_v1, %s1376_s18  ;;  %v1347_v4 = vld [vmem:[%s1419_s17 + $0x4] ss:$8 sps:$4 sm:$0xff]   ;;  %v1352_v27 = vld [vmem:[%s1419_s17] ss:$8 sps:$4 sm:$0xff]  }
  0x12   : > { %v1355_v32 = vld [vmem:[%s1419_s17 + $0x10] ss:$8 sps:$4 sm:$0xff]   ;;  %s170_s17 = scalar_lea.vmem %s1535_s3, %s1167_s21 }
  0x15   : > { %556 = vrot.lane.b32.xlu1 %v1346_v2, %s1376_s18  ;;  %552 = vrot.lane.b32.xlu0 %v1347_v4, %s1376_s18 }
  0x19   : > { %217 = vrot.lane.b32.xlu1 %v1347_v4, %s1377_s23  ;;  %215 = vrot.lane.b32.xlu0 %v1344_v1, %s1377_s23 }
  0x1d   : > { %639 = vrot.lane.b32.xlu1 %v1347_v4, %s1378_s24  ;;  %637 = vrot.lane.b32.xlu0 %v1344_v1, %s1378_s24 }
  0x21   : > { %221 = vrot.lane.b32.xlu1 %v1346_v2, %s1377_s23  ;;  %219 = vrot.lane.b32.xlu0 %v1342_v0, %s1377_s23 }
  0x25   : > { %643 = vrot.lane.b32.xlu1 %v1346_v2, %s1378_s24  ;;  %641 = vrot.lane.b32.xlu0 %v1342_v0, %s1378_s24 }
  0x29   : > { %726 = vrot.lane.b32.xlu1 %v1347_v4, %s1379_s25  ;;  %724 = vrot.lane.b32.xlu0 %v1344_v1, %s1379_s25 }
  0x2d   : > { %730 = vrot.lane.b32.xlu1 %v1346_v2, %s1379_s25  ;;  %728 = vrot.lane.b32.xlu0 %v1342_v0, %s1379_s25 }
  0x31   : > { %378 = vrot.lane.b32.xlu1 %v1347_v4, %s1380_s26  ;;  %376 = vrot.lane.b32.xlu0 %v1344_v1, %s1380_s26 }
  0x35   : > { %813 = vrot.lane.b32.xlu1 %v1347_v4, %s1381_s27  ;;  %811 = vrot.lane.b32.xlu0 %v1344_v1, %s1381_s27 }
  0x39   : > { %382 = vrot.lane.b32.xlu1 %v1346_v2, %s1380_s26  ;;  %380 = vrot.lane.b32.xlu0 %v1342_v0, %s1380_s26 }
  0x3d   : > { %817 = vrot.lane.b32.xlu1 %v1346_v2, %s1381_s27  ;;  %815 = vrot.lane.b32.xlu0 %v1342_v0, %s1381_s27 }
  0x41   : > { %465 = vrot.lane.b32.xlu1 %v1347_v4, %s1382_s28  ;;  %463 = vrot.lane.b32.xlu0 %v1344_v1, %s1382_s28 }
  0x45   : > { %900 = vrot.lane.b32.xlu1 %v1347_v4, %s1383_s29  ;;  %898 = vrot.lane.b32.xlu0 %v1344_v1, %s1383_s29 }
  0x49   : > { %469 = vrot.lane.b32.xlu1 %v1346_v2, %s1382_s28  ;;  %467 = vrot.lane.b32.xlu0 %v1342_v0, %s1382_s28 }
  0x4d   : > { %904 = vrot.lane.b32.xlu1 %v1346_v2, %s1383_s29  ;;  %902 = vrot.lane.b32.xlu0 %v1342_v0, %s1383_s29 }
  0x51   : > { %981 = vperm.xlu1 %1341, %v971_v7   ;;  %976 = vperm.xlu0 %1340, %v970_v8   ;;  %v1365_v8 = vld [vmem:[%s1533_s1 + $0x38] sm:$0xff]  }
  0x55   : > { %986 = vperm.xlu1 %1341, %v972_v9   ;;  %991 = vperm.xlu0 %1340, %v973_v10  }
  0x83   : > { %v555_v11 = vpop.permute.xlu1 %554  ;;  %v551_v12 = vpop.permute.xlu0 %550 }
  0x87   : > { %v557_v13 = vpop.permute.xlu1 %556  ;;  %v553_v14 = vpop.permute.xlu0 %552 }
  0x88   : > { %v559_v15 = vsel %vm558_vm1, %v551_v12, %v553_v14  ;;  %v560_v17 = vsel %vm558_vm1, %v555_v11, %v557_v13  ;;  %v1367_v12 = vld [vmem:[%s1533_s1 + $0x88] sm:$0xff]  }
  0x89   : > { %1251 = vmatprep.subr.bf16.mxu0 %v559_v15 }
  0x8a   : > { %1252 = vmatpush3.bf16.msra.mxu0 %v559_v15 }
  0x8b   : > { %v218_v16 = vpop.permute.xlu1 %217  ;;  %1253 = vmatprep.subr.bf16.mxu0 %v560_v17  ;;  %v216_v18 = vpop.permute.xlu0 %215 }
  0x8c   : > { %v224_v19 = vsel %vm223_vm2, %v216_v18, %v218_v16 }
  0x8d   : > { %1219 = vmatprep.subr.bf16.mxu1 %v224_v19 }
  0x8e   : > { %1220 = vmatpush3.bf16.msra.mxu1 %v224_v19  ;;  %1254 = vmatpush3.bf16.msra.mxu0 %v560_v17 }
  0x8f   : > { %v640_v21 = vpop.permute.xlu1 %639  ;;  %v638_v23 = vpop.permute.xlu0 %637 }
  0x90   : > { %v646_v24 = vsel %vm645_vm3, %v638_v23, %v640_v21 }
  0x91   : > { %1259 = vmatprep.subr.bf16.mxu0 %v646_v24  ;;  %1256 = vmatmul.mubr.msk.bf16.vlgmr.msra.gmra.mrb[0].mxu0 %vm228_vm0, %v1349_v20 }
  0x92   : > { %1260 = vmatpush3.bf16.msra.mxu0 %v646_v24  ;;  %1263 = vmatprep.mubr.msk.bf16.mxu0 %vm228_vm0, %v1353_v22 }
  0x93   : > { %v222_v25 = vpop.permute.xlu1 %221  ;;  %v220_v26 = vpop.permute.xlu0 %219 }
  0x94   : > { %v225_v28 = vsel %vm223_vm2, %v220_v26, %v222_v25 }
  0x95   : > { %1221 = vmatprep.subr.bf16.mxu1 %v225_v28 }
  0x96   : > { %1222 = vmatpush3.bf16.msra.mxu1 %v225_v28 }
  0x97   : > { %v644_v30 = vpop.permute.xlu1 %643  ;;  %v642_v31 = vpop.permute.xlu0 %641  ;;  %1227 = vmatprep.subr.bf16.mxu1 %v1352_v27 }
  0x98   : > { %v647_v34 = vsel %vm645_vm3, %v642_v31, %v644_v30 }
  0x99   : > { %1261 = vmatprep.subr.bf16.mxu0 %v647_v34  ;;  %1224 = vmatmul.mubr.msk.bf16.vlgmr.msra.gmra.mrb[0].mxu1 %vm228_vm0, %v1351_v29 }
  0x9a   : > { %1262 = vmatpush3.bf16.msra.mxu0 %v647_v34  ;;  %1228 = vmatpush3.bf16.msra.mxu1 %v1352_v27 }
  0x9b   : > { %v727_v36 = vpop.permute.xlu1 %726  ;;  %v725_v37 = vpop.permute.xlu0 %724  ;;  %1229 = vmatprep.subr.bf16.mxu1 %v1355_v32  ;;  %1231 = vmatprep.mubr.msk.bf16.mxu1 %vm228_vm0, %v1356_v33 }
  0x9c   : > { %v733_v39 = vsel %vm732_vm4, %v725_v37, %v727_v36 }
  0x9d   : > { %1267 = vmatprep.subr.bf16.mxu0 %v733_v39  ;;  %1264 = vmatmul.mubr.msk.bf16.vlgmr.msra.gmra.mrb[0].mxu0 %vm228_vm0, %v1354_v35 }
  0x9e   : > { %1268 = vmatpush3.bf16.msra.mxu0 %v733_v39  ;;  %1230 = vmatpush3.bf16.msra.mxu1 %v1355_v32 }
  0x9f   : > { %v731_v40 = vpop.permute.xlu1 %730  ;;  %v729_v41 = vpop.permute.xlu0 %728  ;;  %1271 = vmatprep.mubr.msk.bf16.mxu0 %vm228_vm0, %v1358_v38 }
  0xa0   : > { %v734_v42 = vsel %vm732_vm4, %v729_v41, %v731_v40 }
  0xa1   : > { %1269 = vmatprep.subr.bf16.mxu0 %v734_v42 }
  0xa2   : > { %1270 = vmatpush3.bf16.msra.mxu0 %v734_v42 }
  0xa3   : > { %v379_v44 = vpop.permute.xlu1 %378  ;;  %v377_v46 = vpop.permute.xlu0 %376 }
  0xa4   : > { %v385_v47 = vsel %vm384_vm5, %v377_v46, %v379_v44 }
  0xa5   : > { %1235 = vmatprep.subr.bf16.mxu1 %v385_v47  ;;  %1232 = vmatmul.mubr.msk.bf16.vlgmr.msra.gmra.mrb[0].mxu1 %vm228_vm0, %v1357_v43 }
  0xa6   : > { %1236 = vmatpush3.bf16.msra.mxu1 %v385_v47  ;;  %1239 = vmatprep.mubr.msk.bf16.mxu1 %vm228_vm0, %v1360_v45 }
  0xa7   : > { %v814_v49 = vpop.permute.xlu1 %813  ;;  %v812_v51 = vpop.permute.xlu0 %811 }
  0xa8   : > { %v820_v52 = vsel %vm819_vm6, %v812_v51, %v814_v49 }
  0xa9   : > { %1275 = vmatprep.subr.bf16.mxu0 %v820_v52  ;;  %1272 = vmatmul.mubr.msk.bf16.vlgmr.msra.gmra.mrb[0].mxu0 %vm228_vm0, %v1359_v48 }
  0xaa   : > { %1276 = vmatpush3.bf16.msra.mxu0 %v820_v52  ;;  %1279 = vmatprep.mubr.msk.bf16.mxu0 %vm228_vm0, %v1362_v50 }
  0xab   : > { %v383_v53 = vpop.permute.xlu1 %382  ;;  %v381_v54 = vpop.permute.xlu0 %380 }
  0xac   : > { %v386_v55 = vsel %vm384_vm5, %v381_v54, %v383_v53 }
  0xad   : > { %1237 = vmatprep.subr.bf16.mxu1 %v386_v55 }
  0xae   : > { %1238 = vmatpush3.bf16.msra.mxu1 %v386_v55 }
  0xaf   : > { %v818_v57 = vpop.permute.xlu1 %817  ;;  %v816_v59 = vpop.permute.xlu0 %815 }
  0xb0   : > { %v821_v60 = vsel %vm819_vm6, %v816_v59, %v818_v57 }
  0xb1   : > { %1277 = vmatprep.subr.bf16.mxu0 %v821_v60  ;;  %1240 = vmatmul.mubr.msk.bf16.vlgmr.msra.gmra.mrb[0].mxu1 %vm228_vm0, %v1361_v56 }
  0xb2   : > { %1278 = vmatpush3.bf16.msra.mxu0 %v821_v60  ;;  %1247 = vmatprep.mubr.msk.bf16.mxu1 %vm228_vm0, %v1364_v58 }
  0xb3   : > { %v466_v62 = vpop.permute.xlu1 %465  ;;  %v464_v0 = vpop.permute.xlu0 %463 }
  0xb4   : > { %v472_v1 = vsel %vm471_vm7, %v464_v0, %v466_v62 }
  0xb5   : > { %1243 = vmatprep.subr.bf16.mxu1 %v472_v1  ;;  %1280 = vmatmul.mubr.msk.bf16.vlgmr.msra.gmra.mrb[0].mxu0 %vm228_vm0, %v1363_v61 }
  0xb6   : > { %1244 = vmatpush3.bf16.msra.mxu1 %v472_v1  ;;  %1287 = vmatprep.mubr.msk.bf16.mxu0 %vm228_vm0, %v1366_v63 }
  0xb7   : > { %v901_v2 = vpop.permute.xlu1 %900  ;;  %v899_v3 = vpop.permute.xlu0 %898 }
  0xb8   : > { %v907_v4 = vsel %vm906_vm8, %v899_v3, %v901_v2 }
  0xb9   : > { %1283 = vmatprep.subr.bf16.mxu0 %v907_v4 }
  0xba   : > { %1284 = vmatpush3.bf16.msra.mxu0 %v907_v4 }
  0xbb   : > { %v470_v5 = vpop.permute.xlu1 %469  ;;  %v468_v6 = vpop.permute.xlu0 %467 }
  0xbc   : > { %v473_v7 = vsel %vm471_vm7, %v468_v6, %v470_v5 }
  0xbd   : > { %1245 = vmatprep.subr.bf16.mxu1 %v473_v7 }
  0xbe   : > { %1246 = vmatpush3.bf16.msra.mxu1 %v473_v7 }
  0xbf   : > { %v905_v9 = vpop.permute.xlu1 %904  ;;  %v903_v10 = vpop.permute.xlu0 %902 }
  0xc0   : > { %v908_v11 = vsel %vm906_vm8, %v903_v10, %v905_v9 }
  0xc1   : > { %1248 = vmatmul.mubr.msk.bf16.vlgmr.msra.gmra.mrb[0].mxu1 %vm228_vm0, %v1365_v8  ;;  %1285 = vmatprep.subr.bf16.mxu0 %v908_v11 }
  0xc2   : > { %1286 = vmatpush3.bf16.msra.mxu0 %v908_v11 }
  0xc5   : > { %1288 = vmatmul.mubr.msk.bf16.vlgmr.msra.gmra.mrb[0].mxu0 %vm228_vm0, %v1367_v12 }
  0xd0   : > { %v982_v13 = vpop.permute.xlu1 %981  ;;  %v977_v17 = vpop.permute.xlu0 %976 }
  0xd4   : > { %v987_v20 = vpop.permute.xlu1 %986  ;;  %v992_v30 = vpop.permute.xlu0 %991 }
 0x194   : > { %v1249_v14 = vpop.f32.mrb[0].mxu1 }
 0x195   : > { %v516_v15 = vpop.f32.mrb[1].mxu1 }
 0x196   : > { %v1250_v16 = vpop.f32.mrb[2].mxu1 }
 0x197   : > { %v519_v18 = vpop.f32.mrb[3].mxu1 }
 0x198   : > { %v1289_v19 = vpop.f32.mrb[0].mxu0 }
 0x199   : > { %v1291_v21 = vadd.f32 %v1289_v19, %v1249_v14  ;;  %v951_v22 = vpop.f32.mrb[1].mxu0 }
 0x19a   : > { %v1292_v23 = vadd.f32 %v951_v22, %v516_v15  ;;  %v1290_v24 = vpop.f32.mrb[2].mxu0 }
 0x19b   : > { %v996_v25 = vadd.f32 %v1291_v21, %v987_v20  ;;  %v1293_v26 = vadd.f32 %v1290_v24, %v1250_v16  ;;  %v954_v27 = vpop.f32.mrb[3].mxu0 }
 0x19c   : > { %v994_v28 = vadd.f32 %v1292_v23, %v977_v17  ;;  %v1294_v29 = vadd.f32 %v954_v27, %v519_v18 }
 0x19d   : > { %v997_v31 = vadd.f32 %v1293_v26, %v992_v30  ;;  %v1000_v33 = vmax.f32 %v996_v25, 0.0 }
 0x19e   : > { %v995_v32 = vadd.f32 %v1294_v29, %v982_v13  ;;  %v998_v35 = vmax.f32 %v994_v28, 0.0 }
 0x19f   : > { %v1001_v34 = vmax.f32 %v997_v31, 0.0 }
 0x1a0   : > { %v999_v36 = vmax.f32 %v995_v32, 0.0 }
 0x1a1   : > { %v1180_v37 = vpack.c.bf16 %v1001_v34, %v1000_v33 }
 0x1a2   : > { %v1175_v38 = vpack.c.bf16 %v999_v36, %v998_v35 }
 0x1a3   : > { %1182 = vst [vmem:[%s170_s17 + $0x8] sm:$0xff] %v1180_v37  }
 0x1a4   : > { %1176 = vst [vmem:[%s170_s17] sm:$0xff] %v1175_v38  }
 0x1a5 PF: > { %s13_s12 = sadd.s32 1, %s1374_s12  }
 0x1a6   : > { %p10_p4 = scmp.ge.s32.totalorder %s13_s12, 4  }
 0x1a8   :  { %12 = sbr.rel (!%p10_p4) target bundleno = 1 (0x1), region = 70 }

// kernel: feature_extraction_fwd.27
= control target key start
LH: loop header
LB: loop body
LE: loop exit
PB: predicated region body
PF: predicated region fallthrough
CT: control target
= control target key end

     0   :  { %s1489_s15 = smov 0   ;;  %s1623_s0 = inlined_call_operand.vmem [shape: bf16[2,1,32,138], index: 0, kind: input, shape index: {}]   ;;  %s1624_s1 = inlined_call_operand.vmem [shape: bf16[9,32,32], index: 1, kind: input, shape index: {}]   ;;  %s1625_s2 = inlined_call_operand.vmem [shape: f32[32,1], index: 2, kind: input, shape index: {}]   ;;  %s1626_s3 = inlined_call_operand.vmem [shape: bf16[2,32,128], index: 3, kind: input, shape index: {}]   ;;  %s1627_s4 = inlined_call_operand.vmem [shape: bf16[2,32,128], index: 4, kind: output, shape index: {}]  }
   0x1 LB: > { %s1144_s16 = sadd.s32 4294967295, %s1453_s15   ;;  %p1148_p0 = scmp.ge.s32.totalorder %s1453_s15, 1  ;;  %s1453_s15 = sphi %s1489_s15, %s14_s15  }
   0x2   : > { %p172_p1 = scmp.lt.s32.totalorder %s1453_s15, 3 }
   0x4   : > { %p173_p2 = pnand %p1148_p0, %p172_p1 }
   0x5   : > { %p203_p3 = scmp.lt.s32.totalorder (!%p173_p2), %s1144_s16, 1  ;;  %vm275_vm0 = vcmask (!%p173_p2), 261120   ;;  %s1455_s21 = smov (!%p173_p2), 123   ;;  %v1427_v3 = vld [vmem:[%s1624_s1 + $0x40] sm:$0xff] (!%p173_p2)   ;;  %v1429_v5 = vld [vmem:[%s1624_s1 + $0x10] sm:$0xff] (!%p173_p2)   ;;  %v1463_v6 = vmov (!%p173_p2), 0  }
   0x6   : > { %176 = sbr.rel (%p173_p2) target bundleno = 421 (0x1a5), region = 36  ;;  %1334 = vmatprep.mubr.msk.bf16.mxu0 (!%p173_p2), %vm275_vm0, %v1427_v3  ;;  %s1456_s26 = smov (!%p173_p2), 127   ;;  %1302 = vmatprep.mubr.msk.bf16.mxu1 (!%p173_p2), %vm275_vm0, %v1429_v5  ;;  %v1018_v7 = vld [vmem:[%s1625_s2 + $0x8] sm:$0xff] (!%p173_p2)  ;;  %v1017_v8 = vld [vmem:[%s1625_s2] sm:$0xff] (!%p173_p2)  ;;  %v1019_v9 = vld [vmem:[%s1625_s2 + $0x10] sm:$0xff] (!%p173_p2)  ;;  %vm605_vm1 = vcmask (!%p173_p2), 1006592  }
   0x7   : > { %s1457_s27 = smov (!%p173_p2), 122   ;;  %s1458_s28 = smov (!%p173_p2), 120   ;;  %1420 = vset.pattern.permute.xlu1 (!%p173_p2), %v1463_v6  ;;  %1419 = vset.pattern.permute.xlu0 (!%p173_p2), %v1463_v6  ;;  %v1020_v10 = vld [vmem:[%s1625_s2 + $0x18] sm:$0xff] (!%p173_p2)  ;;  %vm270_vm2 = vcmask (!%p173_p2), 1039360   ;;  %vm692_vm3 = vcmask (!%p173_p2), 998400   ;;  %v1428_v20 = vld [vmem:[%s1624_s1 + $0x48] sm:$0xff] (!%p173_p2)  }
   0x8   : > { %s1459_s29 = smov (!%p173_p2), 126   ;;  %s1460_s30 = smov (!%p173_p2), 119   ;;  %v1432_v22 = vld [vmem:[%s1624_s1 + $0x50] sm:$0xff] (!%p173_p2)   ;;  %v1430_v29 = vld [vmem:[%s1624_s1 + $0x18] sm:$0xff] (!%p173_p2)   ;;  %v1435_v33 = vld [vmem:[%s1624_s1] sm:$0xff] (!%p173_p2)   ;;  %vm779_vm4 = vcmask (!%p173_p2), 982016  }
   0x9   : > { %s1461_s5 = smov (!%p173_p2), 124   ;;  %s1462_s6 = smov (!%p173_p2), 118   ;;  %v1433_v35 = vld [vmem:[%s1624_s1 + $0x58] sm:$0xff] (!%p173_p2)   ;;  %v1437_v38 = vld [vmem:[%s1624_s1 + $0x60] sm:$0xff] (!%p173_p2)   ;;  %vm431_vm5 = vcmask (!%p173_p2), 1031168   ;;  %v1436_v43 = vld [vmem:[%s1624_s1 + $0x8] sm:$0xff] (!%p173_p2)  }
   0xa   : > { %v1439_v45 = vld [vmem:[%s1624_s1 + $0x20] sm:$0xff] (!%p173_p2)   ;;  %vm866_vm6 = vcmask (!%p173_p2), 973824   ;;  %v1438_v48 = vld [vmem:[%s1624_s1 + $0x68] sm:$0xff] (!%p173_p2)   ;;  %v1441_v50 = vld [vmem:[%s1624_s1 + $0x70] sm:$0xff] (!%p173_p2)   ;;  %vm518_vm7 = vcmask (!%p173_p2), 1014784   ;;  %vm953_vm8 = vcmask (!%p173_p2), 965632  }
   0xb   : > { %v1440_v56 = vld [vmem:[%s1624_s1 + $0x28] sm:$0xff] (!%p173_p2)   ;;  %v1443_v58 = vld [vmem:[%s1624_s1 + $0x30] sm:$0xff] (!%p173_p2)   ;;  %v1442_v61 = vld [vmem:[%s1624_s1 + $0x78] sm:$0xff] (!%p173_p2)  }
   0xc   : > { %v1445_v63 = vld [vmem:[%s1624_s1 + $0x80] sm:$0xff] (!%p173_p2)  }
   0xd   : > { %s1629_s16 = smov (!%p203_p3, %s1144_s16), 1 }
   0xe   : > { %s1235_s17 = sshll.u32 %s1629_s16, 5 }
   0xf   : > { %s1503_s20 = scalar_lea.vmem %s1623_s0, %s1235_s17 }
  0x10   : > { %v1421_v0 = vld [vmem:[%s1503_s20 + $0x10] ss:$8 sps:$4 sm:$0xff]   ;;  %v1423_v1 = vld [vmem:[%s1503_s20] ss:$8 sps:$4 sm:$0xff]   ;;  %v1425_v2 = vld [vmem:[%s1503_s20 + $0x14] ss:$8 sps:$4 sm:$0xff]  }
  0x11   : > { %601 = vrot.lane.b32.xlu1 %v1421_v0, %s1455_s21  ;;  %597 = vrot.lane.b32.xlu0 %v1423_v1, %s1455_s21  ;;  %v1426_v4 = vld [vmem:[%s1503_s20 + $0x4] ss:$8 sps:$4 sm:$0xff]   ;;  %v1431_v27 = vld [vmem:[%s1503_s20] ss:$8 sps:$4 sm:$0xff]  }
  0x12   : > { %v1434_v32 = vld [vmem:[%s1503_s20 + $0x10] ss:$8 sps:$4 sm:$0xff]  }
  0x15   : > { %603 = vrot.lane.b32.xlu1 %v1425_v2, %s1455_s21  ;;  %599 = vrot.lane.b32.xlu0 %v1426_v4, %s1455_s21 }
  0x19   : > { %264 = vrot.lane.b32.xlu1 %v1426_v4, %s1456_s26  ;;  %262 = vrot.lane.b32.xlu0 %v1423_v1, %s1456_s26 }
  0x1d   : > { %686 = vrot.lane.b32.xlu1 %v1426_v4, %s1457_s27  ;;  %684 = vrot.lane.b32.xlu0 %v1423_v1, %s1457_s27 }
  0x21   : > { %268 = vrot.lane.b32.xlu1 %v1425_v2, %s1456_s26  ;;  %266 = vrot.lane.b32.xlu0 %v1421_v0, %s1456_s26  ;;  %s1236_s26 = sshll.u32 %s1629_s16, 4 }
  0x25   : > { %690 = vrot.lane.b32.xlu1 %v1425_v2, %s1457_s27  ;;  %688 = vrot.lane.b32.xlu0 %v1421_v0, %s1457_s27 }
  0x29   : > { %773 = vrot.lane.b32.xlu1 %v1426_v4, %s1458_s28  ;;  %771 = vrot.lane.b32.xlu0 %v1423_v1, %s1458_s28 }
  0x2d   : > { %777 = vrot.lane.b32.xlu1 %v1425_v2, %s1458_s28  ;;  %775 = vrot.lane.b32.xlu0 %v1421_v0, %s1458_s28  ;;  %s212_s28 = scalar_lea.vmem %s1626_s3, %s1236_s26 }
  0x31   : > { %425 = vrot.lane.b32.xlu1 %v1426_v4, %s1459_s29  ;;  %423 = vrot.lane.b32.xlu0 %v1423_v1, %s1459_s29 }
  0x35   : > { %860 = vrot.lane.b32.xlu1 %v1426_v4, %s1460_s30  ;;  %858 = vrot.lane.b32.xlu0 %v1423_v1, %s1460_s30 }
  0x39   : > { %429 = vrot.lane.b32.xlu1 %v1425_v2, %s1459_s29  ;;  %427 = vrot.lane.b32.xlu0 %v1421_v0, %s1459_s29 }
  0x3d   : > { %864 = vrot.lane.b32.xlu1 %v1425_v2, %s1460_s30  ;;  %862 = vrot.lane.b32.xlu0 %v1421_v0, %s1460_s30 }
  0x41   : > { %512 = vrot.lane.b32.xlu1 %v1426_v4, %s1461_s5  ;;  %510 = vrot.lane.b32.xlu0 %v1423_v1, %s1461_s5 }
  0x45   : > { %947 = vrot.lane.b32.xlu1 %v1426_v4, %s1462_s6  ;;  %945 = vrot.lane.b32.xlu0 %v1423_v1, %s1462_s6 }
  0x49   : > { %516 = vrot.lane.b32.xlu1 %v1425_v2, %s1461_s5  ;;  %514 = vrot.lane.b32.xlu0 %v1421_v0, %s1461_s5  ;;  %s217_s5 = scalar_lea.vmem %s1627_s4, %s1236_s26 }
  0x4d   : > { %951 = vrot.lane.b32.xlu1 %v1425_v2, %s1462_s6  ;;  %949 = vrot.lane.b32.xlu0 %v1421_v0, %s1462_s6 }
  0x51   : > { %1028 = vperm.xlu1 %1420, %v1018_v7   ;;  %1023 = vperm.xlu0 %1419, %v1017_v8   ;;  %v1444_v8 = vld [vmem:[%s1624_s1 + $0x38] sm:$0xff]  }
  0x55   : > { %1033 = vperm.xlu1 %1420, %v1019_v9   ;;  %1038 = vperm.xlu0 %1419, %v1020_v10  }
  0x83   : > { %v602_v11 = vpop.permute.xlu1 %601  ;;  %v598_v12 = vpop.permute.xlu0 %597 }
  0x87   : > { %v604_v13 = vpop.permute.xlu1 %603  ;;  %v600_v14 = vpop.permute.xlu0 %599 }
  0x88   : > { %v606_v15 = vsel %vm605_vm1, %v598_v12, %v600_v14  ;;  %v607_v17 = vsel %vm605_vm1, %v602_v11, %v604_v13  ;;  %v1446_v12 = vld [vmem:[%s1624_s1 + $0x88] sm:$0xff]  }
  0x89   : > { %1330 = vmatprep.subr.bf16.mxu0 %v606_v15 }
  0x8a   : > { %1331 = vmatpush3.bf16.msra.mxu0 %v606_v15 }
  0x8b   : > { %v265_v16 = vpop.permute.xlu1 %264  ;;  %1332 = vmatprep.subr.bf16.mxu0 %v607_v17  ;;  %v263_v18 = vpop.permute.xlu0 %262 }
  0x8c   : > { %v271_v19 = vsel %vm270_vm2, %v263_v18, %v265_v16 }
  0x8d   : > { %1298 = vmatprep.subr.bf16.mxu1 %v271_v19 }
  0x8e   : > { %1299 = vmatpush3.bf16.msra.mxu1 %v271_v19  ;;  %1333 = vmatpush3.bf16.msra.mxu0 %v607_v17 }
  0x8f   : > { %v687_v21 = vpop.permute.xlu1 %686  ;;  %v685_v23 = vpop.permute.xlu0 %684 }
  0x90   : > { %v693_v24 = vsel %vm692_vm3, %v685_v23, %v687_v21 }
  0x91   : > { %1338 = vmatprep.subr.bf16.mxu0 %v693_v24  ;;  %1335 = vmatmul.mubr.msk.bf16.vlgmr.msra.gmra.mrb[0].mxu0 %vm275_vm0, %v1428_v20  ;;  %v1260_v20 = vld [vmem:[%s212_s28 + $0x8] sm:$0xff]  }
  0x92   : > { %1339 = vmatpush3.bf16.msra.mxu0 %v693_v24  ;;  %1342 = vmatprep.mubr.msk.bf16.mxu0 %vm275_vm0, %v1432_v22  ;;  %v1243_v24 = vld [vmem:[%s212_s28] sm:$0xff]  }
  0x93   : > { %v269_v25 = vpop.permute.xlu1 %268  ;;  %v267_v26 = vpop.permute.xlu0 %266 }
  0x94   : > { %v272_v28 = vsel %vm270_vm2, %v267_v26, %v269_v25 }
  0x95   : > { %1300 = vmatprep.subr.bf16.mxu1 %v272_v28 }
  0x96   : > { %1301 = vmatpush3.bf16.msra.mxu1 %v272_v28 }
  0x97   : > { %v691_v30 = vpop.permute.xlu1 %690  ;;  %v689_v31 = vpop.permute.xlu0 %688  ;;  %1306 = vmatprep.subr.bf16.mxu1 %v1431_v27 }
  0x98   : > { %v694_v34 = vsel %vm692_vm3, %v689_v31, %v691_v30  ;;  %v1249_v31 = vunpack.c.h.bf16 %v1260_v20 }
  0x99   : > { %1340 = vmatprep.subr.bf16.mxu0 %v694_v34  ;;  %1303 = vmatmul.mubr.msk.bf16.vlgmr.msra.gmra.mrb[0].mxu1 %vm275_vm0, %v1430_v29 }
  0x9a   : > { %1341 = vmatpush3.bf16.msra.mxu0 %v694_v34  ;;  %1307 = vmatpush3.bf16.msra.mxu1 %v1431_v27  ;;  %v1248_v27 = vunpack.c.l.bf16 %v1260_v20 }
  0x9b   : > { %v774_v36 = vpop.permute.xlu1 %773  ;;  %v772_v37 = vpop.permute.xlu0 %771  ;;  %1308 = vmatprep.subr.bf16.mxu1 %v1434_v32  ;;  %1310 = vmatprep.mubr.msk.bf16.mxu1 %vm275_vm0, %v1435_v33  ;;  %v1244_v33 = vunpack.c.l.bf16 %v1243_v24 }
  0x9c   : > { %v780_v39 = vsel %vm779_vm4, %v772_v37, %v774_v36 }
  0x9d   : > { %1346 = vmatprep.subr.bf16.mxu0 %v780_v39  ;;  %1343 = vmatmul.mubr.msk.bf16.vlgmr.msra.gmra.mrb[0].mxu0 %vm275_vm0, %v1433_v35  ;;  %v1245_v35 = vunpack.c.h.bf16 %v1243_v24 }
  0x9e   : > { %1347 = vmatpush3.bf16.msra.mxu0 %v780_v39  ;;  %1309 = vmatpush3.bf16.msra.mxu1 %v1434_v32 }
  0x9f   : > { %v778_v40 = vpop.permute.xlu1 %777  ;;  %v776_v41 = vpop.permute.xlu0 %775  ;;  %1350 = vmatprep.mubr.msk.bf16.mxu0 %vm275_vm0, %v1437_v38 }
  0xa0   : > { %v781_v42 = vsel %vm779_vm4, %v776_v41, %v778_v40 }
  0xa1   : > { %1348 = vmatprep.subr.bf16.mxu0 %v781_v42 }
  0xa2   : > { %1349 = vmatpush3.bf16.msra.mxu0 %v781_v42 }
  0xa3   : > { %v426_v44 = vpop.permute.xlu1 %425  ;;  %v424_v46 = vpop.permute.xlu0 %423 }
  0xa4   : > { %v432_v47 = vsel %vm431_vm5, %v424_v46, %v426_v44 }
  0xa5   : > { %1314 = vmatprep.subr.bf16.mxu1 %v432_v47  ;;  %1311 = vmatmul.mubr.msk.bf16.vlgmr.msra.gmra.mrb[0].mxu1 %vm275_vm0, %v1436_v43 }
  0xa6   : > { %1315 = vmatpush3.bf16.msra.mxu1 %v432_v47  ;;  %1318 = vmatprep.mubr.msk.bf16.mxu1 %vm275_vm0, %v1439_v45 }
  0xa7   : > { %v861_v49 = vpop.permute.xlu1 %860  ;;  %v859_v51 = vpop.permute.xlu0 %858 }
  0xa8   : > { %v867_v52 = vsel %vm866_vm6, %v859_v51, %v861_v49 }
  0xa9   : > { %1354 = vmatprep.subr.bf16.mxu0 %v867_v52  ;;  %1351 = vmatmul.mubr.msk.bf16.vlgmr.msra.gmra.mrb[0].mxu0 %vm275_vm0, %v1438_v48 }
  0xaa   : > { %1355 = vmatpush3.bf16.msra.mxu0 %v867_v52  ;;  %1358 = vmatprep.mubr.msk.bf16.mxu0 %vm275_vm0, %v1441_v50 }
  0xab   : > { %v430_v53 = vpop.permute.xlu1 %429  ;;  %v428_v54 = vpop.permute.xlu0 %427 }
  0xac   : > { %v433_v55 = vsel %vm431_vm5, %v428_v54, %v430_v53 }
  0xad   : > { %1316 = vmatprep.subr.bf16.mxu1 %v433_v55 }
  0xae   : > { %1317 = vmatpush3.bf16.msra.mxu1 %v433_v55 }
  0xaf   : > { %v865_v57 = vpop.permute.xlu1 %864  ;;  %v863_v59 = vpop.permute.xlu0 %862 }
  0xb0   : > { %v868_v60 = vsel %vm866_vm6, %v863_v59, %v865_v57 }
  0xb1   : > { %1356 = vmatprep.subr.bf16.mxu0 %v868_v60  ;;  %1319 = vmatmul.mubr.msk.bf16.vlgmr.msra.gmra.mrb[0].mxu1 %vm275_vm0, %v1440_v56 }
  0xb2   : > { %1357 = vmatpush3.bf16.msra.mxu0 %v868_v60  ;;  %1326 = vmatprep.mubr.msk.bf16.mxu1 %vm275_vm0, %v1443_v58 }
  0xb3   : > { %v513_v62 = vpop.permute.xlu1 %512  ;;  %v511_v0 = vpop.permute.xlu0 %510 }
  0xb4   : > { %v519_v1 = vsel %vm518_vm7, %v511_v0, %v513_v62 }
  0xb5   : > { %1322 = vmatprep.subr.bf16.mxu1 %v519_v1  ;;  %1359 = vmatmul.mubr.msk.bf16.vlgmr.msra.gmra.mrb[0].mxu0 %vm275_vm0, %v1442_v61 }
  0xb6   : > { %1323 = vmatpush3.bf16.msra.mxu1 %v519_v1  ;;  %1366 = vmatprep.mubr.msk.bf16.mxu0 %vm275_vm0, %v1445_v63 }
  0xb7   : > { %v948_v2 = vpop.permute.xlu1 %947  ;;  %v946_v3 = vpop.permute.xlu0 %945 }
  0xb8   : > { %v954_v4 = vsel %vm953_vm8, %v946_v3, %v948_v2 }
  0xb9   : > { %1362 = vmatprep.subr.bf16.mxu0 %v954_v4 }
  0xba   : > { %1363 = vmatpush3.bf16.msra.mxu0 %v954_v4 }
  0xbb   : > { %v517_v5 = vpop.permute.xlu1 %516  ;;  %v515_v6 = vpop.permute.xlu0 %514 }
  0xbc   : > { %v520_v7 = vsel %vm518_vm7, %v515_v6, %v517_v5 }
  0xbd   : > { %1324 = vmatprep.subr.bf16.mxu1 %v520_v7 }
  0xbe   : > { %1325 = vmatpush3.bf16.msra.mxu1 %v520_v7 }
  0xbf   : > { %v952_v9 = vpop.permute.xlu1 %951  ;;  %v950_v10 = vpop.permute.xlu0 %949 }
  0xc0   : > { %v955_v11 = vsel %vm953_vm8, %v950_v10, %v952_v9 }
  0xc1   : > { %1327 = vmatmul.mubr.msk.bf16.vlgmr.msra.gmra.mrb[0].mxu1 %vm275_vm0, %v1444_v8  ;;  %1364 = vmatprep.subr.bf16.mxu0 %v955_v11 }
  0xc2   : > { %1365 = vmatpush3.bf16.msra.mxu0 %v955_v11 }
  0xc5   : > { %1367 = vmatmul.mubr.msk.bf16.vlgmr.msra.gmra.mrb[0].mxu0 %vm275_vm0, %v1446_v12 }
  0xd0   : > { %v1029_v13 = vpop.permute.xlu1 %1028  ;;  %v1024_v17 = vpop.permute.xlu0 %1023 }
  0xd4   : > { %v1034_v21 = vpop.permute.xlu1 %1033  ;;  %v1039_v36 = vpop.permute.xlu0 %1038 }
 0x194   : > { %v1328_v14 = vpop.f32.mrb[0].mxu1 }
 0x195   : > { %v563_v15 = vpop.f32.mrb[1].mxu1 }
 0x196   : > { %v1329_v16 = vpop.f32.mrb[2].mxu1 }
 0x197   : > { %v566_v18 = vpop.f32.mrb[3].mxu1 }
 0x198   : > { %v1368_v19 = vpop.f32.mrb[0].mxu0 }
 0x199   : > { %v1370_v22 = vadd.f32 %v1368_v19, %v1328_v14  ;;  %v998_v23 = vpop.f32.mrb[1].mxu0 }
 0x19a   : > { %v1371_v25 = vadd.f32 %v998_v23, %v563_v15  ;;  %v1369_v26 = vpop.f32.mrb[2].mxu0 }
 0x19b   : > { %v1043_v28 = vadd.f32 %v1370_v22, %v1034_v21  ;;  %v1372_v29 = vadd.f32 %v1369_v26, %v1329_v16  ;;  %v1001_v30 = vpop.f32.mrb[3].mxu0 }
 0x19c   : > { %v1041_v32 = vadd.f32 %v1371_v25, %v1024_v17  ;;  %v1373_v34 = vadd.f32 %v1001_v30, %v566_v18 }
 0x19d   : > { %v1044_v37 = vadd.f32 %v1372_v29, %v1039_v36  ;;  %v1055_v39 = vadd.f32 %v1248_v27, %v1043_v28 }
 0x19e   : > { %v1042_v38 = vadd.f32 %v1373_v34, %v1029_v13  ;;  %v1053_v41 = vadd.f32 %v1244_v33, %v1041_v32 }
 0x19f   : > { %v1056_v40 = vadd.f32 %v1249_v31, %v1044_v37 }
 0x1a0   : > { %v1054_v42 = vadd.f32 %v1245_v35, %v1042_v38 }
 0x1a1   : > { %v1258_v43 = vpack.c.bf16 %v1056_v40, %v1055_v39 }
 0x1a2   : > { %v1253_v44 = vpack.c.bf16 %v1054_v42, %v1053_v41 }
 0x1a3   : > { %1261 = vst [vmem:[%s217_s5 + $0x8] sm:$0xff] %v1258_v43  }
 0x1a4   : > { %1254 = vst [vmem:[%s217_s5] sm:$0xff] %v1253_v44  }
 0x1a5 PF: > { %s14_s15 = sadd.s32 1, %s1453_s15  }
 0x1a6   : > { %p11_p4 = scmp.ge.s32.totalorder %s14_s15, 4  }
 0x1a8   :  { %13 = sbr.rel (!%p11_p4) target bundleno = 1 (0x1), region = 77 }

// kernel: feature_extraction_fwd.36
= control target key start
LH: loop header
LB: loop body
LE: loop exit
PB: predicated region body
PF: predicated region fallthrough
CT: control target
= control target key end

     0   :  { %s1493_s15 = smov 0   ;;  %s1627_s0 = inlined_call_operand.vmem [shape: bf16[2,1,32,138], index: 0, kind: input, shape index: {}]   ;;  %s1628_s1 = inlined_call_operand.vmem [shape: bf16[9,32,32], index: 1, kind: input, shape index: {}]   ;;  %s1629_s2 = inlined_call_operand.vmem [shape: f32[32,1], index: 2, kind: input, shape index: {}]   ;;  %s1630_s3 = inlined_call_operand.vmem [shape: bf16[2,32,128], index: 3, kind: input, shape index: {}]   ;;  %s1631_s4 = inlined_call_operand.vmem [shape: bf16[2,32,128], index: 4, kind: output, shape index: {}]  }
   0x1 LB: > { %s1148_s16 = sadd.s32 4294967295, %s1457_s15   ;;  %p1152_p0 = scmp.ge.s32.totalorder %s1457_s15, 1  ;;  %s1457_s15 = sphi %s1493_s15, %s14_s15  }
   0x2   : > { %p172_p1 = scmp.lt.s32.totalorder %s1457_s15, 3 }
   0x4   : > { %p173_p2 = pnand %p1152_p0, %p172_p1 }
   0x5   : > { %p203_p3 = scmp.lt.s32.totalorder (!%p173_p2), %s1148_s16, 1  ;;  %vm275_vm0 = vcmask (!%p173_p2), 261120   ;;  %s1459_s21 = smov (!%p173_p2), 123   ;;  %v1431_v3 = vld [vmem:[%s1628_s1 + $0x40] sm:$0xff] (!%p173_p2)   ;;  %v1433_v5 = vld [vmem:[%s1628_s1 + $0x10] sm:$0xff] (!%p173_p2)   ;;  %v1467_v6 = vmov (!%p173_p2), 0  }
   0x6   : > { %176 = sbr.rel (%p173_p2) target bundleno = 423 (0x1a7), region = 36  ;;  %1338 = vmatprep.mubr.msk.bf16.mxu0 (!%p173_p2), %vm275_vm0, %v1431_v3  ;;  %s1460_s26 = smov (!%p173_p2), 127   ;;  %1306 = vmatprep.mubr.msk.bf16.mxu1 (!%p173_p2), %vm275_vm0, %v1433_v5  ;;  %v1018_v7 = vld [vmem:[%s1629_s2 + $0x8] sm:$0xff] (!%p173_p2)  ;;  %v1017_v8 = vld [vmem:[%s1629_s2] sm:$0xff] (!%p173_p2)  ;;  %v1019_v9 = vld [vmem:[%s1629_s2 + $0x10] sm:$0xff] (!%p173_p2)  ;;  %vm605_vm1 = vcmask (!%p173_p2), 1006592  }
   0x7   : > { %s1461_s27 = smov (!%p173_p2), 122   ;;  %s1462_s28 = smov (!%p173_p2), 120   ;;  %1424 = vset.pattern.permute.xlu1 (!%p173_p2), %v1467_v6  ;;  %1423 = vset.pattern.permute.xlu0 (!%p173_p2), %v1467_v6  ;;  %v1020_v10 = vld [vmem:[%s1629_s2 + $0x18] sm:$0xff] (!%p173_p2)  ;;  %vm270_vm2 = vcmask (!%p173_p2), 1039360   ;;  %vm692_vm3 = vcmask (!%p173_p2), 998400   ;;  %v1432_v20 = vld [vmem:[%s1628_s1 + $0x48] sm:$0xff] (!%p173_p2)  }
   0x8   : > { %s1463_s29 = smov (!%p173_p2), 126   ;;  %s1464_s30 = smov (!%p173_p2), 119   ;;  %v1436_v22 = vld [vmem:[%s1628_s1 + $0x50] sm:$0xff] (!%p173_p2)   ;;  %v1434_v29 = vld [vmem:[%s1628_s1 + $0x18] sm:$0xff] (!%p173_p2)   ;;  %v1439_v33 = vld [vmem:[%s1628_s1] sm:$0xff] (!%p173_p2)   ;;  %vm779_vm4 = vcmask (!%p173_p2), 982016  }
   0x9   : > { %s1465_s5 = smov (!%p173_p2), 124   ;;  %s1466_s6 = smov (!%p173_p2), 118   ;;  %v1437_v35 = vld [vmem:[%s1628_s1 + $0x58] sm:$0xff] (!%p173_p2)   ;;  %v1441_v38 = vld [vmem:[%s1628_s1 + $0x60] sm:$0xff] (!%p173_p2)   ;;  %vm431_vm5 = vcmask (!%p173_p2), 1031168   ;;  %v1440_v43 = vld [vmem:[%s1628_s1 + $0x8] sm:$0xff] (!%p173_p2)  }
   0xa   : > { %v1443_v45 = vld [vmem:[%s1628_s1 + $0x20] sm:$0xff] (!%p173_p2)   ;;  %vm866_vm6 = vcmask (!%p173_p2), 973824   ;;  %v1442_v48 = vld [vmem:[%s1628_s1 + $0x68] sm:$0xff] (!%p173_p2)   ;;  %v1445_v50 = vld [vmem:[%s1628_s1 + $0x70] sm:$0xff] (!%p173_p2)   ;;  %vm518_vm7 = vcmask (!%p173_p2), 1014784   ;;  %vm953_vm8 = vcmask (!%p173_p2), 965632  }
   0xb   : > { %v1444_v56 = vld [vmem:[%s1628_s1 + $0x28] sm:$0xff] (!%p173_p2)   ;;  %v1447_v58 = vld [vmem:[%s1628_s1 + $0x30] sm:$0xff] (!%p173_p2)   ;;  %v1446_v61 = vld [vmem:[%s1628_s1 + $0x78] sm:$0xff] (!%p173_p2)  }
   0xc   : > { %v1449_v63 = vld [vmem:[%s1628_s1 + $0x80] sm:$0xff] (!%p173_p2)  }
   0xd   : > { %s1633_s16 = smov (!%p203_p3, %s1148_s16), 1 }
   0xe   : > { %s1239_s17 = sshll.u32 %s1633_s16, 5 }
   0xf   : > { %s1507_s20 = scalar_lea.vmem %s1627_s0, %s1239_s17 }
  0x10   : > { %v1425_v0 = vld [vmem:[%s1507_s20 + $0x10] ss:$8 sps:$4 sm:$0xff]   ;;  %v1427_v1 = vld [vmem:[%s1507_s20] ss:$8 sps:$4 sm:$0xff]   ;;  %v1429_v2 = vld [vmem:[%s1507_s20 + $0x14] ss:$8 sps:$4 sm:$0xff]  }
  0x11   : > { %601 = vrot.lane.b32.xlu1 %v1425_v0, %s1459_s21  ;;  %597 = vrot.lane.b32.xlu0 %v1427_v1, %s1459_s21  ;;  %v1430_v4 = vld [vmem:[%s1507_s20 + $0x4] ss:$8 sps:$4 sm:$0xff]   ;;  %v1435_v27 = vld [vmem:[%s1507_s20] ss:$8 sps:$4 sm:$0xff]  }
  0x12   : > { %v1438_v32 = vld [vmem:[%s1507_s20 + $0x10] ss:$8 sps:$4 sm:$0xff]  }
  0x15   : > { %603 = vrot.lane.b32.xlu1 %v1429_v2, %s1459_s21  ;;  %599 = vrot.lane.b32.xlu0 %v1430_v4, %s1459_s21 }
  0x19   : > { %264 = vrot.lane.b32.xlu1 %v1430_v4, %s1460_s26  ;;  %262 = vrot.lane.b32.xlu0 %v1427_v1, %s1460_s26 }
  0x1d   : > { %686 = vrot.lane.b32.xlu1 %v1430_v4, %s1461_s27  ;;  %684 = vrot.lane.b32.xlu0 %v1427_v1, %s1461_s27 }
  0x21   : > { %268 = vrot.lane.b32.xlu1 %v1429_v2, %s1460_s26  ;;  %266 = vrot.lane.b32.xlu0 %v1425_v0, %s1460_s26  ;;  %s1240_s26 = sshll.u32 %s1633_s16, 4 }
  0x25   : > { %690 = vrot.lane.b32.xlu1 %v1429_v2, %s1461_s27  ;;  %688 = vrot.lane.b32.xlu0 %v1425_v0, %s1461_s27 }
  0x29   : > { %773 = vrot.lane.b32.xlu1 %v1430_v4, %s1462_s28  ;;  %771 = vrot.lane.b32.xlu0 %v1427_v1, %s1462_s28 }
  0x2d   : > { %777 = vrot.lane.b32.xlu1 %v1429_v2, %s1462_s28  ;;  %775 = vrot.lane.b32.xlu0 %v1425_v0, %s1462_s28  ;;  %s212_s28 = scalar_lea.vmem %s1630_s3, %s1240_s26 }
  0x31   : > { %425 = vrot.lane.b32.xlu1 %v1430_v4, %s1463_s29  ;;  %423 = vrot.lane.b32.xlu0 %v1427_v1, %s1463_s29 }
  0x35   : > { %860 = vrot.lane.b32.xlu1 %v1430_v4, %s1464_s30  ;;  %858 = vrot.lane.b32.xlu0 %v1427_v1, %s1464_s30 }
  0x39   : > { %429 = vrot.lane.b32.xlu1 %v1429_v2, %s1463_s29  ;;  %427 = vrot.lane.b32.xlu0 %v1425_v0, %s1463_s29 }
  0x3d   : > { %864 = vrot.lane.b32.xlu1 %v1429_v2, %s1464_s30  ;;  %862 = vrot.lane.b32.xlu0 %v1425_v0, %s1464_s30 }
  0x41   : > { %512 = vrot.lane.b32.xlu1 %v1430_v4, %s1465_s5  ;;  %510 = vrot.lane.b32.xlu0 %v1427_v1, %s1465_s5 }
  0x45   : > { %947 = vrot.lane.b32.xlu1 %v1430_v4, %s1466_s6  ;;  %945 = vrot.lane.b32.xlu0 %v1427_v1, %s1466_s6 }
  0x49   : > { %516 = vrot.lane.b32.xlu1 %v1429_v2, %s1465_s5  ;;  %514 = vrot.lane.b32.xlu0 %v1425_v0, %s1465_s5  ;;  %s217_s5 = scalar_lea.vmem %s1631_s4, %s1240_s26 }
  0x4d   : > { %951 = vrot.lane.b32.xlu1 %v1429_v2, %s1466_s6  ;;  %949 = vrot.lane.b32.xlu0 %v1425_v0, %s1466_s6 }
  0x51   : > { %1028 = vperm.xlu1 %1424, %v1018_v7   ;;  %1023 = vperm.xlu0 %1423, %v1017_v8   ;;  %v1448_v8 = vld [vmem:[%s1628_s1 + $0x38] sm:$0xff]  }
  0x55   : > { %1033 = vperm.xlu1 %1424, %v1019_v9   ;;  %1038 = vperm.xlu0 %1423, %v1020_v10  }
  0x83   : > { %v602_v11 = vpop.permute.xlu1 %601  ;;  %v598_v12 = vpop.permute.xlu0 %597 }
  0x87   : > { %v604_v13 = vpop.permute.xlu1 %603  ;;  %v600_v14 = vpop.permute.xlu0 %599 }
  0x88   : > { %v606_v15 = vsel %vm605_vm1, %v598_v12, %v600_v14  ;;  %v607_v17 = vsel %vm605_vm1, %v602_v11, %v604_v13  ;;  %v1450_v12 = vld [vmem:[%s1628_s1 + $0x88] sm:$0xff]  }
  0x89   : > { %1334 = vmatprep.subr.bf16.mxu0 %v606_v15 }
  0x8a   : > { %1335 = vmatpush3.bf16.msra.mxu0 %v606_v15 }
  0x8b   : > { %v265_v16 = vpop.permute.xlu1 %264  ;;  %1336 = vmatprep.subr.bf16.mxu0 %v607_v17  ;;  %v263_v18 = vpop.permute.xlu0 %262 }
  0x8c   : > { %v271_v19 = vsel %vm270_vm2, %v263_v18, %v265_v16  ;;  %v1264_v18 = vld [vmem:[%s212_s28 + $0x8] sm:$0xff]  }
  0x8d   : > { %1302 = vmatprep.subr.bf16.mxu1 %v271_v19 }
  0x8e   : > { %1303 = vmatpush3.bf16.msra.mxu1 %v271_v19  ;;  %1337 = vmatpush3.bf16.msra.mxu0 %v607_v17 }
  0x8f   : > { %v687_v21 = vpop.permute.xlu1 %686  ;;  %v685_v23 = vpop.permute.xlu0 %684 }
  0x90   : > { %v693_v24 = vsel %vm692_vm3, %v685_v23, %v687_v21 }
  0x91   : > { %1342 = vmatprep.subr.bf16.mxu0 %v693_v24  ;;  %1339 = vmatmul.mubr.msk.bf16.vlgmr.msra.gmra.mrb[0].mxu0 %vm275_vm0, %v1432_v20  ;;  %v1247_v20 = vld [vmem:[%s212_s28] sm:$0xff]  }
  0x92   : > { %1343 = vmatpush3.bf16.msra.mxu0 %v693_v24  ;;  %1346 = vmatprep.mubr.msk.bf16.mxu0 %vm275_vm0, %v1436_v22 }
  0x93   : > { %v269_v25 = vpop.permute.xlu1 %268  ;;  %v267_v26 = vpop.permute.xlu0 %266 }
  0x94   : > { %v272_v28 = vsel %vm270_vm2, %v267_v26, %v269_v25  ;;  %v1252_v25 = vunpack.c.l.bf16 %v1264_v18 }
  0x95   : > { %1304 = vmatprep.subr.bf16.mxu1 %v272_v28 }
  0x96   : > { %1305 = vmatpush3.bf16.msra.mxu1 %v272_v28 }
  0x97   : > { %v691_v30 = vpop.permute.xlu1 %690  ;;  %v689_v31 = vpop.permute.xlu0 %688  ;;  %1310 = vmatprep.subr.bf16.mxu1 %v1435_v27 }
  0x98   : > { %v694_v34 = vsel %vm692_vm3, %v689_v31, %v691_v30 }
  0x99   : > { %1344 = vmatprep.subr.bf16.mxu0 %v694_v34  ;;  %1307 = vmatmul.mubr.msk.bf16.vlgmr.msra.gmra.mrb[0].mxu1 %vm275_vm0, %v1434_v29 }
  0x9a   : > { %1345 = vmatpush3.bf16.msra.mxu0 %v694_v34  ;;  %1311 = vmatpush3.bf16.msra.mxu1 %v1435_v27  ;;  %v1248_v27 = vunpack.c.l.bf16 %v1247_v20 }
  0x9b   : > { %v774_v36 = vpop.permute.xlu1 %773  ;;  %v772_v37 = vpop.permute.xlu0 %771  ;;  %1312 = vmatprep.subr.bf16.mxu1 %v1438_v32  ;;  %1314 = vmatprep.mubr.msk.bf16.mxu1 %vm275_vm0, %v1439_v33 }
  0x9c   : > { %v780_v39 = vsel %vm779_vm4, %v772_v37, %v774_v36 }
  0x9d   : > { %1350 = vmatprep.subr.bf16.mxu0 %v780_v39  ;;  %1347 = vmatmul.mubr.msk.bf16.vlgmr.msra.gmra.mrb[0].mxu0 %vm275_vm0, %v1437_v35  ;;  %v1249_v35 = vunpack.c.h.bf16 %v1247_v20 }
  0x9e   : > { %1351 = vmatpush3.bf16.msra.mxu0 %v780_v39  ;;  %1313 = vmatpush3.bf16.msra.mxu1 %v1438_v32  ;;  %v1253_v32 = vunpack.c.h.bf16 %v1264_v18 }
  0x9f   : > { %v778_v40 = vpop.permute.xlu1 %777  ;;  %v776_v41 = vpop.permute.xlu0 %775  ;;  %1354 = vmatprep.mubr.msk.bf16.mxu0 %vm275_vm0, %v1441_v38 }
  0xa0   : > { %v781_v42 = vsel %vm779_vm4, %v776_v41, %v778_v40 }
  0xa1   : > { %1352 = vmatprep.subr.bf16.mxu0 %v781_v42 }
  0xa2   : > { %1353 = vmatpush3.bf16.msra.mxu0 %v781_v42 }
  0xa3   : > { %v426_v44 = vpop.permute.xlu1 %425  ;;  %v424_v46 = vpop.permute.xlu0 %423 }
  0xa4   : > { %v432_v47 = vsel %vm431_vm5, %v424_v46, %v426_v44 }
  0xa5   : > { %1318 = vmatprep.subr.bf16.mxu1 %v432_v47  ;;  %1315 = vmatmul.mubr.msk.bf16.vlgmr.msra.gmra.mrb[0].mxu1 %vm275_vm0, %v1440_v43 }
  0xa6   : > { %1319 = vmatpush3.bf16.msra.mxu1 %v432_v47  ;;  %1322 = vmatprep.mubr.msk.bf16.mxu1 %vm275_vm0, %v1443_v45 }
  0xa7   : > { %v861_v49 = vpop.permute.xlu1 %860  ;;  %v859_v51 = vpop.permute.xlu0 %858 }
  0xa8   : > { %v867_v52 = vsel %vm866_vm6, %v859_v51, %v861_v49 }
  0xa9   : > { %1358 = vmatprep.subr.bf16.mxu0 %v867_v52  ;;  %1355 = vmatmul.mubr.msk.bf16.vlgmr.msra.gmra.mrb[0].mxu0 %vm275_vm0, %v1442_v48 }
  0xaa   : > { %1359 = vmatpush3.bf16.msra.mxu0 %v867_v52  ;;  %1362 = vmatprep.mubr.msk.bf16.mxu0 %vm275_vm0, %v1445_v50 }
  0xab   : > { %v430_v53 = vpop.permute.xlu1 %429  ;;  %v428_v54 = vpop.permute.xlu0 %427 }
  0xac   : > { %v433_v55 = vsel %vm431_vm5, %v428_v54, %v430_v53 }
  0xad   : > { %1320 = vmatprep.subr.bf16.mxu1 %v433_v55 }
  0xae   : > { %1321 = vmatpush3.bf16.msra.mxu1 %v433_v55 }
  0xaf   : > { %v865_v57 = vpop.permute.xlu1 %864  ;;  %v863_v59 = vpop.permute.xlu0 %862 }
  0xb0   : > { %v868_v60 = vsel %vm866_vm6, %v863_v59, %v865_v57 }
  0xb1   : > { %1360 = vmatprep.subr.bf16.mxu0 %v868_v60  ;;  %1323 = vmatmul.mubr.msk.bf16.vlgmr.msra.gmra.mrb[0].mxu1 %vm275_vm0, %v1444_v56 }
  0xb2   : > { %1361 = vmatpush3.bf16.msra.mxu0 %v868_v60  ;;  %1330 = vmatprep.mubr.msk.bf16.mxu1 %vm275_vm0, %v1447_v58 }
  0xb3   : > { %v513_v62 = vpop.permute.xlu1 %512  ;;  %v511_v0 = vpop.permute.xlu0 %510 }
  0xb4   : > { %v519_v1 = vsel %vm518_vm7, %v511_v0, %v513_v62 }
  0xb5   : > { %1326 = vmatprep.subr.bf16.mxu1 %v519_v1  ;;  %1363 = vmatmul.mubr.msk.bf16.vlgmr.msra.gmra.mrb[0].mxu0 %vm275_vm0, %v1446_v61 }
  0xb6   : > { %1327 = vmatpush3.bf16.msra.mxu1 %v519_v1  ;;  %1370 = vmatprep.mubr.msk.bf16.mxu0 %vm275_vm0, %v1449_v63 }
  0xb7   : > { %v948_v2 = vpop.permute.xlu1 %947  ;;  %v946_v3 = vpop.permute.xlu0 %945 }
  0xb8   : > { %v954_v4 = vsel %vm953_vm8, %v946_v3, %v948_v2 }
  0xb9   : > { %1366 = vmatprep.subr.bf16.mxu0 %v954_v4 }
  0xba   : > { %1367 = vmatpush3.bf16.msra.mxu0 %v954_v4 }
  0xbb   : > { %v517_v5 = vpop.permute.xlu1 %516  ;;  %v515_v6 = vpop.permute.xlu0 %514 }
  0xbc   : > { %v520_v7 = vsel %vm518_vm7, %v515_v6, %v517_v5 }
  0xbd   : > { %1328 = vmatprep.subr.bf16.mxu1 %v520_v7 }
  0xbe   : > { %1329 = vmatpush3.bf16.msra.mxu1 %v520_v7 }
  0xbf   : > { %v952_v9 = vpop.permute.xlu1 %951  ;;  %v950_v10 = vpop.permute.xlu0 %949 }
  0xc0   : > { %v955_v11 = vsel %vm953_vm8, %v950_v10, %v952_v9 }
  0xc1   : > { %1331 = vmatmul.mubr.msk.bf16.vlgmr.msra.gmra.mrb[0].mxu1 %vm275_vm0, %v1448_v8  ;;  %1368 = vmatprep.subr.bf16.mxu0 %v955_v11 }
  0xc2   : > { %1369 = vmatpush3.bf16.msra.mxu0 %v955_v11 }
  0xc5   : > { %1371 = vmatmul.mubr.msk.bf16.vlgmr.msra.gmra.mrb[0].mxu0 %vm275_vm0, %v1450_v12 }
  0xd0   : > { %v1029_v13 = vpop.permute.xlu1 %1028  ;;  %v1024_v17 = vpop.permute.xlu0 %1023 }
  0xd4   : > { %v1034_v22 = vpop.permute.xlu1 %1033  ;;  %v1039_v36 = vpop.permute.xlu0 %1038 }
 0x194   : > { %v1332_v14 = vpop.f32.mrb[0].mxu1 }
 0x195   : > { %v563_v15 = vpop.f32.mrb[1].mxu1 }
 0x196   : > { %v1333_v16 = vpop.f32.mrb[2].mxu1 }
 0x197   : > { %v566_v19 = vpop.f32.mrb[3].mxu1 }
 0x198   : > { %v1372_v21 = vpop.f32.mrb[0].mxu0 }
 0x199   : > { %v1374_v23 = vadd.f32 %v1372_v21, %v1332_v14  ;;  %v998_v24 = vpop.f32.mrb[1].mxu0 }
 0x19a   : > { %v1375_v26 = vadd.f32 %v998_v24, %v563_v15  ;;  %v1373_v28 = vpop.f32.mrb[2].mxu0 }
 0x19b   : > { %v1043_v29 = vadd.f32 %v1374_v23, %v1034_v22  ;;  %v1376_v30 = vadd.f32 %v1373_v28, %v1333_v16  ;;  %v1001_v31 = vpop.f32.mrb[3].mxu0 }
 0x19c   : > { %v1041_v33 = vadd.f32 %v1375_v26, %v1024_v17  ;;  %v1377_v34 = vadd.f32 %v1001_v31, %v566_v19 }
 0x19d   : > { %v1055_v37 = vadd.f32 %v1252_v25, %v1043_v29  ;;  %v1044_v38 = vadd.f32 %v1376_v30, %v1039_v36 }
 0x19e   : > { %v1053_v39 = vadd.f32 %v1248_v27, %v1041_v33  ;;  %v1042_v40 = vadd.f32 %v1377_v34, %v1029_v13 }
 0x19f   : > { %v1056_v41 = vadd.f32 %v1253_v32, %v1044_v38  ;;  %v1059_v43 = vmax.f32 %v1055_v37, 0.0 }
 0x1a0   : > { %v1054_v42 = vadd.f32 %v1249_v35, %v1042_v40  ;;  %v1057_v45 = vmax.f32 %v1053_v39, 0.0 }
 0x1a1   : > { %v1060_v44 = vmax.f32 %v1056_v41, 0.0 }
 0x1a2   : > { %v1058_v46 = vmax.f32 %v1054_v42, 0.0 }
 0x1a3   : > { %v1262_v47 = vpack.c.bf16 %v1060_v44, %v1059_v43 }
 0x1a4   : > { %v1257_v48 = vpack.c.bf16 %v1058_v46, %v1057_v45 }
 0x1a5   : > { %1265 = vst [vmem:[%s217_s5 + $0x8] sm:$0xff] %v1262_v47  }
 0x1a6   : > { %1258 = vst [vmem:[%s217_s5] sm:$0xff] %v1257_v48  }
 0x1a7 PF: > { %s14_s15 = sadd.s32 1, %s1457_s15  }
 0x1a8   : > { %p11_p4 = scmp.ge.s32.totalorder %s14_s15, 4  }
 0x1aa   :  { %13 = sbr.rel (!%p11_p4) target bundleno = 1 (0x1), region = 77 }

// kernel: feature_extraction_fwd.37
= control target key start
LH: loop header
LB: loop body
LE: loop exit
PB: predicated region body
PF: predicated region fallthrough
CT: control target
= control target key end

     0   :  { %s1401_s12 = smov 0   ;;  %s1528_s0 = inlined_call_operand.vmem [shape: bf16[2,1,32,138], index: 0, kind: input, shape index: {}]   ;;  %s1529_s1 = inlined_call_operand.vmem [shape: bf16[9,32,32], index: 1, kind: input, shape index: {}]   ;;  %s1530_s2 = inlined_call_operand.vmem [shape: f32[32,1], index: 2, kind: input, shape index: {}]   ;;  %s1531_s3 = inlined_call_operand.vmem [shape: bf16[2,32,128], index: 3, kind: output, shape index: {}]  }
   0x1 LB: > { %s1073_s13 = sadd.s32 4294967295, %s1370_s12   ;;  %p1077_p0 = scmp.ge.s32.totalorder %s1370_s12, 1  ;;  %s1370_s12 = sphi %s1401_s12, %s13_s12  }
   0x2   : > { %p137_p1 = scmp.lt.s32.totalorder %s1370_s12, 3 }
   0x4   : > { %p138_p2 = pnand %p1077_p0, %p137_p1 }
   0x5   : > { %p161_p3 = scmp.lt.s32.totalorder (!%p138_p2), %s1073_s13, 1  ;;  %vm228_vm0 = vcmask (!%p138_p2), 261120   ;;  %s1372_s18 = smov (!%p138_p2), 123   ;;  %v1344_v3 = vld [vmem:[%s1529_s1 + $0x40] sm:$0xff] (!%p138_p2)   ;;  %v1346_v5 = vld [vmem:[%s1529_s1 + $0x10] sm:$0xff] (!%p138_p2)   ;;  %v1380_v6 = vmov (!%p138_p2), 0  }
   0x6   : > { %141 = sbr.rel (%p138_p2) target bundleno = 419 (0x1a3), region = 32  ;;  %1251 = vmatprep.mubr.msk.bf16.mxu0 (!%p138_p2), %vm228_vm0, %v1344_v3  ;;  %s1373_s23 = smov (!%p138_p2), 127   ;;  %1219 = vmatprep.mubr.msk.bf16.mxu1 (!%p138_p2), %vm228_vm0, %v1346_v5  ;;  %v971_v7 = vld [vmem:[%s1530_s2 + $0x8] sm:$0xff] (!%p138_p2)  ;;  %v970_v8 = vld [vmem:[%s1530_s2] sm:$0xff] (!%p138_p2)  ;;  %v972_v9 = vld [vmem:[%s1530_s2 + $0x10] sm:$0xff] (!%p138_p2)  ;;  %vm558_vm1 = vcmask (!%p138_p2), 1006592  }
   0x7   : > { %s1374_s24 = smov (!%p138_p2), 122   ;;  %s1375_s25 = smov (!%p138_p2), 120   ;;  %1337 = vset.pattern.permute.xlu1 (!%p138_p2), %v1380_v6  ;;  %1336 = vset.pattern.permute.xlu0 (!%p138_p2), %v1380_v6  ;;  %v973_v10 = vld [vmem:[%s1530_s2 + $0x18] sm:$0xff] (!%p138_p2)  ;;  %vm223_vm2 = vcmask (!%p138_p2), 1039360   ;;  %vm645_vm3 = vcmask (!%p138_p2), 998400   ;;  %v1345_v20 = vld [vmem:[%s1529_s1 + $0x48] sm:$0xff] (!%p138_p2)  }
   0x8   : > { %s1376_s26 = smov (!%p138_p2), 126   ;;  %s1377_s27 = smov (!%p138_p2), 119   ;;  %v1349_v22 = vld [vmem:[%s1529_s1 + $0x50] sm:$0xff] (!%p138_p2)   ;;  %v1347_v29 = vld [vmem:[%s1529_s1 + $0x18] sm:$0xff] (!%p138_p2)   ;;  %v1352_v33 = vld [vmem:[%s1529_s1] sm:$0xff] (!%p138_p2)   ;;  %vm732_vm4 = vcmask (!%p138_p2), 982016  }
   0x9   : > { %s1378_s28 = smov (!%p138_p2), 124   ;;  %s1379_s29 = smov (!%p138_p2), 118   ;;  %v1350_v35 = vld [vmem:[%s1529_s1 + $0x58] sm:$0xff] (!%p138_p2)   ;;  %v1354_v38 = vld [vmem:[%s1529_s1 + $0x60] sm:$0xff] (!%p138_p2)   ;;  %vm384_vm5 = vcmask (!%p138_p2), 1031168   ;;  %v1353_v43 = vld [vmem:[%s1529_s1 + $0x8] sm:$0xff] (!%p138_p2)  }
   0xa   : > { %v1356_v45 = vld [vmem:[%s1529_s1 + $0x20] sm:$0xff] (!%p138_p2)   ;;  %vm819_vm6 = vcmask (!%p138_p2), 973824   ;;  %v1355_v48 = vld [vmem:[%s1529_s1 + $0x68] sm:$0xff] (!%p138_p2)   ;;  %v1358_v50 = vld [vmem:[%s1529_s1 + $0x70] sm:$0xff] (!%p138_p2)   ;;  %vm471_vm7 = vcmask (!%p138_p2), 1014784   ;;  %vm906_vm8 = vcmask (!%p138_p2), 965632  }
   0xb   : > { %v1357_v56 = vld [vmem:[%s1529_s1 + $0x28] sm:$0xff] (!%p138_p2)   ;;  %v1360_v58 = vld [vmem:[%s1529_s1 + $0x30] sm:$0xff] (!%p138_p2)   ;;  %v1359_v61 = vld [vmem:[%s1529_s1 + $0x78] sm:$0xff] (!%p138_p2)  }
   0xc   : > { %v1362_v63 = vld [vmem:[%s1529_s1 + $0x80] sm:$0xff] (!%p138_p2)  }
   0xd   : > { %s1533_s13 = smov (!%p161_p3, %s1073_s13), 1 }
   0xe   : > { %s1162_s14 = sshll.u32 %s1533_s13, 5  ;;  %s1163_s21 = sshll.u32 %s1533_s13, 4 }
   0xf   : > { %s1415_s17 = scalar_lea.vmem %s1528_s0, %s1162_s14 }
  0x10   : > { %v1338_v0 = vld [vmem:[%s1415_s17 + $0x10] ss:$8 sps:$4 sm:$0xff]   ;;  %v1340_v1 = vld [vmem:[%s1415_s17] ss:$8 sps:$4 sm:$0xff]   ;;  %v1342_v2 = vld [vmem:[%s1415_s17 + $0x14] ss:$8 sps:$4 sm:$0xff]  }
  0x11   : > { %554 = vrot.lane.b32.xlu1 %v1338_v0, %s1372_s18  ;;  %550 = vrot.lane.b32.xlu0 %v1340_v1, %s1372_s18  ;;  %v1343_v4 = vld [vmem:[%s1415_s17 + $0x4] ss:$8 sps:$4 sm:$0xff]   ;;  %v1348_v27 = vld [vmem:[%s1415_s17] ss:$8 sps:$4 sm:$0xff]  }
  0x12   : > { %v1351_v32 = vld [vmem:[%s1415_s17 + $0x10] ss:$8 sps:$4 sm:$0xff]   ;;  %s170_s17 = scalar_lea.vmem %s1531_s3, %s1163_s21 }
  0x15   : > { %556 = vrot.lane.b32.xlu1 %v1342_v2, %s1372_s18  ;;  %552 = vrot.lane.b32.xlu0 %v1343_v4, %s1372_s18 }
  0x19   : > { %217 = vrot.lane.b32.xlu1 %v1343_v4, %s1373_s23  ;;  %215 = vrot.lane.b32.xlu0 %v1340_v1, %s1373_s23 }
  0x1d   : > { %639 = vrot.lane.b32.xlu1 %v1343_v4, %s1374_s24  ;;  %637 = vrot.lane.b32.xlu0 %v1340_v1, %s1374_s24 }
  0x21   : > { %221 = vrot.lane.b32.xlu1 %v1342_v2, %s1373_s23  ;;  %219 = vrot.lane.b32.xlu0 %v1338_v0, %s1373_s23 }
  0x25   : > { %643 = vrot.lane.b32.xlu1 %v1342_v2, %s1374_s24  ;;  %641 = vrot.lane.b32.xlu0 %v1338_v0, %s1374_s24 }
  0x29   : > { %726 = vrot.lane.b32.xlu1 %v1343_v4, %s1375_s25  ;;  %724 = vrot.lane.b32.xlu0 %v1340_v1, %s1375_s25 }
  0x2d   : > { %730 = vrot.lane.b32.xlu1 %v1342_v2, %s1375_s25  ;;  %728 = vrot.lane.b32.xlu0 %v1338_v0, %s1375_s25 }
  0x31   : > { %378 = vrot.lane.b32.xlu1 %v1343_v4, %s1376_s26  ;;  %376 = vrot.lane.b32.xlu0 %v1340_v1, %s1376_s26 }
  0x35   : > { %813 = vrot.lane.b32.xlu1 %v1343_v4, %s1377_s27  ;;  %811 = vrot.lane.b32.xlu0 %v1340_v1, %s1377_s27 }
  0x39   : > { %382 = vrot.lane.b32.xlu1 %v1342_v2, %s1376_s26  ;;  %380 = vrot.lane.b32.xlu0 %v1338_v0, %s1376_s26 }
  0x3d   : > { %817 = vrot.lane.b32.xlu1 %v1342_v2, %s1377_s27  ;;  %815 = vrot.lane.b32.xlu0 %v1338_v0, %s1377_s27 }
  0x41   : > { %465 = vrot.lane.b32.xlu1 %v1343_v4, %s1378_s28  ;;  %463 = vrot.lane.b32.xlu0 %v1340_v1, %s1378_s28 }
  0x45   : > { %900 = vrot.lane.b32.xlu1 %v1343_v4, %s1379_s29  ;;  %898 = vrot.lane.b32.xlu0 %v1340_v1, %s1379_s29 }
  0x49   : > { %469 = vrot.lane.b32.xlu1 %v1342_v2, %s1378_s28  ;;  %467 = vrot.lane.b32.xlu0 %v1338_v0, %s1378_s28 }
  0x4d   : > { %904 = vrot.lane.b32.xlu1 %v1342_v2, %s1379_s29  ;;  %902 = vrot.lane.b32.xlu0 %v1338_v0, %s1379_s29 }
  0x51   : > { %981 = vperm.xlu1 %1337, %v971_v7   ;;  %976 = vperm.xlu0 %1336, %v970_v8   ;;  %v1361_v8 = vld [vmem:[%s1529_s1 + $0x38] sm:$0xff]  }
  0x55   : > { %986 = vperm.xlu1 %1337, %v972_v9   ;;  %991 = vperm.xlu0 %1336, %v973_v10  }
  0x83   : > { %v555_v11 = vpop.permute.xlu1 %554  ;;  %v551_v12 = vpop.permute.xlu0 %550 }
  0x87   : > { %v557_v13 = vpop.permute.xlu1 %556  ;;  %v553_v14 = vpop.permute.xlu0 %552 }
  0x88   : > { %v559_v15 = vsel %vm558_vm1, %v551_v12, %v553_v14  ;;  %v560_v17 = vsel %vm558_vm1, %v555_v11, %v557_v13  ;;  %v1363_v12 = vld [vmem:[%s1529_s1 + $0x88] sm:$0xff]  }
  0x89   : > { %1247 = vmatprep.subr.bf16.mxu0 %v559_v15 }
  0x8a   : > { %1248 = vmatpush3.bf16.msra.mxu0 %v559_v15 }
  0x8b   : > { %v218_v16 = vpop.permute.xlu1 %217  ;;  %1249 = vmatprep.subr.bf16.mxu0 %v560_v17  ;;  %v216_v18 = vpop.permute.xlu0 %215 }
  0x8c   : > { %v224_v19 = vsel %vm223_vm2, %v216_v18, %v218_v16 }
  0x8d   : > { %1215 = vmatprep.subr.bf16.mxu1 %v224_v19 }
  0x8e   : > { %1216 = vmatpush3.bf16.msra.mxu1 %v224_v19  ;;  %1250 = vmatpush3.bf16.msra.mxu0 %v560_v17 }
  0x8f   : > { %v640_v21 = vpop.permute.xlu1 %639  ;;  %v638_v23 = vpop.permute.xlu0 %637 }
  0x90   : > { %v646_v24 = vsel %vm645_vm3, %v638_v23, %v640_v21 }
  0x91   : > { %1255 = vmatprep.subr.bf16.mxu0 %v646_v24  ;;  %1252 = vmatmul.mubr.msk.bf16.vlgmr.msra.gmra.mrb[0].mxu0 %vm228_vm0, %v1345_v20 }
  0x92   : > { %1256 = vmatpush3.bf16.msra.mxu0 %v646_v24  ;;  %1259 = vmatprep.mubr.msk.bf16.mxu0 %vm228_vm0, %v1349_v22 }
  0x93   : > { %v222_v25 = vpop.permute.xlu1 %221  ;;  %v220_v26 = vpop.permute.xlu0 %219 }
  0x94   : > { %v225_v28 = vsel %vm223_vm2, %v220_v26, %v222_v25 }
  0x95   : > { %1217 = vmatprep.subr.bf16.mxu1 %v225_v28 }
  0x96   : > { %1218 = vmatpush3.bf16.msra.mxu1 %v225_v28 }
  0x97   : > { %v644_v30 = vpop.permute.xlu1 %643  ;;  %v642_v31 = vpop.permute.xlu0 %641  ;;  %1223 = vmatprep.subr.bf16.mxu1 %v1348_v27 }
  0x98   : > { %v647_v34 = vsel %vm645_vm3, %v642_v31, %v644_v30 }
  0x99   : > { %1257 = vmatprep.subr.bf16.mxu0 %v647_v34  ;;  %1220 = vmatmul.mubr.msk.bf16.vlgmr.msra.gmra.mrb[0].mxu1 %vm228_vm0, %v1347_v29 }
  0x9a   : > { %1258 = vmatpush3.bf16.msra.mxu0 %v647_v34  ;;  %1224 = vmatpush3.bf16.msra.mxu1 %v1348_v27 }
  0x9b   : > { %v727_v36 = vpop.permute.xlu1 %726  ;;  %v725_v37 = vpop.permute.xlu0 %724  ;;  %1225 = vmatprep.subr.bf16.mxu1 %v1351_v32  ;;  %1227 = vmatprep.mubr.msk.bf16.mxu1 %vm228_vm0, %v1352_v33 }
  0x9c   : > { %v733_v39 = vsel %vm732_vm4, %v725_v37, %v727_v36 }
  0x9d   : > { %1263 = vmatprep.subr.bf16.mxu0 %v733_v39  ;;  %1260 = vmatmul.mubr.msk.bf16.vlgmr.msra.gmra.mrb[0].mxu0 %vm228_vm0, %v1350_v35 }
  0x9e   : > { %1264 = vmatpush3.bf16.msra.mxu0 %v733_v39  ;;  %1226 = vmatpush3.bf16.msra.mxu1 %v1351_v32 }
  0x9f   : > { %v731_v40 = vpop.permute.xlu1 %730  ;;  %v729_v41 = vpop.permute.xlu0 %728  ;;  %1267 = vmatprep.mubr.msk.bf16.mxu0 %vm228_vm0, %v1354_v38 }
  0xa0   : > { %v734_v42 = vsel %vm732_vm4, %v729_v41, %v731_v40 }
  0xa1   : > { %1265 = vmatprep.subr.bf16.mxu0 %v734_v42 }
  0xa2   : > { %1266 = vmatpush3.bf16.msra.mxu0 %v734_v42 }
  0xa3   : > { %v379_v44 = vpop.permute.xlu1 %378  ;;  %v377_v46 = vpop.permute.xlu0 %376 }
  0xa4   : > { %v385_v47 = vsel %vm384_vm5, %v377_v46, %v379_v44 }
  0xa5   : > { %1231 = vmatprep.subr.bf16.mxu1 %v385_v47  ;;  %1228 = vmatmul.mubr.msk.bf16.vlgmr.msra.gmra.mrb[0].mxu1 %vm228_vm0, %v1353_v43 }
  0xa6   : > { %1232 = vmatpush3.bf16.msra.mxu1 %v385_v47  ;;  %1235 = vmatprep.mubr.msk.bf16.mxu1 %vm228_vm0, %v1356_v45 }
  0xa7   : > { %v814_v49 = vpop.permute.xlu1 %813  ;;  %v812_v51 = vpop.permute.xlu0 %811 }
  0xa8   : > { %v820_v52 = vsel %vm819_vm6, %v812_v51, %v814_v49 }
  0xa9   : > { %1271 = vmatprep.subr.bf16.mxu0 %v820_v52  ;;  %1268 = vmatmul.mubr.msk.bf16.vlgmr.msra.gmra.mrb[0].mxu0 %vm228_vm0, %v1355_v48 }
  0xaa   : > { %1272 = vmatpush3.bf16.msra.mxu0 %v820_v52  ;;  %1275 = vmatprep.mubr.msk.bf16.mxu0 %vm228_vm0, %v1358_v50 }
  0xab   : > { %v383_v53 = vpop.permute.xlu1 %382  ;;  %v381_v54 = vpop.permute.xlu0 %380 }
  0xac   : > { %v386_v55 = vsel %vm384_vm5, %v381_v54, %v383_v53 }
  0xad   : > { %1233 = vmatprep.subr.bf16.mxu1 %v386_v55 }
  0xae   : > { %1234 = vmatpush3.bf16.msra.mxu1 %v386_v55 }
  0xaf   : > { %v818_v57 = vpop.permute.xlu1 %817  ;;  %v816_v59 = vpop.permute.xlu0 %815 }
  0xb0   : > { %v821_v60 = vsel %vm819_vm6, %v816_v59, %v818_v57 }
  0xb1   : > { %1273 = vmatprep.subr.bf16.mxu0 %v821_v60  ;;  %1236 = vmatmul.mubr.msk.bf16.vlgmr.msra.gmra.mrb[0].mxu1 %vm228_vm0, %v1357_v56 }
  0xb2   : > { %1274 = vmatpush3.bf16.msra.mxu0 %v821_v60  ;;  %1243 = vmatprep.mubr.msk.bf16.mxu1 %vm228_vm0, %v1360_v58 }
  0xb3   : > { %v466_v62 = vpop.permute.xlu1 %465  ;;  %v464_v0 = vpop.permute.xlu0 %463 }
  0xb4   : > { %v472_v1 = vsel %vm471_vm7, %v464_v0, %v466_v62 }
  0xb5   : > { %1239 = vmatprep.subr.bf16.mxu1 %v472_v1  ;;  %1276 = vmatmul.mubr.msk.bf16.vlgmr.msra.gmra.mrb[0].mxu0 %vm228_vm0, %v1359_v61 }
  0xb6   : > { %1240 = vmatpush3.bf16.msra.mxu1 %v472_v1  ;;  %1283 = vmatprep.mubr.msk.bf16.mxu0 %vm228_vm0, %v1362_v63 }
  0xb7   : > { %v901_v2 = vpop.permute.xlu1 %900  ;;  %v899_v3 = vpop.permute.xlu0 %898 }
  0xb8   : > { %v907_v4 = vsel %vm906_vm8, %v899_v3, %v901_v2 }
  0xb9   : > { %1279 = vmatprep.subr.bf16.mxu0 %v907_v4 }
  0xba   : > { %1280 = vmatpush3.bf16.msra.mxu0 %v907_v4 }
  0xbb   : > { %v470_v5 = vpop.permute.xlu1 %469  ;;  %v468_v6 = vpop.permute.xlu0 %467 }
  0xbc   : > { %v473_v7 = vsel %vm471_vm7, %v468_v6, %v470_v5 }
  0xbd   : > { %1241 = vmatprep.subr.bf16.mxu1 %v473_v7 }
  0xbe   : > { %1242 = vmatpush3.bf16.msra.mxu1 %v473_v7 }
  0xbf   : > { %v905_v9 = vpop.permute.xlu1 %904  ;;  %v903_v10 = vpop.permute.xlu0 %902 }
  0xc0   : > { %v908_v11 = vsel %vm906_vm8, %v903_v10, %v905_v9 }
  0xc1   : > { %1244 = vmatmul.mubr.msk.bf16.vlgmr.msra.gmra.mrb[0].mxu1 %vm228_vm0, %v1361_v8  ;;  %1281 = vmatprep.subr.bf16.mxu0 %v908_v11 }
  0xc2   : > { %1282 = vmatpush3.bf16.msra.mxu0 %v908_v11 }
  0xc5   : > { %1284 = vmatmul.mubr.msk.bf16.vlgmr.msra.gmra.mrb[0].mxu0 %vm228_vm0, %v1363_v12 }
  0xd0   : > { %v982_v14 = vpop.permute.xlu1 %981  ;;  %v977_v17 = vpop.permute.xlu0 %976 }
  0xd4   : > { %v987_v23 = vpop.permute.xlu1 %986  ;;  %v992_v28 = vpop.permute.xlu0 %991 }
 0x194   : > { %v1245_v13 = vpop.f32.mrb[0].mxu1 }
 0x195   : > { %v516_v15 = vpop.f32.mrb[1].mxu1 }
 0x196   : > { %v1246_v16 = vpop.f32.mrb[2].mxu1 }
 0x197   : > { %v519_v18 = vpop.f32.mrb[3].mxu1 }
 0x198   : > { %v1285_v19 = vpop.f32.mrb[0].mxu0 }
 0x199   : > { %v1287_v20 = vadd.f32 %v1285_v19, %v1245_v13  ;;  %v951_v21 = vpop.f32.mrb[1].mxu0 }
 0x19a   : > { %v1288_v22 = vadd.f32 %v951_v21, %v516_v15  ;;  %v1286_v24 = vpop.f32.mrb[2].mxu0 }
 0x19b   : > { %v1289_v25 = vadd.f32 %v1286_v24, %v1246_v16  ;;  %v954_v26 = vpop.f32.mrb[3].mxu0  ;;  %v996_v29 = vadd.f32 %v1287_v20, %v987_v23 }
 0x19c   : > { %v1290_v27 = vadd.f32 %v954_v26, %v519_v18  ;;  %v994_v31 = vadd.f32 %v1288_v22, %v977_v17 }
 0x19d   : > { %v997_v30 = vadd.f32 %v1289_v25, %v992_v28 }
 0x19e   : > { %v995_v32 = vadd.f32 %v1290_v27, %v982_v14 }
 0x19f   : > { %v1176_v33 = vpack.c.bf16 %v997_v30, %v996_v29 }
 0x1a0   : > { %v1171_v34 = vpack.c.bf16 %v995_v32, %v994_v31 }
 0x1a1   : > { %1178 = vst [vmem:[%s170_s17 + $0x8] sm:$0xff] %v1176_v33  }
 0x1a2   : > { %1172 = vst [vmem:[%s170_s17] sm:$0xff] %v1171_v34  }
 0x1a3 PF: > { %s13_s12 = sadd.s32 1, %s1370_s12  }
 0x1a4   : > { %p10_p4 = scmp.ge.s32.totalorder %s13_s12, 4  }
 0x1a6   :  { %12 = sbr.rel (!%p10_p4) target bundleno = 1 (0x1), region = 70 }

// kernel: feature_extraction_fwd.28
= control target key start
LH: loop header
LB: loop body
LE: loop exit
PB: predicated region body
PF: predicated region fallthrough
CT: control target
= control target key end

     0   :  { %s891_s12 = smov 0   ;;  %s987_s0 = inlined_call_operand.vmem [shape: bf16[2,1,8,150], index: 0, kind: input, shape index: {}]   ;;  %s988_s1 = inlined_call_operand.vmem [shape: bf16[9,8,8], index: 1, kind: input, shape index: {}]   ;;  %s989_s2 = inlined_call_operand.vmem [shape: f32[8,1], index: 2, kind: input, shape index: {}]   ;;  %s990_s3 = inlined_call_operand.vmem [shape: bf16[2,8,128], index: 3, kind: output, shape index: {}]  }
   0x1 LB: > { %s728_s13 = sadd.s32 4294967295, %s858_s12   ;;  %p732_p0 = scmp.ge.s32.totalorder %s858_s12, 1  ;;  %s858_s12 = sphi %s891_s12, %s13_s12  }
   0x2   : > { %p137_p1 = scmp.lt.s32.totalorder %s858_s12, 3 }
   0x4   : > { %p138_p2 = pnand %p732_p0, %p137_p1 }
   0x5   : > { %p160_p3 = scmp.lt.s32.totalorder (!%p138_p2), %s728_s13, 1  ;;  %v860_v0 = vmov (!%p138_p2), 0.0   ;;  %vm861_vm0 = vmmov (!%p138_p2), 0   ;;  %vm190_vm1 = vcmask (!%p138_p2), 1043456   ;;  %vm186_vm2 = vcmask (!%p138_p2), 64512   ;;  %s862_s20 = smov (!%p138_p2), 126  }
   0x6   : > { %141 = sbr.rel (%p138_p2) target bundleno = 397 (0x18d), region = 32  ;;  %776 = vmatprep.subr.bf16.mxu0 (!%p138_p2), %v860_v0  ;;  %782 = vmatprep.subr.bf16.mxu1 (!%p138_p2), %v860_v0  ;;  %v171_v5 = vld [vmem:[%s988_s1] sm:$0xf] (!%p138_p2)  ;;  %s863_s21 = smov (!%p138_p2), 127   ;;  %v870_v7 = vmov (!%p138_p2), 0   ;;  %vm286_vm3 = vcmask (!%p138_p2), 1031168  }
   0x7   : > { %778 = vmatprep.mubr.msk.bf16.mxu0 (!%p138_p2), %vm861_vm0, %v860_v0  ;;  %784 = vmatprep.mubr.msk.bf16.mxu1 (!%p138_p2), %vm861_vm0, %v860_v0  ;;  %s864_s22 = smov (!%p138_p2), 118   ;;  %s865_s23 = smov (!%p138_p2), 117   ;;  %v665_v8 = vld [vmem:[%s989_s2] sm:$0xff] (!%p138_p2)  ;;  %vm184_vm4 = vcmask (!%p138_p2), 1039360   ;;  %vm341_vm5 = vcmask (!%p138_p2), 965632   ;;  %vm396_vm6 = vcmask (!%p138_p2), 957440  }
   0x8   : > { %s866_s24 = smov (!%p138_p2), 116   ;;  %s867_s25 = smov (!%p138_p2), 108   ;;  %849 = vset.pattern.permute.xlu0 (!%p138_p2), %v870_v7  ;;  %v736_v16 = vld [vmem:[%s988_s1 + $0x4] sm:$0xf] (!%p138_p2)  ;;  %v743_v22 = vld [vmem:[%s988_s1 + $0xc] sm:$0xf] (!%p138_p2) }
   0x9   : > { %s868_s26 = smov (!%p138_p2), 107   ;;  %s869_s27 = smov (!%p138_p2), 106   ;;  %vm451_vm7 = vcmask (!%p138_p2), 949248   ;;  %v741_v26 = vld [vmem:[%s988_s1 + $0x8] sm:$0xf] (!%p138_p2)  ;;  %vm506_vm8 = vcmask (!%p138_p2), 883712  }
   0xa   : > { %v747_v32 = vld [vmem:[%s988_s1 + $0x14] sm:$0xf] (!%p138_p2)  ;;  %vm561_vm9 = vcmask (!%p138_p2), 875520   ;;  %v745_v36 = vld [vmem:[%s988_s1 + $0x10] sm:$0xf] (!%p138_p2)  ;;  %vm616_vm10 = vcmask (!%p138_p2), 867328  }
   0xb   : > { %v751_v42 = vld [vmem:[%s988_s1 + $0x1c] sm:$0xf] (!%p138_p2)  ;;  %v749_v46 = vld [vmem:[%s988_s1 + $0x18] sm:$0xf] (!%p138_p2)  ;;  %v753_v48 = vld [vmem:[%s988_s1 + $0x20] sm:$0xf] (!%p138_p2) }
   0xd   : > { %s992_s13 = smov (!%p160_p3, %s728_s13), 1 }
   0xe   : > { %s757_s14 = sshll.u32 %s992_s13, 3 }
   0xf   : > { %s164_s17 = scalar_lea.vmem %s987_s0, %s757_s14 }
  0x10   : > { %v172_v1 = vld [vmem:[%s164_s17] sm:$0xff] }
  0x11   : > { %v170_v2 = vld [vmem:[%s164_s17] sm:$0xf]  ;;  %v737_v3 = vcombine.low %v172_v1, %v172_v1  ;;  %v738_v6 = vcombine.high %v172_v1, %v172_v1 }
  0x12   : > { %v238_v4 = vsel %vm190_vm1, %v170_v2, 0 }
  0x13   : > { %783 = vmatpush3.bf16.msra.mxu1 %v238_v4  ;;  %282 = vrot.lane.b32.xlu1 %v737_v3, %s862_s20 }
  0x14   : > { %180 = vrot.lane.b32.xlu0 %v737_v3, %s863_s21  ;;  %794 = vmatprep.subr.bf16.mxu1 %v860_v0 }
  0x16   : > { %785 = vmatmul.mubr.msk.bf16.vlgmr.msra.gmra.mrb[0].mxu1 %vm186_vm2, %v171_v5 }
  0x17   : > { %796 = vmatprep.mubr.msk.bf16.mxu1 %vm861_vm0, %v860_v0  ;;  %284 = vrot.lane.b32.xlu1 %v738_v6, %s862_s20 }
  0x18   : > { %182 = vrot.lane.b32.xlu0 %v738_v6, %s863_s21  ;;  %s735_s21 = sshll.u32 %s992_s13, 2 }
  0x1b   : > { %339 = vrot.lane.b32.xlu1 %v738_v6, %s864_s22 }
  0x1c   : > { %337 = vrot.lane.b32.xlu0 %v737_v3, %s864_s22 }
  0x1f   : > { %394 = vrot.lane.b32.xlu1 %v738_v6, %s865_s23 }
  0x20   : > { %392 = vrot.lane.b32.xlu0 %v737_v3, %s865_s23 }
  0x23   : > { %449 = vrot.lane.b32.xlu1 %v738_v6, %s866_s24 }
  0x24   : > { %447 = vrot.lane.b32.xlu0 %v737_v3, %s866_s24  ;;  %s168_s24 = scalar_lea.vmem %s990_s3, %s735_s21 }
  0x27   : > { %504 = vrot.lane.b32.xlu1 %v738_v6, %s867_s25 }
  0x28   : > { %502 = vrot.lane.b32.xlu0 %v737_v3, %s867_s25 }
  0x2b   : > { %559 = vrot.lane.b32.xlu1 %v738_v6, %s868_s26 }
  0x2c   : > { %557 = vrot.lane.b32.xlu0 %v737_v3, %s868_s26 }
  0x2f   : > { %614 = vrot.lane.b32.xlu1 %v738_v6, %s869_s27 }
  0x30   : > { %612 = vrot.lane.b32.xlu0 %v737_v3, %s869_s27 }
  0x34   : > { %668 = vperm.xlu0 %849, %v665_v8  }
  0x85   : > { %v283_v9 = vpop.permute.xlu1 %282 }
  0x86   : > { %v181_v10 = vpop.permute.xlu0 %180 }
  0x89   : > { %v285_v11 = vpop.permute.xlu1 %284 }
  0x8a   : > { %v183_v12 = vpop.permute.xlu0 %182  ;;  %v287_v13 = vsel %vm286_vm3, %v283_v9, %v285_v11 }
  0x8b   : > { %v185_v14 = vsel %vm184_vm4, %v181_v10, %v183_v12  ;;  %v292_v17 = vsel %vm190_vm1, %v287_v13, 0 }
  0x8c   : > { %v192_v15 = vsel %vm190_vm1, %v185_v14, 0 }
  0x8d   : > { %777 = vmatpush3.bf16.msra.mxu0 %v192_v15  ;;  %v340_v18 = vpop.permute.xlu1 %339 }
  0x8e   : > { %788 = vmatprep.subr.bf16.mxu0 %v860_v0  ;;  %v338_v19 = vpop.permute.xlu0 %337 }
  0x8f   : > { %v342_v20 = vsel %vm341_vm5, %v338_v19, %v340_v18 }
  0x90   : > { %779 = vmatmul.mubr.msk.bf16.vlgmr.msra.gmra.mrb[0].mxu0 %vm186_vm2, %v736_v16  ;;  %v347_v21 = vsel %vm190_vm1, %v342_v20, 0 }
  0x91   : > { %789 = vmatpush3.bf16.msra.mxu0 %v292_v17  ;;  %795 = vmatpush3.bf16.msra.mxu1 %v347_v21  ;;  %v395_v23 = vpop.permute.xlu1 %394 }
  0x92   : > { %v393_v24 = vpop.permute.xlu0 %392  ;;  %790 = vmatprep.mubr.msk.bf16.mxu0 %vm861_vm0, %v860_v0  ;;  %800 = vmatprep.subr.bf16.mxu0 %v860_v0 }
  0x93   : > { %v397_v25 = vsel %vm396_vm6, %v393_v24, %v395_v23  ;;  %806 = vmatprep.subr.bf16.mxu1 %v860_v0 }
  0x94   : > { %797 = vmatmul.mubr.msk.bf16.vlgmr.msra.gmra.mrb[4].mxu1 %vm186_vm2, %v743_v22  ;;  %v402_v27 = vsel %vm190_vm1, %v397_v25, 0 }
  0x95   : > { %808 = vmatprep.mubr.msk.bf16.mxu1 %vm861_vm0, %v860_v0  ;;  %v450_v28 = vpop.permute.xlu1 %449 }
  0x96   : > { %v448_v29 = vpop.permute.xlu0 %447 }
  0x97   : > { %v452_v30 = vsel %vm451_vm7, %v448_v29, %v450_v28 }
  0x98   : > { %791 = vmatmul.mubr.msk.bf16.vlgmr.msra.gmra.mrb[4].mxu0 %vm186_vm2, %v741_v26  ;;  %v457_v31 = vsel %vm190_vm1, %v452_v30, 0 }
  0x99   : > { %801 = vmatpush3.bf16.msra.mxu0 %v402_v27  ;;  %807 = vmatpush3.bf16.msra.mxu1 %v457_v31  ;;  %v505_v33 = vpop.permute.xlu1 %504 }
  0x9a   : > { %v503_v34 = vpop.permute.xlu0 %502  ;;  %802 = vmatprep.mubr.msk.bf16.mxu0 %vm861_vm0, %v860_v0  ;;  %812 = vmatprep.subr.bf16.mxu0 %v860_v0 }
  0x9b   : > { %v507_v35 = vsel %vm506_vm8, %v503_v34, %v505_v33  ;;  %818 = vmatprep.subr.bf16.mxu1 %v860_v0 }
  0x9c   : > { %809 = vmatmul.mubr.msk.bf16.vlgmr.msra.gmra.mrb[8].mxu1 %vm186_vm2, %v747_v32  ;;  %v512_v37 = vsel %vm190_vm1, %v507_v35, 0 }
  0x9d   : > { %820 = vmatprep.mubr.msk.bf16.mxu1 %vm861_vm0, %v860_v0  ;;  %v560_v38 = vpop.permute.xlu1 %559 }
  0x9e   : > { %v558_v39 = vpop.permute.xlu0 %557 }
  0x9f   : > { %v562_v40 = vsel %vm561_vm9, %v558_v39, %v560_v38 }
  0xa0   : > { %803 = vmatmul.mubr.msk.bf16.vlgmr.msra.gmra.mrb[8].mxu0 %vm186_vm2, %v745_v36  ;;  %v567_v41 = vsel %vm190_vm1, %v562_v40, 0 }
  0xa1   : > { %813 = vmatpush3.bf16.msra.mxu0 %v512_v37  ;;  %819 = vmatpush3.bf16.msra.mxu1 %v567_v41  ;;  %v615_v43 = vpop.permute.xlu1 %614 }
  0xa2   : > { %v613_v44 = vpop.permute.xlu0 %612  ;;  %814 = vmatprep.mubr.msk.bf16.mxu0 %vm861_vm0, %v860_v0  ;;  %824 = vmatprep.subr.bf16.mxu0 %v860_v0 }
  0xa3   : > { %v617_v45 = vsel %vm616_vm10, %v613_v44, %v615_v43 }
  0xa4   : > { %821 = vmatmul.mubr.msk.bf16.vlgmr.msra.gmra.mrb[12].mxu1 %vm186_vm2, %v751_v42  ;;  %v622_v47 = vsel %vm190_vm1, %v617_v45, 0 }
  0xa8   : > { %815 = vmatmul.mubr.msk.bf16.vlgmr.msra.gmra.mrb[12].mxu0 %vm186_vm2, %v749_v46 }
  0xa9   : > { %825 = vmatpush3.bf16.msra.mxu0 %v622_v47  ;;  %826 = vmatprep.mubr.msk.bf16.mxu0 %vm861_vm0, %v860_v0 }
  0xb0   : > { %827 = vmatmul.mubr.msk.bf16.vlgmr.msra.gmra.mrb[16].mxu0 %vm186_vm2, %v753_v48 }
  0xb3   : > { %v669_v25 = vpop.permute.xlu0 %668 }
  0xe9   : > { %v274_v49 = vpop.f32.mrb[0].mxu1 }
  0xea   : > { %v786_v50 = vpop.f32.mrb[1].mxu1 }
  0xeb   : > { %v277_v51 = vpop.f32.mrb[2].mxu1 }
  0xec   : > { %v787_v52 = vpop.f32.mrb[3].mxu1 }
 0x163   : > { %v228_v53 = vpop.f32.mrb[0].mxu0 }
 0x164   : > { %v780_v54 = vpop.f32.mrb[1].mxu0  ;;  %v275_v55 = vadd.f32 %v274_v49, %v228_v53 }
 0x165   : > { %v231_v56 = vpop.f32.mrb[2].mxu0 }
 0x166   : > { %v781_v57 = vpop.f32.mrb[3].mxu0 }
 0x167   : > { %v383_v58 = vpop.f32.mrb[4].mxu1 }
 0x168   : > { %v798_v59 = vpop.f32.mrb[5].mxu1 }
 0x169   : > { %v386_v60 = vpop.f32.mrb[6].mxu1 }
 0x16a   : > { %v799_v61 = vpop.f32.mrb[7].mxu1 }
 0x16b   : > { %v328_v62 = vpop.f32.mrb[4].mxu0 }
 0x16c   : > { %v334_v63 = vadd.f32 %v328_v62, %v275_v55  ;;  %v792_v0 = vpop.f32.mrb[5].mxu0 }
 0x16d   : > { %v331_v1 = vpop.f32.mrb[6].mxu0 }
 0x16e   : > { %v389_v2 = vadd.f32 %v383_v58, %v334_v63  ;;  %v793_v3 = vpop.f32.mrb[7].mxu0 }
 0x16f   : > { %v493_v4 = vpop.f32.mrb[8].mxu1 }
 0x170   : > { %v810_v5 = vpop.f32.mrb[9].mxu1 }
 0x171   : > { %v496_v6 = vpop.f32.mrb[10].mxu1 }
 0x172   : > { %v811_v7 = vpop.f32.mrb[11].mxu1 }
 0x173   : > { %v438_v8 = vpop.f32.mrb[8].mxu0 }
 0x174   : > { %v444_v9 = vadd.f32 %v438_v8, %v389_v2  ;;  %v804_v10 = vpop.f32.mrb[9].mxu0 }
 0x175   : > { %v441_v11 = vpop.f32.mrb[10].mxu0 }
 0x176   : > { %v499_v12 = vadd.f32 %v493_v4, %v444_v9  ;;  %v805_v13 = vpop.f32.mrb[11].mxu0 }
 0x177   : > { %v603_v14 = vpop.f32.mrb[12].mxu1 }
 0x178   : > { %v822_v15 = vpop.f32.mrb[13].mxu1 }
 0x179   : > { %v606_v16 = vpop.f32.mrb[14].mxu1 }
 0x17a   : > { %v823_v17 = vpop.f32.mrb[15].mxu1 }
 0x17b   : > { %v548_v18 = vpop.f32.mrb[12].mxu0 }
 0x17c   : > { %v554_v19 = vadd.f32 %v548_v18, %v499_v12  ;;  %v816_v20 = vpop.f32.mrb[13].mxu0 }
 0x17d   : > { %v551_v21 = vpop.f32.mrb[14].mxu0 }
 0x17e   : > { %v609_v22 = vadd.f32 %v603_v14, %v554_v19  ;;  %v817_v23 = vpop.f32.mrb[15].mxu0 }
 0x183   : > { %v658_v24 = vpop.f32.mrb[16].mxu0 }
 0x184   : > { %v664_v26 = vadd.f32 %v658_v24, %v609_v22  ;;  %v828_v27 = vpop.f32.mrb[17].mxu0 }
 0x185   : > { %v661_v28 = vpop.f32.mrb[18].mxu0 }
 0x186   : > { %v671_v29 = vadd.f32 %v669_v25, %v664_v26  ;;  %v829_v30 = vpop.f32.mrb[19].mxu0 }
 0x188   : > { %v672_v31 = vmax.f32 %v671_v29, 0.0 }
 0x18a   : > { %v673_v32 = vpack.c.bf16 %v672_v31, %v672_v31 }
 0x18c   : > { %674 = vst [vmem:[%s168_s24] sm:$0xf] %v673_v32 }
 0x18d PF: > { %s13_s12 = sadd.s32 1, %s858_s12  }
 0x18e   : > { %p10_p4 = scmp.ge.s32.totalorder %s13_s12, 4  }
 0x190   :  { %12 = sbr.rel (!%p10_p4) target bundleno = 1 (0x1), region = 70 }

// kernel: feature_extraction_fwd.29
= control target key start
LH: loop header
LB: loop body
LE: loop exit
PB: predicated region body
PF: predicated region fallthrough
CT: control target
= control target key end

     0   :  { %s955_s15 = smov 0   ;;  %s1054_s0 = inlined_call_operand.vmem [shape: bf16[2,1,8,150], index: 0, kind: input, shape index: {}]   ;;  %s1055_s1 = inlined_call_operand.vmem [shape: bf16[9,8,8], index: 1, kind: input, shape index: {}]   ;;  %s1056_s2 = inlined_call_operand.vmem [shape: f32[8,1], index: 2, kind: input, shape index: {}]   ;;  %s1057_s3 = inlined_call_operand.vmem [shape: bf16[2,8,128], index: 3, kind: input, shape index: {}]   ;;  %s1058_s4 = inlined_call_operand.vmem [shape: bf16[2,8,128], index: 4, kind: output, shape index: {}]  }
   0x1 LB: > { %s786_s16 = sadd.s32 4294967295, %s917_s15   ;;  %p790_p0 = scmp.ge.s32.totalorder %s917_s15, 1  ;;  %s917_s15 = sphi %s955_s15, %s14_s15  }
   0x2   : > { %p171_p1 = scmp.lt.s32.totalorder %s917_s15, 3 }
   0x4   : > { %p172_p2 = pnand %p790_p0, %p171_p1 }
   0x5   : > { %p200_p3 = scmp.lt.s32.totalorder (!%p172_p2), %s786_s16, 1  ;;  %v919_v0 = vmov (!%p172_p2), 0.0   ;;  %vm920_vm0 = vmmov (!%p172_p2), 0   ;;  %vm234_vm1 = vcmask (!%p172_p2), 1043456   ;;  %vm230_vm2 = vcmask (!%p172_p2), 64512   ;;  %s921_s23 = smov (!%p172_p2), 126  }
   0x6   : > { %175 = sbr.rel (%p172_p2) target bundleno = 397 (0x18d), region = 36  ;;  %835 = vmatprep.subr.bf16.mxu0 (!%p172_p2), %v919_v0  ;;  %841 = vmatprep.subr.bf16.mxu1 (!%p172_p2), %v919_v0  ;;  %v215_v5 = vld [vmem:[%s1055_s1] sm:$0xf] (!%p172_p2)  ;;  %s922_s24 = smov (!%p172_p2), 127   ;;  %v929_v7 = vmov (!%p172_p2), 0   ;;  %vm330_vm3 = vcmask (!%p172_p2), 1031168  }
   0x7   : > { %837 = vmatprep.mubr.msk.bf16.mxu0 (!%p172_p2), %vm920_vm0, %v919_v0  ;;  %843 = vmatprep.mubr.msk.bf16.mxu1 (!%p172_p2), %vm920_vm0, %v919_v0  ;;  %s923_s25 = smov (!%p172_p2), 118   ;;  %s924_s26 = smov (!%p172_p2), 117   ;;  %v709_v8 = vld [vmem:[%s1056_s2] sm:$0xff] (!%p172_p2)  ;;  %vm228_vm4 = vcmask (!%p172_p2), 1039360   ;;  %vm385_vm5 = vcmask (!%p172_p2), 965632   ;;  %vm440_vm6 = vcmask (!%p172_p2), 957440  }
   0x8   : > { %s925_s27 = smov (!%p172_p2), 116   ;;  %s926_s28 = smov (!%p172_p2), 108   ;;  %908 = vset.pattern.permute.xlu0 (!%p172_p2), %v929_v7  ;;  %v795_v16 = vld [vmem:[%s1055_s1 + $0x4] sm:$0xf] (!%p172_p2)  ;;  %v802_v22 = vld [vmem:[%s1055_s1 + $0xc] sm:$0xf] (!%p172_p2) }
   0x9   : > { %s927_s29 = smov (!%p172_p2), 107   ;;  %s928_s30 = smov (!%p172_p2), 106   ;;  %vm495_vm7 = vcmask (!%p172_p2), 949248   ;;  %v800_v26 = vld [vmem:[%s1055_s1 + $0x8] sm:$0xf] (!%p172_p2)  ;;  %vm550_vm8 = vcmask (!%p172_p2), 883712  }
   0xa   : > { %v806_v32 = vld [vmem:[%s1055_s1 + $0x14] sm:$0xf] (!%p172_p2)  ;;  %vm605_vm9 = vcmask (!%p172_p2), 875520   ;;  %v804_v36 = vld [vmem:[%s1055_s1 + $0x10] sm:$0xf] (!%p172_p2)  ;;  %vm660_vm10 = vcmask (!%p172_p2), 867328  }
   0xb   : > { %v810_v42 = vld [vmem:[%s1055_s1 + $0x1c] sm:$0xf] (!%p172_p2)  ;;  %v808_v46 = vld [vmem:[%s1055_s1 + $0x18] sm:$0xf] (!%p172_p2)  ;;  %v812_v48 = vld [vmem:[%s1055_s1 + $0x20] sm:$0xf] (!%p172_p2) }
   0xd   : > { %s1060_s16 = smov (!%p200_p3, %s786_s16), 1 }
   0xe   : > { %s816_s17 = sshll.u32 %s1060_s16, 3 }
   0xf   : > { %s204_s20 = scalar_lea.vmem %s1054_s0, %s816_s17 }
  0x10   : > { %v216_v1 = vld [vmem:[%s204_s20] sm:$0xff] }
  0x11   : > { %v214_v2 = vld [vmem:[%s204_s20] sm:$0xf]  ;;  %v796_v3 = vcombine.low %v216_v1, %v216_v1  ;;  %v797_v6 = vcombine.high %v216_v1, %v216_v1 }
  0x12   : > { %v282_v4 = vsel %vm234_vm1, %v214_v2, 0 }
  0x13   : > { %842 = vmatpush3.bf16.msra.mxu1 %v282_v4  ;;  %326 = vrot.lane.b32.xlu1 %v796_v3, %s921_s23 }
  0x14   : > { %224 = vrot.lane.b32.xlu0 %v796_v3, %s922_s24  ;;  %853 = vmatprep.subr.bf16.mxu1 %v919_v0 }
  0x16   : > { %844 = vmatmul.mubr.msk.bf16.vlgmr.msra.gmra.mrb[0].mxu1 %vm230_vm2, %v215_v5 }
  0x17   : > { %855 = vmatprep.mubr.msk.bf16.mxu1 %vm920_vm0, %v919_v0  ;;  %328 = vrot.lane.b32.xlu1 %v797_v6, %s921_s23 }
  0x18   : > { %226 = vrot.lane.b32.xlu0 %v797_v6, %s922_s24 }
  0x1b   : > { %383 = vrot.lane.b32.xlu1 %v797_v6, %s923_s25 }
  0x1c   : > { %381 = vrot.lane.b32.xlu0 %v796_v3, %s923_s25  ;;  %s793_s25 = sshll.u32 %s1060_s16, 2 }
  0x1f   : > { %438 = vrot.lane.b32.xlu1 %v797_v6, %s924_s26 }
  0x20   : > { %436 = vrot.lane.b32.xlu0 %v796_v3, %s924_s26 }
  0x23   : > { %493 = vrot.lane.b32.xlu1 %v797_v6, %s925_s27 }
  0x24   : > { %491 = vrot.lane.b32.xlu0 %v796_v3, %s925_s27 }
  0x27   : > { %548 = vrot.lane.b32.xlu1 %v797_v6, %s926_s28 }
  0x28   : > { %546 = vrot.lane.b32.xlu0 %v796_v3, %s926_s28  ;;  %s208_s28 = scalar_lea.vmem %s1057_s3, %s793_s25 }
  0x2b   : > { %603 = vrot.lane.b32.xlu1 %v797_v6, %s927_s29 }
  0x2c   : > { %601 = vrot.lane.b32.xlu0 %v796_v3, %s927_s29 }
  0x2f   : > { %658 = vrot.lane.b32.xlu1 %v797_v6, %s928_s30 }
  0x30   : > { %656 = vrot.lane.b32.xlu0 %v796_v3, %s928_s30  ;;  %s212_s30 = scalar_lea.vmem %s1058_s4, %s793_s25 }
  0x34   : > { %712 = vperm.xlu0 %908, %v709_v8  }
  0x85   : > { %v327_v9 = vpop.permute.xlu1 %326 }
  0x86   : > { %v225_v10 = vpop.permute.xlu0 %224 }
  0x89   : > { %v329_v11 = vpop.permute.xlu1 %328 }
  0x8a   : > { %v227_v12 = vpop.permute.xlu0 %226  ;;  %v331_v13 = vsel %vm330_vm3, %v327_v9, %v329_v11 }
  0x8b   : > { %v229_v14 = vsel %vm228_vm4, %v225_v10, %v227_v12  ;;  %v336_v17 = vsel %vm234_vm1, %v331_v13, 0 }
  0x8c   : > { %v236_v15 = vsel %vm234_vm1, %v229_v14, 0 }
  0x8d   : > { %836 = vmatpush3.bf16.msra.mxu0 %v236_v15  ;;  %v384_v18 = vpop.permute.xlu1 %383 }
  0x8e   : > { %847 = vmatprep.subr.bf16.mxu0 %v919_v0  ;;  %v382_v19 = vpop.permute.xlu0 %381 }
  0x8f   : > { %v386_v20 = vsel %vm385_vm5, %v382_v19, %v384_v18 }
  0x90   : > { %838 = vmatmul.mubr.msk.bf16.vlgmr.msra.gmra.mrb[0].mxu0 %vm230_vm2, %v795_v16  ;;  %v391_v21 = vsel %vm234_vm1, %v386_v20, 0 }
  0x91   : > { %848 = vmatpush3.bf16.msra.mxu0 %v336_v17  ;;  %854 = vmatpush3.bf16.msra.mxu1 %v391_v21  ;;  %v439_v23 = vpop.permute.xlu1 %438 }
  0x92   : > { %v437_v24 = vpop.permute.xlu0 %436  ;;  %849 = vmatprep.mubr.msk.bf16.mxu0 %vm920_vm0, %v919_v0  ;;  %859 = vmatprep.subr.bf16.mxu0 %v919_v0 }
  0x93   : > { %v441_v25 = vsel %vm440_vm6, %v437_v24, %v439_v23  ;;  %865 = vmatprep.subr.bf16.mxu1 %v919_v0  ;;  %v716_v24 = vld [vmem:[%s208_s28] sm:$0xf] }
  0x94   : > { %856 = vmatmul.mubr.msk.bf16.vlgmr.msra.gmra.mrb[4].mxu1 %vm230_vm2, %v802_v22  ;;  %v446_v27 = vsel %vm234_vm1, %v441_v25, 0 }
  0x95   : > { %867 = vmatprep.mubr.msk.bf16.mxu1 %vm920_vm0, %v919_v0  ;;  %v494_v28 = vpop.permute.xlu1 %493 }
  0x96   : > { %v492_v29 = vpop.permute.xlu0 %491 }
  0x97   : > { %v496_v30 = vsel %vm495_vm7, %v492_v29, %v494_v28  ;;  %v717_v29 = vunpack.c.l.bf16 %v716_v24 }
  0x98   : > { %850 = vmatmul.mubr.msk.bf16.vlgmr.msra.gmra.mrb[4].mxu0 %vm230_vm2, %v800_v26  ;;  %v501_v31 = vsel %vm234_vm1, %v496_v30, 0 }
  0x99   : > { %860 = vmatpush3.bf16.msra.mxu0 %v446_v27  ;;  %866 = vmatpush3.bf16.msra.mxu1 %v501_v31  ;;  %v549_v33 = vpop.permute.xlu1 %548 }
  0x9a   : > { %v547_v34 = vpop.permute.xlu0 %546  ;;  %861 = vmatprep.mubr.msk.bf16.mxu0 %vm920_vm0, %v919_v0  ;;  %871 = vmatprep.subr.bf16.mxu0 %v919_v0 }
  0x9b   : > { %v551_v35 = vsel %vm550_vm8, %v547_v34, %v549_v33  ;;  %877 = vmatprep.subr.bf16.mxu1 %v919_v0 }
  0x9c   : > { %868 = vmatmul.mubr.msk.bf16.vlgmr.msra.gmra.mrb[8].mxu1 %vm230_vm2, %v806_v32  ;;  %v556_v37 = vsel %vm234_vm1, %v551_v35, 0 }
  0x9d   : > { %879 = vmatprep.mubr.msk.bf16.mxu1 %vm920_vm0, %v919_v0  ;;  %v604_v38 = vpop.permute.xlu1 %603 }
  0x9e   : > { %v602_v39 = vpop.permute.xlu0 %601 }
  0x9f   : > { %v606_v40 = vsel %vm605_vm9, %v602_v39, %v604_v38 }
  0xa0   : > { %862 = vmatmul.mubr.msk.bf16.vlgmr.msra.gmra.mrb[8].mxu0 %vm230_vm2, %v804_v36  ;;  %v611_v41 = vsel %vm234_vm1, %v606_v40, 0 }
  0xa1   : > { %872 = vmatpush3.bf16.msra.mxu0 %v556_v37  ;;  %878 = vmatpush3.bf16.msra.mxu1 %v611_v41  ;;  %v659_v43 = vpop.permute.xlu1 %658 }
  0xa2   : > { %v657_v44 = vpop.permute.xlu0 %656  ;;  %873 = vmatprep.mubr.msk.bf16.mxu0 %vm920_vm0, %v919_v0  ;;  %883 = vmatprep.subr.bf16.mxu0 %v919_v0 }
  0xa3   : > { %v661_v45 = vsel %vm660_vm10, %v657_v44, %v659_v43 }
  0xa4   : > { %880 = vmatmul.mubr.msk.bf16.vlgmr.msra.gmra.mrb[12].mxu1 %vm230_vm2, %v810_v42  ;;  %v666_v47 = vsel %vm234_vm1, %v661_v45, 0 }
  0xa8   : > { %874 = vmatmul.mubr.msk.bf16.vlgmr.msra.gmra.mrb[12].mxu0 %vm230_vm2, %v808_v46 }
  0xa9   : > { %884 = vmatpush3.bf16.msra.mxu0 %v666_v47  ;;  %885 = vmatprep.mubr.msk.bf16.mxu0 %vm920_vm0, %v919_v0 }
  0xb0   : > { %886 = vmatmul.mubr.msk.bf16.vlgmr.msra.gmra.mrb[16].mxu0 %vm230_vm2, %v812_v48 }
  0xb3   : > { %v713_v26 = vpop.permute.xlu0 %712 }
  0xe9   : > { %v318_v49 = vpop.f32.mrb[0].mxu1 }
  0xea   : > { %v845_v50 = vpop.f32.mrb[1].mxu1 }
  0xeb   : > { %v321_v51 = vpop.f32.mrb[2].mxu1 }
  0xec   : > { %v846_v52 = vpop.f32.mrb[3].mxu1 }
 0x163   : > { %v272_v53 = vpop.f32.mrb[0].mxu0 }
 0x164   : > { %v839_v54 = vpop.f32.mrb[1].mxu0  ;;  %v319_v55 = vadd.f32 %v318_v49, %v272_v53 }
 0x165   : > { %v275_v56 = vpop.f32.mrb[2].mxu0 }
 0x166   : > { %v840_v57 = vpop.f32.mrb[3].mxu0 }
 0x167   : > { %v427_v58 = vpop.f32.mrb[4].mxu1 }
 0x168   : > { %v857_v59 = vpop.f32.mrb[5].mxu1 }
 0x169   : > { %v430_v60 = vpop.f32.mrb[6].mxu1 }
 0x16a   : > { %v858_v61 = vpop.f32.mrb[7].mxu1 }
 0x16b   : > { %v372_v62 = vpop.f32.mrb[4].mxu0 }
 0x16c   : > { %v378_v63 = vadd.f32 %v372_v62, %v319_v55  ;;  %v851_v0 = vpop.f32.mrb[5].mxu0 }
 0x16d   : > { %v375_v1 = vpop.f32.mrb[6].mxu0 }
 0x16e   : > { %v433_v2 = vadd.f32 %v427_v58, %v378_v63  ;;  %v852_v3 = vpop.f32.mrb[7].mxu0 }
 0x16f   : > { %v537_v4 = vpop.f32.mrb[8].mxu1 }
 0x170   : > { %v869_v5 = vpop.f32.mrb[9].mxu1 }
 0x171   : > { %v540_v6 = vpop.f32.mrb[10].mxu1 }
 0x172   : > { %v870_v7 = vpop.f32.mrb[11].mxu1 }
 0x173   : > { %v482_v8 = vpop.f32.mrb[8].mxu0 }
 0x174   : > { %v488_v9 = vadd.f32 %v482_v8, %v433_v2  ;;  %v863_v10 = vpop.f32.mrb[9].mxu0 }
 0x175   : > { %v485_v11 = vpop.f32.mrb[10].mxu0 }
 0x176   : > { %v543_v12 = vadd.f32 %v537_v4, %v488_v9  ;;  %v864_v13 = vpop.f32.mrb[11].mxu0 }
 0x177   : > { %v647_v14 = vpop.f32.mrb[12].mxu1 }
 0x178   : > { %v881_v15 = vpop.f32.mrb[13].mxu1 }
 0x179   : > { %v650_v16 = vpop.f32.mrb[14].mxu1 }
 0x17a   : > { %v882_v17 = vpop.f32.mrb[15].mxu1 }
 0x17b   : > { %v592_v18 = vpop.f32.mrb[12].mxu0 }
 0x17c   : > { %v598_v19 = vadd.f32 %v592_v18, %v543_v12  ;;  %v875_v20 = vpop.f32.mrb[13].mxu0 }
 0x17d   : > { %v595_v21 = vpop.f32.mrb[14].mxu0 }
 0x17e   : > { %v653_v22 = vadd.f32 %v647_v14, %v598_v19  ;;  %v876_v23 = vpop.f32.mrb[15].mxu0 }
 0x183   : > { %v702_v25 = vpop.f32.mrb[16].mxu0 }
 0x184   : > { %v708_v27 = vadd.f32 %v702_v25, %v653_v22  ;;  %v887_v28 = vpop.f32.mrb[17].mxu0 }
 0x185   : > { %v705_v30 = vpop.f32.mrb[18].mxu0 }
 0x186   : > { %v715_v31 = vadd.f32 %v713_v26, %v708_v27  ;;  %v888_v32 = vpop.f32.mrb[19].mxu0 }
 0x188   : > { %v718_v33 = vadd.f32 %v717_v29, %v715_v31 }
 0x18a   : > { %v719_v34 = vpack.c.bf16 %v718_v33, %v718_v33 }
 0x18c   : > { %720 = vst [vmem:[%s212_s30] sm:$0xf] %v719_v34 }
 0x18d PF: > { %s14_s15 = sadd.s32 1, %s917_s15  }
 0x18e   : > { %p11_p4 = scmp.ge.s32.totalorder %s14_s15, 4  }
 0x190   :  { %13 = sbr.rel (!%p11_p4) target bundleno = 1 (0x1), region = 77 }

// kernel: feature_extraction_fwd.31
= control target key start
LH: loop header
LB: loop body
LE: loop exit
PB: predicated region body
PF: predicated region fallthrough
CT: control target
= control target key end

     0   :  { %s956_s15 = smov 0   ;;  %s1055_s0 = inlined_call_operand.vmem [shape: bf16[2,1,8,150], index: 0, kind: input, shape index: {}]   ;;  %s1056_s1 = inlined_call_operand.vmem [shape: bf16[9,8,8], index: 1, kind: input, shape index: {}]   ;;  %s1057_s2 = inlined_call_operand.vmem [shape: f32[8,1], index: 2, kind: input, shape index: {}]   ;;  %s1058_s3 = inlined_call_operand.vmem [shape: bf16[2,8,128], index: 3, kind: input, shape index: {}]   ;;  %s1059_s4 = inlined_call_operand.vmem [shape: bf16[2,8,128], index: 4, kind: output, shape index: {}]  }
   0x1 LB: > { %s787_s16 = sadd.s32 4294967295, %s918_s15   ;;  %p791_p0 = scmp.ge.s32.totalorder %s918_s15, 1  ;;  %s918_s15 = sphi %s956_s15, %s14_s15  }
   0x2   : > { %p171_p1 = scmp.lt.s32.totalorder %s918_s15, 3 }
   0x4   : > { %p172_p2 = pnand %p791_p0, %p171_p1 }
   0x5   : > { %p200_p3 = scmp.lt.s32.totalorder (!%p172_p2), %s787_s16, 1  ;;  %v920_v0 = vmov (!%p172_p2), 0.0   ;;  %vm921_vm0 = vmmov (!%p172_p2), 0   ;;  %vm234_vm1 = vcmask (!%p172_p2), 1043456   ;;  %vm230_vm2 = vcmask (!%p172_p2), 64512   ;;  %s922_s23 = smov (!%p172_p2), 126  }
   0x6   : > { %175 = sbr.rel (%p172_p2) target bundleno = 399 (0x18f), region = 36  ;;  %836 = vmatprep.subr.bf16.mxu0 (!%p172_p2), %v920_v0  ;;  %842 = vmatprep.subr.bf16.mxu1 (!%p172_p2), %v920_v0  ;;  %v215_v5 = vld [vmem:[%s1056_s1] sm:$0xf] (!%p172_p2)  ;;  %s923_s24 = smov (!%p172_p2), 127   ;;  %v930_v7 = vmov (!%p172_p2), 0   ;;  %vm330_vm3 = vcmask (!%p172_p2), 1031168  }
   0x7   : > { %838 = vmatprep.mubr.msk.bf16.mxu0 (!%p172_p2), %vm921_vm0, %v920_v0  ;;  %844 = vmatprep.mubr.msk.bf16.mxu1 (!%p172_p2), %vm921_vm0, %v920_v0  ;;  %s924_s25 = smov (!%p172_p2), 118   ;;  %s925_s26 = smov (!%p172_p2), 117   ;;  %v709_v8 = vld [vmem:[%s1057_s2] sm:$0xff] (!%p172_p2)  ;;  %vm228_vm4 = vcmask (!%p172_p2), 1039360   ;;  %vm385_vm5 = vcmask (!%p172_p2), 965632   ;;  %vm440_vm6 = vcmask (!%p172_p2), 957440  }
   0x8   : > { %s926_s27 = smov (!%p172_p2), 116   ;;  %s927_s28 = smov (!%p172_p2), 108   ;;  %909 = vset.pattern.permute.xlu0 (!%p172_p2), %v930_v7  ;;  %v796_v16 = vld [vmem:[%s1056_s1 + $0x4] sm:$0xf] (!%p172_p2)  ;;  %v803_v22 = vld [vmem:[%s1056_s1 + $0xc] sm:$0xf] (!%p172_p2) }
   0x9   : > { %s928_s29 = smov (!%p172_p2), 107   ;;  %s929_s30 = smov (!%p172_p2), 106   ;;  %vm495_vm7 = vcmask (!%p172_p2), 949248   ;;  %v801_v26 = vld [vmem:[%s1056_s1 + $0x8] sm:$0xf] (!%p172_p2)  ;;  %vm550_vm8 = vcmask (!%p172_p2), 883712  }
   0xa   : > { %v807_v32 = vld [vmem:[%s1056_s1 + $0x14] sm:$0xf] (!%p172_p2)  ;;  %vm605_vm9 = vcmask (!%p172_p2), 875520   ;;  %v805_v36 = vld [vmem:[%s1056_s1 + $0x10] sm:$0xf] (!%p172_p2)  ;;  %vm660_vm10 = vcmask (!%p172_p2), 867328  }
   0xb   : > { %v811_v42 = vld [vmem:[%s1056_s1 + $0x1c] sm:$0xf] (!%p172_p2)  ;;  %v809_v46 = vld [vmem:[%s1056_s1 + $0x18] sm:$0xf] (!%p172_p2)  ;;  %v813_v48 = vld [vmem:[%s1056_s1 + $0x20] sm:$0xf] (!%p172_p2) }
   0xd   : > { %s1061_s16 = smov (!%p200_p3, %s787_s16), 1 }
   0xe   : > { %s817_s17 = sshll.u32 %s1061_s16, 3 }
   0xf   : > { %s204_s20 = scalar_lea.vmem %s1055_s0, %s817_s17 }
  0x10   : > { %v216_v1 = vld [vmem:[%s204_s20] sm:$0xff] }
  0x11   : > { %v214_v2 = vld [vmem:[%s204_s20] sm:$0xf]  ;;  %v797_v3 = vcombine.low %v216_v1, %v216_v1  ;;  %v798_v6 = vcombine.high %v216_v1, %v216_v1 }
  0x12   : > { %v282_v4 = vsel %vm234_vm1, %v214_v2, 0 }
  0x13   : > { %843 = vmatpush3.bf16.msra.mxu1 %v282_v4  ;;  %326 = vrot.lane.b32.xlu1 %v797_v3, %s922_s23 }
  0x14   : > { %224 = vrot.lane.b32.xlu0 %v797_v3, %s923_s24  ;;  %854 = vmatprep.subr.bf16.mxu1 %v920_v0 }
  0x16   : > { %845 = vmatmul.mubr.msk.bf16.vlgmr.msra.gmra.mrb[0].mxu1 %vm230_vm2, %v215_v5 }
  0x17   : > { %856 = vmatprep.mubr.msk.bf16.mxu1 %vm921_vm0, %v920_v0  ;;  %328 = vrot.lane.b32.xlu1 %v798_v6, %s922_s23 }
  0x18   : > { %226 = vrot.lane.b32.xlu0 %v798_v6, %s923_s24 }
  0x1b   : > { %383 = vrot.lane.b32.xlu1 %v798_v6, %s924_s25 }
  0x1c   : > { %381 = vrot.lane.b32.xlu0 %v797_v3, %s924_s25  ;;  %s794_s25 = sshll.u32 %s1061_s16, 2 }
  0x1f   : > { %438 = vrot.lane.b32.xlu1 %v798_v6, %s925_s26 }
  0x20   : > { %436 = vrot.lane.b32.xlu0 %v797_v3, %s925_s26 }
  0x23   : > { %493 = vrot.lane.b32.xlu1 %v798_v6, %s926_s27 }
  0x24   : > { %491 = vrot.lane.b32.xlu0 %v797_v3, %s926_s27 }
  0x27   : > { %548 = vrot.lane.b32.xlu1 %v798_v6, %s927_s28 }
  0x28   : > { %546 = vrot.lane.b32.xlu0 %v797_v3, %s927_s28  ;;  %s208_s28 = scalar_lea.vmem %s1058_s3, %s794_s25 }
  0x2b   : > { %603 = vrot.lane.b32.xlu1 %v798_v6, %s928_s29 }
  0x2c   : > { %601 = vrot.lane.b32.xlu0 %v797_v3, %s928_s29 }
  0x2f   : > { %658 = vrot.lane.b32.xlu1 %v798_v6, %s929_s30 }
  0x30   : > { %656 = vrot.lane.b32.xlu0 %v797_v3, %s929_s30  ;;  %s212_s30 = scalar_lea.vmem %s1059_s4, %s794_s25 }
  0x34   : > { %712 = vperm.xlu0 %909, %v709_v8  }
  0x85   : > { %v327_v9 = vpop.permute.xlu1 %326 }
  0x86   : > { %v225_v10 = vpop.permute.xlu0 %224 }
  0x89   : > { %v329_v11 = vpop.permute.xlu1 %328 }
  0x8a   : > { %v227_v12 = vpop.permute.xlu0 %226  ;;  %v331_v13 = vsel %vm330_vm3, %v327_v9, %v329_v11 }
  0x8b   : > { %v229_v14 = vsel %vm228_vm4, %v225_v10, %v227_v12  ;;  %v336_v17 = vsel %vm234_vm1, %v331_v13, 0 }
  0x8c   : > { %v236_v15 = vsel %vm234_vm1, %v229_v14, 0 }
  0x8d   : > { %837 = vmatpush3.bf16.msra.mxu0 %v236_v15  ;;  %v384_v18 = vpop.permute.xlu1 %383 }
  0x8e   : > { %848 = vmatprep.subr.bf16.mxu0 %v920_v0  ;;  %v382_v19 = vpop.permute.xlu0 %381 }
  0x8f   : > { %v386_v20 = vsel %vm385_vm5, %v382_v19, %v384_v18 }
  0x90   : > { %839 = vmatmul.mubr.msk.bf16.vlgmr.msra.gmra.mrb[0].mxu0 %vm230_vm2, %v796_v16  ;;  %v391_v21 = vsel %vm234_vm1, %v386_v20, 0 }
  0x91   : > { %849 = vmatpush3.bf16.msra.mxu0 %v336_v17  ;;  %855 = vmatpush3.bf16.msra.mxu1 %v391_v21  ;;  %v439_v23 = vpop.permute.xlu1 %438 }
  0x92   : > { %v437_v24 = vpop.permute.xlu0 %436  ;;  %850 = vmatprep.mubr.msk.bf16.mxu0 %vm921_vm0, %v920_v0  ;;  %860 = vmatprep.subr.bf16.mxu0 %v920_v0 }
  0x93   : > { %v441_v25 = vsel %vm440_vm6, %v437_v24, %v439_v23  ;;  %866 = vmatprep.subr.bf16.mxu1 %v920_v0  ;;  %v716_v24 = vld [vmem:[%s208_s28] sm:$0xf] }
  0x94   : > { %857 = vmatmul.mubr.msk.bf16.vlgmr.msra.gmra.mrb[4].mxu1 %vm230_vm2, %v803_v22  ;;  %v446_v27 = vsel %vm234_vm1, %v441_v25, 0 }
  0x95   : > { %868 = vmatprep.mubr.msk.bf16.mxu1 %vm921_vm0, %v920_v0  ;;  %v494_v28 = vpop.permute.xlu1 %493 }
  0x96   : > { %v492_v29 = vpop.permute.xlu0 %491 }
  0x97   : > { %v496_v30 = vsel %vm495_vm7, %v492_v29, %v494_v28  ;;  %v717_v29 = vunpack.c.l.bf16 %v716_v24 }
  0x98   : > { %851 = vmatmul.mubr.msk.bf16.vlgmr.msra.gmra.mrb[4].mxu0 %vm230_vm2, %v801_v26  ;;  %v501_v31 = vsel %vm234_vm1, %v496_v30, 0 }
  0x99   : > { %861 = vmatpush3.bf16.msra.mxu0 %v446_v27  ;;  %867 = vmatpush3.bf16.msra.mxu1 %v501_v31  ;;  %v549_v33 = vpop.permute.xlu1 %548 }
  0x9a   : > { %v547_v34 = vpop.permute.xlu0 %546  ;;  %862 = vmatprep.mubr.msk.bf16.mxu0 %vm921_vm0, %v920_v0  ;;  %872 = vmatprep.subr.bf16.mxu0 %v920_v0 }
  0x9b   : > { %v551_v35 = vsel %vm550_vm8, %v547_v34, %v549_v33  ;;  %878 = vmatprep.subr.bf16.mxu1 %v920_v0 }
  0x9c   : > { %869 = vmatmul.mubr.msk.bf16.vlgmr.msra.gmra.mrb[8].mxu1 %vm230_vm2, %v807_v32  ;;  %v556_v37 = vsel %vm234_vm1, %v551_v35, 0 }
  0x9d   : > { %880 = vmatprep.mubr.msk.bf16.mxu1 %vm921_vm0, %v920_v0  ;;  %v604_v38 = vpop.permute.xlu1 %603 }
  0x9e   : > { %v602_v39 = vpop.permute.xlu0 %601 }
  0x9f   : > { %v606_v40 = vsel %vm605_vm9, %v602_v39, %v604_v38 }
  0xa0   : > { %863 = vmatmul.mubr.msk.bf16.vlgmr.msra.gmra.mrb[8].mxu0 %vm230_vm2, %v805_v36  ;;  %v611_v41 = vsel %vm234_vm1, %v606_v40, 0 }
  0xa1   : > { %873 = vmatpush3.bf16.msra.mxu0 %v556_v37  ;;  %879 = vmatpush3.bf16.msra.mxu1 %v611_v41  ;;  %v659_v43 = vpop.permute.xlu1 %658 }
  0xa2   : > { %v657_v44 = vpop.permute.xlu0 %656  ;;  %874 = vmatprep.mubr.msk.bf16.mxu0 %vm921_vm0, %v920_v0  ;;  %884 = vmatprep.subr.bf16.mxu0 %v920_v0 }
  0xa3   : > { %v661_v45 = vsel %vm660_vm10, %v657_v44, %v659_v43 }
  0xa4   : > { %881 = vmatmul.mubr.msk.bf16.vlgmr.msra.gmra.mrb[12].mxu1 %vm230_vm2, %v811_v42  ;;  %v666_v47 = vsel %vm234_vm1, %v661_v45, 0 }
  0xa8   : > { %875 = vmatmul.mubr.msk.bf16.vlgmr.msra.gmra.mrb[12].mxu0 %vm230_vm2, %v809_v46 }
  0xa9   : > { %885 = vmatpush3.bf16.msra.mxu0 %v666_v47  ;;  %886 = vmatprep.mubr.msk.bf16.mxu0 %vm921_vm0, %v920_v0 }
  0xb0   : > { %887 = vmatmul.mubr.msk.bf16.vlgmr.msra.gmra.mrb[16].mxu0 %vm230_vm2, %v813_v48 }
  0xb3   : > { %v713_v26 = vpop.permute.xlu0 %712 }
  0xe9   : > { %v318_v49 = vpop.f32.mrb[0].mxu1 }
  0xea   : > { %v846_v50 = vpop.f32.mrb[1].mxu1 }
  0xeb   : > { %v321_v51 = vpop.f32.mrb[2].mxu1 }
  0xec   : > { %v847_v52 = vpop.f32.mrb[3].mxu1 }
 0x163   : > { %v272_v53 = vpop.f32.mrb[0].mxu0 }
 0x164   : > { %v840_v54 = vpop.f32.mrb[1].mxu0  ;;  %v319_v55 = vadd.f32 %v318_v49, %v272_v53 }
 0x165   : > { %v275_v56 = vpop.f32.mrb[2].mxu0 }
 0x166   : > { %v841_v57 = vpop.f32.mrb[3].mxu0 }
 0x167   : > { %v427_v58 = vpop.f32.mrb[4].mxu1 }
 0x168   : > { %v858_v59 = vpop.f32.mrb[5].mxu1 }
 0x169   : > { %v430_v60 = vpop.f32.mrb[6].mxu1 }
 0x16a   : > { %v859_v61 = vpop.f32.mrb[7].mxu1 }
 0x16b   : > { %v372_v62 = vpop.f32.mrb[4].mxu0 }
 0x16c   : > { %v378_v63 = vadd.f32 %v372_v62, %v319_v55  ;;  %v852_v0 = vpop.f32.mrb[5].mxu0 }
 0x16d   : > { %v375_v1 = vpop.f32.mrb[6].mxu0 }
 0x16e   : > { %v433_v2 = vadd.f32 %v427_v58, %v378_v63  ;;  %v853_v3 = vpop.f32.mrb[7].mxu0 }
 0x16f   : > { %v537_v4 = vpop.f32.mrb[8].mxu1 }
 0x170   : > { %v870_v5 = vpop.f32.mrb[9].mxu1 }
 0x171   : > { %v540_v6 = vpop.f32.mrb[10].mxu1 }
 0x172   : > { %v871_v7 = vpop.f32.mrb[11].mxu1 }
 0x173   : > { %v482_v8 = vpop.f32.mrb[8].mxu0 }
 0x174   : > { %v488_v9 = vadd.f32 %v482_v8, %v433_v2  ;;  %v864_v10 = vpop.f32.mrb[9].mxu0 }
 0x175   : > { %v485_v11 = vpop.f32.mrb[10].mxu0 }
 0x176   : > { %v543_v12 = vadd.f32 %v537_v4, %v488_v9  ;;  %v865_v13 = vpop.f32.mrb[11].mxu0 }
 0x177   : > { %v647_v14 = vpop.f32.mrb[12].mxu1 }
 0x178   : > { %v882_v15 = vpop.f32.mrb[13].mxu1 }
 0x179   : > { %v650_v16 = vpop.f32.mrb[14].mxu1 }
 0x17a   : > { %v883_v17 = vpop.f32.mrb[15].mxu1 }
 0x17b   : > { %v592_v18 = vpop.f32.mrb[12].mxu0 }
 0x17c   : > { %v598_v19 = vadd.f32 %v592_v18, %v543_v12  ;;  %v876_v20 = vpop.f32.mrb[13].mxu0 }
 0x17d   : > { %v595_v21 = vpop.f32.mrb[14].mxu0 }
 0x17e   : > { %v653_v22 = vadd.f32 %v647_v14, %v598_v19  ;;  %v877_v23 = vpop.f32.mrb[15].mxu0 }
 0x183   : > { %v702_v25 = vpop.f32.mrb[16].mxu0 }
 0x184   : > { %v708_v27 = vadd.f32 %v702_v25, %v653_v22  ;;  %v888_v28 = vpop.f32.mrb[17].mxu0 }
 0x185   : > { %v705_v30 = vpop.f32.mrb[18].mxu0 }
 0x186   : > { %v715_v31 = vadd.f32 %v713_v26, %v708_v27  ;;  %v889_v32 = vpop.f32.mrb[19].mxu0 }
 0x188   : > { %v718_v33 = vadd.f32 %v717_v29, %v715_v31 }
 0x18a   : > { %v719_v34 = vmax.f32 %v718_v33, 0.0 }
 0x18c   : > { %v720_v35 = vpack.c.bf16 %v719_v34, %v719_v34 }
 0x18e   : > { %721 = vst [vmem:[%s212_s30] sm:$0xf] %v720_v35 }
 0x18f PF: > { %s14_s15 = sadd.s32 1, %s918_s15  }
 0x190   : > { %p11_p4 = scmp.ge.s32.totalorder %s14_s15, 4  }
 0x192   :  { %13 = sbr.rel (!%p11_p4) target bundleno = 1 (0x1), region = 77 }

// kernel: feature_extraction_fwd.32
= control target key start
LH: loop header
LB: loop body
LE: loop exit
PB: predicated region body
PF: predicated region fallthrough
CT: control target
= control target key end

     0   :  { %s890_s12 = smov 0   ;;  %s986_s0 = inlined_call_operand.vmem [shape: bf16[2,1,8,150], index: 0, kind: input, shape index: {}]   ;;  %s987_s1 = inlined_call_operand.vmem [shape: bf16[9,8,8], index: 1, kind: input, shape index: {}]   ;;  %s988_s2 = inlined_call_operand.vmem [shape: f32[8,1], index: 2, kind: input, shape index: {}]   ;;  %s989_s3 = inlined_call_operand.vmem [shape: bf16[2,8,128], index: 3, kind: output, shape index: {}]  }
   0x1 LB: > { %s727_s13 = sadd.s32 4294967295, %s857_s12   ;;  %p731_p0 = scmp.ge.s32.totalorder %s857_s12, 1  ;;  %s857_s12 = sphi %s890_s12, %s13_s12  }
   0x2   : > { %p137_p1 = scmp.lt.s32.totalorder %s857_s12, 3 }
   0x4   : > { %p138_p2 = pnand %p731_p0, %p137_p1 }
   0x5   : > { %p160_p3 = scmp.lt.s32.totalorder (!%p138_p2), %s727_s13, 1  ;;  %v859_v0 = vmov (!%p138_p2), 0.0   ;;  %vm860_vm0 = vmmov (!%p138_p2), 0   ;;  %vm190_vm1 = vcmask (!%p138_p2), 1043456   ;;  %vm186_vm2 = vcmask (!%p138_p2), 64512   ;;  %s861_s20 = smov (!%p138_p2), 126  }
   0x6   : > { %141 = sbr.rel (%p138_p2) target bundleno = 395 (0x18b), region = 32  ;;  %775 = vmatprep.subr.bf16.mxu0 (!%p138_p2), %v859_v0  ;;  %781 = vmatprep.subr.bf16.mxu1 (!%p138_p2), %v859_v0  ;;  %v171_v5 = vld [vmem:[%s987_s1] sm:$0xf] (!%p138_p2)  ;;  %s862_s21 = smov (!%p138_p2), 127   ;;  %v869_v7 = vmov (!%p138_p2), 0   ;;  %vm286_vm3 = vcmask (!%p138_p2), 1031168  }
   0x7   : > { %777 = vmatprep.mubr.msk.bf16.mxu0 (!%p138_p2), %vm860_vm0, %v859_v0  ;;  %783 = vmatprep.mubr.msk.bf16.mxu1 (!%p138_p2), %vm860_vm0, %v859_v0  ;;  %s863_s22 = smov (!%p138_p2), 118   ;;  %s864_s23 = smov (!%p138_p2), 117   ;;  %v665_v8 = vld [vmem:[%s988_s2] sm:$0xff] (!%p138_p2)  ;;  %vm184_vm4 = vcmask (!%p138_p2), 1039360   ;;  %vm341_vm5 = vcmask (!%p138_p2), 965632   ;;  %vm396_vm6 = vcmask (!%p138_p2), 957440  }
   0x8   : > { %s865_s24 = smov (!%p138_p2), 116   ;;  %s866_s25 = smov (!%p138_p2), 108   ;;  %848 = vset.pattern.permute.xlu0 (!%p138_p2), %v869_v7  ;;  %v735_v16 = vld [vmem:[%s987_s1 + $0x4] sm:$0xf] (!%p138_p2)  ;;  %v742_v22 = vld [vmem:[%s987_s1 + $0xc] sm:$0xf] (!%p138_p2) }
   0x9   : > { %s867_s26 = smov (!%p138_p2), 107   ;;  %s868_s27 = smov (!%p138_p2), 106   ;;  %vm451_vm7 = vcmask (!%p138_p2), 949248   ;;  %v740_v26 = vld [vmem:[%s987_s1 + $0x8] sm:$0xf] (!%p138_p2)  ;;  %vm506_vm8 = vcmask (!%p138_p2), 883712  }
   0xa   : > { %v746_v32 = vld [vmem:[%s987_s1 + $0x14] sm:$0xf] (!%p138_p2)  ;;  %vm561_vm9 = vcmask (!%p138_p2), 875520   ;;  %v744_v36 = vld [vmem:[%s987_s1 + $0x10] sm:$0xf] (!%p138_p2)  ;;  %vm616_vm10 = vcmask (!%p138_p2), 867328  }
   0xb   : > { %v750_v42 = vld [vmem:[%s987_s1 + $0x1c] sm:$0xf] (!%p138_p2)  ;;  %v748_v46 = vld [vmem:[%s987_s1 + $0x18] sm:$0xf] (!%p138_p2)  ;;  %v752_v48 = vld [vmem:[%s987_s1 + $0x20] sm:$0xf] (!%p138_p2) }
   0xd   : > { %s991_s13 = smov (!%p160_p3, %s727_s13), 1 }
   0xe   : > { %s756_s14 = sshll.u32 %s991_s13, 3 }
   0xf   : > { %s164_s17 = scalar_lea.vmem %s986_s0, %s756_s14 }
  0x10   : > { %v172_v1 = vld [vmem:[%s164_s17] sm:$0xff] }
  0x11   : > { %v170_v2 = vld [vmem:[%s164_s17] sm:$0xf]  ;;  %v736_v3 = vcombine.low %v172_v1, %v172_v1  ;;  %v737_v6 = vcombine.high %v172_v1, %v172_v1 }
  0x12   : > { %v238_v4 = vsel %vm190_vm1, %v170_v2, 0 }
  0x13   : > { %782 = vmatpush3.bf16.msra.mxu1 %v238_v4  ;;  %282 = vrot.lane.b32.xlu1 %v736_v3, %s861_s20 }
  0x14   : > { %180 = vrot.lane.b32.xlu0 %v736_v3, %s862_s21  ;;  %793 = vmatprep.subr.bf16.mxu1 %v859_v0 }
  0x16   : > { %784 = vmatmul.mubr.msk.bf16.vlgmr.msra.gmra.mrb[0].mxu1 %vm186_vm2, %v171_v5 }
  0x17   : > { %795 = vmatprep.mubr.msk.bf16.mxu1 %vm860_vm0, %v859_v0  ;;  %284 = vrot.lane.b32.xlu1 %v737_v6, %s861_s20 }
  0x18   : > { %182 = vrot.lane.b32.xlu0 %v737_v6, %s862_s21  ;;  %s734_s21 = sshll.u32 %s991_s13, 2 }
  0x1b   : > { %339 = vrot.lane.b32.xlu1 %v737_v6, %s863_s22 }
  0x1c   : > { %337 = vrot.lane.b32.xlu0 %v736_v3, %s863_s22 }
  0x1f   : > { %394 = vrot.lane.b32.xlu1 %v737_v6, %s864_s23 }
  0x20   : > { %392 = vrot.lane.b32.xlu0 %v736_v3, %s864_s23 }
  0x23   : > { %449 = vrot.lane.b32.xlu1 %v737_v6, %s865_s24 }
  0x24   : > { %447 = vrot.lane.b32.xlu0 %v736_v3, %s865_s24  ;;  %s168_s24 = scalar_lea.vmem %s989_s3, %s734_s21 }
  0x27   : > { %504 = vrot.lane.b32.xlu1 %v737_v6, %s866_s25 }
  0x28   : > { %502 = vrot.lane.b32.xlu0 %v736_v3, %s866_s25 }
  0x2b   : > { %559 = vrot.lane.b32.xlu1 %v737_v6, %s867_s26 }
  0x2c   : > { %557 = vrot.lane.b32.xlu0 %v736_v3, %s867_s26 }
  0x2f   : > { %614 = vrot.lane.b32.xlu1 %v737_v6, %s868_s27 }
  0x30   : > { %612 = vrot.lane.b32.xlu0 %v736_v3, %s868_s27 }
  0x34   : > { %668 = vperm.xlu0 %848, %v665_v8  }
  0x85   : > { %v283_v9 = vpop.permute.xlu1 %282 }
  0x86   : > { %v181_v10 = vpop.permute.xlu0 %180 }
  0x89   : > { %v285_v11 = vpop.permute.xlu1 %284 }
  0x8a   : > { %v183_v12 = vpop.permute.xlu0 %182  ;;  %v287_v13 = vsel %vm286_vm3, %v283_v9, %v285_v11 }
  0x8b   : > { %v185_v14 = vsel %vm184_vm4, %v181_v10, %v183_v12  ;;  %v292_v17 = vsel %vm190_vm1, %v287_v13, 0 }
  0x8c   : > { %v192_v15 = vsel %vm190_vm1, %v185_v14, 0 }
  0x8d   : > { %776 = vmatpush3.bf16.msra.mxu0 %v192_v15  ;;  %v340_v18 = vpop.permute.xlu1 %339 }
  0x8e   : > { %787 = vmatprep.subr.bf16.mxu0 %v859_v0  ;;  %v338_v19 = vpop.permute.xlu0 %337 }
  0x8f   : > { %v342_v20 = vsel %vm341_vm5, %v338_v19, %v340_v18 }
  0x90   : > { %778 = vmatmul.mubr.msk.bf16.vlgmr.msra.gmra.mrb[0].mxu0 %vm186_vm2, %v735_v16  ;;  %v347_v21 = vsel %vm190_vm1, %v342_v20, 0 }
  0x91   : > { %788 = vmatpush3.bf16.msra.mxu0 %v292_v17  ;;  %794 = vmatpush3.bf16.msra.mxu1 %v347_v21  ;;  %v395_v23 = vpop.permute.xlu1 %394 }
  0x92   : > { %v393_v24 = vpop.permute.xlu0 %392  ;;  %789 = vmatprep.mubr.msk.bf16.mxu0 %vm860_vm0, %v859_v0  ;;  %799 = vmatprep.subr.bf16.mxu0 %v859_v0 }
  0x93   : > { %v397_v25 = vsel %vm396_vm6, %v393_v24, %v395_v23  ;;  %805 = vmatprep.subr.bf16.mxu1 %v859_v0 }
  0x94   : > { %796 = vmatmul.mubr.msk.bf16.vlgmr.msra.gmra.mrb[4].mxu1 %vm186_vm2, %v742_v22  ;;  %v402_v27 = vsel %vm190_vm1, %v397_v25, 0 }
  0x95   : > { %807 = vmatprep.mubr.msk.bf16.mxu1 %vm860_vm0, %v859_v0  ;;  %v450_v28 = vpop.permute.xlu1 %449 }
  0x96   : > { %v448_v29 = vpop.permute.xlu0 %447 }
  0x97   : > { %v452_v30 = vsel %vm451_vm7, %v448_v29, %v450_v28 }
  0x98   : > { %790 = vmatmul.mubr.msk.bf16.vlgmr.msra.gmra.mrb[4].mxu0 %vm186_vm2, %v740_v26  ;;  %v457_v31 = vsel %vm190_vm1, %v452_v30, 0 }
  0x99   : > { %800 = vmatpush3.bf16.msra.mxu0 %v402_v27  ;;  %806 = vmatpush3.bf16.msra.mxu1 %v457_v31  ;;  %v505_v33 = vpop.permute.xlu1 %504 }
  0x9a   : > { %v503_v34 = vpop.permute.xlu0 %502  ;;  %801 = vmatprep.mubr.msk.bf16.mxu0 %vm860_vm0, %v859_v0  ;;  %811 = vmatprep.subr.bf16.mxu0 %v859_v0 }
  0x9b   : > { %v507_v35 = vsel %vm506_vm8, %v503_v34, %v505_v33  ;;  %817 = vmatprep.subr.bf16.mxu1 %v859_v0 }
  0x9c   : > { %808 = vmatmul.mubr.msk.bf16.vlgmr.msra.gmra.mrb[8].mxu1 %vm186_vm2, %v746_v32  ;;  %v512_v37 = vsel %vm190_vm1, %v507_v35, 0 }
  0x9d   : > { %819 = vmatprep.mubr.msk.bf16.mxu1 %vm860_vm0, %v859_v0  ;;  %v560_v38 = vpop.permute.xlu1 %559 }
  0x9e   : > { %v558_v39 = vpop.permute.xlu0 %557 }
  0x9f   : > { %v562_v40 = vsel %vm561_vm9, %v558_v39, %v560_v38 }
  0xa0   : > { %802 = vmatmul.mubr.msk.bf16.vlgmr.msra.gmra.mrb[8].mxu0 %vm186_vm2, %v744_v36  ;;  %v567_v41 = vsel %vm190_vm1, %v562_v40, 0 }
  0xa1   : > { %812 = vmatpush3.bf16.msra.mxu0 %v512_v37  ;;  %818 = vmatpush3.bf16.msra.mxu1 %v567_v41  ;;  %v615_v43 = vpop.permute.xlu1 %614 }
  0xa2   : > { %v613_v44 = vpop.permute.xlu0 %612  ;;  %813 = vmatprep.mubr.msk.bf16.mxu0 %vm860_vm0, %v859_v0  ;;  %823 = vmatprep.subr.bf16.mxu0 %v859_v0 }
  0xa3   : > { %v617_v45 = vsel %vm616_vm10, %v613_v44, %v615_v43 }
  0xa4   : > { %820 = vmatmul.mubr.msk.bf16.vlgmr.msra.gmra.mrb[12].mxu1 %vm186_vm2, %v750_v42  ;;  %v622_v47 = vsel %vm190_vm1, %v617_v45, 0 }
  0xa8   : > { %814 = vmatmul.mubr.msk.bf16.vlgmr.msra.gmra.mrb[12].mxu0 %vm186_vm2, %v748_v46 }
  0xa9   : > { %824 = vmatpush3.bf16.msra.mxu0 %v622_v47  ;;  %825 = vmatprep.mubr.msk.bf16.mxu0 %vm860_vm0, %v859_v0 }
  0xb0   : > { %826 = vmatmul.mubr.msk.bf16.vlgmr.msra.gmra.mrb[16].mxu0 %vm186_vm2, %v752_v48 }
  0xb3   : > { %v669_v25 = vpop.permute.xlu0 %668 }
  0xe9   : > { %v274_v49 = vpop.f32.mrb[0].mxu1 }
  0xea   : > { %v785_v50 = vpop.f32.mrb[1].mxu1 }
  0xeb   : > { %v277_v51 = vpop.f32.mrb[2].mxu1 }
  0xec   : > { %v786_v52 = vpop.f32.mrb[3].mxu1 }
 0x163   : > { %v228_v53 = vpop.f32.mrb[0].mxu0 }
 0x164   : > { %v779_v54 = vpop.f32.mrb[1].mxu0  ;;  %v275_v55 = vadd.f32 %v274_v49, %v228_v53 }
 0x165   : > { %v231_v56 = vpop.f32.mrb[2].mxu0 }
 0x166   : > { %v780_v57 = vpop.f32.mrb[3].mxu0 }
 0x167   : > { %v383_v58 = vpop.f32.mrb[4].mxu1 }
 0x168   : > { %v797_v59 = vpop.f32.mrb[5].mxu1 }
 0x169   : > { %v386_v60 = vpop.f32.mrb[6].mxu1 }
 0x16a   : > { %v798_v61 = vpop.f32.mrb[7].mxu1 }
 0x16b   : > { %v328_v62 = vpop.f32.mrb[4].mxu0 }
 0x16c   : > { %v334_v63 = vadd.f32 %v328_v62, %v275_v55  ;;  %v791_v0 = vpop.f32.mrb[5].mxu0 }
 0x16d   : > { %v331_v1 = vpop.f32.mrb[6].mxu0 }
 0x16e   : > { %v389_v2 = vadd.f32 %v383_v58, %v334_v63  ;;  %v792_v3 = vpop.f32.mrb[7].mxu0 }
 0x16f   : > { %v493_v4 = vpop.f32.mrb[8].mxu1 }
 0x170   : > { %v809_v5 = vpop.f32.mrb[9].mxu1 }
 0x171   : > { %v496_v6 = vpop.f32.mrb[10].mxu1 }
 0x172   : > { %v810_v7 = vpop.f32.mrb[11].mxu1 }
 0x173   : > { %v438_v8 = vpop.f32.mrb[8].mxu0 }
 0x174   : > { %v444_v9 = vadd.f32 %v438_v8, %v389_v2  ;;  %v803_v10 = vpop.f32.mrb[9].mxu0 }
 0x175   : > { %v441_v11 = vpop.f32.mrb[10].mxu0 }
 0x176   : > { %v499_v12 = vadd.f32 %v493_v4, %v444_v9  ;;  %v804_v13 = vpop.f32.mrb[11].mxu0 }
 0x177   : > { %v603_v14 = vpop.f32.mrb[12].mxu1 }
 0x178   : > { %v821_v15 = vpop.f32.mrb[13].mxu1 }
 0x179   : > { %v606_v16 = vpop.f32.mrb[14].mxu1 }
 0x17a   : > { %v822_v17 = vpop.f32.mrb[15].mxu1 }
 0x17b   : > { %v548_v18 = vpop.f32.mrb[12].mxu0 }
 0x17c   : > { %v554_v19 = vadd.f32 %v548_v18, %v499_v12  ;;  %v815_v20 = vpop.f32.mrb[13].mxu0 }
 0x17d   : > { %v551_v21 = vpop.f32.mrb[14].mxu0 }
 0x17e   : > { %v609_v22 = vadd.f32 %v603_v14, %v554_v19  ;;  %v816_v23 = vpop.f32.mrb[15].mxu0 }
 0x183   : > { %v658_v24 = vpop.f32.mrb[16].mxu0 }
 0x184   : > { %v664_v26 = vadd.f32 %v658_v24, %v609_v22  ;;  %v827_v27 = vpop.f32.mrb[17].mxu0 }
 0x185   : > { %v661_v28 = vpop.f32.mrb[18].mxu0 }
 0x186   : > { %v671_v29 = vadd.f32 %v669_v25, %v664_v26  ;;  %v828_v30 = vpop.f32.mrb[19].mxu0 }
 0x188   : > { %v672_v31 = vpack.c.bf16 %v671_v29, %v671_v29 }
 0x18a   : > { %673 = vst [vmem:[%s168_s24] sm:$0xf] %v672_v31 }
 0x18b PF: > { %s13_s12 = sadd.s32 1, %s857_s12  }
 0x18c   : > { %p10_p4 = scmp.ge.s32.totalorder %s13_s12, 4  }
 0x18e   :  { %12 = sbr.rel (!%p10_p4) target bundleno = 1 (0x1), region = 70 }

</bundles_post_ra>
